<compile_context>
chip_gen: v6e
topology: v6e:2x2x1
jax: 0.10.0
libtpu: 0.0.40
codegen_flags: <defaults>
</compile_context>

<pallas_src>
import functools
import math

import jax
import jax.numpy as jnp
from jax import lax
from jax.experimental import pallas as pl
from jax.experimental.pallas import tpu as pltpu

# Large finite negative instead of -inf (keeps online softmax NaN-free when a
# whole row of a processed tile is masked; contributions rescale away later).
_MASK_VALUE = -0.7 * float(jnp.finfo(jnp.float32).max)


def _any_attention_kernel(fm_ref, xq_ref, kv_ref, mask_ref, w_ref, bp_ref,
                          o_ref, q_s, m_s, l_s, acc_s, *, num_heads):
    # fm_ref:   (B*n_k,)   i32 SMEM  1 == this (b, ki) kv-tile is fully masked
    # xq_ref:   (1, TQ, D)  bf16     query-side tokens
    # kv_ref:   (1, TK, 2D) bf16     precomputed [K | V] tile
    # mask_ref: (1, 1, TK)  f32      >0 == masked (broadcast over queries/heads)
    # w_ref:    (D, 2D)     bf16     [Wq*scale | Wproj], (in, out)
    # bp_ref:   (1, D)      f32      proj bias
    # scratch (head-major): q_s (G,TQ,C) bf16; m_s/l_s (G,TQ,1) f32;
    #                       acc_s (G,TQ,C) f32
    b = pl.program_id(0)
    ki = pl.program_id(2)
    nk = pl.num_programs(2)
    D = w_ref.shape[0]
    G = num_heads
    C = D // G

    @pl.when(ki == 0)
    def _init():
        # q projection once per (batch, q-tile); softmax scale folded into Wq.
        q = jnp.dot(xq_ref[0], w_ref[:, :D], preferred_element_type=jnp.float32)
        qb = q.astype(jnp.bfloat16)
        for g in range(G):
            q_s[g] = qb[:, g * C:(g + 1) * C]          # head-major scratch
        m_s[...] = jnp.full_like(m_s, -jnp.inf)
        l_s[...] = jnp.zeros_like(l_s)
        acc_s[...] = jnp.zeros_like(acc_s)

    # Skip the whole tile if every key in it is masked: saves all of its exp
    # (the binding EUP work at small C) plus the QK^T / PV matmuls.
    @pl.when(fm_ref[b * nk + ki] == 0)
    def _tile():
        kv = kv_ref[0]                                  # (TK, 2D) bf16
        masked = mask_ref[0] > 0.0                      # (1, TK)
        # TODO(synk): if a bundle dump shows vreg spills at large tiles,
        # convert this static head loop to lax.fori_loop (head-major scratch
        # already makes the indices loop-friendly).
        for g in range(G):
            lo = g * C
            kh = kv[:, lo:lo + C]                       # (TK, C)
            vh = kv[:, D + lo:D + lo + C]               # (TK, C)
            # q @ k^T without materializing a transpose: contract head dim.
            s = lax.dot_general(q_s[g], kh, (((1,), (1,)), ((), ())),
                                preferred_element_type=jnp.float32)  # (TQ, TK)
            s = jnp.where(masked, _MASK_VALUE, s)
            m_prev = m_s[g]                             # (TQ, 1)
            m_new = jnp.maximum(m_prev, jnp.max(s, axis=-1, keepdims=True))
            alpha = jnp.exp(m_prev - m_new)
            # f32 exp everywhere (v5e has no bf16 EUP); on v6e/v7x a bf16 exp
            # for p is a possible further EUP saving -- verify with a bundle.
            p = jnp.exp(s - m_new)    # masked cols -> exactly 0 (no re-mask)
            l_s[g] = alpha * l_s[g] + jnp.sum(p, axis=-1, keepdims=True)
            acc_s[g] = alpha * acc_s[g] + jnp.dot(
                p.astype(jnp.bfloat16), vh, preferred_element_type=jnp.float32)
            m_s[g] = m_new

    @pl.when(ki == nk - 1)
    def _finalize():
        tq = acc_s.shape[1]
        out = jnp.zeros((tq, D), jnp.float32)
        for g in range(G):
            lo = g * C
            # max() guard: rows whose tiles were all skipped have l == 0 and
            # acc == 0 -> output is exactly the proj bias (matches PyTorch).
            inv_l = pl.reciprocal(jnp.maximum(l_s[g], 1e-30), approx=True)
            og = (acc_s[g] * inv_l).astype(jnp.bfloat16)            # (TQ, C)
            # Per-head output projection: sublane slice of Wproj rows (cheap),
            # avoids re-assembling a (TQ, D) head-concat in the lane dim.
            out = out + jnp.dot(og, w_ref[lo:lo + C, D:],
                                preferred_element_type=jnp.float32)
        out = out + bp_ref[...]
        o_ref[0] = out.astype(o_ref.dtype)


def _round_up(x, m):
    return ((x + m - 1) // m) * m


def _choose_block(n, requested):
    # Multiples of 128 (mask-block lane constraint; also >= bf16 sublane 16).
    req = max(128, (int(requested) // 128) * 128)
    return min(req, _round_up(n, 128))


def any_attention(x, mask, wq_t, wk_t, wv_t, wp_t, bp, num_heads,
                  *, block_q=512, block_k=512, out_dtype=None):
    """x: (B, N, D); mask: (B, 1, N) with >0 == masked; w*_t: (D, D) already
    transposed to (in, out); bp: (1, D).

    Defaults (512 tiles) target v6e/v7x; pass smaller blocks for tiny N.
    out_dtype=jnp.bfloat16 halves the HBM writeback (useful on v5e)."""
    B, N, D = x.shape
    assert D % num_heads == 0
    C = D // num_heads
    scale = float(C) ** -0.5
    out_dtype = x.dtype if out_dtype is None else out_dtype

    block_q = _choose_block(N, block_q)
    block_k = _choose_block(N, block_k)
    if B == 1:
        # v7x has 2 TensorCores: keep B * n_q >= 2 when N allows so the
        # ("parallel","parallel",...) grid shards across both.
        half = (_round_up(N, 128) // 2) // 128 * 128
        if half >= 128:
            block_q = min(block_q, half)

    # Pad N host-side instead of falling back to a full-extent (N, N) tile.
    n_pad = _round_up(N, math.lcm(block_q, block_k))
    n_q = n_pad // block_q
    n_k = n_pad // block_k

    mask = mask.astype(jnp.float32)
    if n_pad != N:
        pad = n_pad - N
        x = jnp.pad(x, ((0, 0), (0, pad), (0, 0)))
        mask = jnp.pad(mask, ((0, 0), (0, 0), (0, pad)), constant_values=1.0)

    x_bf = x.astype(jnp.bfloat16)

    # K/V projected ONCE here (plain XLA matmul) instead of once per q-tile
    # inside the kernel; streamed in as one fused bf16 [K | V] tensor.
    wkv = jnp.concatenate([wk_t, wv_t], axis=1).astype(jnp.bfloat16)
    kv = jnp.dot(x_bf, wkv, preferred_element_type=jnp.float32)
    kv = kv.astype(jnp.bfloat16)                                  # (B, Np, 2D)

    # In-kernel weights: [Wq*scale | Wproj] in one bf16 stream.
    w_fused = jnp.concatenate([wq_t * scale, wp_t], axis=1).astype(jnp.bfloat16)
    bp = bp.astype(jnp.float32)

    # Per-(batch, kv-tile) "fully masked" flags, scalar-prefetched into SMEM
    # (flattened to 1D to avoid SMEM 2D padding).
    fully_masked = (mask[:, 0, :] > 0.0).reshape(B, n_k, block_k).all(axis=-1)
    fully_masked = fully_masked.reshape(B * n_k).astype(jnp.int32)

    kernel = functools.partial(_any_attention_kernel, num_heads=num_heads)

    # VMEM budget from the actual working set (double-buffered inputs/outputs,
    # lane-padded scratch, a few live f32 score temporaries); cap at 48 MiB so
    # it stays safe on v7x's 64 MiB VMEM.
    out_bytes = jnp.dtype(out_dtype).itemsize
    lane = lambda c: max(128, _round_up(c, 128))
    est = (2 * block_q * D * 2                        # x_q
           + 2 * block_k * 2 * D * 2                  # kv
           + 2 * 8 * lane(block_k) * 4                # mask
           + 2 * D * 2 * D * 2                        # fused weights
           + 2 * 8 * lane(D) * 4                      # bias
           + 2 * block_q * D * out_bytes              # out
           + num_heads * block_q * lane(C) * 2        # q scratch
           + 2 * num_heads * block_q * 128 * 4        # m, l scratch
           + num_heads * block_q * lane(C) * 4        # acc scratch
           + 3 * block_q * block_k * 4)               # live f32 s/p temps
    vmem_limit = int(min(48 * 1024 * 1024, max(32 * 1024 * 1024, 2 * est)))

    flops = B * (2 * n_pad * D * D                    # q projection
                 + 2 * n_pad * D * D                  # output projection
                 + 4 * n_pad * n_pad * D)             # scores + p@v
    transcendentals = B * num_heads * n_pad * n_pad
    bytes_accessed = (B * n_pad * D * 2               # x (q side)
                      + n_q * B * n_pad * 2 * D * 2   # kv re-read per q-tile
                      + B * n_pad * 4                 # mask
                      + 2 * D * 2 * D                 # weights
                      + B * n_pad * D * out_bytes)    # output

    out = pl.pallas_call(
        kernel,
        out_shape=jax.ShapeDtypeStruct((B, n_pad, D), out_dtype),
        grid_spec=pltpu.PrefetchScalarGridSpec(
            num_scalar_prefetch=1,
            grid=(B, n_q, n_k),
            in_specs=[
                pl.BlockSpec((1, block_q, D), lambda b, qi, ki, fm: (b, qi, 0)),      # x (q)
                pl.BlockSpec((1, block_k, 2 * D), lambda b, qi, ki, fm: (b, ki, 0)),  # [K|V]
                pl.BlockSpec((1, 1, block_k), lambda b, qi, ki, fm: (b, 0, ki)),      # mask
                pl.BlockSpec((D, 2 * D), lambda b, qi, ki, fm: (0, 0)),               # weights
                pl.BlockSpec((1, D), lambda b, qi, ki, fm: (0, 0)),                   # bias
            ],
            out_specs=pl.BlockSpec((1, block_q, D),
                                   lambda b, qi, ki, fm: (b, qi, 0)),
            scratch_shapes=[
                pltpu.VMEM((num_heads, block_q, C), jnp.bfloat16),   # q (head-major)
                pltpu.VMEM((num_heads, block_q, 1), jnp.float32),    # running max
                pltpu.VMEM((num_heads, block_q, 1), jnp.float32),    # running sum
                pltpu.VMEM((num_heads, block_q, C), jnp.float32),    # output acc
            ],
        ),
        compiler_params=pltpu.CompilerParams(
            dimension_semantics=("parallel", "parallel", "arbitrary"),
            vmem_limit_bytes=vmem_limit,
        ),
        cost_estimate=pl.CostEstimate(
            flops=int(flops), transcendentals=int(transcendentals),
            bytes_accessed=int(bytes_accessed)),
    )(fully_masked, x_bf, kv, mask, w_fused, bp)

    return out[:, :N, :]


def _reference(x, mask, wq_t, wk_t, wv_t, wp_t, bp, num_heads):
    """Pure-JAX f32 reference mirroring the PyTorch forward (default config)."""
    B, N, D = x.shape
    C = D // num_heads
    scale = float(C) ** -0.5
    q = (x @ wq_t).reshape(B, N, num_heads, C)
    k = (x @ wk_t).reshape(B, N, num_heads, C)
    v = (x @ wv_t).reshape(B, N, num_heads, C)
    attn = jnp.einsum('bqgc,bkgc->bqgk', q, k) * scale
    m = (mask[:, :, None, :] > 0.0)
    attn = jnp.where(m, -jnp.inf, attn)
    attn = jax.nn.softmax(attn, axis=-1)
    attn = jnp.where(m, 0.0, attn)
    out = jnp.einsum('bqgk,bkgc->bqgc', attn, v).reshape(B, N, D)
    return out @ wp_t + bp


def _make_params(key, D):
    kq, kk, kv_, kp, kb = jax.random.split(key, 5)
    wq_t = jax.random.normal(kq, (D, D), dtype=jnp.float32) * 0.05
    wk_t = jax.random.normal(kk, (D, D), dtype=jnp.float32) * 0.05
    wv_t = jax.random.normal(kv_, (D, D), dtype=jnp.float32) * 0.05
    wp_t = jax.random.normal(kp, (D, D), dtype=jnp.float32) * 0.05
    bp = jax.random.normal(kb, (1, D), dtype=jnp.float32) * 0.05
    return wq_t, wk_t, wv_t, wp_t, bp


if __name__ == "__main__":
    D, G = 128, 4
    key = jax.random.PRNGKey(0)
    kparams, kx1, km1, kx2, km2 = jax.random.split(key, 5)
    wq_t, wk_t, wv_t, wp_t, bp = _make_params(kparams, D)

    # --- case 1: B=2, N=200 (non-multiple of 128 -> exercises host padding,
    #             multi-tile online softmax, partially-masked tiles). ---
    B1, N1 = 2, 200
    x1 = jax.random.normal(kx1, (B1, N1, D), dtype=jnp.float32)
    mask1 = (jax.random.uniform(km1, (B1, 1, N1)) < 0.25).astype(jnp.float32)
    mask1 = mask1.at[:, :, 0].set(0.0)        # >= 1 unmasked key per row
    out1 = any_attention(x1, mask1, wq_t, wk_t, wv_t, wp_t, bp, G,
                         block_q=128, block_k=128)
    out1 = jax.block_until_ready(out1)
    ref1 = _reference(x1, mask1, wq_t, wk_t, wv_t, wp_t, bp, G)
    err1 = float(jnp.max(jnp.abs(out1 - ref1)))
    assert jnp.allclose(out1, ref1, atol=2e-2, rtol=2e-2), (
        f"case1 mismatch vs reference, max abs err = {err1}")

    # --- case 2: B=1, N=256, keys 128..255 fully masked -> exercises the
    #             scalar-prefetch tile-skip path and the B==1 q-tile split. ---
    B2, N2 = 1, 256
    x2 = jax.random.normal(kx2, (B2, N2, D), dtype=jnp.float32)
    mask2 = (jax.random.uniform(km2, (B2, 1, N2)) < 0.25).astype(jnp.float32)
    mask2 = mask2.at[:, :, 0].set(0.0)
    mask2 = mask2.at[:, :, 128:].set(1.0)     # second 128-key tile fully masked
    out2 = any_attention(x2, mask2, wq_t, wk_t, wv_t, wp_t, bp, G,
                         block_q=256, block_k=128)
    out2 = jax.block_until_ready(out2)
    ref2 = _reference(x2, mask2, wq_t, wk_t, wv_t, wp_t, bp, G)
    err2 = float(jnp.max(jnp.abs(out2 - ref2)))
    assert jnp.allclose(out2, ref2, atol=2e-2, rtol=2e-2), (
        f"case2 mismatch vs reference, max abs err = {err2}")

    print("KERNEL_OK")
</pallas_src>

<mosaic_0001>
module attributes {stable_mosaic.version = 11 : i64} {
  func.func @_any_attention_kernel(%arg0: i32, %arg1: i32, %arg2: i32, %arg3: memref<4xi32, #tpu.memory_space<smem>>, %arg4: memref<1x128x128xbf16, #tpu.memory_space<vmem>>, %arg5: memref<1x128x256xbf16, #tpu.memory_space<vmem>>, %arg6: memref<1x1x128xf32, #tpu.memory_space<vmem>>, %arg7: memref<128x256xbf16, #tpu.memory_space<vmem>>, %arg8: memref<1x128xf32, #tpu.memory_space<vmem>>, %arg9: memref<1x128x128xf32, #tpu.memory_space<vmem>>, %arg10: memref<4x128x32xbf16, #tpu.memory_space<vmem>>, %arg11: memref<4x128x1xf32, #tpu.memory_space<vmem>>, %arg12: memref<4x128x1xf32, #tpu.memory_space<vmem>>, %arg13: memref<4x128x32xf32, #tpu.memory_space<vmem>>) attributes {dimension_semantics = [#tpu.dimension_semantics<parallel>, #tpu.dimension_semantics<parallel>, #tpu.dimension_semantics<arbitrary>], iteration_bounds = array<i64: 2, 2, 2>, scalar_prefetch = 1 : i64, scratch_operands = 4 : i64, tpu.core_type = #tpu.core_type<tc>, window_params = [{transform_indices = @transform_0, window_bounds = array<i64: 1, 128, 128>}, {transform_indices = @transform_1, window_bounds = array<i64: 1, 128, 256>}, {transform_indices = @transform_2, window_bounds = array<i64: 1, 1, 128>}, {pipeline_mode = #tpu.pipeline_mode<synchronous>, transform_indices = @transform_3, window_bounds = array<i64: 128, 256>}, {pipeline_mode = #tpu.pipeline_mode<synchronous>, transform_indices = @transform_4, window_bounds = array<i64: 1, 128>}, {transform_indices = @transform_5, window_bounds = array<i64: 1, 128, 128>}]} {
    %c0_i32 = arith.constant 0 : i32
    %0 = arith.cmpi eq, %arg2, %c0_i32 : i32
    %1 = arith.extui %0 : i1 to i32
    %c0_i32_0 = arith.constant 0 : i32
    %2 = arith.cmpi ne, %1, %c0_i32_0 : i32
    scf.if %2 {
      %c0 = arith.constant 0 : index
      %c0_4 = arith.constant 0 : index
      %c0_5 = arith.constant 0 : index
      %13 = vector.load %arg4[%c0, %c0_4, %c0_5] : memref<1x128x128xbf16, #tpu.memory_space<vmem>>, vector<1x128x128xbf16>
      %14 = vector.shape_cast %13 : vector<1x128x128xbf16> to vector<128x128xbf16>
      %c0_6 = arith.constant 0 : index
      %c0_7 = arith.constant 0 : index
      %15 = vector.load %arg7[%c0_6, %c0_7] : memref<128x256xbf16, #tpu.memory_space<vmem>>, vector<128x128xbf16>
      %cst = arith.constant dense<0.000000e+00> : vector<128x128xf32>
      %16 = tpu.matmul %14, %15, %cst {dimension_numbers = #tpu.dot_dimension_numbers<[1], [0], [0], [1], [0, 0, 1, 1], [], []>} : vector<128x128xbf16>, vector<128x128xbf16>, vector<128x128xf32> -> vector<128x128xf32>
      %17 = arith.truncf %16 : vector<128x128xf32> to vector<128x128xbf16>
      %18 = vector.extract_strided_slice %17 {offsets = [0, 0], sizes = [128, 32], strides = [1, 1]} : vector<128x128xbf16> to vector<128x32xbf16>
      %c0_8 = arith.constant 0 : index
      %c0_9 = arith.constant 0 : index
      %c0_10 = arith.constant 0 : index
      %19 = vector.load %arg10[%c0_8, %c0_9, %c0_10] : memref<4x128x32xbf16, #tpu.memory_space<vmem>>, vector<1x128x32xbf16>
      %20 = vector.shape_cast %19 : vector<1x128x32xbf16> to vector<128x32xbf16>
      %21 = vector.shape_cast %18 : vector<128x32xbf16> to vector<1x128x32xbf16>
      tpu.vector_store %arg10[%c0_8, %c0_9, %c0_10], %21 {strides = array<i32>} : memref<4x128x32xbf16, #tpu.memory_space<vmem>>, vector<1x128x32xbf16>,
      %22 = vector.extract_strided_slice %17 {offsets = [0, 32], sizes = [128, 32], strides = [1, 1]} : vector<128x128xbf16> to vector<128x32xbf16>
      %c1 = arith.constant 1 : index
      %c0_11 = arith.constant 0 : index
      %c0_12 = arith.constant 0 : index
      %23 = vector.load %arg10[%c1, %c0_11, %c0_12] : memref<4x128x32xbf16, #tpu.memory_space<vmem>>, vector<1x128x32xbf16>
      %24 = vector.shape_cast %23 : vector<1x128x32xbf16> to vector<128x32xbf16>
      %25 = vector.shape_cast %22 : vector<128x32xbf16> to vector<1x128x32xbf16>
      tpu.vector_store %arg10[%c1, %c0_11, %c0_12], %25 {strides = array<i32>} : memref<4x128x32xbf16, #tpu.memory_space<vmem>>, vector<1x128x32xbf16>,
      %26 = vector.extract_strided_slice %17 {offsets = [0, 64], sizes = [128, 32], strides = [1, 1]} : vector<128x128xbf16> to vector<128x32xbf16>
      %c2 = arith.constant 2 : index
      %c0_13 = arith.constant 0 : index
      %c0_14 = arith.constant 0 : index
      %27 = vector.load %arg10[%c2, %c0_13, %c0_14] : memref<4x128x32xbf16, #tpu.memory_space<vmem>>, vector<1x128x32xbf16>
      %28 = vector.shape_cast %27 : vector<1x128x32xbf16> to vector<128x32xbf16>
      %29 = vector.shape_cast %26 : vector<128x32xbf16> to vector<1x128x32xbf16>
      tpu.vector_store %arg10[%c2, %c0_13, %c0_14], %29 {strides = array<i32>} : memref<4x128x32xbf16, #tpu.memory_space<vmem>>, vector<1x128x32xbf16>,
      %30 = vector.extract_strided_slice %17 {offsets = [0, 96], sizes = [128, 32], strides = [1, 1]} : vector<128x128xbf16> to vector<128x32xbf16>
      %c3 = arith.constant 3 : index
      %c0_15 = arith.constant 0 : index
      %c0_16 = arith.constant 0 : index
      %31 = vector.load %arg10[%c3, %c0_15, %c0_16] : memref<4x128x32xbf16, #tpu.memory_space<vmem>>, vector<1x128x32xbf16>
      %32 = vector.shape_cast %31 : vector<1x128x32xbf16> to vector<128x32xbf16>
      %33 = vector.shape_cast %30 : vector<128x32xbf16> to vector<1x128x32xbf16>
      tpu.vector_store %arg10[%c3, %c0_15, %c0_16], %33 {strides = array<i32>} : memref<4x128x32xbf16, #tpu.memory_space<vmem>>, vector<1x128x32xbf16>,
      %cst_17 = arith.constant 0xFF800000 : f32
      %34 = vector.broadcast %cst_17 : f32 to vector<4x128x1xf32>
      %c0_18 = arith.constant 0 : index
      %c0_19 = arith.constant 0 : index
      %c0_20 = arith.constant 0 : index
      %35 = vector.load %arg11[%c0_18, %c0_19, %c0_20] : memref<4x128x1xf32, #tpu.memory_space<vmem>>, vector<4x128x1xf32>
      tpu.vector_store %arg11[%c0_18, %c0_19, %c0_20], %34 {strides = array<i32>} : memref<4x128x1xf32, #tpu.memory_space<vmem>>, vector<4x128x1xf32>,
      %cst_21 = arith.constant 0.000000e+00 : f32
      %36 = vector.broadcast %cst_21 : f32 to vector<4x128x1xf32>
      %c0_22 = arith.constant 0 : index
      %c0_23 = arith.constant 0 : index
      %c0_24 = arith.constant 0 : index
      %37 = vector.load %arg12[%c0_22, %c0_23, %c0_24] : memref<4x128x1xf32, #tpu.memory_space<vmem>>, vector<4x128x1xf32>
      tpu.vector_store %arg12[%c0_22, %c0_23, %c0_24], %36 {strides = array<i32>} : memref<4x128x1xf32, #tpu.memory_space<vmem>>, vector<4x128x1xf32>,
      %cst_25 = arith.constant 0.000000e+00 : f32
      %38 = vector.broadcast %cst_25 : f32 to vector<4x128x32xf32>
      %c0_26 = arith.constant 0 : index
      %c0_27 = arith.constant 0 : index
      %c0_28 = arith.constant 0 : index
      %39 = vector.load %arg13[%c0_26, %c0_27, %c0_28] : memref<4x128x32xf32, #tpu.memory_space<vmem>>, vector<4x128x32xf32>
      tpu.vector_store %arg13[%c0_26, %c0_27, %c0_28], %38 {strides = array<i32>} : memref<4x128x32xf32, #tpu.memory_space<vmem>>, vector<4x128x32xf32>,
    } else {
    }
    %c2_i32 = arith.constant 2 : i32
    %3 = arith.muli %arg0, %c2_i32 : i32
    %4 = arith.addi %3, %arg2 : i32
    %5 = arith.index_cast %4 : i32 to index
    %6 = memref.load %arg3[%5] : memref<4xi32, #tpu.memory_space<smem>>
    %c0_i32_1 = arith.constant 0 : i32
    %7 = arith.cmpi eq, %6, %c0_i32_1 : i32
    %8 = arith.extui %7 : i1 to i32
    %c0_i32_2 = arith.constant 0 : i32
    %9 = arith.cmpi ne, %8, %c0_i32_2 : i32
    scf.if %9 {
      %c0 = arith.constant 0 : index
      %c0_4 = arith.constant 0 : index
      %c0_5 = arith.constant 0 : index
      %13 = vector.load %arg5[%c0, %c0_4, %c0_5] : memref<1x128x256xbf16, #tpu.memory_space<vmem>>, vector<1x128x256xbf16>
      %14 = vector.shape_cast %13 : vector<1x128x256xbf16> to vector<128x256xbf16>
      %c0_6 = arith.constant 0 : index
      %c0_7 = arith.constant 0 : index
      %c0_8 = arith.constant 0 : index
      %15 = vector.load %arg6[%c0_6, %c0_7, %c0_8] : memref<1x1x128xf32, #tpu.memory_space<vmem>>, vector<1x1x128xf32>
      %16 = vector.shape_cast %15 : vector<1x1x128xf32> to vector<1x128xf32>
      %cst = arith.constant 0.000000e+00 : f32
      %17 = vector.broadcast %cst : f32 to vector<1x128xf32>
      %18 = arith.cmpf ogt, %16, %17 : vector<1x128xf32>
      %19 = vector.extract_strided_slice %14 {offsets = [0, 0], sizes = [128, 32], strides = [1, 1]} : vector<128x256xbf16> to vector<128x32xbf16>
      %20 = vector.extract_strided_slice %14 {offsets = [0, 128], sizes = [128, 32], strides = [1, 1]} : vector<128x256xbf16> to vector<128x32xbf16>
      %c0_9 = arith.constant 0 : index
      %c0_10 = arith.constant 0 : index
      %c0_11 = arith.constant 0 : index
      %21 = vector.load %arg10[%c0_9, %c0_10, %c0_11] : memref<4x128x32xbf16, #tpu.memory_space<vmem>>, vector<1x128x32xbf16>
      %22 = vector.shape_cast %21 : vector<1x128x32xbf16> to vector<128x32xbf16>
      %cst_12 = arith.constant dense<0.000000e+00> : vector<128x128xf32>
      %23 = tpu.matmul %22, %19, %cst_12 {dimension_numbers = #tpu.dot_dimension_numbers<[1], [1], [0], [0], [0, 0, 1, 0], [], []>} : vector<128x32xbf16>, vector<128x32xbf16>, vector<128x128xf32> -> vector<128x128xf32>
      %cst_13 = arith.constant -2.38197633E+38 : f32
      %24 = vector.shape_cast %18 : vector<1x128xi1> to vector<1x128xi1>
      %25 = vector.broadcast %24 : vector<1x128xi1> to vector<128x128xi1>
      %26 = vector.broadcast %cst_13 : f32 to vector<128x128xf32>
      %27 = arith.select %25, %26, %23 : vector<128x128xi1>, vector<128x128xf32>
      %c0_14 = arith.constant 0 : index
      %c0_15 = arith.constant 0 : index
      %c0_16 = arith.constant 0 : index
      %28 = vector.load %arg11[%c0_14, %c0_15, %c0_16] : memref<4x128x1xf32, #tpu.memory_space<vmem>>, vector<1x128x1xf32>
      %29 = vector.shape_cast %28 : vector<1x128x1xf32> to vector<128x1xf32>
      %cst_17 = arith.constant dense<0xFF800000> : vector<128xf32>
      %30 = vector.multi_reduction <maximumf>, %27, %cst_17 [1] : vector<128x128xf32> to vector<128xf32>
      %31 = vector.shape_cast %30 : vector<128xf32> to vector<128x1xf32>
      %32 = arith.maximumf %29, %31 : vector<128x1xf32>
      %33 = arith.subf %29, %32 : vector<128x1xf32>
      %34 = math.exp %33 : vector<128x1xf32>
      %35 = vector.broadcast %32 : vector<128x1xf32> to vector<128x128xf32>
      %36 = arith.subf %27, %35 : vector<128x128xf32>
      %37 = math.exp %36 : vector<128x128xf32>
      %c0_18 = arith.constant 0 : index
      %c0_19 = arith.constant 0 : index
      %c0_20 = arith.constant 0 : index
      %38 = vector.load %arg12[%c0_18, %c0_19, %c0_20] : memref<4x128x1xf32, #tpu.memory_space<vmem>>, vector<1x128x1xf32>
      %39 = vector.shape_cast %38 : vector<1x128x1xf32> to vector<128x1xf32>
      %40 = arith.mulf %34, %39 : vector<128x1xf32>
      %cst_21 = arith.constant dense<0.000000e+00> : vector<128xf32>
      %41 = vector.multi_reduction <add>, %37, %cst_21 [1] : vector<128x128xf32> to vector<128xf32>
      %42 = vector.shape_cast %41 : vector<128xf32> to vector<128x1xf32>
      %43 = arith.addf %40, %42 : vector<128x1xf32>
      %c0_22 = arith.constant 0 : index
      %c0_23 = arith.constant 0 : index
      %c0_24 = arith.constant 0 : index
      %44 = vector.load %arg12[%c0_22, %c0_23, %c0_24] : memref<4x128x1xf32, #tpu.memory_space<vmem>>, vector<1x128x1xf32>
      %45 = vector.shape_cast %44 : vector<1x128x1xf32> to vector<128x1xf32>
      %46 = vector.shape_cast %43 : vector<128x1xf32> to vector<1x128x1xf32>
      tpu.vector_store %arg12[%c0_22, %c0_23, %c0_24], %46 {strides = array<i32>} : memref<4x128x1xf32, #tpu.memory_space<vmem>>, vector<1x128x1xf32>,
      %c0_25 = arith.constant 0 : index
      %c0_26 = arith.constant 0 : index
      %c0_27 = arith.constant 0 : index
      %47 = vector.load %arg13[%c0_25, %c0_26, %c0_27] : memref<4x128x32xf32, #tpu.memory_space<vmem>>, vector<1x128x32xf32>
      %48 = vector.shape_cast %47 : vector<1x128x32xf32> to vector<128x32xf32>
      %49 = vector.broadcast %34 : vector<128x1xf32> to vector<128x32xf32>
      %50 = arith.mulf %49, %48 : vector<128x32xf32>
      %51 = arith.truncf %37 : vector<128x128xf32> to vector<128x128xbf16>
      %cst_28 = arith.constant dense<0.000000e+00> : vector<128x32xf32>
      %52 = tpu.matmul %51, %20, %cst_28 {dimension_numbers = #tpu.dot_dimension_numbers<[1], [0], [0], [1], [0, 0, 1, 1], [], []>} : vector<128x128xbf16>, vector<128x32xbf16>, vector<128x32xf32> -> vector<128x32xf32>
      %53 = arith.addf %50, %52 : vector<128x32xf32>
      %c0_29 = arith.constant 0 : index
      %c0_30 = arith.constant 0 : index
      %c0_31 = arith.constant 0 : index
      %54 = vector.load %arg13[%c0_29, %c0_30, %c0_31] : memref<4x128x32xf32, #tpu.memory_space<vmem>>, vector<1x128x32xf32>
      %55 = vector.shape_cast %54 : vector<1x128x32xf32> to vector<128x32xf32>
      %56 = vector.shape_cast %53 : vector<128x32xf32> to vector<1x128x32xf32>
      tpu.vector_store %arg13[%c0_29, %c0_30, %c0_31], %56 {strides = array<i32>} : memref<4x128x32xf32, #tpu.memory_space<vmem>>, vector<1x128x32xf32>,
      %c0_32 = arith.constant 0 : index
      %c0_33 = arith.constant 0 : index
      %c0_34 = arith.constant 0 : index
      %57 = vector.load %arg11[%c0_32, %c0_33, %c0_34] : memref<4x128x1xf32, #tpu.memory_space<vmem>>, vector<1x128x1xf32>
      %58 = vector.shape_cast %57 : vector<1x128x1xf32> to vector<128x1xf32>
      %59 = vector.shape_cast %32 : vector<128x1xf32> to vector<1x128x1xf32>
      tpu.vector_store %arg11[%c0_32, %c0_33, %c0_34], %59 {strides = array<i32>} : memref<4x128x1xf32, #tpu.memory_space<vmem>>, vector<1x128x1xf32>,
      %60 = vector.extract_strided_slice %14 {offsets = [0, 32], sizes = [128, 32], strides = [1, 1]} : vector<128x256xbf16> to vector<128x32xbf16>
      %61 = vector.extract_strided_slice %14 {offsets = [0, 160], sizes = [128, 32], strides = [1, 1]} : vector<128x256xbf16> to vector<128x32xbf16>
      %c1 = arith.constant 1 : index
      %c0_35 = arith.constant 0 : index
      %c0_36 = arith.constant 0 : index
      %62 = vector.load %arg10[%c1, %c0_35, %c0_36] : memref<4x128x32xbf16, #tpu.memory_space<vmem>>, vector<1x128x32xbf16>
      %63 = vector.shape_cast %62 : vector<1x128x32xbf16> to vector<128x32xbf16>
      %cst_37 = arith.constant dense<0.000000e+00> : vector<128x128xf32>
      %64 = tpu.matmul %63, %60, %cst_37 {dimension_numbers = #tpu.dot_dimension_numbers<[1], [1], [0], [0], [0, 0, 1, 0], [], []>} : vector<128x32xbf16>, vector<128x32xbf16>, vector<128x128xf32> -> vector<128x128xf32>
      %cst_38 = arith.constant -2.38197633E+38 : f32
      %65 = vector.shape_cast %18 : vector<1x128xi1> to vector<1x128xi1>
      %66 = vector.broadcast %65 : vector<1x128xi1> to vector<128x128xi1>
      %67 = vector.broadcast %cst_38 : f32 to vector<128x128xf32>
      %68 = arith.select %66, %67, %64 : vector<128x128xi1>, vector<128x128xf32>
      %c1_39 = arith.constant 1 : index
      %c0_40 = arith.constant 0 : index
      %c0_41 = arith.constant 0 : index
      %69 = vector.load %arg11[%c1_39, %c0_40, %c0_41] : memref<4x128x1xf32, #tpu.memory_space<vmem>>, vector<1x128x1xf32>
      %70 = vector.shape_cast %69 : vector<1x128x1xf32> to vector<128x1xf32>
      %cst_42 = arith.constant dense<0xFF800000> : vector<128xf32>
      %71 = vector.multi_reduction <maximumf>, %68, %cst_42 [1] : vector<128x128xf32> to vector<128xf32>
      %72 = vector.shape_cast %71 : vector<128xf32> to vector<128x1xf32>
      %73 = arith.maximumf %70, %72 : vector<128x1xf32>
      %74 = arith.subf %70, %73 : vector<128x1xf32>
      %75 = math.exp %74 : vector<128x1xf32>
      %76 = vector.broadcast %73 : vector<128x1xf32> to vector<128x128xf32>
      %77 = arith.subf %68, %76 : vector<128x128xf32>
      %78 = math.exp %77 : vector<128x128xf32>
      %c1_43 = arith.constant 1 : index
      %c0_44 = arith.constant 0 : index
      %c0_45 = arith.constant 0 : index
      %79 = vector.load %arg12[%c1_43, %c0_44, %c0_45] : memref<4x128x1xf32, #tpu.memory_space<vmem>>, vector<1x128x1xf32>
      %80 = vector.shape_cast %79 : vector<1x128x1xf32> to vector<128x1xf32>
      %81 = arith.mulf %75, %80 : vector<128x1xf32>
      %cst_46 = arith.constant dense<0.000000e+00> : vector<128xf32>
      %82 = vector.multi_reduction <add>, %78, %cst_46 [1] : vector<128x128xf32> to vector<128xf32>
      %83 = vector.shape_cast %82 : vector<128xf32> to vector<128x1xf32>
      %84 = arith.addf %81, %83 : vector<128x1xf32>
      %c1_47 = arith.constant 1 : index
      %c0_48 = arith.constant 0 : index
      %c0_49 = arith.constant 0 : index
      %85 = vector.load %arg12[%c1_47, %c0_48, %c0_49] : memref<4x128x1xf32, #tpu.memory_space<vmem>>, vector<1x128x1xf32>
      %86 = vector.shape_cast %85 : vector<1x128x1xf32> to vector<128x1xf32>
      %87 = vector.shape_cast %84 : vector<128x1xf32> to vector<1x128x1xf32>
      tpu.vector_store %arg12[%c1_47, %c0_48, %c0_49], %87 {strides = array<i32>} : memref<4x128x1xf32, #tpu.memory_space<vmem>>, vector<1x128x1xf32>,
      %c1_50 = arith.constant 1 : index
      %c0_51 = arith.constant 0 : index
      %c0_52 = arith.constant 0 : index
      %88 = vector.load %arg13[%c1_50, %c0_51, %c0_52] : memref<4x128x32xf32, #tpu.memory_space<vmem>>, vector<1x128x32xf32>
      %89 = vector.shape_cast %88 : vector<1x128x32xf32> to vector<128x32xf32>
      %90 = vector.broadcast %75 : vector<128x1xf32> to vector<128x32xf32>
      %91 = arith.mulf %90, %89 : vector<128x32xf32>
      %92 = arith.truncf %78 : vector<128x128xf32> to vector<128x128xbf16>
      %cst_53 = arith.constant dense<0.000000e+00> : vector<128x32xf32>
      %93 = tpu.matmul %92, %61, %cst_53 {dimension_numbers = #tpu.dot_dimension_numbers<[1], [0], [0], [1], [0, 0, 1, 1], [], []>} : vector<128x128xbf16>, vector<128x32xbf16>, vector<128x32xf32> -> vector<128x32xf32>
      %94 = arith.addf %91, %93 : vector<128x32xf32>
      %c1_54 = arith.constant 1 : index
      %c0_55 = arith.constant 0 : index
      %c0_56 = arith.constant 0 : index
      %95 = vector.load %arg13[%c1_54, %c0_55, %c0_56] : memref<4x128x32xf32, #tpu.memory_space<vmem>>, vector<1x128x32xf32>
      %96 = vector.shape_cast %95 : vector<1x128x32xf32> to vector<128x32xf32>
      %97 = vector.shape_cast %94 : vector<128x32xf32> to vector<1x128x32xf32>
      tpu.vector_store %arg13[%c1_54, %c0_55, %c0_56], %97 {strides = array<i32>} : memref<4x128x32xf32, #tpu.memory_space<vmem>>, vector<1x128x32xf32>,
      %c1_57 = arith.constant 1 : index
      %c0_58 = arith.constant 0 : index
      %c0_59 = arith.constant 0 : index
      %98 = vector.load %arg11[%c1_57, %c0_58, %c0_59] : memref<4x128x1xf32, #tpu.memory_space<vmem>>, vector<1x128x1xf32>
      %99 = vector.shape_cast %98 : vector<1x128x1xf32> to vector<128x1xf32>
      %100 = vector.shape_cast %73 : vector<128x1xf32> to vector<1x128x1xf32>
      tpu.vector_store %arg11[%c1_57, %c0_58, %c0_59], %100 {strides = array<i32>} : memref<4x128x1xf32, #tpu.memory_space<vmem>>, vector<1x128x1xf32>,
      %101 = vector.extract_strided_slice %14 {offsets = [0, 64], sizes = [128, 32], strides = [1, 1]} : vector<128x256xbf16> to vector<128x32xbf16>
      %102 = vector.extract_strided_slice %14 {offsets = [0, 192], sizes = [128, 32], strides = [1, 1]} : vector<128x256xbf16> to vector<128x32xbf16>
      %c2 = arith.constant 2 : index
      %c0_60 = arith.constant 0 : index
      %c0_61 = arith.constant 0 : index
      %103 = vector.load %arg10[%c2, %c0_60, %c0_61] : memref<4x128x32xbf16, #tpu.memory_space<vmem>>, vector<1x128x32xbf16>
      %104 = vector.shape_cast %103 : vector<1x128x32xbf16> to vector<128x32xbf16>
      %cst_62 = arith.constant dense<0.000000e+00> : vector<128x128xf32>
      %105 = tpu.matmul %104, %101, %cst_62 {dimension_numbers = #tpu.dot_dimension_numbers<[1], [1], [0], [0], [0, 0, 1, 0], [], []>} : vector<128x32xbf16>, vector<128x32xbf16>, vector<128x128xf32> -> vector<128x128xf32>
      %cst_63 = arith.constant -2.38197633E+38 : f32
      %106 = vector.shape_cast %18 : vector<1x128xi1> to vector<1x128xi1>
      %107 = vector.broadcast %106 : vector<1x128xi1> to vector<128x128xi1>
      %108 = vector.broadcast %cst_63 : f32 to vector<128x128xf32>
      %109 = arith.select %107, %108, %105 : vector<128x128xi1>, vector<128x128xf32>
      %c2_64 = arith.constant 2 : index
      %c0_65 = arith.constant 0 : index
      %c0_66 = arith.constant 0 : index
      %110 = vector.load %arg11[%c2_64, %c0_65, %c0_66] : memref<4x128x1xf32, #tpu.memory_space<vmem>>, vector<1x128x1xf32>
      %111 = vector.shape_cast %110 : vector<1x128x1xf32> to vector<128x1xf32>
      %cst_67 = arith.constant dense<0xFF800000> : vector<128xf32>
      %112 = vector.multi_reduction <maximumf>, %109, %cst_67 [1] : vector<128x128xf32> to vector<128xf32>
      %113 = vector.shape_cast %112 : vector<128xf32> to vector<128x1xf32>
      %114 = arith.maximumf %111, %113 : vector<128x1xf32>
      %115 = arith.subf %111, %114 : vector<128x1xf32>
      %116 = math.exp %115 : vector<128x1xf32>
      %117 = vector.broadcast %114 : vector<128x1xf32> to vector<128x128xf32>
      %118 = arith.subf %109, %117 : vector<128x128xf32>
      %119 = math.exp %118 : vector<128x128xf32>
      %c2_68 = arith.constant 2 : index
      %c0_69 = arith.constant 0 : index
      %c0_70 = arith.constant 0 : index
      %120 = vector.load %arg12[%c2_68, %c0_69, %c0_70] : memref<4x128x1xf32, #tpu.memory_space<vmem>>, vector<1x128x1xf32>
      %121 = vector.shape_cast %120 : vector<1x128x1xf32> to vector<128x1xf32>
      %122 = arith.mulf %116, %121 : vector<128x1xf32>
      %cst_71 = arith.constant dense<0.000000e+00> : vector<128xf32>
      %123 = vector.multi_reduction <add>, %119, %cst_71 [1] : vector<128x128xf32> to vector<128xf32>
      %124 = vector.shape_cast %123 : vector<128xf32> to vector<128x1xf32>
      %125 = arith.addf %122, %124 : vector<128x1xf32>
      %c2_72 = arith.constant 2 : index
      %c0_73 = arith.constant 0 : index
      %c0_74 = arith.constant 0 : index
      %126 = vector.load %arg12[%c2_72, %c0_73, %c0_74] : memref<4x128x1xf32, #tpu.memory_space<vmem>>, vector<1x128x1xf32>
      %127 = vector.shape_cast %126 : vector<1x128x1xf32> to vector<128x1xf32>
      %128 = vector.shape_cast %125 : vector<128x1xf32> to vector<1x128x1xf32>
      tpu.vector_store %arg12[%c2_72, %c0_73, %c0_74], %128 {strides = array<i32>} : memref<4x128x1xf32, #tpu.memory_space<vmem>>, vector<1x128x1xf32>,
      %c2_75 = arith.constant 2 : index
      %c0_76 = arith.constant 0 : index
      %c0_77 = arith.constant 0 : index
      %129 = vector.load %arg13[%c2_75, %c0_76, %c0_77] : memref<4x128x32xf32, #tpu.memory_space<vmem>>, vector<1x128x32xf32>
      %130 = vector.shape_cast %129 : vector<1x128x32xf32> to vector<128x32xf32>
      %131 = vector.broadcast %116 : vector<128x1xf32> to vector<128x32xf32>
      %132 = arith.mulf %131, %130 : vector<128x32xf32>
      %133 = arith.truncf %119 : vector<128x128xf32> to vector<128x128xbf16>
      %cst_78 = arith.constant dense<0.000000e+00> : vector<128x32xf32>
      %134 = tpu.matmul %133, %102, %cst_78 {dimension_numbers = #tpu.dot_dimension_numbers<[1], [0], [0], [1], [0, 0, 1, 1], [], []>} : vector<128x128xbf16>, vector<128x32xbf16>, vector<128x32xf32> -> vector<128x32xf32>
      %135 = arith.addf %132, %134 : vector<128x32xf32>
      %c2_79 = arith.constant 2 : index
      %c0_80 = arith.constant 0 : index
      %c0_81 = arith.constant 0 : index
      %136 = vector.load %arg13[%c2_79, %c0_80, %c0_81] : memref<4x128x32xf32, #tpu.memory_space<vmem>>, vector<1x128x32xf32>
      %137 = vector.shape_cast %136 : vector<1x128x32xf32> to vector<128x32xf32>
      %138 = vector.shape_cast %135 : vector<128x32xf32> to vector<1x128x32xf32>
      tpu.vector_store %arg13[%c2_79, %c0_80, %c0_81], %138 {strides = array<i32>} : memref<4x128x32xf32, #tpu.memory_space<vmem>>, vector<1x128x32xf32>,
      %c2_82 = arith.constant 2 : index
      %c0_83 = arith.constant 0 : index
      %c0_84 = arith.constant 0 : index
      %139 = vector.load %arg11[%c2_82, %c0_83, %c0_84] : memref<4x128x1xf32, #tpu.memory_space<vmem>>, vector<1x128x1xf32>
      %140 = vector.shape_cast %139 : vector<1x128x1xf32> to vector<128x1xf32>
      %141 = vector.shape_cast %114 : vector<128x1xf32> to vector<1x128x1xf32>
      tpu.vector_store %arg11[%c2_82, %c0_83, %c0_84], %141 {strides = array<i32>} : memref<4x128x1xf32, #tpu.memory_space<vmem>>, vector<1x128x1xf32>,
      %142 = vector.extract_strided_slice %14 {offsets = [0, 96], sizes = [128, 32], strides = [1, 1]} : vector<128x256xbf16> to vector<128x32xbf16>
      %143 = vector.extract_strided_slice %14 {offsets = [0, 224], sizes = [128, 32], strides = [1, 1]} : vector<128x256xbf16> to vector<128x32xbf16>
      %c3 = arith.constant 3 : index
      %c0_85 = arith.constant 0 : index
      %c0_86 = arith.constant 0 : index
      %144 = vector.load %arg10[%c3, %c0_85, %c0_86] : memref<4x128x32xbf16, #tpu.memory_space<vmem>>, vector<1x128x32xbf16>
      %145 = vector.shape_cast %144 : vector<1x128x32xbf16> to vector<128x32xbf16>
      %cst_87 = arith.constant dense<0.000000e+00> : vector<128x128xf32>
      %146 = tpu.matmul %145, %142, %cst_87 {dimension_numbers = #tpu.dot_dimension_numbers<[1], [1], [0], [0], [0, 0, 1, 0], [], []>} : vector<128x32xbf16>, vector<128x32xbf16>, vector<128x128xf32> -> vector<128x128xf32>
      %cst_88 = arith.constant -2.38197633E+38 : f32
      %147 = vector.shape_cast %18 : vector<1x128xi1> to vector<1x128xi1>
      %148 = vector.broadcast %147 : vector<1x128xi1> to vector<128x128xi1>
      %149 = vector.broadcast %cst_88 : f32 to vector<128x128xf32>
      %150 = arith.select %148, %149, %146 : vector<128x128xi1>, vector<128x128xf32>
      %c3_89 = arith.constant 3 : index
      %c0_90 = arith.constant 0 : index
      %c0_91 = arith.constant 0 : index
      %151 = vector.load %arg11[%c3_89, %c0_90, %c0_91] : memref<4x128x1xf32, #tpu.memory_space<vmem>>, vector<1x128x1xf32>
      %152 = vector.shape_cast %151 : vector<1x128x1xf32> to vector<128x1xf32>
      %cst_92 = arith.constant dense<0xFF800000> : vector<128xf32>
      %153 = vector.multi_reduction <maximumf>, %150, %cst_92 [1] : vector<128x128xf32> to vector<128xf32>
      %154 = vector.shape_cast %153 : vector<128xf32> to vector<128x1xf32>
      %155 = arith.maximumf %152, %154 : vector<128x1xf32>
      %156 = arith.subf %152, %155 : vector<128x1xf32>
      %157 = math.exp %156 : vector<128x1xf32>
      %158 = vector.broadcast %155 : vector<128x1xf32> to vector<128x128xf32>
      %159 = arith.subf %150, %158 : vector<128x128xf32>
      %160 = math.exp %159 : vector<128x128xf32>
      %c3_93 = arith.constant 3 : index
      %c0_94 = arith.constant 0 : index
      %c0_95 = arith.constant 0 : index
      %161 = vector.load %arg12[%c3_93, %c0_94, %c0_95] : memref<4x128x1xf32, #tpu.memory_space<vmem>>, vector<1x128x1xf32>
      %162 = vector.shape_cast %161 : vector<1x128x1xf32> to vector<128x1xf32>
      %163 = arith.mulf %157, %162 : vector<128x1xf32>
      %cst_96 = arith.constant dense<0.000000e+00> : vector<128xf32>
      %164 = vector.multi_reduction <add>, %160, %cst_96 [1] : vector<128x128xf32> to vector<128xf32>
      %165 = vector.shape_cast %164 : vector<128xf32> to vector<128x1xf32>
      %166 = arith.addf %163, %165 : vector<128x1xf32>
      %c3_97 = arith.constant 3 : index
      %c0_98 = arith.constant 0 : index
      %c0_99 = arith.constant 0 : index
      %167 = vector.load %arg12[%c3_97, %c0_98, %c0_99] : memref<4x128x1xf32, #tpu.memory_space<vmem>>, vector<1x128x1xf32>
      %168 = vector.shape_cast %167 : vector<1x128x1xf32> to vector<128x1xf32>
      %169 = vector.shape_cast %166 : vector<128x1xf32> to vector<1x128x1xf32>
      tpu.vector_store %arg12[%c3_97, %c0_98, %c0_99], %169 {strides = array<i32>} : memref<4x128x1xf32, #tpu.memory_space<vmem>>, vector<1x128x1xf32>,
      %c3_100 = arith.constant 3 : index
      %c0_101 = arith.constant 0 : index
      %c0_102 = arith.constant 0 : index
      %170 = vector.load %arg13[%c3_100, %c0_101, %c0_102] : memref<4x128x32xf32, #tpu.memory_space<vmem>>, vector<1x128x32xf32>
      %171 = vector.shape_cast %170 : vector<1x128x32xf32> to vector<128x32xf32>
      %172 = vector.broadcast %157 : vector<128x1xf32> to vector<128x32xf32>
      %173 = arith.mulf %172, %171 : vector<128x32xf32>
      %174 = arith.truncf %160 : vector<128x128xf32> to vector<128x128xbf16>
      %cst_103 = arith.constant dense<0.000000e+00> : vector<128x32xf32>
      %175 = tpu.matmul %174, %143, %cst_103 {dimension_numbers = #tpu.dot_dimension_numbers<[1], [0], [0], [1], [0, 0, 1, 1], [], []>} : vector<128x128xbf16>, vector<128x32xbf16>, vector<128x32xf32> -> vector<128x32xf32>
      %176 = arith.addf %173, %175 : vector<128x32xf32>
      %c3_104 = arith.constant 3 : index
      %c0_105 = arith.constant 0 : index
      %c0_106 = arith.constant 0 : index
      %177 = vector.load %arg13[%c3_104, %c0_105, %c0_106] : memref<4x128x32xf32, #tpu.memory_space<vmem>>, vector<1x128x32xf32>
      %178 = vector.shape_cast %177 : vector<1x128x32xf32> to vector<128x32xf32>
      %179 = vector.shape_cast %176 : vector<128x32xf32> to vector<1x128x32xf32>
      tpu.vector_store %arg13[%c3_104, %c0_105, %c0_106], %179 {strides = array<i32>} : memref<4x128x32xf32, #tpu.memory_space<vmem>>, vector<1x128x32xf32>,
      %c3_107 = arith.constant 3 : index
      %c0_108 = arith.constant 0 : index
      %c0_109 = arith.constant 0 : index
      %180 = vector.load %arg11[%c3_107, %c0_108, %c0_109] : memref<4x128x1xf32, #tpu.memory_space<vmem>>, vector<1x128x1xf32>
      %181 = vector.shape_cast %180 : vector<1x128x1xf32> to vector<128x1xf32>
      %182 = vector.shape_cast %155 : vector<128x1xf32> to vector<1x128x1xf32>
      tpu.vector_store %arg11[%c3_107, %c0_108, %c0_109], %182 {strides = array<i32>} : memref<4x128x1xf32, #tpu.memory_space<vmem>>, vector<1x128x1xf32>,
    } else {
    }
    %c1_i32 = arith.constant 1 : i32
    %10 = arith.cmpi eq, %arg2, %c1_i32 : i32
    %11 = arith.extui %10 : i1 to i32
    %c0_i32_3 = arith.constant 0 : i32
    %12 = arith.cmpi ne, %11, %c0_i32_3 : i32
    scf.if %12 {
      %cst = arith.constant 0.000000e+00 : f32
      %13 = vector.broadcast %cst : f32 to vector<128x128xf32>
      %c0 = arith.constant 0 : index
      %c0_4 = arith.constant 0 : index
      %c0_5 = arith.constant 0 : index
      %14 = vector.load %arg12[%c0, %c0_4, %c0_5] : memref<4x128x1xf32, #tpu.memory_space<vmem>>, vector<1x128x1xf32>
      %15 = vector.shape_cast %14 : vector<1x128x1xf32> to vector<128x1xf32>
      %cst_6 = arith.constant 1.000000e-30 : f32
      %16 = vector.broadcast %cst_6 : f32 to vector<128x1xf32>
      %17 = arith.maximumf %15, %16 : vector<128x1xf32>
      %18 = tpu.reciprocal %17 {approx = true} : vector<128x1xf32> -> vector<128x1xf32>
      %c0_7 = arith.constant 0 : index
      %c0_8 = arith.constant 0 : index
      %c0_9 = arith.constant 0 : index
      %19 = vector.load %arg13[%c0_7, %c0_8, %c0_9] : memref<4x128x32xf32, #tpu.memory_space<vmem>>, vector<1x128x32xf32>
      %20 = vector.shape_cast %19 : vector<1x128x32xf32> to vector<128x32xf32>
      %21 = vector.broadcast %18 : vector<128x1xf32> to vector<128x32xf32>
      %22 = arith.mulf %20, %21 : vector<128x32xf32>
      %23 = arith.truncf %22 : vector<128x32xf32> to vector<128x32xbf16>
      %c0_10 = arith.constant 0 : index
      %c128 = arith.constant 128 : index
      %24 = vector.load %arg7[%c0_10, %c128] : memref<128x256xbf16, #tpu.memory_space<vmem>>, vector<32x128xbf16>
      %cst_11 = arith.constant dense<0.000000e+00> : vector<128x128xf32>
      %25 = tpu.matmul %23, %24, %cst_11 {dimension_numbers = #tpu.dot_dimension_numbers<[1], [0], [0], [1], [0, 0, 1, 1], [], []>} : vector<128x32xbf16>, vector<32x128xbf16>, vector<128x128xf32> -> vector<128x128xf32>
      %26 = arith.addf %13, %25 : vector<128x128xf32>
      %c1 = arith.constant 1 : index
      %c0_12 = arith.constant 0 : index
      %c0_13 = arith.constant 0 : index
      %27 = vector.load %arg12[%c1, %c0_12, %c0_13] : memref<4x128x1xf32, #tpu.memory_space<vmem>>, vector<1x128x1xf32>
      %28 = vector.shape_cast %27 : vector<1x128x1xf32> to vector<128x1xf32>
      %cst_14 = arith.constant 1.000000e-30 : f32
      %29 = vector.broadcast %cst_14 : f32 to vector<128x1xf32>
      %30 = arith.maximumf %28, %29 : vector<128x1xf32>
      %31 = tpu.reciprocal %30 {approx = true} : vector<128x1xf32> -> vector<128x1xf32>
      %c1_15 = arith.constant 1 : index
      %c0_16 = arith.constant 0 : index
      %c0_17 = arith.constant 0 : index
      %32 = vector.load %arg13[%c1_15, %c0_16, %c0_17] : memref<4x128x32xf32, #tpu.memory_space<vmem>>, vector<1x128x32xf32>
      %33 = vector.shape_cast %32 : vector<1x128x32xf32> to vector<128x32xf32>
      %34 = vector.broadcast %31 : vector<128x1xf32> to vector<128x32xf32>
      %35 = arith.mulf %33, %34 : vector<128x32xf32>
      %36 = arith.truncf %35 : vector<128x32xf32> to vector<128x32xbf16>
      %c32 = arith.constant 32 : index
      %c128_18 = arith.constant 128 : index
      %37 = vector.load %arg7[%c32, %c128_18] : memref<128x256xbf16, #tpu.memory_space<vmem>>, vector<32x128xbf16>
      %cst_19 = arith.constant dense<0.000000e+00> : vector<128x128xf32>
      %38 = tpu.matmul %36, %37, %cst_19 {dimension_numbers = #tpu.dot_dimension_numbers<[1], [0], [0], [1], [0, 0, 1, 1], [], []>} : vector<128x32xbf16>, vector<32x128xbf16>, vector<128x128xf32> -> vector<128x128xf32>
      %39 = arith.addf %26, %38 : vector<128x128xf32>
      %c2 = arith.constant 2 : index
      %c0_20 = arith.constant 0 : index
      %c0_21 = arith.constant 0 : index
      %40 = vector.load %arg12[%c2, %c0_20, %c0_21] : memref<4x128x1xf32, #tpu.memory_space<vmem>>, vector<1x128x1xf32>
      %41 = vector.shape_cast %40 : vector<1x128x1xf32> to vector<128x1xf32>
      %cst_22 = arith.constant 1.000000e-30 : f32
      %42 = vector.broadcast %cst_22 : f32 to vector<128x1xf32>
      %43 = arith.maximumf %41, %42 : vector<128x1xf32>
      %44 = tpu.reciprocal %43 {approx = true} : vector<128x1xf32> -> vector<128x1xf32>
      %c2_23 = arith.constant 2 : index
      %c0_24 = arith.constant 0 : index
      %c0_25 = arith.constant 0 : index
      %45 = vector.load %arg13[%c2_23, %c0_24, %c0_25] : memref<4x128x32xf32, #tpu.memory_space<vmem>>, vector<1x128x32xf32>
      %46 = vector.shape_cast %45 : vector<1x128x32xf32> to vector<128x32xf32>
      %47 = vector.broadcast %44 : vector<128x1xf32> to vector<128x32xf32>
      %48 = arith.mulf %46, %47 : vector<128x32xf32>
      %49 = arith.truncf %48 : vector<128x32xf32> to vector<128x32xbf16>
      %c64 = arith.constant 64 : index
      %c128_26 = arith.constant 128 : index
      %50 = vector.load %arg7[%c64, %c128_26] : memref<128x256xbf16, #tpu.memory_space<vmem>>, vector<32x128xbf16>
      %cst_27 = arith.constant dense<0.000000e+00> : vector<128x128xf32>
      %51 = tpu.matmul %49, %50, %cst_27 {dimension_numbers = #tpu.dot_dimension_numbers<[1], [0], [0], [1], [0, 0, 1, 1], [], []>} : vector<128x32xbf16>, vector<32x128xbf16>, vector<128x128xf32> -> vector<128x128xf32>
      %52 = arith.addf %39, %51 : vector<128x128xf32>
      %c3 = arith.constant 3 : index
      %c0_28 = arith.constant 0 : index
      %c0_29 = arith.constant 0 : index
      %53 = vector.load %arg12[%c3, %c0_28, %c0_29] : memref<4x128x1xf32, #tpu.memory_space<vmem>>, vector<1x128x1xf32>
      %54 = vector.shape_cast %53 : vector<1x128x1xf32> to vector<128x1xf32>
      %cst_30 = arith.constant 1.000000e-30 : f32
      %55 = vector.broadcast %cst_30 : f32 to vector<128x1xf32>
      %56 = arith.maximumf %54, %55 : vector<128x1xf32>
      %57 = tpu.reciprocal %56 {approx = true} : vector<128x1xf32> -> vector<128x1xf32>
      %c3_31 = arith.constant 3 : index
      %c0_32 = arith.constant 0 : index
      %c0_33 = arith.constant 0 : index
      %58 = vector.load %arg13[%c3_31, %c0_32, %c0_33] : memref<4x128x32xf32, #tpu.memory_space<vmem>>, vector<1x128x32xf32>
      %59 = vector.shape_cast %58 : vector<1x128x32xf32> to vector<128x32xf32>
      %60 = vector.broadcast %57 : vector<128x1xf32> to vector<128x32xf32>
      %61 = arith.mulf %59, %60 : vector<128x32xf32>
      %62 = arith.truncf %61 : vector<128x32xf32> to vector<128x32xbf16>
      %c96 = arith.constant 96 : index
      %c128_34 = arith.constant 128 : index
      %63 = vector.load %arg7[%c96, %c128_34] : memref<128x256xbf16, #tpu.memory_space<vmem>>, vector<32x128xbf16>
      %cst_35 = arith.constant dense<0.000000e+00> : vector<128x128xf32>
      %64 = tpu.matmul %62, %63, %cst_35 {dimension_numbers = #tpu.dot_dimension_numbers<[1], [0], [0], [1], [0, 0, 1, 1], [], []>} : vector<128x32xbf16>, vector<32x128xbf16>, vector<128x128xf32> -> vector<128x128xf32>
      %65 = arith.addf %52, %64 : vector<128x128xf32>
      %c0_36 = arith.constant 0 : index
      %c0_37 = arith.constant 0 : index
      %66 = vector.load %arg8[%c0_36, %c0_37] : memref<1x128xf32, #tpu.memory_space<vmem>>, vector<1x128xf32>
      %67 = vector.broadcast %66 : vector<1x128xf32> to vector<128x128xf32>
      %68 = arith.addf %65, %67 : vector<128x128xf32>
      %c0_38 = arith.constant 0 : index
      %c0_39 = arith.constant 0 : index
      %c0_40 = arith.constant 0 : index
      %69 = vector.load %arg9[%c0_38, %c0_39, %c0_40] : memref<1x128x128xf32, #tpu.memory_space<vmem>>, vector<1x128x128xf32>
      %70 = vector.shape_cast %69 : vector<1x128x128xf32> to vector<128x128xf32>
      %71 = vector.shape_cast %68 : vector<128x128xf32> to vector<1x128x128xf32>
      tpu.vector_store %arg9[%c0_38, %c0_39, %c0_40], %71 {strides = array<i32>} : memref<1x128x128xf32, #tpu.memory_space<vmem>>, vector<1x128x128xf32>,
    } else {
    }
    return
  }
  func.func @transform_0(%arg0: i32, %arg1: i32, %arg2: i32, %arg3: memref<4xi32, #tpu.memory_space<smem>>) -> (i32, i32, i32) {
    %c0_i32 = arith.constant 0 : i32
    %c0_i32_0 = arith.constant 0 : i32
    return %arg0, %arg1, %c0_i32 : i32, i32, i32
  }
  func.func @transform_1(%arg0: i32, %arg1: i32, %arg2: i32, %arg3: memref<4xi32, #tpu.memory_space<smem>>) -> (i32, i32, i32) {
    %c0_i32 = arith.constant 0 : i32
    %c0_i32_0 = arith.constant 0 : i32
    return %arg0, %arg2, %c0_i32 : i32, i32, i32
  }
  func.func @transform_2(%arg0: i32, %arg1: i32, %arg2: i32, %arg3: memref<4xi32, #tpu.memory_space<smem>>) -> (i32, i32, i32) {
    %c0_i32 = arith.constant 0 : i32
    %c0_i32_0 = arith.constant 0 : i32
    return %arg0, %c0_i32, %arg2 : i32, i32, i32
  }
  func.func @transform_3(%arg0: i32, %arg1: i32, %arg2: i32, %arg3: memref<4xi32, #tpu.memory_space<smem>>) -> (i32, i32) {
    %c0_i32 = arith.constant 0 : i32
    %c0_i32_0 = arith.constant 0 : i32
    %c0_i32_1 = arith.constant 0 : i32
    return %c0_i32, %c0_i32_0 : i32, i32
  }
  func.func @transform_4(%arg0: i32, %arg1: i32, %arg2: i32, %arg3: memref<4xi32, #tpu.memory_space<smem>>) -> (i32, i32) {
    %c0_i32 = arith.constant 0 : i32
    %c0_i32_0 = arith.constant 0 : i32
    %c0_i32_1 = arith.constant 0 : i32
    return %c0_i32, %c0_i32_0 : i32, i32
  }
  func.func @transform_5(%arg0: i32, %arg1: i32, %arg2: i32, %arg3: memref<4xi32, #tpu.memory_space<smem>>) -> (i32, i32, i32) {
    %c0_i32 = arith.constant 0 : i32
    %c0_i32_0 = arith.constant 0 : i32
    return %arg0, %arg1, %c0_i32 : i32, i32, i32
  }
}

</mosaic_0001>

<bundles_post_ra>
// kernel: tpu_custom_call.1
= control target key start
LH: loop header
LB: loop body
LE: loop exit
PB: predicated region body
PF: predicated region fallthrough
CT: control target
= control target key end

     0   :  { %s7695_s21 = smov [#allocation7]   ;;  %s10976_s0 = inlined_call_operand.hbm [shape: s32[4], index: 0, kind: input, shape index: {}]   ;;  %s10977_s1 = inlined_call_operand.hbm [shape: bf16[2,256,128], index: 1, kind: input, shape index: {}]   ;;  %s10978_s2 = inlined_call_operand.hbm [shape: bf16[2,256,256], index: 2, kind: input, shape index: {}]   ;;  %s10979_s3 = inlined_call_operand.vmem [shape: f32[2,1,256], index: 3, kind: input, shape index: {}]   ;;  %s10980_s4 = inlined_call_operand.hbm [shape: bf16[128,256], index: 4, kind: input, shape index: {}]   ;;  %s10981_s5 = inlined_call_operand.vmem [shape: f32[1,128], index: 5, kind: input, shape index: {}]   ;;  %s10982_s6 = inlined_call_operand.hbm [shape: f32[2,256,128], index: 6, kind: output, shape index: {}]  }
   0x1   :  { %11085 = sst [smem:[#allocation122_spill]] %s10977_s1 }
   0x2   :  { %11086 = sst [smem:[#allocation123_spill]] %s10979_s3 }
   0x3   :  { %11087 = sst [smem:[#allocation124_spill]] %s10980_s4 }
   0x4   :  { %11088 = sst [smem:[#allocation125_spill]] %s10981_s5 }
   0x5   :  { %11089 = sst [smem:[#allocation126_spill]] %s10982_s6 }
   0x6   :  { %12 = dma.hbm_to_smem %s10976_s0, 16, %s7695_s21, [#allocation6] }
   0x7   :  { %7625 = dma.done.wait [#allocation6], 16 }
   0x8   :  { %7626 = vsyncadd [#allocation6], 4294967280 }
   0x9   :  { %14 = sfence }
   0xa   :  { %15 = vsyncpa [#allocation9], 0 }
   0xb   :  { %17 = vsyncpa [#allocation9 + $0x1], 0 }
   0xc   :  { %18 = vsyncpa [#allocation12], 0 }
   0xd   :  { %20 = vsyncpa [#allocation12 + $0x1], 0 }
   0xe   :  { %21 = vsyncpa [#allocation10], 0 }
   0xf   :  { %23 = vsyncpa [#allocation10 + $0x1], 0  ;;  %s7754_s24 = smov 0   ;;  %s7756_s25 = smov 0  }
  0x10   :  { %s7758_s26 = smov 0   ;;  %s7760_s27 = smov 0  }
  0x11   :  { %s7762_s28 = smov 0   ;;  %s7764_s0 = smov 0  }
  0x12   :  { %s7766_s29 = smov 0   ;;  %s7768_s30 = smov 0  }
  0x13   :  { %s7770_s7 = smov 0   ;;  %s7772_s8 = smov 0  }
  0x14   :  { %s7774_s9 = smov 0   ;;  %s7776_s10 = smov 0  }
  0x15   :  { %s7778_s11 = smov 0  }
  0x16 LB: > { %11090 = sst [smem:[#allocation20_spill]] %s7657_s27  ;;  %s7818_s12 = sadd.s32 4294967295, %s7693_s11   ;;  %s7693_s11 = sphi %s7778_s11, %s29_s11   ;;  %s7689_s10 = sphi %s7776_s10, %s11449_s10   ;;  %s7685_s9 = sphi %s7774_s9, %s11440_s9   ;;  %s7681_s8 = sphi %s7772_s8, %s11439_s8   ;;  %s7677_s7 = sphi %s7770_s7, %s11448_s7   ;;  %s7673_s30 = sphi %s7768_s30, %s11438_s30   ;;  %s7669_s29 = sphi %s7766_s29, %s11437_s29   ;;  %s7665_s0 = sphi %s7764_s0, %s11447_s0   ;;  %s7661_s28 = sphi %s7762_s28, %s11446_s28   ;;  %s7657_s27 = sphi %s7760_s27, %s11445_s27   ;;  %s7653_s26 = sphi %s7758_s26, %s11444_s26   ;;  %s7649_s25 = sphi %s7756_s25, %s11443_s25   ;;  %s7645_s24 = sphi %s7754_s24, %s11442_s24  }
  0x17   : > { %11091 = sst [smem:[#allocation21_spill]] %s7673_s30  ;;  %s6037_s13 = sadd.s32 4294967294, %s7693_s11  }
  0x18   : > { %11092 = sst [smem:[#allocation22_spill]] %s7681_s8  ;;  %p70_p0 = scmp.ne.s32.totalorder %s7661_s28, %s7657_s27 }
  0x19   : > { %11093 = sst [smem:[#allocation23_spill]] %s7685_s9  ;;  %p10991_p1 = scmp.eq.s32.totalorder %s7818_s12, 0 }
  0x1a   : > { %p98_p2 = scmp.ne.s32.totalorder %s7649_s25, %s7645_s24  ;;  %p200_p4 = scmp.eq.s32.totalorder %s6037_s13, 7 }
  0x1b   : > { %p7827_p3 = por %p10991_p1, %p70_p0  ;;  %p6038_p6 = scmp.ge.s32.totalorder %s7693_s11, 1 }
  0x1c   : > { %p7833_p5 = por %p98_p2, %p10991_p1  ;;  %p7838_p7 = por %p200_p4, %p70_p0 }
  0x1d   : > { %p207_p8 = scmp.lt.s32.totalorder %s7693_s11, 9  ;;  %s7696_s18 = smov [#allocation13]  }
  0x1e   : > { %s11095_s15 = scalar_select %p7833_p5, 1, 0 }
  0x1f   : > { %s11096_s16 = scalar_select %p7838_p7, 1, 0 }
  0x20   : > { %p7843_p9 = pnand %p6038_p6, %p207_p8  ;;  %s219_s19 = sshll.u32 %s7696_s18, 4  ;;  %s220_s19 = int_to_ptr.vmem [resolvable:$true] %s219_s19 }
  0x21   : > { %11097 = sst [smem:[#allocation24_spill]] %s11096_s16  ;;  %s7476_s20 = scalar_lea.vmem %s220_s19, 2048 }
  0x22   : > { %p6846_p10 = pneg %p7843_p9  ;;  %p7477_p13 = scmp.ne.s32.totalorder %s220_s19, %s7476_s20 }
  0x23   : > { %p7484_p4 = scmp.lt.s32.totalorder %s220_s19, %s220_s19  ;;  %p7485_p7 = scmp.lt.s32.totalorder %s7476_s20, %s7476_s20 }
  0x24   : > { %p6847_p11 = pnand %p6846_p10, %p10991_p1 }
  0x25   : > { %p7486_p5 = por %p7485_p7, %p7484_p4 }
  0x26   : > { %p7467_p12 = pneg %p6847_p11 }
  0x28   : > { %p7479_p0 = pnand %p7477_p13, %p7467_p12 }
  0x2a   : > { %p7480_p2 = pneg %p7479_p0 }
  0x2c   : > { %p7487_p6 = pnand %p7486_p5, %p7480_p2 }
  0x2e   : > { %7490 = shalt.err (!%p7487_p6)
}
  0x2f   : > { %s10987_s21 = smov 128   ;;  %s10988_s22 = smov 8  }
  0x30   : > { %s11099_s4 = sld [smem:[#allocation124_spill]]  ;;  %p194_p5 = scmp.eq.s32.totalorder %s7818_s12, 7 }
  0x31   : > { %p64_p7 = scmp.ne.s32.totalorder %s7665_s0, %s7661_s28  ;;  %p65_p8 = scmp.eq.s32.totalorder %s7693_s11, 0 }
  0x32   : > { %p6862_p10 = scmp.lt.s32.totalorder %s7693_s11, 8  ;;  %s236_s20 = sand.u32 1, %s7665_s0  }
  0x33   : > { %p66_p12 = por %p65_p8, %p64_p7  ;;  %p7867_p13 = por %p194_p5, %p64_p7 }
  0x34   : > { %s6041_s27 = sshll.u32 %s236_s20, 6  ;;  %s6042_s6 = sshll.u32 %s7685_s9, 4 }
  0x35   : > { %s11100_s16 = scalar_select %p7867_p13, 1, 0 }
  0x36   : > { %6849 = dma.hbm_to_vmem [thread:$0]  (!%p6847_p11), %s11099_s4, 2048, %s220_s19, [#allocation12], %s10987_s21, %s10987_s21, %s10988_s22  }
  0x37   : > { %11101 = sst [smem:[#allocation25_spill]] %s11100_s16  ;;  %s6043_s30 = sshll.u32 %s7689_s10, 5 }
  0x38   : > { %s240_s5 = scalar_lea.vmem [#allocation8], %s6041_s27  ;;  %s246_s19 = sadd.s32 %s6043_s30, %s6042_s6 }
  0x39   : > { %s249_s23 = sshll.u32 %s240_s5, 4  ;;  %s6044_s24 = sshll.u32 %s246_s19, 6  ;;  %s250_s23 = int_to_ptr.vmem [resolvable:$true] %s249_s23 }
  0x3a   : > { %p7875_p11 = pnand %p6862_p10, %p66_p12  ;;  %s11103_s1 = sld [smem:[#allocation122_spill]] }
  0x3b   : > { %s237_s4 = scalar_lea.sflag [#allocation9], %s236_s20  ;;  %s7504_s16 = scalar_lea.vmem %s250_s23, 1024 }
  0x3c   : > { %p7493_p0 = pneg %p7875_p11  ;;  %p7505_p2 = scmp.ne.s32.totalorder %s250_s23, %s7504_s16 }
  0x3d   : > { %s7699_s5 = smov [#allocation8]  }
  0x3e   : > { %p7507_p4 = pnand %p7505_p2, %p7493_p0  ;;  %s7509_s6 = sshll.u32 %s7699_s5, 4  ;;  %s7510_s6 = int_to_ptr.vmem [resolvable:$false] %s7509_s6 }
  0x3f   : > { %s7511_s27 = scalar_lea.vmem %s7510_s6, 2048  ;;  %p7512_p5 = scmp.lt.s32.totalorder %s250_s23, %s7510_s6 }
  0x40   : > { %s248_s13 = scalar_lea.hbm %s11103_s1, %s6044_s24  ;;  %p7508_p6 = pneg %p7507_p4 }
  0x41   : > { %p7513_p7 = scmp.lt.s32.totalorder %s7511_s27, %s7504_s16 }
  0x43   : > { %p7514_p12 = por %p7513_p7, %p7512_p5 }
  0x45   : > { %p7515_p1 = pnand %p7514_p12, %p7508_p6 }
  0x47   : > { %7518 = shalt.err (!%p7515_p1)
}
  0x48   : > { %s7700_s30 = smov 64   ;;  %s7701_s22 = smov 4  }
  0x49   : > { %6853 = dma.hbm_to_vmem [thread:$0]  (!%p7875_p11), %s248_s13, 1024, %s250_s23, %s237_s4, %s7700_s30, %s7700_s30, %s7701_s22  }
  0x4a   : > { %s41_s18 = sadd.s32 1, %s7681_s8  ;;  %p92_p0 = scmp.ne.s32.totalorder %s7653_s26, %s7649_s25 }
  0x4b   : > { %p42_p1 = scmp.ge.s32.totalorder %s41_s18, 2  ;;  %s261_s19 = sand.u32 1, %s7653_s26  }
  0x4c   : > { %s11105_s24 = sadd.s32 1, %s7685_s9  ;;  %s259_s6 = sand.u32 1, %s7693_s11  }
  0x4d   : > { %s11451_s18 = smov (%p42_p1, %s41_s18), 0  ;;  %s11453_s24 = smov (!%p42_p1, %s11105_s24), %s7685_s9 }
  0x4e   : > { %11104 = sst [smem:[#allocation26_spill]] %s11451_s18  ;;  %s81_s5 = ssub.s32 %s7681_s8, %s11451_s18 }
  0x4f   : > { %p46_p2 = scmp.ge.s32.totalorder %s11453_s24, 2  ;;  %p7902_p11 = por %p92_p0, %p65_p8 }
  0x50   : > { %s6045_s21 = sshll.u32 %s261_s19, 7  ;;  %s6219_s13 = sshll.u32 %s7681_s8, 5 }
  0x51   : > { %s11455_s24 = smov (%p46_p2, %s11453_s24), 0  ;;  %s11108_s23 = sadd.s32 1, %s7689_s10 }
  0x52   : > { %11107 = sst [smem:[#allocation27_spill]] %s11455_s24  ;;  %s11457_s23 = smov (!%p46_p2, %s11108_s23), %s7689_s10 }
  0x53   : > { %s53_s27 = ssub.s32 %s7685_s9, %s11455_s24  ;;  %p50_p4 = scmp.ge.s32.totalorder %s11457_s23, 2 }
  0x54   : > { %s6048_s30 = sshll.u32 %s7689_s10, 6  ;;  %s263_s20 = scalar_lea.vmem [#allocation11], %s6045_s21 }
  0x55   : > { %s270_s22 = sadd.s32 %s6219_s13, %s6048_s30  ;;  %s273_s16 = sshll.u32 %s263_s20, 4  ;;  %s274_s16 = int_to_ptr.vmem [resolvable:$true] %s273_s16 }
  0x56   : > { %s11459_s23 = smov (%p50_p4, %s11457_s23), 0  ;;  %s6049_s19 = sshll.u32 %s270_s22, 6 }
  0x57   : > { %s52_s1 = ssub.s32 %s7689_s10, %s11459_s23  ;;  %s272_s3 = scalar_lea.hbm %s10978_s2, %s6049_s19 }
  0x58   : > { %s54_s18 = sor.u32 %s53_s27, %s52_s1  ;;  %s82_s8 = sor.u32 %s81_s5, %s52_s1 }
  0x59   : > { %p55_p8 = scmp.eq.s32.totalorder %s54_s18, 0  ;;  %p83_p6 = scmp.eq.s32.totalorder %s82_s8, 0 }
  0x5a   : > { %p7926_p5 = pnand %p6862_p10, %p7902_p11  ;;  %s11110_s20 = sadd.s32 1, %s7665_s0 }
  0x5b   : > { %s7933_s21 = scalar_select %p55_p8, %s7665_s0, %s11110_s20  }
  0x5c   : > { %s11111_s30 = sadd.s32 1, %s7653_s26  ;;  %s260_s1 = scalar_lea.sflag [#allocation12], %s259_s6 }
  0x5d   : > { %s7938_s22 = scalar_select %p83_p6, %s7653_s26, %s11111_s30  }
  0x5e   : > { %p7521_p7 = pneg %p7926_p5  ;;  %s7532_s8 = scalar_lea.vmem %s274_s16, 2048 }
  0x5f   : > { %p7533_p12 = scmp.ne.s32.totalorder %s274_s16, %s7532_s8  ;;  %s7702_s9 = smov [#allocation11]  }
  0x60   : > { %s7537_s18 = sshll.u32 %s7702_s9, 4  ;;  %s7538_s18 = int_to_ptr.vmem [resolvable:$false] %s7537_s18 }
  0x61   : > { %p7535_p1 = pnand %p7533_p12, %p7521_p7  ;;  %s7539_s24 = scalar_lea.vmem %s7538_s18, 4096 }
  0x62   : > { %p7540_p10 = scmp.lt.s32.totalorder %s274_s16, %s7538_s18  ;;  %p7541_p2 = scmp.lt.s32.totalorder %s7539_s24, %s7532_s8 }
  0x63   : > { %p7536_p0 = pneg %p7535_p1 }
  0x64   : > { %p7542_p11 = por %p7541_p2, %p7540_p10 }
  0x66   : > { %p7543_p4 = pnand %p7542_p11, %p7536_p0 }
  0x68   : > { %7546 = shalt.err (!%p7543_p4)
}
  0x69   : > { %s11112_s5 = smov 8   ;;  %s11113_s4 = smov 128  }
  0x6a   : > { %6856 = dma.hbm_to_vmem [thread:$0]  (!%p7926_p5), %s272_s3, 2048, %s274_s16, %s260_s1, %s11113_s4, %s11113_s4, %s11112_s5  }
  0x6b   : > { %295 = sbr.rel (%p7843_p9) target bundleno = 3558 (0xde6), region = 40  ;;  %s7950_s6 = sand.u32 (!%p7843_p9), 1, %s7661_s28  }
  0x6c   : > { %s6051_s27 = sshll.u32 (!%p7843_p9), %s7950_s6, 6  ;;  %s298_s19 = scalar_lea.sflag (!%p7843_p9), [#allocation9], %s7950_s6 }
  0x6d   : > { %s7954_s20 = scalar_lea.vmem (!%p7843_p9), [#allocation8], %s6051_s27 }
  0x70   : > { %7628 = dma.done.wait (%p7827_p3), %s298_s19, 1024  }
  0x71   : > { %7630 = vsyncadd (%p7827_p3), %s298_s19, 4294966272  ;;  %s306_s3 = sand.u32 1, %s7818_s12   ;;  %s308_s17 = sand.u32 1, %s7649_s25  }
  0x72   : > { %s6052_s16 = sshll.u32 %s308_s17, 7  ;;  %s307_s13 = scalar_lea.sflag [#allocation12], %s306_s3 }
  0x73   : > { %s7962_s30 = scalar_lea.vmem [#allocation11], %s6052_s16  ;;  %p11114_p9 = scmp.ne.s32.totalorder %s11095_s15, 0 }
  0x75   : > { %7632 = dma.done.wait (%p11114_p9), %s307_s13, 2048  }
  0x76   : > { %7634 = vsyncadd (%p11114_p9), %s307_s13, 4294965248  ;;  %p11115_p8 = scmp.eq.s32.totalorder %s7818_s12, 0 }
  0x78   : > { %7636 = dma.done.wait (%p11115_p8), [#allocation12], 2048   ;;  %p11116_p6 = pmov %p11115_p8 }
  0x79   : > { %s6054_s14 = sshll.u32 %s7950_s6, 7  ;;  %p355_p3 = scmp.lt.s32.totalorder %s7677_s7, 1 }
  0x7a   : > { %7638 = vsyncadd (%p11116_p6), [#allocation12], 4294965248  ;;  %p357_p5 = scmp.lt.s32.totalorder %s7669_s29, 1  ;;  %s11117_s5 = sld [smem:[#allocation123_spill]] }
  0x7b   : > { %s356_s1 = scalar_select %p355_p3, %s7677_s7, 1 }
  0x7c   : > { %s358_s8 = scalar_select %p357_p5, %s7669_s29, 1 }
  0x7d   : > { %s6055_s9 = sshll.u32 %s356_s1, 1  ;;  %s7983_s12 = scalar_lea.vmem [#allocation14], %s6054_s14 }
  0x7e   : > { %s7977_s18 = sadd.s32 %s6055_s9, %s358_s8  ;;  %p6056_p7 = scmp.ne.s32.totalorder %s7669_s29, 0 }
  0x7f   : > { %s7703_s27 = smov (!%p6056_p7), 96   ;;  %s7704_s19 = smov (!%p6056_p7), 64  }
  0x80   : > { %s361_s4 = scalar_lea.vmem %s11117_s5, %s7977_s18  ;;  %367 = sbr.rel (%p6056_p7) target bundleno = 569 (0x239), region = 56 }
  0x85   : > { %v6987_v0 = vld [vmem:[#allocation13 + $0x70] ss:$8 sps:$4 sm:$0xff]   ;;  %v6988_v1 = vld [vmem:[#allocation13 + $0x60] ss:$8 sps:$4 sm:$0xff]   ;;  %vm657_vm0 = vcmask 257024   ;;  %vm869_vm1 = vcmask 7168  }
  0x86   : > { %6420 = vmatprep.subr.bf16.mxu0 %v6987_v0  ;;  %6788 = vmatprep.subr.bf16.mxu1 %v6987_v0  ;;  %v6989_v2 = vld [vmem:[#allocation13 + $0x50] ss:$8 sps:$4 sm:$0xff]   ;;  %v6990_v3 = vld [vmem:[#allocation13 + $0x40] ss:$8 sps:$4 sm:$0xff]   ;;  %vm998_vm2 = vcmask 261120   ;;  %v7706_v48 = vmov -inf  }
  0x87   : > { %6421 = vmatpush3.bf16.msra.mxu0 %v6987_v0  ;;  %6796 = vmatpush3.bf16.msra.mxu1 %v6987_v0  ;;  %v6995_v4 = vld [vmem:[%s7954_s20] sm:$0xff]   ;;  %v6991_v6 = vld [vmem:[#allocation13 + $0x30] ss:$8 sps:$4 sm:$0xff]   ;;  %v6997_v10 = vld [vmem:[%s7954_s20 + $0x8] sm:$0xff]   ;;  %870 = vst.msk [vmem:[#allocation3] sm:$0xff] %vm869_vm1, %v7706_v48  ;;  %v7707_v49 = vmov 0.0  }
  0x88   : > { %6422 = vmatprep.subr.bf16.mxu0 %v6988_v1  ;;  %6789 = vmatprep.subr.bf16.mxu1 %v6988_v1  ;;  %v6996_v5 = vld [vmem:[%s7954_s20 + $0x20] sm:$0xff]   ;;  %v6993_v8 = vld [vmem:[#allocation13 + $0x10] ss:$8 sps:$4 sm:$0xff]   ;;  %v6998_v11 = vld [vmem:[%s7954_s20 + $0x28] sm:$0xff]   ;;  %871 = vst.msk [vmem:[#allocation3 + $0x8] sm:$0xff] %vm869_vm1, %v7706_v48 }
  0x89   : > { %6436 = vmatprep.mubr.bf16.mxu0 %v6995_v4  ;;  %6444 = vmatprep.mubr.bf16.mxu1 %v6996_v5  ;;  %v6992_v7 = vld [vmem:[#allocation13 + $0x20] ss:$8 sps:$4 sm:$0xff]   ;;  %v6999_v12 = vld [vmem:[%s7954_s20 + $0x10] sm:$0xff]   ;;  %v7000_v14 = vld [vmem:[%s7954_s20 + $0x18] sm:$0xff]   ;;  %872 = vst.msk [vmem:[#allocation3 + $0x10] sm:$0xff] %vm869_vm1, %v7706_v48 }
  0x8a   : > { %v6994_v9 = vld [vmem:[#allocation13] ss:$8 sps:$4 sm:$0xff]   ;;  %v7001_v13 = vld [vmem:[%s7954_s20 + $0x30] sm:$0xff]   ;;  %v7002_v15 = vld [vmem:[%s7954_s20 + $0x38] sm:$0xff]   ;;  %s7705_s20 = smov 32   ;;  %873 = vst.msk [vmem:[#allocation3 + $0x18] sm:$0xff] %vm869_vm1, %v7706_v48 }
  0x8b   : > { %6423 = vmatpush3.bf16.msra.mxu0 %v6988_v1  ;;  %6797 = vmatpush3.bf16.msra.mxu1 %v6988_v1  ;;  %874 = vst.msk [vmem:[#allocation3 + $0x20] sm:$0xff] %vm869_vm1, %v7706_v48  ;;  %875 = vst.msk [vmem:[#allocation3 + $0x28] sm:$0xff] %vm869_vm1, %v7706_v48 }
  0x8c   : > { %6424 = vmatprep.subr.bf16.mxu0 %v6989_v2  ;;  %6790 = vmatprep.subr.bf16.mxu1 %v6989_v2  ;;  %876 = vst.msk [vmem:[#allocation3 + $0x30] sm:$0xff] %vm869_vm1, %v7706_v48  ;;  %877 = vst.msk [vmem:[#allocation3 + $0x38] sm:$0xff] %vm869_vm1, %v7706_v48 }
  0x8d   : > { %878 = vst.msk [vmem:[#allocation3 + $0x40] sm:$0xff] %vm869_vm1, %v7706_v48  ;;  %879 = vst.msk [vmem:[#allocation3 + $0x48] sm:$0xff] %vm869_vm1, %v7706_v48 }
  0x8e   : > { %880 = vst.msk [vmem:[#allocation3 + $0x50] sm:$0xff] %vm869_vm1, %v7706_v48  ;;  %881 = vst.msk [vmem:[#allocation3 + $0x58] sm:$0xff] %vm869_vm1, %v7706_v48 }
  0x8f   : > { %6425 = vmatpush3.bf16.msra.mxu0 %v6989_v2  ;;  %6798 = vmatpush3.bf16.msra.mxu1 %v6989_v2  ;;  %882 = vst.msk [vmem:[#allocation3 + $0x60] sm:$0xff] %vm869_vm1, %v7706_v48  ;;  %883 = vst.msk [vmem:[#allocation3 + $0x68] sm:$0xff] %vm869_vm1, %v7706_v48 }
  0x90   : > { %6426 = vmatprep.subr.bf16.mxu0 %v6990_v3  ;;  %6791 = vmatprep.subr.bf16.mxu1 %v6990_v3  ;;  %884 = vst.msk [vmem:[#allocation3 + $0x70] sm:$0xff] %vm869_vm1, %v7706_v48  ;;  %885 = vst.msk [vmem:[#allocation3 + $0x78] sm:$0xff] %vm869_vm1, %v7706_v48 }
  0x91   : > { %886 = vst.msk [vmem:[#allocation3 + $0x80] sm:$0xff] %vm869_vm1, %v7706_v48  ;;  %887 = vst.msk [vmem:[#allocation3 + $0x88] sm:$0xff] %vm869_vm1, %v7706_v48 }
  0x92   : > { %888 = vst.msk [vmem:[#allocation3 + $0x90] sm:$0xff] %vm869_vm1, %v7706_v48  ;;  %889 = vst.msk [vmem:[#allocation3 + $0x98] sm:$0xff] %vm869_vm1, %v7706_v48 }
  0x93   : > { %6427 = vmatpush3.bf16.msra.mxu0 %v6990_v3  ;;  %6799 = vmatpush3.bf16.msra.mxu1 %v6990_v3  ;;  %890 = vst.msk [vmem:[#allocation3 + $0xa0] sm:$0xff] %vm869_vm1, %v7706_v48  ;;  %891 = vst.msk [vmem:[#allocation3 + $0xa8] sm:$0xff] %vm869_vm1, %v7706_v48 }
  0x94   : > { %6428 = vmatprep.subr.bf16.mxu0 %v6991_v6  ;;  %6792 = vmatprep.subr.bf16.mxu1 %v6991_v6  ;;  %892 = vst.msk [vmem:[#allocation3 + $0xb0] sm:$0xff] %vm869_vm1, %v7706_v48  ;;  %893 = vst.msk [vmem:[#allocation3 + $0xb8] sm:$0xff] %vm869_vm1, %v7706_v48 }
  0x95   : > { %894 = vst.msk [vmem:[#allocation3 + $0xc0] sm:$0xff] %vm869_vm1, %v7706_v48  ;;  %895 = vst.msk [vmem:[#allocation3 + $0xc8] sm:$0xff] %vm869_vm1, %v7706_v48 }
  0x96   : > { %896 = vst.msk [vmem:[#allocation3 + $0xd0] sm:$0xff] %vm869_vm1, %v7706_v48  ;;  %897 = vst.msk [vmem:[#allocation3 + $0xd8] sm:$0xff] %vm869_vm1, %v7706_v48 }
  0x97   : > { %6429 = vmatpush3.bf16.msra.mxu0 %v6991_v6  ;;  %6800 = vmatpush3.bf16.msra.mxu1 %v6991_v6  ;;  %898 = vst.msk [vmem:[#allocation3 + $0xe0] sm:$0xff] %vm869_vm1, %v7706_v48  ;;  %899 = vst.msk [vmem:[#allocation3 + $0xe8] sm:$0xff] %vm869_vm1, %v7706_v48 }
  0x98   : > { %6430 = vmatprep.subr.bf16.mxu0 %v6992_v7  ;;  %6793 = vmatprep.subr.bf16.mxu1 %v6992_v7  ;;  %900 = vst.msk [vmem:[#allocation3 + $0xf0] sm:$0xff] %vm869_vm1, %v7706_v48  ;;  %901 = vst.msk [vmem:[#allocation3 + $0xf8] sm:$0xff] %vm869_vm1, %v7706_v48 }
  0x99   : > { %902 = vst.msk [vmem:[#allocation3 + $0x100] sm:$0xff] %vm869_vm1, %v7706_v48  ;;  %903 = vst.msk [vmem:[#allocation3 + $0x108] sm:$0xff] %vm869_vm1, %v7706_v48 }
  0x9a   : > { %904 = vst.msk [vmem:[#allocation3 + $0x110] sm:$0xff] %vm869_vm1, %v7706_v48  ;;  %905 = vst.msk [vmem:[#allocation3 + $0x118] sm:$0xff] %vm869_vm1, %v7706_v48 }
  0x9b   : > { %6431 = vmatpush3.bf16.msra.mxu0 %v6992_v7  ;;  %6801 = vmatpush3.bf16.msra.mxu1 %v6992_v7  ;;  %906 = vst.msk [vmem:[#allocation3 + $0x120] sm:$0xff] %vm869_vm1, %v7706_v48  ;;  %907 = vst.msk [vmem:[#allocation3 + $0x128] sm:$0xff] %vm869_vm1, %v7706_v48 }
  0x9c   : > { %6432 = vmatprep.subr.bf16.mxu0 %v6993_v8  ;;  %6794 = vmatprep.subr.bf16.mxu1 %v6993_v8  ;;  %908 = vst.msk [vmem:[#allocation3 + $0x130] sm:$0xff] %vm869_vm1, %v7706_v48  ;;  %909 = vst.msk [vmem:[#allocation3 + $0x138] sm:$0xff] %vm869_vm1, %v7706_v48 }
  0x9d   : > { %910 = vst.msk [vmem:[#allocation3 + $0x140] sm:$0xff] %vm869_vm1, %v7706_v48  ;;  %911 = vst.msk [vmem:[#allocation3 + $0x148] sm:$0xff] %vm869_vm1, %v7706_v48 }
  0x9e   : > { %912 = vst.msk [vmem:[#allocation3 + $0x150] sm:$0xff] %vm869_vm1, %v7706_v48  ;;  %913 = vst.msk [vmem:[#allocation3 + $0x158] sm:$0xff] %vm869_vm1, %v7706_v48 }
  0x9f   : > { %6433 = vmatpush3.bf16.msra.mxu0 %v6993_v8  ;;  %6802 = vmatpush3.bf16.msra.mxu1 %v6993_v8  ;;  %914 = vst.msk [vmem:[#allocation3 + $0x160] sm:$0xff] %vm869_vm1, %v7706_v48  ;;  %915 = vst.msk [vmem:[#allocation3 + $0x168] sm:$0xff] %vm869_vm1, %v7706_v48 }
  0xa0   : > { %6434 = vmatprep.subr.bf16.mxu0 %v6994_v9  ;;  %6795 = vmatprep.subr.bf16.mxu1 %v6994_v9  ;;  %916 = vst.msk [vmem:[#allocation3 + $0x170] sm:$0xff] %vm869_vm1, %v7706_v48  ;;  %917 = vst.msk [vmem:[#allocation3 + $0x178] sm:$0xff] %vm869_vm1, %v7706_v48 }
  0xa1   : > { %918 = vst.msk [vmem:[#allocation3 + $0x180] sm:$0xff] %vm869_vm1, %v7706_v48  ;;  %919 = vst.msk [vmem:[#allocation3 + $0x188] sm:$0xff] %vm869_vm1, %v7706_v48 }
  0xa2   : > { %920 = vst.msk [vmem:[#allocation3 + $0x190] sm:$0xff] %vm869_vm1, %v7706_v48  ;;  %921 = vst.msk [vmem:[#allocation3 + $0x198] sm:$0xff] %vm869_vm1, %v7706_v48 }
  0xa3   : > { %6435 = vmatpush3.bf16.msra.mxu0 %v6994_v9  ;;  %6803 = vmatpush3.bf16.msra.mxu1 %v6994_v9  ;;  %922 = vst.msk [vmem:[#allocation3 + $0x1a0] sm:$0xff] %vm869_vm1, %v7706_v48  ;;  %923 = vst.msk [vmem:[#allocation3 + $0x1a8] sm:$0xff] %vm869_vm1, %v7706_v48 }
  0xa4   : > { %924 = vst.msk [vmem:[#allocation3 + $0x1b0] sm:$0xff] %vm869_vm1, %v7706_v48  ;;  %925 = vst.msk [vmem:[#allocation3 + $0x1b8] sm:$0xff] %vm869_vm1, %v7706_v48 }
  0xa5   : > { %926 = vst.msk [vmem:[#allocation3 + $0x1c0] sm:$0xff] %vm869_vm1, %v7706_v48  ;;  %927 = vst.msk [vmem:[#allocation3 + $0x1c8] sm:$0xff] %vm869_vm1, %v7706_v48 }
  0xa6   : > { %6437 = vmatmul.mubr.bf16.vlgmr.msra.gmra.mxu0 %v6997_v10  ;;  %6445 = vmatmul.mubr.bf16.vlgmr.msra.gmra.mxu1 %v6998_v11  ;;  %928 = vst.msk [vmem:[#allocation3 + $0x1d0] sm:$0xff] %vm869_vm1, %v7706_v48  ;;  %929 = vst.msk [vmem:[#allocation3 + $0x1d8] sm:$0xff] %vm869_vm1, %v7706_v48 }
  0xa7   : > { %6440 = vmatprep.mubr.bf16.mxu0 %v6999_v12  ;;  %6448 = vmatprep.mubr.bf16.mxu1 %v7001_v13  ;;  %930 = vst.msk [vmem:[#allocation3 + $0x1e0] sm:$0xff] %vm869_vm1, %v7706_v48  ;;  %931 = vst.msk [vmem:[#allocation3 + $0x1e8] sm:$0xff] %vm869_vm1, %v7706_v48 }
  0xa8   : > { %932 = vst.msk [vmem:[#allocation3 + $0x1f0] sm:$0xff] %vm869_vm1, %v7706_v48  ;;  %933 = vst.msk [vmem:[#allocation3 + $0x1f8] sm:$0xff] %vm869_vm1, %v7706_v48 }
  0xa9   : > { %934 = vst.msk [vmem:[#allocation4] sm:$0xff] %vm869_vm1, %v7707_v49  ;;  %935 = vst.msk [vmem:[#allocation4 + $0x8] sm:$0xff] %vm869_vm1, %v7707_v49 }
  0xaa   : > { %936 = vst.msk [vmem:[#allocation4 + $0x10] sm:$0xff] %vm869_vm1, %v7707_v49  ;;  %937 = vst.msk [vmem:[#allocation4 + $0x18] sm:$0xff] %vm869_vm1, %v7707_v49 }
  0xab   : > { %938 = vst.msk [vmem:[#allocation4 + $0x20] sm:$0xff] %vm869_vm1, %v7707_v49  ;;  %939 = vst.msk [vmem:[#allocation4 + $0x28] sm:$0xff] %vm869_vm1, %v7707_v49 }
  0xac   : > { %940 = vst.msk [vmem:[#allocation4 + $0x30] sm:$0xff] %vm869_vm1, %v7707_v49  ;;  %941 = vst.msk [vmem:[#allocation4 + $0x38] sm:$0xff] %vm869_vm1, %v7707_v49 }
  0xad   : > { %942 = vst.msk [vmem:[#allocation4 + $0x40] sm:$0xff] %vm869_vm1, %v7707_v49  ;;  %943 = vst.msk [vmem:[#allocation4 + $0x48] sm:$0xff] %vm869_vm1, %v7707_v49 }
  0xae   : > { %6441 = vmatmul.mubr.bf16.gmra.mxu0 %v7000_v14  ;;  %6449 = vmatmul.mubr.bf16.gmra.mxu1 %v7002_v15  ;;  %944 = vst.msk [vmem:[#allocation4 + $0x50] sm:$0xff] %vm869_vm1, %v7707_v49  ;;  %945 = vst.msk [vmem:[#allocation4 + $0x58] sm:$0xff] %vm869_vm1, %v7707_v49 }
  0xaf   : > { %946 = vst.msk [vmem:[#allocation4 + $0x60] sm:$0xff] %vm869_vm1, %v7707_v49  ;;  %947 = vst.msk [vmem:[#allocation4 + $0x68] sm:$0xff] %vm869_vm1, %v7707_v49 }
  0xb0   : > { %948 = vst.msk [vmem:[#allocation4 + $0x70] sm:$0xff] %vm869_vm1, %v7707_v49  ;;  %949 = vst.msk [vmem:[#allocation4 + $0x78] sm:$0xff] %vm869_vm1, %v7707_v49 }
  0xb1   : > { %950 = vst.msk [vmem:[#allocation4 + $0x80] sm:$0xff] %vm869_vm1, %v7707_v49  ;;  %951 = vst.msk [vmem:[#allocation4 + $0x88] sm:$0xff] %vm869_vm1, %v7707_v49 }
  0xb2   : > { %952 = vst.msk [vmem:[#allocation4 + $0x90] sm:$0xff] %vm869_vm1, %v7707_v49  ;;  %953 = vst.msk [vmem:[#allocation4 + $0x98] sm:$0xff] %vm869_vm1, %v7707_v49 }
  0xb3   : > { %954 = vst.msk [vmem:[#allocation4 + $0xa0] sm:$0xff] %vm869_vm1, %v7707_v49  ;;  %955 = vst.msk [vmem:[#allocation4 + $0xa8] sm:$0xff] %vm869_vm1, %v7707_v49 }
  0xb4   : > { %956 = vst.msk [vmem:[#allocation4 + $0xb0] sm:$0xff] %vm869_vm1, %v7707_v49  ;;  %957 = vst.msk [vmem:[#allocation4 + $0xb8] sm:$0xff] %vm869_vm1, %v7707_v49 }
  0xb5   : > { %958 = vst.msk [vmem:[#allocation4 + $0xc0] sm:$0xff] %vm869_vm1, %v7707_v49  ;;  %959 = vst.msk [vmem:[#allocation4 + $0xc8] sm:$0xff] %vm869_vm1, %v7707_v49 }
  0xb6   : > { %960 = vst.msk [vmem:[#allocation4 + $0xd0] sm:$0xff] %vm869_vm1, %v7707_v49  ;;  %961 = vst.msk [vmem:[#allocation4 + $0xd8] sm:$0xff] %vm869_vm1, %v7707_v49 }
  0xb7   : > { %962 = vst.msk [vmem:[#allocation4 + $0xe0] sm:$0xff] %vm869_vm1, %v7707_v49  ;;  %963 = vst.msk [vmem:[#allocation4 + $0xe8] sm:$0xff] %vm869_vm1, %v7707_v49 }
  0xb8   : > { %964 = vst.msk [vmem:[#allocation4 + $0xf0] sm:$0xff] %vm869_vm1, %v7707_v49  ;;  %965 = vst.msk [vmem:[#allocation4 + $0xf8] sm:$0xff] %vm869_vm1, %v7707_v49 }
  0xb9   : > { %966 = vst.msk [vmem:[#allocation4 + $0x100] sm:$0xff] %vm869_vm1, %v7707_v49  ;;  %967 = vst.msk [vmem:[#allocation4 + $0x108] sm:$0xff] %vm869_vm1, %v7707_v49 }
  0xba   : > { %968 = vst.msk [vmem:[#allocation4 + $0x110] sm:$0xff] %vm869_vm1, %v7707_v49  ;;  %969 = vst.msk [vmem:[#allocation4 + $0x118] sm:$0xff] %vm869_vm1, %v7707_v49 }
  0xbb   : > { %970 = vst.msk [vmem:[#allocation4 + $0x120] sm:$0xff] %vm869_vm1, %v7707_v49  ;;  %971 = vst.msk [vmem:[#allocation4 + $0x128] sm:$0xff] %vm869_vm1, %v7707_v49 }
  0xbc   : > { %972 = vst.msk [vmem:[#allocation4 + $0x130] sm:$0xff] %vm869_vm1, %v7707_v49  ;;  %973 = vst.msk [vmem:[#allocation4 + $0x138] sm:$0xff] %vm869_vm1, %v7707_v49 }
  0xbd   : > { %974 = vst.msk [vmem:[#allocation4 + $0x140] sm:$0xff] %vm869_vm1, %v7707_v49  ;;  %975 = vst.msk [vmem:[#allocation4 + $0x148] sm:$0xff] %vm869_vm1, %v7707_v49 }
  0xbe   : > { %976 = vst.msk [vmem:[#allocation4 + $0x150] sm:$0xff] %vm869_vm1, %v7707_v49  ;;  %977 = vst.msk [vmem:[#allocation4 + $0x158] sm:$0xff] %vm869_vm1, %v7707_v49 }
  0xbf   : > { %978 = vst.msk [vmem:[#allocation4 + $0x160] sm:$0xff] %vm869_vm1, %v7707_v49  ;;  %979 = vst.msk [vmem:[#allocation4 + $0x168] sm:$0xff] %vm869_vm1, %v7707_v49 }
  0xc0   : > { %980 = vst.msk [vmem:[#allocation4 + $0x170] sm:$0xff] %vm869_vm1, %v7707_v49  ;;  %981 = vst.msk [vmem:[#allocation4 + $0x178] sm:$0xff] %vm869_vm1, %v7707_v49 }
  0xc1   : > { %982 = vst.msk [vmem:[#allocation4 + $0x180] sm:$0xff] %vm869_vm1, %v7707_v49  ;;  %983 = vst.msk [vmem:[#allocation4 + $0x188] sm:$0xff] %vm869_vm1, %v7707_v49 }
  0xc2   : > { %984 = vst.msk [vmem:[#allocation4 + $0x190] sm:$0xff] %vm869_vm1, %v7707_v49  ;;  %985 = vst.msk [vmem:[#allocation4 + $0x198] sm:$0xff] %vm869_vm1, %v7707_v49 }
  0xc3   : > { %986 = vst.msk [vmem:[#allocation4 + $0x1a0] sm:$0xff] %vm869_vm1, %v7707_v49  ;;  %987 = vst.msk [vmem:[#allocation4 + $0x1a8] sm:$0xff] %vm869_vm1, %v7707_v49 }
  0xc4   : > { %988 = vst.msk [vmem:[#allocation4 + $0x1b0] sm:$0xff] %vm869_vm1, %v7707_v49  ;;  %989 = vst.msk [vmem:[#allocation4 + $0x1b8] sm:$0xff] %vm869_vm1, %v7707_v49 }
  0xc5   : > { %990 = vst.msk [vmem:[#allocation4 + $0x1c0] sm:$0xff] %vm869_vm1, %v7707_v49  ;;  %991 = vst.msk [vmem:[#allocation4 + $0x1c8] sm:$0xff] %vm869_vm1, %v7707_v49 }
  0xc6   : > { %992 = vst.msk [vmem:[#allocation4 + $0x1d0] sm:$0xff] %vm869_vm1, %v7707_v49  ;;  %993 = vst.msk [vmem:[#allocation4 + $0x1d8] sm:$0xff] %vm869_vm1, %v7707_v49 }
  0xc7   : > { %994 = vst.msk [vmem:[#allocation4 + $0x1e0] sm:$0xff] %vm869_vm1, %v7707_v49  ;;  %995 = vst.msk [vmem:[#allocation4 + $0x1e8] sm:$0xff] %vm869_vm1, %v7707_v49 }
  0xc8   : > { %996 = vst.msk [vmem:[#allocation4 + $0x1f0] sm:$0xff] %vm869_vm1, %v7707_v49  ;;  %997 = vst.msk [vmem:[#allocation4 + $0x1f8] sm:$0xff] %vm869_vm1, %v7707_v49 }
  0xc9   : > { %999 = vst.msk [vmem:[#allocation5] sm:$0xff] %vm998_vm2, %v7707_v49  ;;  %1000 = vst.msk [vmem:[#allocation5 + $0x8] sm:$0xff] %vm998_vm2, %v7707_v49 }
  0xca   : > { %1001 = vst.msk [vmem:[#allocation5 + $0x10] sm:$0xff] %vm998_vm2, %v7707_v49  ;;  %1002 = vst.msk [vmem:[#allocation5 + $0x18] sm:$0xff] %vm998_vm2, %v7707_v49 }
  0xcb   : > { %1003 = vst.msk [vmem:[#allocation5 + $0x20] sm:$0xff] %vm998_vm2, %v7707_v49  ;;  %1004 = vst.msk [vmem:[#allocation5 + $0x28] sm:$0xff] %vm998_vm2, %v7707_v49 }
  0xcc   : > { %1005 = vst.msk [vmem:[#allocation5 + $0x30] sm:$0xff] %vm998_vm2, %v7707_v49  ;;  %1006 = vst.msk [vmem:[#allocation5 + $0x38] sm:$0xff] %vm998_vm2, %v7707_v49 }
  0xcd   : > { %1007 = vst.msk [vmem:[#allocation5 + $0x40] sm:$0xff] %vm998_vm2, %v7707_v49  ;;  %1008 = vst.msk [vmem:[#allocation5 + $0x48] sm:$0xff] %vm998_vm2, %v7707_v49 }
  0xce   : > { %1009 = vst.msk [vmem:[#allocation5 + $0x50] sm:$0xff] %vm998_vm2, %v7707_v49  ;;  %1010 = vst.msk [vmem:[#allocation5 + $0x58] sm:$0xff] %vm998_vm2, %v7707_v49 }
  0xcf   : > { %1011 = vst.msk [vmem:[#allocation5 + $0x60] sm:$0xff] %vm998_vm2, %v7707_v49  ;;  %1012 = vst.msk [vmem:[#allocation5 + $0x68] sm:$0xff] %vm998_vm2, %v7707_v49 }
  0xd0   : > { %1013 = vst.msk [vmem:[#allocation5 + $0x70] sm:$0xff] %vm998_vm2, %v7707_v49  ;;  %1014 = vst.msk [vmem:[#allocation5 + $0x78] sm:$0xff] %vm998_vm2, %v7707_v49 }
  0xd1   : > { %1015 = vst.msk [vmem:[#allocation5 + $0x80] sm:$0xff] %vm998_vm2, %v7707_v49  ;;  %1016 = vst.msk [vmem:[#allocation5 + $0x88] sm:$0xff] %vm998_vm2, %v7707_v49 }
  0xd2   : > { %1017 = vst.msk [vmem:[#allocation5 + $0x90] sm:$0xff] %vm998_vm2, %v7707_v49  ;;  %1018 = vst.msk [vmem:[#allocation5 + $0x98] sm:$0xff] %vm998_vm2, %v7707_v49 }
  0xd3   : > { %1019 = vst.msk [vmem:[#allocation5 + $0xa0] sm:$0xff] %vm998_vm2, %v7707_v49  ;;  %1020 = vst.msk [vmem:[#allocation5 + $0xa8] sm:$0xff] %vm998_vm2, %v7707_v49 }
  0xd4   : > { %1021 = vst.msk [vmem:[#allocation5 + $0xb0] sm:$0xff] %vm998_vm2, %v7707_v49  ;;  %1022 = vst.msk [vmem:[#allocation5 + $0xb8] sm:$0xff] %vm998_vm2, %v7707_v49 }
  0xd5   : > { %1023 = vst.msk [vmem:[#allocation5 + $0xc0] sm:$0xff] %vm998_vm2, %v7707_v49  ;;  %1024 = vst.msk [vmem:[#allocation5 + $0xc8] sm:$0xff] %vm998_vm2, %v7707_v49 }
  0xd6   : > { %1025 = vst.msk [vmem:[#allocation5 + $0xd0] sm:$0xff] %vm998_vm2, %v7707_v49  ;;  %1026 = vst.msk [vmem:[#allocation5 + $0xd8] sm:$0xff] %vm998_vm2, %v7707_v49 }
  0xd7   : > { %1027 = vst.msk [vmem:[#allocation5 + $0xe0] sm:$0xff] %vm998_vm2, %v7707_v49  ;;  %1028 = vst.msk [vmem:[#allocation5 + $0xe8] sm:$0xff] %vm998_vm2, %v7707_v49 }
  0xd8   : > { %1029 = vst.msk [vmem:[#allocation5 + $0xf0] sm:$0xff] %vm998_vm2, %v7707_v49  ;;  %1030 = vst.msk [vmem:[#allocation5 + $0xf8] sm:$0xff] %vm998_vm2, %v7707_v49 }
  0xd9   : > { %1031 = vst.msk [vmem:[#allocation5 + $0x100] sm:$0xff] %vm998_vm2, %v7707_v49  ;;  %1032 = vst.msk [vmem:[#allocation5 + $0x108] sm:$0xff] %vm998_vm2, %v7707_v49 }
  0xda   : > { %1033 = vst.msk [vmem:[#allocation5 + $0x110] sm:$0xff] %vm998_vm2, %v7707_v49  ;;  %1034 = vst.msk [vmem:[#allocation5 + $0x118] sm:$0xff] %vm998_vm2, %v7707_v49 }
  0xdb   : > { %1035 = vst.msk [vmem:[#allocation5 + $0x120] sm:$0xff] %vm998_vm2, %v7707_v49  ;;  %1036 = vst.msk [vmem:[#allocation5 + $0x128] sm:$0xff] %vm998_vm2, %v7707_v49 }
  0xdc   : > { %1037 = vst.msk [vmem:[#allocation5 + $0x130] sm:$0xff] %vm998_vm2, %v7707_v49  ;;  %1038 = vst.msk [vmem:[#allocation5 + $0x138] sm:$0xff] %vm998_vm2, %v7707_v49 }
  0xdd   : > { %1039 = vst.msk [vmem:[#allocation5 + $0x140] sm:$0xff] %vm998_vm2, %v7707_v49  ;;  %1040 = vst.msk [vmem:[#allocation5 + $0x148] sm:$0xff] %vm998_vm2, %v7707_v49 }
  0xde   : > { %1041 = vst.msk [vmem:[#allocation5 + $0x150] sm:$0xff] %vm998_vm2, %v7707_v49  ;;  %1042 = vst.msk [vmem:[#allocation5 + $0x158] sm:$0xff] %vm998_vm2, %v7707_v49 }
  0xdf   : > { %1043 = vst.msk [vmem:[#allocation5 + $0x160] sm:$0xff] %vm998_vm2, %v7707_v49  ;;  %1044 = vst.msk [vmem:[#allocation5 + $0x168] sm:$0xff] %vm998_vm2, %v7707_v49 }
  0xe0   : > { %1045 = vst.msk [vmem:[#allocation5 + $0x170] sm:$0xff] %vm998_vm2, %v7707_v49  ;;  %1046 = vst.msk [vmem:[#allocation5 + $0x178] sm:$0xff] %vm998_vm2, %v7707_v49 }
  0xe1   : > { %1047 = vst.msk [vmem:[#allocation5 + $0x180] sm:$0xff] %vm998_vm2, %v7707_v49  ;;  %1048 = vst.msk [vmem:[#allocation5 + $0x188] sm:$0xff] %vm998_vm2, %v7707_v49 }
  0xe2   : > { %1049 = vst.msk [vmem:[#allocation5 + $0x190] sm:$0xff] %vm998_vm2, %v7707_v49  ;;  %1050 = vst.msk [vmem:[#allocation5 + $0x198] sm:$0xff] %vm998_vm2, %v7707_v49 }
  0xe3   : > { %1051 = vst.msk [vmem:[#allocation5 + $0x1a0] sm:$0xff] %vm998_vm2, %v7707_v49  ;;  %1052 = vst.msk [vmem:[#allocation5 + $0x1a8] sm:$0xff] %vm998_vm2, %v7707_v49 }
  0xe4   : > { %1053 = vst.msk [vmem:[#allocation5 + $0x1b0] sm:$0xff] %vm998_vm2, %v7707_v49  ;;  %1054 = vst.msk [vmem:[#allocation5 + $0x1b8] sm:$0xff] %vm998_vm2, %v7707_v49 }
  0xe5   : > { %1055 = vst.msk [vmem:[#allocation5 + $0x1c0] sm:$0xff] %vm998_vm2, %v7707_v49  ;;  %1056 = vst.msk [vmem:[#allocation5 + $0x1c8] sm:$0xff] %vm998_vm2, %v7707_v49 }
  0xe6   : > { %1057 = vst.msk [vmem:[#allocation5 + $0x1d0] sm:$0xff] %vm998_vm2, %v7707_v49  ;;  %1058 = vst.msk [vmem:[#allocation5 + $0x1d8] sm:$0xff] %vm998_vm2, %v7707_v49 }
  0xe7   : > { %1059 = vst.msk [vmem:[#allocation5 + $0x1e0] sm:$0xff] %vm998_vm2, %v7707_v49  ;;  %1060 = vst.msk [vmem:[#allocation5 + $0x1e8] sm:$0xff] %vm998_vm2, %v7707_v49 }
  0xe8   : > { %1061 = vst.msk [vmem:[#allocation5 + $0x1f0] sm:$0xff] %vm998_vm2, %v7707_v49  ;;  %1062 = vst.msk [vmem:[#allocation5 + $0x1f8] sm:$0xff] %vm998_vm2, %v7707_v49 }
 0x166   : > { %v6438_v16 = vpop.f32.mrf.mxu0  ;;  %v6446_v17 = vpop.f32.mrf.mxu1 }
 0x167   : > { %v6222_v18 = vpack.c.bf16 %v6438_v16, %v6438_v16  ;;  %v6230_v19 = vpack.c.bf16 %v6446_v17, %v6446_v17 }
 0x168   : > { %v530_v20 = vpop.f32.mrf.mxu0  ;;  %v562_v21 = vpop.f32.mrf.mxu1 }
 0x169   : > { %660 = vst.msk [vmem:[#allocation2 + $0x8] sm:$0xf] %vm657_vm0, %v6222_v18  ;;  %668 = vst.msk [vmem:[#allocation2 + $0x28] sm:$0xf] %vm657_vm0, %v6230_v19  ;;  %v6220_v22 = vpack.c.bf16 %v530_v20, %v530_v20  ;;  %v6228_v23 = vpack.c.bf16 %v562_v21, %v562_v21  ;;  %694 = vrot.lane.b32.xlu0 %v6230_v19, %s7703_s27  ;;  %678 = vrot.lane.b32.xlu1 %v6222_v18, %s7703_s27 }
 0x16a   : > { %v6439_v24 = vpop.f32.mrf.mxu0  ;;  %v6447_v25 = vpop.f32.mrf.mxu1 }
 0x16b   : > { %658 = vst.msk [vmem:[#allocation2] sm:$0xf] %vm657_vm0, %v6220_v22  ;;  %666 = vst.msk [vmem:[#allocation2 + $0x20] sm:$0xf] %vm657_vm0, %v6228_v23  ;;  %v6223_v26 = vpack.c.bf16 %v6439_v24, %v6439_v24  ;;  %v6231_v27 = vpack.c.bf16 %v6447_v25, %v6447_v25 }
 0x16c   : > { %v533_v28 = vpop.f32.mrf.mxu0  ;;  %v565_v29 = vpop.f32.mrf.mxu1 }
 0x16d   : > { %661 = vst.msk [vmem:[#allocation2 + $0xc] sm:$0xf] %vm657_vm0, %v6223_v26  ;;  %669 = vst.msk [vmem:[#allocation2 + $0x2c] sm:$0xf] %vm657_vm0, %v6231_v27  ;;  %v6221_v30 = vpack.c.bf16 %v533_v28, %v533_v28  ;;  %v6229_v31 = vpack.c.bf16 %v565_v29, %v565_v29  ;;  %743 = vrot.lane.b32.xlu0 %v6222_v18, %s7704_s19  ;;  %680 = vrot.lane.b32.xlu1 %v6223_v26, %s7703_s27 }
 0x16e   : > { %v6442_v32 = vpop.f32.mrf.mxu0  ;;  %v6450_v33 = vpop.f32.mrf.mxu1 }
 0x16f   : > { %659 = vst.msk [vmem:[#allocation2 + $0x4] sm:$0xf] %vm657_vm0, %v6221_v30  ;;  %667 = vst.msk [vmem:[#allocation2 + $0x24] sm:$0xf] %vm657_vm0, %v6229_v31  ;;  %v6226_v34 = vpack.c.bf16 %v6442_v32, %v6442_v32  ;;  %v8006_v35 = vpack.c.bf16 %v6450_v33, %v6450_v33 }
 0x170   : > { %v546_v36 = vpop.f32.mrf.mxu0  ;;  %v578_v37 = vpop.f32.mrf.mxu1 }
 0x171   : > { %759 = vrot.lane.b32.xlu0 %v6230_v19, %s7704_s19  ;;  %696 = vrot.lane.b32.xlu1 %v6231_v27, %s7703_s27  ;;  %664 = vst.msk [vmem:[#allocation2 + $0x18] sm:$0xf] %vm657_vm0, %v6226_v34  ;;  %v8011_v38 = vpack.c.bf16 %v546_v36, %v546_v36  ;;  %672 = vst.msk [vmem:[#allocation2 + $0x38] sm:$0xf] %vm657_vm0, %v8006_v35  ;;  %v8015_v39 = vpack.c.bf16 %v578_v37, %v578_v37 }
 0x172   : > { %v6443_v40 = vpop.f32.mrf.mxu0  ;;  %v6451_v41 = vpop.f32.mrf.mxu1 }
 0x173   : > { %662 = vst.msk [vmem:[#allocation2 + $0x10] sm:$0xf] %vm657_vm0, %v8011_v38  ;;  %v6227_v42 = vpack.c.bf16 %v6443_v40, %v6443_v40  ;;  %670 = vst.msk [vmem:[#allocation2 + $0x30] sm:$0xf] %vm657_vm0, %v8015_v39  ;;  %v8021_v43 = vpack.c.bf16 %v6451_v41, %v6451_v41 }
 0x174   : > { %v549_v44 = vpop.f32.mrf.mxu0  ;;  %v581_v45 = vpop.f32.mrf.mxu1 }
 0x175   : > { %808 = vrot.lane.b32.xlu0 %v6222_v18, %s7705_s20  ;;  %745 = vrot.lane.b32.xlu1 %v6223_v26, %s7704_s19  ;;  %665 = vst.msk [vmem:[#allocation2 + $0x1c] sm:$0xf] %vm657_vm0, %v6227_v42  ;;  %v8026_v46 = vpack.c.bf16 %v549_v44, %v549_v44  ;;  %673 = vst.msk [vmem:[#allocation2 + $0x3c] sm:$0xf] %vm657_vm0, %v8021_v43  ;;  %v8030_v47 = vpack.c.bf16 %v581_v45, %v581_v45 }
 0x177   : > { %663 = vst.msk [vmem:[#allocation2 + $0x14] sm:$0xf] %vm657_vm0, %v8026_v46  ;;  %671 = vst.msk [vmem:[#allocation2 + $0x34] sm:$0xf] %vm657_vm0, %v8030_v47 }
 0x179   : > { %824 = vrot.lane.b32.xlu0 %v6230_v19, %s7705_s20  ;;  %761 = vrot.lane.b32.xlu1 %v6231_v27, %s7704_s19 }
 0x17d   : > { %674 = vrot.lane.b32.xlu0 %v6220_v22, %s7703_s27  ;;  %810 = vrot.lane.b32.xlu1 %v6223_v26, %s7705_s20 }
 0x181   : > { %690 = vrot.lane.b32.xlu0 %v6228_v23, %s7703_s27  ;;  %826 = vrot.lane.b32.xlu1 %v6231_v27, %s7705_s20 }
 0x185   : > { %739 = vrot.lane.b32.xlu0 %v6220_v22, %s7704_s19  ;;  %692 = vrot.lane.b32.xlu1 %v6229_v31, %s7703_s27 }
 0x189   : > { %755 = vrot.lane.b32.xlu0 %v6228_v23, %s7704_s19  ;;  %741 = vrot.lane.b32.xlu1 %v6221_v30, %s7704_s19 }
 0x18d   : > { %804 = vrot.lane.b32.xlu0 %v6220_v22, %s7705_s20  ;;  %757 = vrot.lane.b32.xlu1 %v6229_v31, %s7704_s19 }
 0x191   : > { %820 = vrot.lane.b32.xlu0 %v6228_v23, %s7705_s20  ;;  %806 = vrot.lane.b32.xlu1 %v6221_v30, %s7705_s20 }
 0x195   : > { %822 = vrot.lane.b32.xlu1 %v6229_v31, %s7705_s20  ;;  %676 = vrot.lane.b32.xlu0 %v6221_v30, %s7703_s27 }
 0x199   : > { %686 = vrot.lane.b32.xlu0 %v6226_v34, %s7703_s27  ;;  %688 = vrot.lane.b32.xlu1 %v6227_v42, %s7703_s27 }
 0x19d   : > { %702 = vrot.lane.b32.xlu0 %v8006_v35, %s7703_s27  ;;  %704 = vrot.lane.b32.xlu1 %v8021_v43, %s7703_s27 }
 0x1a1   : > { %751 = vrot.lane.b32.xlu0 %v6226_v34, %s7704_s19  ;;  %753 = vrot.lane.b32.xlu1 %v6227_v42, %s7704_s19 }
 0x1a5   : > { %767 = vrot.lane.b32.xlu0 %v8006_v35, %s7704_s19  ;;  %769 = vrot.lane.b32.xlu1 %v8021_v43, %s7704_s19 }
 0x1a9   : > { %816 = vrot.lane.b32.xlu0 %v6226_v34, %s7705_s20  ;;  %818 = vrot.lane.b32.xlu1 %v6227_v42, %s7705_s20 }
 0x1ad   : > { %682 = vrot.lane.b32.xlu0 %v8011_v38, %s7703_s27  ;;  %684 = vrot.lane.b32.xlu1 %v8026_v46, %s7703_s27 }
 0x1b1   : > { %698 = vrot.lane.b32.xlu0 %v8015_v39, %s7703_s27  ;;  %700 = vrot.lane.b32.xlu1 %v8030_v47, %s7703_s27 }
 0x1b5   : > { %747 = vrot.lane.b32.xlu0 %v8011_v38, %s7704_s19  ;;  %749 = vrot.lane.b32.xlu1 %v8026_v46, %s7704_s19 }
 0x1b9   : > { %763 = vrot.lane.b32.xlu0 %v8015_v39, %s7704_s19  ;;  %765 = vrot.lane.b32.xlu1 %v8030_v47, %s7704_s19 }
 0x1bd   : > { %812 = vrot.lane.b32.xlu0 %v8011_v38, %s7705_s20  ;;  %814 = vrot.lane.b32.xlu1 %v8026_v46, %s7705_s20 }
 0x1c1   : > { %828 = vrot.lane.b32.xlu0 %v8015_v39, %s7705_s20  ;;  %830 = vrot.lane.b32.xlu1 %v8030_v47, %s7705_s20 }
 0x1c5   : > { %832 = vrot.lane.b32.xlu0 %v8006_v35, %s7705_s20  ;;  %834 = vrot.lane.b32.xlu1 %v8021_v43, %s7705_s20 }
 0x1db   : > { %v695_v50 = vpop.permute.xlu0 %694  ;;  %v679_v51 = vpop.permute.xlu1 %678 }
 0x1dc   : > { %733 = vst.msk [vmem:[#allocation2 + $0x68] sm:$0xf] %vm657_vm0, %v695_v50  ;;  %725 = vst.msk [vmem:[#allocation2 + $0x48] sm:$0xf] %vm657_vm0, %v679_v51 }
 0x1df   : > { %v744_v52 = vpop.permute.xlu0 %743  ;;  %v681_v53 = vpop.permute.xlu1 %680 }
 0x1e0   : > { %790 = vst.msk [vmem:[#allocation2 + $0x88] sm:$0xf] %vm657_vm0, %v744_v52  ;;  %726 = vst.msk [vmem:[#allocation2 + $0x4c] sm:$0xf] %vm657_vm0, %v681_v53 }
 0x1e3   : > { %v760_v54 = vpop.permute.xlu0 %759  ;;  %v697_v55 = vpop.permute.xlu1 %696 }
 0x1e4   : > { %798 = vst.msk [vmem:[#allocation2 + $0xa8] sm:$0xf] %vm657_vm0, %v760_v54  ;;  %734 = vst.msk [vmem:[#allocation2 + $0x6c] sm:$0xf] %vm657_vm0, %v697_v55 }
 0x1e7   : > { %v809_v56 = vpop.permute.xlu0 %808  ;;  %v746_v57 = vpop.permute.xlu1 %745 }
 0x1e8   : > { %855 = vst.msk [vmem:[#allocation2 + $0xc8] sm:$0xf] %vm657_vm0, %v809_v56  ;;  %791 = vst.msk [vmem:[#allocation2 + $0x8c] sm:$0xf] %vm657_vm0, %v746_v57 }
 0x1eb   : > { %v825_v58 = vpop.permute.xlu0 %824  ;;  %v762_v59 = vpop.permute.xlu1 %761 }
 0x1ec   : > { %863 = vst.msk [vmem:[#allocation2 + $0xe8] sm:$0xf] %vm657_vm0, %v825_v58  ;;  %799 = vst.msk [vmem:[#allocation2 + $0xac] sm:$0xf] %vm657_vm0, %v762_v59 }
 0x1ef   : > { %v675_v60 = vpop.permute.xlu0 %674  ;;  %v811_v61 = vpop.permute.xlu1 %810 }
 0x1f0   : > { %723 = vst.msk [vmem:[#allocation2 + $0x40] sm:$0xf] %vm657_vm0, %v675_v60  ;;  %856 = vst.msk [vmem:[#allocation2 + $0xcc] sm:$0xf] %vm657_vm0, %v811_v61 }
 0x1f3   : > { %v691_v62 = vpop.permute.xlu0 %690  ;;  %v827_v63 = vpop.permute.xlu1 %826 }
 0x1f4   : > { %731 = vst.msk [vmem:[#allocation2 + $0x60] sm:$0xf] %vm657_vm0, %v691_v62  ;;  %864 = vst.msk [vmem:[#allocation2 + $0xec] sm:$0xf] %vm657_vm0, %v827_v63 }
 0x1f7   : > { %v740_v0 = vpop.permute.xlu0 %739  ;;  %v693_v1 = vpop.permute.xlu1 %692 }
 0x1f8   : > { %788 = vst.msk [vmem:[#allocation2 + $0x80] sm:$0xf] %vm657_vm0, %v740_v0  ;;  %732 = vst.msk [vmem:[#allocation2 + $0x64] sm:$0xf] %vm657_vm0, %v693_v1 }
 0x1fb   : > { %v756_v2 = vpop.permute.xlu0 %755  ;;  %v742_v3 = vpop.permute.xlu1 %741 }
 0x1fc   : > { %796 = vst.msk [vmem:[#allocation2 + $0xa0] sm:$0xf] %vm657_vm0, %v756_v2  ;;  %789 = vst.msk [vmem:[#allocation2 + $0x84] sm:$0xf] %vm657_vm0, %v742_v3 }
 0x1ff   : > { %v805_v4 = vpop.permute.xlu0 %804  ;;  %v758_v5 = vpop.permute.xlu1 %757 }
 0x200   : > { %853 = vst.msk [vmem:[#allocation2 + $0xc0] sm:$0xf] %vm657_vm0, %v805_v4  ;;  %797 = vst.msk [vmem:[#allocation2 + $0xa4] sm:$0xf] %vm657_vm0, %v758_v5 }
 0x203   : > { %v821_v6 = vpop.permute.xlu0 %820  ;;  %v807_v7 = vpop.permute.xlu1 %806 }
 0x204   : > { %861 = vst.msk [vmem:[#allocation2 + $0xe0] sm:$0xf] %vm657_vm0, %v821_v6  ;;  %854 = vst.msk [vmem:[#allocation2 + $0xc4] sm:$0xf] %vm657_vm0, %v807_v7 }
 0x207   : > { %v823_v8 = vpop.permute.xlu1 %822  ;;  %v677_v9 = vpop.permute.xlu0 %676 }
 0x208   : > { %862 = vst.msk [vmem:[#allocation2 + $0xe4] sm:$0xf] %vm657_vm0, %v823_v8  ;;  %724 = vst.msk [vmem:[#allocation2 + $0x44] sm:$0xf] %vm657_vm0, %v677_v9 }
 0x20b   : > { %v687_v10 = vpop.permute.xlu0 %686  ;;  %v689_v11 = vpop.permute.xlu1 %688 }
 0x20c   : > { %729 = vst.msk [vmem:[#allocation2 + $0x58] sm:$0xf] %vm657_vm0, %v687_v10  ;;  %730 = vst.msk [vmem:[#allocation2 + $0x5c] sm:$0xf] %vm657_vm0, %v689_v11 }
 0x20f   : > { %v703_v12 = vpop.permute.xlu0 %702  ;;  %v705_v13 = vpop.permute.xlu1 %704 }
 0x210   : > { %737 = vst.msk [vmem:[#allocation2 + $0x78] sm:$0xf] %vm657_vm0, %v703_v12  ;;  %738 = vst.msk [vmem:[#allocation2 + $0x7c] sm:$0xf] %vm657_vm0, %v705_v13 }
 0x213   : > { %v752_v14 = vpop.permute.xlu0 %751  ;;  %v754_v15 = vpop.permute.xlu1 %753 }
 0x214   : > { %794 = vst.msk [vmem:[#allocation2 + $0x98] sm:$0xf] %vm657_vm0, %v752_v14  ;;  %795 = vst.msk [vmem:[#allocation2 + $0x9c] sm:$0xf] %vm657_vm0, %v754_v15 }
 0x217   : > { %v768_v16 = vpop.permute.xlu0 %767  ;;  %v770_v17 = vpop.permute.xlu1 %769 }
 0x218   : > { %802 = vst.msk [vmem:[#allocation2 + $0xb8] sm:$0xf] %vm657_vm0, %v768_v16  ;;  %803 = vst.msk [vmem:[#allocation2 + $0xbc] sm:$0xf] %vm657_vm0, %v770_v17 }
 0x21b   : > { %v817_v18 = vpop.permute.xlu0 %816  ;;  %v819_v19 = vpop.permute.xlu1 %818 }
 0x21c   : > { %859 = vst.msk [vmem:[#allocation2 + $0xd8] sm:$0xf] %vm657_vm0, %v817_v18  ;;  %860 = vst.msk [vmem:[#allocation2 + $0xdc] sm:$0xf] %vm657_vm0, %v819_v19 }
 0x21f   : > { %v683_v20 = vpop.permute.xlu0 %682  ;;  %v685_v21 = vpop.permute.xlu1 %684 }
 0x220   : > { %727 = vst.msk [vmem:[#allocation2 + $0x50] sm:$0xf] %vm657_vm0, %v683_v20  ;;  %728 = vst.msk [vmem:[#allocation2 + $0x54] sm:$0xf] %vm657_vm0, %v685_v21 }
 0x223   : > { %v699_v22 = vpop.permute.xlu0 %698  ;;  %v701_v23 = vpop.permute.xlu1 %700 }
 0x224   : > { %735 = vst.msk [vmem:[#allocation2 + $0x70] sm:$0xf] %vm657_vm0, %v699_v22  ;;  %736 = vst.msk [vmem:[#allocation2 + $0x74] sm:$0xf] %vm657_vm0, %v701_v23 }
 0x227   : > { %v748_v24 = vpop.permute.xlu0 %747  ;;  %v750_v25 = vpop.permute.xlu1 %749 }
 0x228   : > { %792 = vst.msk [vmem:[#allocation2 + $0x90] sm:$0xf] %vm657_vm0, %v748_v24  ;;  %793 = vst.msk [vmem:[#allocation2 + $0x94] sm:$0xf] %vm657_vm0, %v750_v25 }
 0x22b   : > { %v764_v26 = vpop.permute.xlu0 %763  ;;  %v766_v27 = vpop.permute.xlu1 %765 }
 0x22c   : > { %800 = vst.msk [vmem:[#allocation2 + $0xb0] sm:$0xf] %vm657_vm0, %v764_v26  ;;  %801 = vst.msk [vmem:[#allocation2 + $0xb4] sm:$0xf] %vm657_vm0, %v766_v27 }
 0x22f   : > { %v813_v28 = vpop.permute.xlu0 %812  ;;  %v815_v29 = vpop.permute.xlu1 %814 }
 0x230   : > { %857 = vst.msk [vmem:[#allocation2 + $0xd0] sm:$0xf] %vm657_vm0, %v813_v28  ;;  %858 = vst.msk [vmem:[#allocation2 + $0xd4] sm:$0xf] %vm657_vm0, %v815_v29 }
 0x233   : > { %v829_v30 = vpop.permute.xlu0 %828  ;;  %v831_v31 = vpop.permute.xlu1 %830 }
 0x234   : > { %865 = vst.msk [vmem:[#allocation2 + $0xf0] sm:$0xf] %vm657_vm0, %v829_v30  ;;  %866 = vst.msk [vmem:[#allocation2 + $0xf4] sm:$0xf] %vm657_vm0, %v831_v31 }
 0x237   : > { %v833_v32 = vpop.permute.xlu0 %832  ;;  %v835_v33 = vpop.permute.xlu1 %834 }
 0x238   : > { %867 = vst.msk [vmem:[#allocation2 + $0xf8] sm:$0xf] %vm657_vm0, %v833_v32  ;;  %868 = vst.msk [vmem:[#allocation2 + $0xfc] sm:$0xf] %vm657_vm0, %v835_v33 }
 0x239 PF: > { %s6089_s3 = sshll.u32 %s7677_s7, 1 }
 0x23a   : > { %s1064_s17 = sadd.s32 %s7669_s29, %s6089_s3 }
 0x23b   : > { %s1065_s16 = sld [smem:[#allocation7 + %s1064_s17]] }
 0x241   : > { %p6090_p12 = scmp.ne.s32.totalorder %s1065_s16, 0 }
 0x243   : > { %1069 = sbr.rel (%p6090_p12) target bundleno = 3050 (0xbea), region = 60 }
 0x248   : > { %v8529_v34 = vld [vmem:[%s7962_s30 + $0x70] ss:$8 sps:$4 sm:$0xff]   ;;  %vm1184_vm3 = vcmask 261120   ;;  %v8532_v35 = vld [vmem:[%s7962_s30 + $0x60] ss:$8 sps:$4 sm:$0xff]   ;;  %v7708_v58 = vmov 0   ;;  %v1331_v59 = vlaneseq }
 0x249   : > { %6804 = vmatprep.subr.msk.bf16.mxu0 %vm1184_vm3, %v8529_v34  ;;  %v1231_v36 = vsel %vm1184_vm3, %v8529_v34, 0  ;;  %v8541_v37 = vld [vmem:[%s7962_s30 + $0x50] ss:$8 sps:$4 sm:$0xff]   ;;  %v1228_v38 = vsel %vm1184_vm3, %v8532_v35, 0  ;;  %v7021_v39 = vld [vmem:[#allocation2] sm:$0xff]   ;;  %v7022_v51 = vld [vmem:[#allocation2 + $0x8] sm:$0xff]   ;;  %7004 = vset.pattern.permute.xlu1 %v7708_v58 }
 0x24a   : > { %6453 = vmatpush3.bf16.xpose.msra.mxu0 %v1231_v36  ;;  %6468 = vmatprep.mubr.msk.bf16.mxu0 %vm1184_vm3, %v7021_v39  ;;  %v8547_v40 = vld [vmem:[%s7962_s30 + $0x40] ss:$8 sps:$4 sm:$0xff]   ;;  %v1225_v41 = vsel %vm1184_vm3, %v8541_v37, 0  ;;  %v8558_v43 = vld [vmem:[%s7962_s30 + $0x30] ss:$8 sps:$4 sm:$0xff]   ;;  %v1332_v61 = vshrl.u32 %v1331_v59, 7 }
 0x24b   : > { %6805 = vmatprep.subr.msk.bf16.mxu0 %vm1184_vm3, %v8532_v35  ;;  %v1222_v42 = vsel %vm1184_vm3, %v8547_v40, 0  ;;  %v1219_v44 = vsel %vm1184_vm3, %v8558_v43, 0  ;;  %v8565_v45 = vld [vmem:[%s7962_s30 + $0x20] ss:$8 sps:$4 sm:$0xff]   ;;  %v8572_v47 = vld [vmem:[%s7962_s30 + $0x10] ss:$8 sps:$4 sm:$0xff]   ;;  %7003 = vset.pattern.permute.xlu0 %v7708_v58 }
 0x24c   : > { %v1216_v46 = vsel %vm1184_vm3, %v8565_v45, 0  ;;  %v1213_v48 = vsel %vm1184_vm3, %v8572_v47, 0  ;;  %v8579_v49 = vld [vmem:[%s7962_s30] ss:$8 sps:$4 sm:$0xff]   ;;  %v7023_v52 = vld [vmem:[#allocation2 + $0x10] sm:$0xff]   ;;  %v7024_v53 = vld [vmem:[#allocation2 + $0x18] sm:$0xff]  }
 0x24d   : > { %v1210_v50 = vsel %vm1184_vm3, %v8579_v49, 0  ;;  %v7025_v54 = vld [vmem:[#allocation2 + $0x20] sm:$0xff]   ;;  %v7026_v55 = vld [vmem:[#allocation2 + $0x28] sm:$0xff]   ;;  %v7027_v56 = vld [vmem:[#allocation2 + $0x30] sm:$0xff]   ;;  %v1333_v62 = vsub.s32 0, %v1332_v61  ;;  %vm1672_vm6 = vcmask 7168  }
 0x24e   : > { %v7028_v57 = vld [vmem:[#allocation2 + $0x38] sm:$0xff]   ;;  %v1086_v60 = vld [vmem:[%s361_s4] sm:$0x1]  ;;  %v1084_v33 = vld [vmem:[%s7962_s30 + $0x70] sm:$0xff]  ;;  %s7709_s8 = smov 96   ;;  %s7710_s9 = smov 64  }
 0x24f   : > { %vm1087_vm4 = vcmp.gt.f32.partialorder %v1086_v60, 0.0  ;;  %v1085_v36 = vld [vmem:[%s7962_s30 + $0x78] sm:$0xff]  ;;  %v1083_v39 = vld [vmem:[%s7962_s30 + $0x68] sm:$0xff]  ;;  %v8713_v60 = vld [vmem:[#allocation3] sm:$0xff]  ;;  %s7711_s18 = smov 32  }
 0x250   : > { %v1330_v63 = vsel %vm1087_vm4, 1, %v7708_v58  ;;  %v8710_v58 = vld [vmem:[#allocation3 + $0x10] sm:$0xff] }
 0x251   : > { %v8597_v0 = vrot.slane %v1330_v63, %v1333_v62  ;;  %v1072_v63 = vld [vmem:[%s7962_s30 + $0x10] sm:$0xff] }
 0x252   : > { %6455 = vmatpush3.bf16.xpose.msra.mxu0 %v1228_v38  ;;  %v1082_v38 = vld [vmem:[%s7962_s30 + $0x60] sm:$0xff] }
 0x253   : > { %6806 = vmatprep.subr.msk.bf16.mxu0 %vm1184_vm3, %v8541_v37  ;;  %11119 = vst [vmem:[#allocation28_spill] sm:$0xff] %v8597_v0  ;;  %vm1335_vm5 = vcmp.eq.s32.totalorder %v8597_v0, 1  ;;  %v9123_v0 = vld [vmem:[#allocation3 + $0x98] sm:$0xff] }
 0x254   : > { %11165 = vst [vmem:[#allocation74_spill] sm:$0xff] %v9123_v0 }
 0x25a   : > { %6457 = vmatpush3.bf16.xpose.msra.mxu0 %v1225_v41  ;;  %v8684_v41 = vcombine.high %v1084_v33, %v1085_v36 }
 0x25b   : > { %6807 = vmatprep.subr.msk.bf16.mxu0 %vm1184_vm3, %v8547_v40 }
 0x25c   : > { %11120 = vst [vmem:[#allocation29_spill] sm:$0xff] %v8684_v41  ;;  %6484 = vmatprep.subr.bf16.mxu1 %v8684_v41 }
 0x25d   : > { %6485 = vmatpush3.bf16.msra.mxu1 %v8684_v41 }
 0x262   : > { %6459 = vmatpush3.bf16.xpose.msra.mxu0 %v1222_v42  ;;  %v8686_v42 = vcombine.high %v1082_v38, %v1083_v39  ;;  %v8767_v39 = vld [vmem:[#allocation3 + $0x38] sm:$0xff] }
 0x263   : > { %6808 = vmatprep.subr.msk.bf16.mxu0 %vm1184_vm3, %v8558_v43 }
 0x264   : > { %11121 = vst [vmem:[#allocation30_spill] sm:$0xff] %v8686_v42  ;;  %6486 = vmatprep.subr.bf16.mxu1 %v8686_v42 }
 0x265   : > { %6487 = vmatpush3.bf16.msra.mxu1 %v8686_v42 }
 0x26a   : > { %6461 = vmatpush3.bf16.xpose.msra.mxu0 %v1219_v44  ;;  %v1080_v44 = vld [vmem:[%s7962_s30 + $0x50] sm:$0xff] }
 0x26b   : > { %6809 = vmatprep.subr.msk.bf16.mxu0 %vm1184_vm3, %v8565_v45 }
 0x272   : > { %6463 = vmatpush3.bf16.xpose.msra.mxu0 %v1216_v46  ;;  %v1081_v46 = vld [vmem:[%s7962_s30 + $0x58] sm:$0xff] }
 0x273   : > { %6810 = vmatprep.subr.msk.bf16.mxu0 %vm1184_vm3, %v8572_v47 }
 0x27a   : > { %6465 = vmatpush3.bf16.xpose.msra.mxu0 %v1213_v48  ;;  %v8693_v48 = vcombine.high %v1080_v44, %v1081_v46 }
 0x27b   : > { %6811 = vmatprep.subr.msk.bf16.mxu0 %vm1184_vm3, %v8579_v49 }
 0x27c   : > { %11122 = vst [vmem:[#allocation31_spill] sm:$0xff] %v8693_v48  ;;  %6488 = vmatprep.subr.bf16.mxu1 %v8693_v48 }
 0x27d   : > { %6489 = vmatpush3.bf16.msra.mxu1 %v8693_v48 }
 0x282   : > { %6467 = vmatpush3.bf16.xpose.msra.mxu0 %v1210_v50  ;;  %v1078_v50 = vld [vmem:[%s7962_s30 + $0x40] sm:$0xff] }
 0x289   : > { %6469 = vmatmul.mubr.msk.bf16.vlgmr.msra.gmra.mxu0 %vm1184_vm3, %v7022_v51  ;;  %v1079_v51 = vld [vmem:[%s7962_s30 + $0x48] sm:$0xff] }
 0x28a   : > { %6472 = vmatprep.mubr.msk.bf16.mxu0 %vm1184_vm3, %v7023_v52  ;;  %v8699_v52 = vcombine.high %v1078_v50, %v1079_v51  ;;  %v8773_v50 = vld [vmem:[#allocation3 + $0x20] sm:$0xff]  ;;  %v8847_v51 = vld [vmem:[#allocation3 + $0x78] sm:$0xff] }
 0x28b   : > { %11138 = vst [vmem:[#allocation47_spill] sm:$0xff] %v8847_v51 }
 0x28c   : > { %11123 = vst [vmem:[#allocation32_spill] sm:$0xff] %v8699_v52  ;;  %6490 = vmatprep.subr.bf16.mxu1 %v8699_v52 }
 0x28d   : > { %6491 = vmatpush3.bf16.msra.mxu1 %v8699_v52 }
 0x291   : > { %6473 = vmatmul.mubr.msk.bf16.gmra.mxu0 %vm1184_vm3, %v7024_v53  ;;  %v1076_v53 = vld [vmem:[%s7962_s30 + $0x30] sm:$0xff] }
 0x292   : > { %6476 = vmatprep.mubr.msk.bf16.mxu0 %vm1184_vm3, %v7025_v54  ;;  %v1077_v54 = vld [vmem:[%s7962_s30 + $0x38] sm:$0xff] }
 0x299   : > { %6477 = vmatmul.mubr.msk.bf16.gmra.mxu0 %vm1184_vm3, %v7026_v55  ;;  %v8706_v55 = vcombine.high %v1076_v53, %v1077_v54 }
 0x29a   : > { %6480 = vmatprep.mubr.msk.bf16.mxu0 %vm1184_vm3, %v7027_v56  ;;  %v1074_v56 = vld [vmem:[%s7962_s30 + $0x20] sm:$0xff] }
 0x29b   : > { %11124 = vst [vmem:[#allocation33_spill] sm:$0xff] %v8706_v55  ;;  %6492 = vmatprep.subr.bf16.mxu1 %v8706_v55 }
 0x29c   : > { %6493 = vmatpush3.bf16.msra.mxu1 %v8706_v55 }
 0x2a1   : > { %6481 = vmatmul.mubr.msk.bf16.gmra.mxu0 %vm1184_vm3, %v7028_v57  ;;  %v1075_v57 = vld [vmem:[%s7962_s30 + $0x28] sm:$0xff] }
 0x2a2   : > { %v8719_v62 = vcombine.high %v1074_v56, %v1075_v57  ;;  %v8784_v56 = vld [vmem:[#allocation3 + $0x28] sm:$0xff] }
 0x2a4   : > { %11125 = vst [vmem:[#allocation34_spill] sm:$0xff] %v8719_v62  ;;  %6494 = vmatprep.subr.bf16.mxu1 %v8719_v62 }
 0x2a5   : > { %6495 = vmatpush3.bf16.msra.mxu1 %v8719_v62 }
 0x349   : > { %v6470_v1 = vpop.f32.mrf.mxu0 }
 0x34a   : > { %v8602_v2 = vsel %vm1335_vm5, -2.3819763e+38, %v6470_v1  ;;  %v1073_v1 = vld [vmem:[%s7962_s30 + $0x18] sm:$0xff] }
 0x34b   : > { %1372 = vmax.xlane.f32.xlu1 %v8602_v2  ;;  %v1267_v3 = vpop.f32.mrf.mxu0 }
 0x34c   : > { %v8607_v4 = vsel %vm1335_vm5, -2.3819763e+38, %v1267_v3 }
 0x34d   : > { %1368 = vmax.xlane.f32.xlu0 %v8607_v4  ;;  %v6471_v5 = vpop.f32.mrf.mxu0 }
 0x34e   : > { %v8612_v6 = vsel %vm1335_vm5, -2.3819763e+38, %v6471_v5  ;;  %v8723_v5 = vld [vmem:[#allocation3 + $0x18] sm:$0xff] }
 0x34f   : > { %1374 = vmax.xlane.f32.xlu1 %v8612_v6  ;;  %v1270_v7 = vpop.f32.mrf.mxu0 }
 0x350   : > { %v8617_v8 = vsel %vm1335_vm5, -2.3819763e+38, %v1270_v7 }
 0x351   : > { %1370 = vmax.xlane.f32.xlu0 %v8617_v8  ;;  %v6474_v9 = vpop.f32.mrf.mxu0 }
 0x352   : > { %v8622_v10 = vsel %vm1335_vm5, -2.3819763e+38, %v6474_v9 }
 0x353   : > { %v1283_v11 = vpop.f32.mrf.mxu0 }
 0x354   : > { %v8631_v14 = vsel %vm1335_vm5, -2.3819763e+38, %v1283_v11 }
 0x355   : > { %1380 = vmax.xlane.f32.xlu0 %v8622_v10  ;;  %v6475_v12 = vpop.f32.mrf.mxu0 }
 0x356   : > { %v8627_v13 = vsel %vm1335_vm5, -2.3819763e+38, %v6475_v12  ;;  %v8734_v12 = vld [vmem:[#allocation3 + $0x8] sm:$0xff] }
 0x357   : > { %1382 = vmax.xlane.f32.xlu1 %v8627_v13  ;;  %v1286_v15 = vpop.f32.mrf.mxu0 }
 0x358   : > { %v8636_v16 = vsel %vm1335_vm5, -2.3819763e+38, %v1286_v15 }
 0x359   : > { %1376 = vmax.xlane.f32.xlu0 %v8631_v14  ;;  %v6478_v17 = vpop.f32.mrf.mxu0 }
 0x35a   : > { %v8641_v18 = vsel %vm1335_vm5, -2.3819763e+38, %v6478_v17 }
 0x35b   : > { %1378 = vmax.xlane.f32.xlu1 %v8636_v16  ;;  %v1299_v19 = vpop.f32.mrf.mxu0 }
 0x35c   : > { %v8651_v22 = vsel %vm1335_vm5, -2.3819763e+38, %v1299_v19  ;;  %v8745_v19 = vcombine.high %v1072_v63, %v1073_v1  ;;  %v8794_v1 = vld [vmem:[#allocation3 + $0x50] sm:$0xff] }
 0x35d   : > { %1388 = vmax.xlane.f32.xlu0 %v8641_v18  ;;  %v6479_v20 = vpop.f32.mrf.mxu0  ;;  %11129 = vst [vmem:[#allocation38_spill] sm:$0xff] %v8794_v1 }
 0x35e   : > { %v8647_v21 = vsel %vm1335_vm5, -2.3819763e+38, %v6479_v20  ;;  %11126 = vst [vmem:[#allocation35_spill] sm:$0xff] %v8745_v19  ;;  %v1070_v20 = vld [vmem:[%s7962_s30] sm:$0xff]  ;;  %6496 = vmatprep.subr.bf16.mxu1 %v8745_v19 }
 0x35f   : > { %1390 = vmax.xlane.f32.xlu1 %v8647_v21  ;;  %v1302_v23 = vpop.f32.mrf.mxu0  ;;  %6497 = vmatpush3.bf16.msra.mxu1 %v8745_v19 }
 0x360   : > { %v8656_v24 = vsel %vm1335_vm5, -2.3819763e+38, %v1302_v23  ;;  %v1071_v23 = vld [vmem:[%s7962_s30 + $0x8] sm:$0xff] }
 0x361   : > { %1384 = vmax.xlane.f32.xlu0 %v8651_v22  ;;  %v6482_v25 = vpop.f32.mrf.mxu0  ;;  %v8765_v36 = vcombine.high %v1070_v20, %v1071_v23  ;;  %v8805_v23 = vld [vmem:[#allocation3 + $0x58] sm:$0xff] }
 0x362   : > { %v8661_v26 = vsel %vm1335_vm5, -2.3819763e+38, %v6482_v25  ;;  %11130 = vst [vmem:[#allocation39_spill] sm:$0xff] %v8805_v23 }
 0x363   : > { %1386 = vmax.xlane.f32.xlu1 %v8656_v24  ;;  %v1315_v27 = vpop.f32.mrf.mxu0  ;;  %11127 = vst [vmem:[#allocation36_spill] sm:$0xff] %v8765_v36  ;;  %6498 = vmatprep.subr.bf16.mxu1 %v8765_v36 }
 0x364   : > { %v8671_v30 = vsel %vm1335_vm5, -2.3819763e+38, %v1315_v27  ;;  %6499 = vmatpush3.bf16.msra.mxu1 %v8765_v36  ;;  %v8868_v27 = vld [vmem:[#allocation3 + $0x68] sm:$0xff] }
 0x365   : > { %v6483_v28 = vpop.f32.mrf.mxu0  ;;  %1396 = vmax.xlane.f32.xlu0 %v8661_v26  ;;  %11142 = vst [vmem:[#allocation51_spill] sm:$0xff] %v8868_v27 }
 0x366   : > { %v8667_v29 = vsel %vm1335_vm5, -2.3819763e+38, %v6483_v28 }
 0x367   : > { %1398 = vmax.xlane.f32.xlu1 %v8667_v29  ;;  %v1318_v31 = vpop.f32.mrf.mxu0 }
 0x368   : > { %v8676_v32 = vsel %vm1335_vm5, -2.3819763e+38, %v1318_v31  ;;  %v8757_v31 = vld [vmem:[#allocation3 + $0x30] sm:$0xff] }
 0x369   : > { %1392 = vmax.xlane.f32.xlu0 %v8671_v30 }
 0x36b   : > { %1394 = vmax.xlane.f32.xlu1 %v8676_v32 }
 0x3d4   : > { %v1373_v59 = vpop.xlane.xlu1 %1372 }
 0x3d5   : > { %v8717_v61 = vmax.f32 %v8710_v58, %v1373_v59 }
 0x3d6   : > { %v1369_v3 = vpop.xlane.xlu0 %1368 }
 0x3d7   : > { %1972 = vst.msk [vmem:[#allocation3 + $0x10] sm:$0xff] %vm1672_vm6, %v8717_v61  ;;  %v8730_v9 = vmax.f32 %v8713_v60, %v1369_v3  ;;  %1476 = vperm.xlu1 %7004, %v8717_v61  }
 0x3d8   : > { %v1375_v11 = vpop.xlane.xlu1 %1374 }
 0x3d9   : > { %1970 = vst.msk [vmem:[#allocation3] sm:$0xff] %vm1672_vm6, %v8730_v9  ;;  %v8742_v17 = vmax.f32 %v8723_v5, %v1375_v11  ;;  %1466 = vperm.xlu0 %7003, %v8730_v9  }
 0x3da   : > { %v1371_v25 = vpop.xlane.xlu0 %1370 }
 0x3db   : > { %1973 = vst.msk [vmem:[#allocation3 + $0x18] sm:$0xff] %vm1672_vm6, %v8742_v17  ;;  %v8754_v28 = vmax.f32 %v8734_v12, %v1371_v25 }
 0x3dd   : > { %1971 = vst.msk [vmem:[#allocation3 + $0x8] sm:$0xff] %vm1672_vm6, %v8754_v28  ;;  %1471 = vperm.xlu1 %7004, %v8754_v28  }
 0x3de   : > { %v1381_v38 = vpop.xlane.xlu0 %1380 }
 0x3df   : > { %v8770_v44 = vmax.f32 %v8757_v31, %v1381_v38 }
 0x3e0   : > { %v1383_v46 = vpop.xlane.xlu1 %1382 }
 0x3e1   : > { %1976 = vst.msk [vmem:[#allocation3 + $0x30] sm:$0xff] %vm1672_vm6, %v8770_v44  ;;  %v8781_v53 = vmax.f32 %v8767_v39, %v1383_v46  ;;  %1481 = vperm.xlu1 %7004, %v8742_v17  }
 0x3e2   : > { %v1377_v54 = vpop.xlane.xlu0 %1376 }
 0x3e3   : > { %11128 = vst [vmem:[#allocation37_spill] sm:$0xff] %v8781_v53  ;;  %1977 = vst.msk [vmem:[#allocation3 + $0x38] sm:$0xff] %vm1672_vm6, %v8781_v53  ;;  %v8791_v59 = vmax.f32 %v8773_v50, %v1377_v54  ;;  %1501 = vperm.xlu0 %7003, %v8781_v53   ;;  %v8814_v54 = vld [vmem:[#allocation3 + $0x40] sm:$0xff] }
 0x3e4   : > { %v1379_v63 = vpop.xlane.xlu1 %1378  ;;  %11132 = vst [vmem:[#allocation41_spill] sm:$0xff] %v8814_v54 }
 0x3e5   : > { %1974 = vst.msk [vmem:[#allocation3 + $0x20] sm:$0xff] %vm1672_vm6, %v8791_v59  ;;  %v8801_v11 = vmax.f32 %v8784_v56, %v1379_v63  ;;  %2057 = vrot.lane.b32.xlu1 %v8529_v34, %s7709_s8 }
 0x3e6   : > { %v1389_v20 = vpop.xlane.xlu0 %1388 }
 0x3e7   : > { %1975 = vst.msk [vmem:[#allocation3 + $0x28] sm:$0xff] %vm1672_vm6, %v8801_v11  ;;  %v8812_v38 = vmax.f32 %v8794_v1, %v1389_v20  ;;  %v8826_v20 = vld [vmem:[#allocation3 + $0x48] sm:$0xff] }
 0x3e8   : > { %v1391_v46 = vpop.xlane.xlu1 %1390  ;;  %11134 = vst [vmem:[#allocation43_spill] sm:$0xff] %v8826_v20 }
 0x3e9   : > { %11131 = vst [vmem:[#allocation40_spill] sm:$0xff] %v8812_v38  ;;  %1980 = vst.msk [vmem:[#allocation3 + $0x50] sm:$0xff] %vm1672_vm6, %v8812_v38  ;;  %v8821_v34 = vmax.f32 %v8805_v23, %v1391_v46  ;;  %1516 = vperm.xlu0 %7003, %v8812_v38   ;;  %2055 = vrot.lane.b32.xlu1 %v8532_v35, %s7709_s8  ;;  %v8835_v46 = vld [vmem:[#allocation3 + $0x70] sm:$0xff] }
 0x3ea   : > { %v1385_v57 = vpop.xlane.xlu0 %1384  ;;  %11136 = vst [vmem:[#allocation45_spill] sm:$0xff] %v8835_v46 }
 0x3eb   : > { %11133 = vst [vmem:[#allocation42_spill] sm:$0xff] %v8821_v34  ;;  %1981 = vst.msk [vmem:[#allocation3 + $0x58] sm:$0xff] %vm1672_vm6, %v8821_v34  ;;  %v8833_v63 = vmax.f32 %v8814_v54, %v1385_v57  ;;  %v9125_v54 = vld [vmem:[#allocation3 + $0x88] sm:$0xff] }
 0x3ec   : > { %v1387_v25 = vpop.xlane.xlu1 %1386  ;;  %11166 = vst [vmem:[#allocation75_spill] sm:$0xff] %v9125_v54 }
 0x3ed   : > { %11135 = vst [vmem:[#allocation44_spill] sm:$0xff] %v8833_v63  ;;  %1978 = vst.msk [vmem:[#allocation3 + $0x40] sm:$0xff] %vm1672_vm6, %v8833_v63  ;;  %v8842_v35 = vmax.f32 %v8826_v20, %v1387_v25  ;;  %1506 = vperm.xlu0 %7003, %v8833_v63   ;;  %2053 = vrot.lane.b32.xlu1 %v8541_v37, %s7709_s8  ;;  %v8856_v25 = vld [vmem:[#allocation3 + $0x60] sm:$0xff] }
 0x3ee   : > { %v1397_v57 = vpop.xlane.xlu0 %1396  ;;  %11140 = vst [vmem:[#allocation49_spill] sm:$0xff] %v8856_v25 }
 0x3ef   : > { %11137 = vst [vmem:[#allocation46_spill] sm:$0xff] %v8842_v35  ;;  %1979 = vst.msk [vmem:[#allocation3 + $0x48] sm:$0xff] %vm1672_vm6, %v8842_v35  ;;  %v8854_v3 = vmax.f32 %v8835_v46, %v1397_v57 }
 0x3f0   : > { %v1399_v7 = vpop.xlane.xlu1 %1398 }
 0x3f1   : > { %11139 = vst [vmem:[#allocation48_spill] sm:$0xff] %v8854_v3  ;;  %v8859_v33 = vmax.f32 %v8847_v51, %v1399_v7  ;;  %1496 = vperm.xlu1 %7004, %v8770_v44   ;;  %2051 = vrot.lane.b32.xlu0 %v8547_v40, %s7709_s8  ;;  %1984 = vst.msk [vmem:[#allocation3 + $0x70] sm:$0xff] %vm1672_vm6, %v8854_v3 }
 0x3f2   : > { %v1393_v57 = vpop.xlane.xlu0 %1392 }
 0x3f3   : > { %11141 = vst [vmem:[#allocation50_spill] sm:$0xff] %v8859_v33  ;;  %1985 = vst.msk [vmem:[#allocation3 + $0x78] sm:$0xff] %vm1672_vm6, %v8859_v33  ;;  %v8875_v7 = vmax.f32 %v8856_v25, %v1393_v57 }
 0x3f4   : > { %v1395_v23 = vpop.xlane.xlu1 %1394 }
 0x3f5   : > { %11143 = vst [vmem:[#allocation52_spill] sm:$0xff] %v8875_v7  ;;  %v8878_v40 = vmax.f32 %v8868_v27, %v1395_v23  ;;  %1486 = vperm.xlu1 %7004, %v8791_v59   ;;  %1982 = vst.msk [vmem:[#allocation3 + $0x60] sm:$0xff] %vm1672_vm6, %v8875_v7 }
 0x3f7   : > { %11144 = vst [vmem:[#allocation53_spill] sm:$0xff] %v8878_v40  ;;  %1983 = vst.msk [vmem:[#allocation3 + $0x68] sm:$0xff] %vm1672_vm6, %v8878_v40  ;;  %1531 = vperm.xlu0 %7003, %v8878_v40  }
 0x3f9   : > { %1491 = vperm.xlu1 %7004, %v8801_v11  }
 0x3fb   : > { %1541 = vperm.xlu0 %7003, %v8859_v33  }
 0x3fd   : > { %1521 = vperm.xlu1 %7004, %v8821_v34  }
 0x3ff   : > { %2047 = vrot.lane.b32.xlu0 %v8565_v45, %s7709_s8 }
 0x401   : > { %1511 = vperm.xlu1 %7004, %v8842_v35   ;;  %v9110_v35 = vld [vmem:[#allocation3 + $0x80] sm:$0xff] }
 0x402   : > { %11162 = vst [vmem:[#allocation71_spill] sm:$0xff] %v9110_v35 }
 0x403   : > { %2043 = vrot.lane.b32.xlu0 %v8579_v49, %s7709_s8 }
 0x405   : > { %1536 = vperm.xlu1 %7004, %v8854_v3  }
 0x409   : > { %1526 = vperm.xlu1 %7004, %v8875_v7  }
 0x40d   : > { %2049 = vrot.lane.b32.xlu1 %v8558_v43, %s7709_s8 }
 0x411   : > { %2045 = vrot.lane.b32.xlu1 %v8572_v47, %s7709_s8 }
 0x452   : > { %v1477_v23 = vpop.permute.xlu1 %1476 }
 0x453   : > { %v1546_v45 = vsub.f32 %v8602_v2, %v1477_v23 }
 0x454   : > { %v1467_v57 = vpop.permute.xlu0 %1466 }
 0x455   : > { %v1544_v15 = vsub.f32 %v8607_v4, %v1467_v57  ;;  %v1564_v3 = vmul.f32 1.442695, %v1546_v45 }
 0x457   : > { %v1560_v37 = vmul.f32 1.442695, %v1544_v15 }
 0x458   : > { %v1472_v33 = vpop.permute.xlu1 %1471 }
 0x459   : > { %v1545_v49 = vsub.f32 %v8617_v8, %v1472_v33  ;;  %7053 = vpow2.f32 %v1560_v37 }
 0x45b   : > { %v1562_v51 = vmul.f32 1.442695, %v1545_v49 }
 0x45c   : > { %v1482_v46 = vpop.permute.xlu1 %1481 }
 0x45d   : > { %7055 = vpow2.f32 %v1562_v51  ;;  %v1547_v43 = vsub.f32 %v8612_v6, %v1482_v46 }
 0x45e   : > { %7057 = vpow2.f32 %v1564_v3  ;;  %v1502_v57 = vpop.permute.xlu0 %1501 }
 0x45f   : > { %v1566_v40 = vmul.f32 1.442695, %v1547_v43  ;;  %v1551_v27 = vsub.f32 %v8627_v13, %v1502_v57 }
 0x460   : > { %v2058_v47 = vpop.permute.xlu1 %2057 }
 0x461   : > { %7059 = vpow2.f32 %v1566_v40  ;;  %6812 = vmatprep.subr.msk.bf16.mxu1 %vm1184_vm3, %v2058_v47  ;;  %v2105_v43 = vsel %vm1184_vm3, %v2058_v47, 0 }
 0x464   : > { %v2056_v4 = vpop.permute.xlu1 %2055  ;;  %v1517_v8 = vpop.permute.xlu0 %1516 }
 0x465   : > { %v2102_v13 = vsel %vm1184_vm3, %v2056_v4, 0 }
 0x466   : > { %v8909_v15 = vpop.eup %7053 }
 0x468   : > { %v2054_v2 = vpop.permute.xlu1 %2053  ;;  %v1507_v40 = vpop.permute.xlu0 %1506 }
 0x469   : > { %v1552_v38 = vsub.f32 %v8651_v22, %v1507_v40 }
 0x46a   : > { %v8911_v23 = vpop.eup %7055 }
 0x46b   : > { %v1801_v33 = vpack.c.bf16 %v8911_v23, %v8909_v15  ;;  %v8915_v37 = vpop.eup %7057 }
 0x46c   : > { %v1497_v51 = vpop.permute.xlu1 %1496 }
 0x46d   : > { %6500 = vmatprep.mubr.bf16.mxu1 %v1801_v33  ;;  %v1550_v3 = vsub.f32 %v8622_v10, %v1497_v51  ;;  %v2052_v33 = vpop.permute.xlu0 %2051  ;;  %v1574_v51 = vmul.f32 1.442695, %v1551_v27 }
 0x46e   : > { %v8917_v6 = vpop.eup %7059 }
 0x46f   : > { %v1802_v46 = vpack.c.bf16 %v8917_v6, %v8915_v37  ;;  %v1572_v7 = vmul.f32 1.442695, %v1550_v3  ;;  %v1554_v3 = vsub.f32 %v8641_v18, %v1517_v8  ;;  %v2099_v18 = vsel %vm1184_vm3, %v2054_v2, 0 }
 0x470   : > { %v1487_v45 = vpop.permute.xlu1 %1486 }
 0x471   : > { %v1548_v49 = vsub.f32 %v8631_v14, %v1487_v45  ;;  %6501 = vmatmul.mubr.bf16.vlgmr.msra.gmra.mxu1 %v1802_v46  ;;  %7061 = vpow2.f32 %v1572_v7  ;;  %v1576_v46 = vmul.f32 1.442695, %v1552_v38 }
 0x472   : > { %6517 = vmatpush3.bf16.xpose.msra.mxu1 %v2105_v43  ;;  %v1532_v57 = vpop.permute.xlu0 %1531 }
 0x473   : > { %6813 = vmatprep.subr.msk.bf16.mxu1 %vm1184_vm3, %v2056_v4  ;;  %v1568_v25 = vmul.f32 1.442695, %v1548_v49 }
 0x474   : > { %v1492_v34 = vpop.permute.xlu1 %1491 }
 0x475   : > { %v1549_v10 = vsub.f32 %v8636_v16, %v1492_v34  ;;  %7063 = vpow2.f32 %v1568_v25  ;;  %v1580_v34 = vmul.f32 1.442695, %v1554_v3 }
 0x477   : > { %v1570_v1 = vmul.f32 1.442695, %v1549_v10 }
 0x478   : > { %v1522_v14 = vpop.permute.xlu1 %1521 }
 0x479   : > { %7065 = vpow2.f32 %v1570_v1  ;;  %v1555_v47 = vsub.f32 %v8647_v21, %v1522_v14  ;;  %v1557_v1 = vsub.f32 %v8676_v32, %v1532_v57  ;;  %v1542_v21 = vpop.permute.xlu0 %1541  ;;  %v2096_v14 = vsel %vm1184_vm3, %v2052_v33, 0 }
 0x47a   : > { %6519 = vmatpush3.bf16.xpose.msra.mxu1 %v2102_v13  ;;  %7067 = vpow2.f32 %v1574_v51  ;;  %v1559_v8 = vsub.f32 %v8667_v29, %v1542_v21 }
 0x47b   : > { %6814 = vmatprep.subr.msk.bf16.mxu1 %vm1184_vm3, %v2054_v2  ;;  %v1582_v16 = vmul.f32 1.442695, %v1555_v47  ;;  %7069 = vpow2.f32 %v1576_v46  ;;  %v1586_v38 = vmul.f32 1.442695, %v1557_v1 }
 0x47c   : > { %v1512_v27 = vpop.permute.xlu1 %1511 }
 0x47d   : > { %v1553_v22 = vsub.f32 %v8656_v24, %v1512_v27  ;;  %7071 = vpow2.f32 %v1582_v16  ;;  %v2048_v16 = vpop.permute.xlu0 %2047 }
 0x47e   : > { %v8938_v24 = vpop.eup %7061  ;;  %v2090_v21 = vsel %vm1184_vm3, %v2048_v16, 0 }
 0x47f   : > { %v1578_v25 = vmul.f32 1.442695, %v1553_v22 }
 0x480   : > { %v1537_v7 = vpop.permute.xlu1 %1536 }
 0x481   : > { %7073 = vpow2.f32 %v1578_v25  ;;  %v1558_v4 = vsub.f32 %v8661_v26, %v1537_v7  ;;  %v1590_v26 = vmul.f32 1.442695, %v1559_v8 }
 0x482   : > { %6521 = vmatpush3.bf16.xpose.msra.mxu1 %v2099_v18  ;;  %7075 = vpow2.f32 %v1580_v34  ;;  %v8940_v45 = vpop.eup %7063  ;;  %v7029_v18 = vld [vmem:[#allocation2 + $0x40] sm:$0xff]  }
 0x483   : > { %6815 = vmatprep.subr.msk.bf16.mxu1 %vm1184_vm3, %v2052_v33  ;;  %v1588_v40 = vmul.f32 1.442695, %v1558_v4  ;;  %7077 = vpow2.f32 %v1586_v38 }
 0x484   : > { %v1527_v32 = vpop.permute.xlu1 %1526 }
 0x485   : > { %v1556_v49 = vsub.f32 %v8671_v30, %v1527_v32  ;;  %7079 = vpow2.f32 %v1588_v40  ;;  %v2044_v40 = vpop.permute.xlu0 %2043 }
 0x486   : > { %v8943_v43 = vpop.eup %7065  ;;  %v2084_v32 = vsel %vm1184_vm3, %v2044_v40, 0 }
 0x487   : > { %v1584_v2 = vmul.f32 1.442695, %v1556_v49  ;;  %v1803_v10 = vpack.c.bf16 %v8943_v43, %v8940_v45  ;;  %v8947_v51 = vpop.eup %7067  ;;  %v7030_v49 = vld [vmem:[#allocation2 + $0x48] sm:$0xff]  }
 0x488   : > { %v2050_v29 = vpop.permute.xlu1 %2049  ;;  %v1804_v47 = vpack.c.bf16 %v8947_v51, %v8938_v24  ;;  %v8953_v30 = vpop.eup %7069 }
 0x489   : > { %7081 = vpow2.f32 %v1584_v2  ;;  %6504 = vmatprep.mubr.bf16.mxu1 %v1803_v10  ;;  %v2093_v46 = vsel %vm1184_vm3, %v2050_v29, 0  ;;  %v7032_v2 = vld [vmem:[#allocation2 + $0x58] sm:$0xff]   ;;  %v7033_v10 = vld [vmem:[#allocation2 + $0x60] sm:$0xff]  }
 0x48a   : > { %6523 = vmatpush3.bf16.xpose.msra.mxu1 %v2096_v14  ;;  %7083 = vpow2.f32 %v1590_v26  ;;  %v8955_v13 = vpop.eup %7071  ;;  %v7031_v26 = vld [vmem:[#allocation2 + $0x50] sm:$0xff]  }
 0x48b   : > { %6505 = vmatmul.mubr.bf16.gmra.mxu1 %v1804_v47  ;;  %6816 = vmatprep.subr.msk.bf16.mxu1 %vm1184_vm3, %v2050_v29  ;;  %v7034_v29 = vld [vmem:[#allocation2 + $0x68] sm:$0xff]   ;;  %v7035_v14 = vld [vmem:[#allocation2 + $0x70] sm:$0xff]   ;;  %v7036_v47 = vld [vmem:[#allocation2 + $0x78] sm:$0xff]  }
 0x48c   : > { %v2046_v4 = vpop.permute.xlu1 %2045 }
 0x48d   : > { %v2087_v8 = vsel %vm1184_vm3, %v2046_v4, 0 }
 0x48e   : > { %v8957_v57 = vpop.eup %7073 }
 0x48f   : > { %v1805_v3 = vpack.c.bf16 %v8957_v57, %v8953_v30  ;;  %v8962_v33 = vpop.eup %7075 }
 0x490   : > { %v1806_v27 = vpack.c.bf16 %v8955_v13, %v8962_v33  ;;  %v8967_v22 = vpop.eup %7077 }
 0x491   : > { %6508 = vmatprep.mubr.bf16.mxu1 %v1805_v3 }
 0x492   : > { %6525 = vmatpush3.bf16.xpose.msra.mxu1 %v2093_v46  ;;  %v8969_v34 = vpop.eup %7079 }
 0x493   : > { %6509 = vmatmul.mubr.bf16.gmra.mxu1 %v1806_v27  ;;  %6817 = vmatprep.subr.msk.bf16.mxu1 %vm1184_vm3, %v2048_v16 }
 0x496   : > { %v8971_v1 = vpop.eup %7081 }
 0x497   : > { %v1807_v25 = vpack.c.bf16 %v8967_v22, %v8971_v1  ;;  %v8976_v7 = vpop.eup %7083 }
 0x498   : > { %v1808_v38 = vpack.c.bf16 %v8976_v7, %v8969_v34 }
 0x499   : > { %6512 = vmatprep.mubr.bf16.mxu1 %v1807_v25 }
 0x49a   : > { %6527 = vmatpush3.bf16.xpose.msra.mxu1 %v2090_v21 }
 0x49b   : > { %6513 = vmatmul.mubr.bf16.gmra.mxu1 %v1808_v38  ;;  %6818 = vmatprep.subr.msk.bf16.mxu1 %vm1184_vm3, %v2046_v4 }
 0x49c   : > { %6532 = vmatprep.mubr.msk.bf16.mxu1 %vm1184_vm3, %v7029_v18 }
 0x4a2   : > { %6529 = vmatpush3.bf16.xpose.msra.mxu1 %v2087_v8 }
 0x4a3   : > { %6819 = vmatprep.subr.msk.bf16.mxu1 %vm1184_vm3, %v2044_v40 }
 0x4aa   : > { %6531 = vmatpush3.bf16.xpose.msra.mxu1 %v2084_v32 }
 0x4b1   : > { %6533 = vmatmul.mubr.msk.bf16.vlgmr.msra.gmra.mxu1 %vm1184_vm3, %v7030_v49 }
 0x4b2   : > { %6536 = vmatprep.mubr.msk.bf16.mxu1 %vm1184_vm3, %v7031_v26 }
 0x4b9   : > { %6537 = vmatmul.mubr.msk.bf16.gmra.mxu1 %vm1184_vm3, %v7032_v2 }
 0x4ba   : > { %6540 = vmatprep.mubr.msk.bf16.mxu1 %vm1184_vm3, %v7033_v10 }
 0x4c1   : > { %6541 = vmatmul.mubr.msk.bf16.gmra.mxu1 %vm1184_vm3, %v7034_v29 }
 0x4c2   : > { %6544 = vmatprep.mubr.msk.bf16.mxu1 %vm1184_vm3, %v7035_v14 }
 0x4c9   : > { %6545 = vmatmul.mubr.msk.bf16.gmra.mxu1 %vm1184_vm3, %v7036_v47 }
 0x531   : > { %v8992_v3 = vpop.f32.mrf.mxu1 }
 0x532   : > { %11145 = vst [vmem:[#allocation54_spill] sm:$0xff] %v8992_v3 }
 0x533   : > { %v8994_v46 = vpop.f32.mrf.mxu1 }
 0x534   : > { %11146 = vst [vmem:[#allocation55_spill] sm:$0xff] %v8994_v46 }
 0x535   : > { %v8996_v16 = vpop.f32.mrf.mxu1 }
 0x536   : > { %11147 = vst [vmem:[#allocation56_spill] sm:$0xff] %v8996_v16 }
 0x537   : > { %v8998_v27 = vpop.f32.mrf.mxu1 }
 0x538   : > { %11148 = vst [vmem:[#allocation57_spill] sm:$0xff] %v8998_v27 }
 0x54b   : > { %v9000_v25 = vpop.f32.mrf.mxu1 }
 0x54c   : > { %11149 = vst [vmem:[#allocation58_spill] sm:$0xff] %v9000_v25 }
 0x54d   : > { %v9002_v21 = vpop.f32.mrf.mxu1 }
 0x54e   : > { %11150 = vst [vmem:[#allocation59_spill] sm:$0xff] %v9002_v21 }
 0x54f   : > { %v9004_v4 = vpop.f32.mrf.mxu1 }
 0x550   : > { %11151 = vst [vmem:[#allocation60_spill] sm:$0xff] %v9004_v4 }
 0x551   : > { %v9006_v18 = vpop.f32.mrf.mxu1 }
 0x552   : > { %11152 = vst [vmem:[#allocation61_spill] sm:$0xff] %v9006_v18 }
 0x553   : > { %v9008_v38 = vpop.f32.mrf.mxu1 }
 0x554   : > { %11153 = vst [vmem:[#allocation62_spill] sm:$0xff] %v9008_v38 }
 0x555   : > { %v9010_v8 = vpop.f32.mrf.mxu1 }
 0x556   : > { %11154 = vst [vmem:[#allocation63_spill] sm:$0xff] %v9010_v8 }
 0x557   : > { %v9012_v40 = vpop.f32.mrf.mxu1 }
 0x558   : > { %11155 = vst [vmem:[#allocation64_spill] sm:$0xff] %v9012_v40 }
 0x559   : > { %v9014_v32 = vpop.f32.mrf.mxu1 }
 0x55a   : > { %11156 = vst [vmem:[#allocation65_spill] sm:$0xff] %v9014_v32 }
 0x55b   : > { %v9016_v49 = vpop.f32.mrf.mxu1 }
 0x55c   : > { %11157 = vst [vmem:[#allocation66_spill] sm:$0xff] %v9016_v49 }
 0x55d   : > { %v9018_v26 = vpop.f32.mrf.mxu1 }
 0x55e   : > { %11158 = vst [vmem:[#allocation67_spill] sm:$0xff] %v9018_v26 }
 0x55f   : > { %v9020_v2 = vpop.f32.mrf.mxu1 }
 0x560   : > { %11159 = vst [vmem:[#allocation68_spill] sm:$0xff] %v9020_v2 }
 0x561   : > { %v9022_v10 = vpop.f32.mrf.mxu1 }
 0x562   : > { %11160 = vst [vmem:[#allocation69_spill] sm:$0xff] %v9022_v10 }
 0x571   : > { %v6534_v29 = vpop.f32.mrf.mxu1 }
 0x572   : > { %v9026_v14 = vsel %vm1335_vm5, -2.3819763e+38, %v6534_v29 }
 0x573   : > { %2241 = vmax.xlane.f32.xlu0 %v9026_v14  ;;  %v2141_v47 = vpop.f32.mrf.mxu1 }
 0x574   : > { %v9031_v40 = vsel %vm1335_vm5, -2.3819763e+38, %v2141_v47 }
 0x575   : > { %2237 = vmax.xlane.f32.xlu1 %v9031_v40  ;;  %v6535_v49 = vpop.f32.mrf.mxu1 }
 0x576   : > { %v9036_v2 = vsel %vm1335_vm5, -2.3819763e+38, %v6535_v49 }
 0x577   : > { %v2144_v26 = vpop.f32.mrf.mxu1 }
 0x578   : > { %v9040_v10 = vsel %vm1335_vm5, -2.3819763e+38, %v2144_v26 }
 0x579   : > { %2243 = vmax.xlane.f32.xlu1 %v9036_v2  ;;  %2239 = vmax.xlane.f32.xlu0 %v9040_v10  ;;  %v6538_v29 = vpop.f32.mrf.mxu1 }
 0x57a   : > { %v9050_v26 = vsel %vm1335_vm5, -2.3819763e+38, %v6538_v29 }
 0x57b   : > { %v2157_v47 = vpop.f32.mrf.mxu1 }
 0x57c   : > { %v9060_v16 = vsel %vm1335_vm5, -2.3819763e+38, %v2157_v47 }
 0x57d   : > { %v6539_v32 = vpop.f32.mrf.mxu1 }
 0x57e   : > { %v9054_v18 = vsel %vm1335_vm5, -2.3819763e+38, %v6539_v32 }
 0x57f   : > { %v2160_v38 = vpop.f32.mrf.mxu1 }
 0x580   : > { %v9064_v21 = vsel %vm1335_vm5, -2.3819763e+38, %v2160_v38 }
 0x581   : > { %v6542_v49 = vpop.f32.mrf.mxu1 }
 0x582   : > { %v9070_v32 = vsel %vm1335_vm5, -2.3819763e+38, %v6542_v49 }
 0x583   : > { %v2173_v4 = vpop.f32.mrf.mxu1 }
 0x584   : > { %v9080_v38 = vsel %vm1335_vm5, -2.3819763e+38, %v2173_v4 }
 0x585   : > { %v6543_v8 = vpop.f32.mrf.mxu1 }
 0x586   : > { %v9074_v27 = vsel %vm1335_vm5, -2.3819763e+38, %v6543_v8 }
 0x587   : > { %v2176_v25 = vpop.f32.mrf.mxu1 }
 0x588   : > { %v9084_v3 = vsel %vm1335_vm5, -2.3819763e+38, %v2176_v25 }
 0x589   : > { %v6546_v29 = vpop.f32.mrf.mxu1 }
 0x58a   : > { %2691 = vrot.lane.b32.xlu1 %v8686_v42, %s7709_s8  ;;  %v9090_v8 = vsel %vm1335_vm5, -2.3819763e+38, %v6546_v29  ;;  %v9108_v29 = vld [vmem:[#allocation3 + $0x90] sm:$0xff] }
 0x58b   : > { %v2189_v47 = vpop.f32.mrf.mxu1  ;;  %11161 = vst [vmem:[#allocation70_spill] sm:$0xff] %v9108_v29 }
 0x58c   : > { %v9100_v25 = vsel %vm1335_vm5, -2.3819763e+38, %v2189_v47 }
 0x58d   : > { %v6547_v49 = vpop.f32.mrf.mxu1 }
 0x58e   : > { %v9094_v42 = vsel %vm1335_vm5, -2.3819763e+38, %v6547_v49 }
 0x58f   : > { %2693 = vrot.lane.b32.xlu0 %v8684_v41, %s7709_s8  ;;  %v2192_v46 = vpop.f32.mrf.mxu1 }
 0x590   : > { %v9104_v4 = vsel %vm1335_vm5, -2.3819763e+38, %v2192_v46 }
 0x5ae   : > { %2249 = vmax.xlane.f32.xlu0 %v9050_v26  ;;  %2251 = vmax.xlane.f32.xlu1 %v9054_v18 }
 0x5b2   : > { %2245 = vmax.xlane.f32.xlu0 %v9060_v16  ;;  %2247 = vmax.xlane.f32.xlu1 %v9064_v21 }
 0x5b6   : > { %2257 = vmax.xlane.f32.xlu0 %v9070_v32  ;;  %2259 = vmax.xlane.f32.xlu1 %v9074_v27 }
 0x5ba   : > { %2253 = vmax.xlane.f32.xlu0 %v9080_v38  ;;  %2255 = vmax.xlane.f32.xlu1 %v9084_v3 }
 0x5be   : > { %2265 = vmax.xlane.f32.xlu0 %v9090_v8  ;;  %2267 = vmax.xlane.f32.xlu1 %v9094_v42 }
 0x5c2   : > { %2261 = vmax.xlane.f32.xlu0 %v9100_v25  ;;  %2263 = vmax.xlane.f32.xlu1 %v9104_v4 }
 0x5fc   : > { %v2242_v49 = vpop.xlane.xlu0 %2241 }
 0x5fd   : > { %v9113_v20 = vmax.f32 %v9108_v29, %v2242_v49  ;;  %v9169_v49 = vld [vmem:[#allocation3 + $0xb0] sm:$0xff] }
 0x5fe   : > { %v2238_v63 = vpop.xlane.xlu1 %2237  ;;  %11170 = vst [vmem:[#allocation79_spill] sm:$0xff] %v9169_v49 }
 0x5ff   : > { %11163 = vst [vmem:[#allocation72_spill] sm:$0xff] %v9113_v20  ;;  %2834 = vst.msk [vmem:[#allocation3 + $0x90] sm:$0xff] %vm1672_vm6, %v9113_v20  ;;  %v9120_v46 = vmax.f32 %v9110_v35, %v2238_v63  ;;  %2345 = vperm.xlu1 %7004, %v9113_v20   ;;  %v7309_v20 = vld [vmem:[%s7962_s30 + $0x70] ss:$8 sps:$4 sm:$0xff]  }
 0x601   : > { %11164 = vst [vmem:[#allocation73_spill] sm:$0xff] %v9120_v46  ;;  %2832 = vst.msk [vmem:[#allocation3 + $0x80] sm:$0xff] %vm1672_vm6, %v9120_v46 }
 0x602   : > { %v2244_v53 = vpop.xlane.xlu1 %2243  ;;  %v2240_v47 = vpop.xlane.xlu0 %2239 }
 0x603   : > { %v9132_v29 = vmax.f32 %v9123_v0, %v2244_v53  ;;  %v9135_v63 = vmax.f32 %v9125_v54, %v2240_v47  ;;  %2335 = vperm.xlu1 %7004, %v9120_v46  }
 0x605   : > { %11167 = vst [vmem:[#allocation76_spill] sm:$0xff] %v9132_v29  ;;  %11168 = vst [vmem:[#allocation77_spill] sm:$0xff] %v9135_v63  ;;  %2340 = vperm.xlu0 %7003, %v9135_v63  }
 0x606   : > { %2835 = vst.msk [vmem:[#allocation3 + $0x98] sm:$0xff] %vm1672_vm6, %v9132_v29  ;;  %2833 = vst.msk [vmem:[#allocation3 + $0x88] sm:$0xff] %vm1672_vm6, %v9135_v63  ;;  %v2694_v53 = vpop.permute.xlu0 %2693  ;;  %v2692_v47 = vpop.permute.xlu1 %2691  ;;  %v9179_v63 = vld [vmem:[#allocation3 + $0xa0] sm:$0xff] }
 0x607   : > { %6548 = vmatprep.subr.bf16.mxu0 %v2694_v53  ;;  %2689 = vrot.lane.b32.xlu1 %v8693_v48, %s7709_s8  ;;  %11174 = vst [vmem:[#allocation83_spill] sm:$0xff] %v9179_v63 }
 0x608   : > { %6549 = vmatpush3.bf16.msra.mxu0 %v2694_v53  ;;  %v7310_v53 = vld [vmem:[%s7962_s30 + $0x50] ss:$8 sps:$4 sm:$0xff]  }
 0x609   : > { %6550 = vmatprep.subr.bf16.mxu0 %v2692_v47  ;;  %2350 = vperm.xlu0 %7003, %v9132_v29   ;;  %v9171_v29 = vld [vmem:[#allocation3 + $0xb8] sm:$0xff] }
 0x60a   : > { %11171 = vst [vmem:[#allocation80_spill] sm:$0xff] %v9171_v29 }
 0x60b   : > { %2685 = vrot.lane.b32.xlu1 %v8706_v55, %s7709_s8  ;;  %v9201_v55 = vld [vmem:[#allocation3 + $0xd8] sm:$0xff] }
 0x60c   : > { %6551 = vmatpush3.bf16.msra.mxu0 %v2692_v47  ;;  %v9165_v47 = vld [vmem:[%s7962_s30 + $0x60] ss:$8 sps:$4 sm:$0xff]   ;;  %11179 = vst [vmem:[#allocation88_spill] sm:$0xff] %v9201_v55 }
 0x60d   : > { %2687 = vrot.lane.b32.xlu0 %v8699_v52, %s7709_s8  ;;  %11169 = vst [vmem:[#allocation78_spill] sm:$0xff] %v9165_v47 }
 0x60f   : > { %2681 = vrot.lane.b32.xlu1 %v8745_v19, %s7709_s8 }
 0x611   : > { %2683 = vrot.lane.b32.xlu0 %v8719_v62, %s7709_s8 }
 0x613   : > { %2919 = vrot.lane.b32.xlu1 %v7309_v20, %s7710_s9 }
 0x615   : > { %2679 = vrot.lane.b32.xlu0 %v8765_v36, %s7709_s8 }
 0x617   : > { %2915 = vrot.lane.b32.xlu1 %v7310_v53, %s7710_s9  ;;  %v9181_v53 = vld [vmem:[#allocation3 + $0xa8] sm:$0xff] }
 0x618   : > { %11175 = vst [vmem:[#allocation84_spill] sm:$0xff] %v9181_v53 }
 0x619   : > { %2917 = vrot.lane.b32.xlu0 %v9165_v47, %s7710_s9 }
 0x637   : > { %v2250_v0 = vpop.xlane.xlu0 %2249  ;;  %v2252_v46 = vpop.xlane.xlu1 %2251 }
 0x638   : > { %v9174_v35 = vmax.f32 %v9169_v49, %v2250_v0  ;;  %v9177_v20 = vmax.f32 %v9171_v29, %v2252_v46  ;;  %v9199_v49 = vld [vmem:[#allocation3 + $0xd0] sm:$0xff] }
 0x639   : > { %11178 = vst [vmem:[#allocation87_spill] sm:$0xff] %v9199_v49 }
 0x63a   : > { %11172 = vst [vmem:[#allocation81_spill] sm:$0xff] %v9174_v35  ;;  %11173 = vst [vmem:[#allocation82_spill] sm:$0xff] %v9177_v20  ;;  %2370 = vperm.xlu0 %7003, %v9177_v20   ;;  %2365 = vperm.xlu1 %7004, %v9174_v35  }
 0x63b   : > { %2838 = vst.msk [vmem:[#allocation3 + $0xb0] sm:$0xff] %vm1672_vm6, %v9174_v35  ;;  %2839 = vst.msk [vmem:[#allocation3 + $0xb8] sm:$0xff] %vm1672_vm6, %v9177_v20  ;;  %v2246_v0 = vpop.xlane.xlu0 %2245  ;;  %v2248_v46 = vpop.xlane.xlu1 %2247  ;;  %v9219_v35 = vld [vmem:[#allocation3 + $0xc0] sm:$0xff] }
 0x63c   : > { %v9194_v47 = vmax.f32 %v9179_v63, %v2246_v0  ;;  %v9197_v54 = vmax.f32 %v9181_v53, %v2248_v46  ;;  %11182 = vst [vmem:[#allocation91_spill] sm:$0xff] %v9219_v35  ;;  %v9221_v63 = vld [vmem:[#allocation3 + $0xc8] sm:$0xff] }
 0x63d   : > { %11183 = vst [vmem:[#allocation92_spill] sm:$0xff] %v9221_v63 }
 0x63e   : > { %11176 = vst [vmem:[#allocation85_spill] sm:$0xff] %v9194_v47  ;;  %11177 = vst [vmem:[#allocation86_spill] sm:$0xff] %v9197_v54  ;;  %2360 = vperm.xlu0 %7003, %v9197_v54   ;;  %2355 = vperm.xlu1 %7004, %v9194_v47  }
 0x63f   : > { %2836 = vst.msk [vmem:[#allocation3 + $0xa0] sm:$0xff] %vm1672_vm6, %v9194_v47  ;;  %2837 = vst.msk [vmem:[#allocation3 + $0xa8] sm:$0xff] %vm1672_vm6, %v9197_v54  ;;  %v2258_v0 = vpop.xlane.xlu0 %2257  ;;  %v2260_v46 = vpop.xlane.xlu1 %2259  ;;  %v9241_v47 = vld [vmem:[#allocation3 + $0xf8] sm:$0xff] }
 0x640   : > { %v9214_v29 = vmax.f32 %v9199_v49, %v2258_v0  ;;  %v9217_v19 = vmax.f32 %v9201_v55, %v2260_v46  ;;  %v9239_v49 = vld [vmem:[#allocation3 + $0xf0] sm:$0xff]  ;;  %11187 = vst [vmem:[#allocation96_spill] sm:$0xff] %v9241_v47 }
 0x641   : > { %11186 = vst [vmem:[#allocation95_spill] sm:$0xff] %v9239_v49 }
 0x642   : > { %11180 = vst [vmem:[#allocation89_spill] sm:$0xff] %v9214_v29  ;;  %11181 = vst [vmem:[#allocation90_spill] sm:$0xff] %v9217_v19  ;;  %2385 = vperm.xlu0 %7003, %v9214_v29   ;;  %2390 = vperm.xlu1 %7004, %v9217_v19  }
 0x643   : > { %2842 = vst.msk [vmem:[#allocation3 + $0xd0] sm:$0xff] %vm1672_vm6, %v9214_v29  ;;  %2843 = vst.msk [vmem:[#allocation3 + $0xd8] sm:$0xff] %vm1672_vm6, %v9217_v19  ;;  %v2254_v0 = vpop.xlane.xlu0 %2253  ;;  %v2256_v46 = vpop.xlane.xlu1 %2255  ;;  %v9259_v29 = vld [vmem:[#allocation3 + $0xe0] sm:$0xff] }
 0x644   : > { %v9234_v53 = vmax.f32 %v9219_v35, %v2254_v0  ;;  %v9237_v20 = vmax.f32 %v9221_v63, %v2256_v46  ;;  %11190 = vst [vmem:[#allocation99_spill] sm:$0xff] %v9259_v29  ;;  %v9261_v35 = vld [vmem:[#allocation3 + $0xe8] sm:$0xff] }
 0x645   : > { %11191 = vst [vmem:[#allocation100_spill] sm:$0xff] %v9261_v35 }
 0x646   : > { %11184 = vst [vmem:[#allocation93_spill] sm:$0xff] %v9234_v53  ;;  %11185 = vst [vmem:[#allocation94_spill] sm:$0xff] %v9237_v20  ;;  %2375 = vperm.xlu0 %7003, %v9234_v53   ;;  %2380 = vperm.xlu1 %7004, %v9237_v20  }
 0x647   : > { %2840 = vst.msk [vmem:[#allocation3 + $0xc0] sm:$0xff] %vm1672_vm6, %v9234_v53  ;;  %2841 = vst.msk [vmem:[#allocation3 + $0xc8] sm:$0xff] %vm1672_vm6, %v9237_v20  ;;  %v2266_v0 = vpop.xlane.xlu0 %2265  ;;  %v2268_v46 = vpop.xlane.xlu1 %2267 }
 0x648   : > { %v9254_v55 = vmax.f32 %v9239_v49, %v2266_v0  ;;  %v9257_v54 = vmax.f32 %v9241_v47, %v2268_v46  ;;  %v9272_v0 = vld [vmem:[%s7962_s30 + $0x40] ss:$8 sps:$4 sm:$0xff]  }
 0x649   : > { %v9305_v49 = vld [vmem:[%s7962_s30 + $0x20] ss:$8 sps:$4 sm:$0xff]  }
 0x64a   : > { %11188 = vst [vmem:[#allocation97_spill] sm:$0xff] %v9254_v55  ;;  %11189 = vst [vmem:[#allocation98_spill] sm:$0xff] %v9257_v54  ;;  %2913 = vrot.lane.b32.xlu0 %v9272_v0, %s7710_s9  ;;  %2405 = vperm.xlu1 %7004, %v9254_v55   ;;  %v9310_v47 = vld [vmem:[%s7962_s30] ss:$8 sps:$4 sm:$0xff]  }
 0x64b   : > { %2846 = vst.msk [vmem:[#allocation3 + $0xf0] sm:$0xff] %vm1672_vm6, %v9254_v55  ;;  %2847 = vst.msk [vmem:[#allocation3 + $0xf8] sm:$0xff] %vm1672_vm6, %v9257_v54  ;;  %v2262_v46 = vpop.xlane.xlu0 %2261  ;;  %v2264_v19 = vpop.xlane.xlu1 %2263 }
 0x64c   : > { %v9278_v63 = vmax.f32 %v9259_v29, %v2262_v46  ;;  %v9281_v20 = vmax.f32 %v9261_v35, %v2264_v19  ;;  %v9294_v46 = vld [vmem:[%s7962_s30 + $0x30] ss:$8 sps:$4 sm:$0xff]  }
 0x64d   : > { %v9300_v19 = vld [vmem:[%s7962_s30 + $0x10] ss:$8 sps:$4 sm:$0xff]  }
 0x64e   : > { %11192 = vst [vmem:[#allocation101_spill] sm:$0xff] %v9278_v63  ;;  %11193 = vst [vmem:[#allocation102_spill] sm:$0xff] %v9281_v20  ;;  %2395 = vperm.xlu1 %7004, %v9278_v63   ;;  %2400 = vperm.xlu0 %7003, %v9281_v20  }
 0x64f   : > { %2844 = vst.msk [vmem:[#allocation3 + $0xe0] sm:$0xff] %vm1672_vm6, %v9278_v63  ;;  %2845 = vst.msk [vmem:[#allocation3 + $0xe8] sm:$0xff] %vm1672_vm6, %v9281_v20 }
 0x652   : > { %2911 = vrot.lane.b32.xlu1 %v9294_v46, %s7710_s9  ;;  %2410 = vperm.xlu0 %7003, %v9257_v54  }
 0x656   : > { %2907 = vrot.lane.b32.xlu1 %v9300_v19, %s7710_s9  ;;  %2909 = vrot.lane.b32.xlu0 %v9305_v49, %s7710_s9 }
 0x65a   : > { %2905 = vrot.lane.b32.xlu0 %v9310_v47, %s7710_s9 }
 0x679   : > { %1626 = vadd.xlane.f32.xlu0 %v8911_v23 }
 0x67a   : > { %1624 = vadd.xlane.f32.xlu1 %v8909_v15  ;;  %v2346_v54 = vpop.permute.xlu1 %2345 }
 0x67d   : > { %1628 = vadd.xlane.f32.xlu0 %v8915_v37  ;;  %v2415_v37 = vsub.f32 %v9026_v14, %v2346_v54 }
 0x67e   : > { %1630 = vadd.xlane.f32.xlu1 %v8917_v6  ;;  %v2336_v20 = vpop.permute.xlu1 %2335 }
 0x67f   : > { %v2413_v35 = vsub.f32 %v9031_v40, %v2336_v20  ;;  %v2433_v40 = vmul.f32 1.442695, %v2415_v37 }
 0x680   : > { %v2341_v55 = vpop.permute.xlu0 %2340 }
 0x681   : > { %v2429_v63 = vmul.f32 1.442695, %v2413_v35  ;;  %v2414_v29 = vsub.f32 %v9040_v10, %v2341_v55  ;;  %1632 = vadd.xlane.f32.xlu0 %v8940_v45 }
 0x682   : > { %1634 = vadd.xlane.f32.xlu1 %v8943_v43  ;;  %v2690_v53 = vpop.permute.xlu1 %2689 }
 0x683   : > { %v2431_v23 = vmul.f32 1.442695, %v2414_v29  ;;  %6552 = vmatprep.subr.bf16.mxu0 %v2690_v53  ;;  %7085 = vpow2.f32 %v2429_v63 }
 0x684   : > { %v2351_v15 = vpop.permute.xlu0 %2350  ;;  %6553 = vmatpush3.bf16.msra.mxu0 %v2690_v53 }
 0x685   : > { %7087 = vpow2.f32 %v2431_v23  ;;  %v2416_v6 = vsub.f32 %v9036_v2, %v2351_v15  ;;  %1636 = vadd.xlane.f32.xlu0 %v8938_v24 }
 0x686   : > { %1638 = vadd.xlane.f32.xlu1 %v8947_v51  ;;  %v2686_v45 = vpop.permute.xlu1 %2685 }
 0x687   : > { %v2435_v55 = vmul.f32 1.442695, %v2416_v6 }
 0x688   : > { %v2688_v35 = vpop.permute.xlu0 %2687 }
 0x689   : > { %1640 = vadd.xlane.f32.xlu0 %v8953_v30  ;;  %6554 = vmatprep.subr.bf16.mxu0 %v2688_v35  ;;  %7089 = vpow2.f32 %v2435_v55 }
 0x68a   : > { %1642 = vadd.xlane.f32.xlu1 %v8957_v57  ;;  %6555 = vmatpush3.bf16.msra.mxu0 %v2688_v35  ;;  %7091 = vpow2.f32 %v2433_v40  ;;  %v2682_v24 = vpop.permute.xlu1 %2681 }
 0x68b   : > { %6556 = vmatprep.subr.bf16.mxu0 %v2686_v45 }
 0x68c   : > { %v2684_v54 = vpop.permute.xlu0 %2683 }
 0x68d   : > { %1644 = vadd.xlane.f32.xlu0 %v8962_v33 }
 0x68e   : > { %1646 = vadd.xlane.f32.xlu1 %v8955_v13  ;;  %6557 = vmatpush3.bf16.msra.mxu0 %v2686_v45  ;;  %v2920_v33 = vpop.permute.xlu1 %2919 }
 0x68f   : > { %6558 = vmatprep.subr.bf16.mxu0 %v2684_v54 }
 0x690   : > { %v9330_v43 = vpop.eup %7085  ;;  %v2680_v57 = vpop.permute.xlu0 %2679 }
 0x691   : > { %1648 = vadd.xlane.f32.xlu0 %v8971_v1  ;;  %v11194_v1 = vsub.f32 %v8713_v60, %v8730_v9 }
 0x692   : > { %v9333_v51 = vpop.eup %7087  ;;  %1650 = vadd.xlane.f32.xlu1 %v8967_v22  ;;  %6559 = vmatpush3.bf16.msra.mxu0 %v2684_v54  ;;  %v2916_v60 = vpop.permute.xlu1 %2915 }
 0x693   : > { %6560 = vmatprep.subr.bf16.mxu0 %v2682_v24  ;;  %v2671_v30 = vpack.c.bf16 %v9333_v51, %v9330_v43  ;;  %v1432_v22 = vmul.f32 1.442695, %v11194_v1  ;;  %v2961_v29 = vsel %vm1184_vm3, %v2916_v60, 0 }
 0x695   : > { %1652 = vadd.xlane.f32.xlu0 %v8969_v34  ;;  %6564 = vmatprep.mubr.bf16.mxu0 %v2671_v30  ;;  %v2967_v34 = vsel %vm1184_vm3, %v2920_v33, 0  ;;  %7093 = vpow2.f32 %v1432_v22 }
 0x696   : > { %1654 = vadd.xlane.f32.xlu1 %v8976_v7  ;;  %6561 = vmatpush3.bf16.msra.mxu0 %v2682_v24  ;;  %v9340_v13 = vpop.eup %7089  ;;  %v2918_v7 = vpop.permute.xlu0 %2917 }
 0x697   : > { %6562 = vmatprep.subr.bf16.mxu0 %v2680_v57  ;;  %v9345_v2 = vpop.eup %7091  ;;  %v2964_v14 = vsel %vm1184_vm3, %v2918_v7, 0 }
 0x698   : > { %v2672_v10 = vpack.c.bf16 %v9340_v13, %v9345_v2 }
 0x69a   : > { %6563 = vmatpush3.bf16.msra.mxu0 %v2680_v57 }
 0x69b   : > { %6820 = vmatprep.subr.msk.bf16.mxu0 %vm1184_vm3, %v2920_v33 }
 0x69d   : > { %6565 = vmatmul.mubr.bf16.vlgmr.msra.gmra.mxu0 %v2672_v10 }
 0x69e   : > { %6581 = vmatpush3.bf16.xpose.msra.mxu0 %v2967_v34 }
 0x69f   : > { %6821 = vmatprep.subr.msk.bf16.mxu0 %vm1184_vm3, %v2918_v7 }
 0x6a2   : > { %v9356_v9 = vpop.eup %7093 }
 0x6a6   : > { %6583 = vmatpush3.bf16.xpose.msra.mxu0 %v2964_v14 }
 0x6a7   : > { %6822 = vmatprep.subr.msk.bf16.mxu0 %vm1184_vm3, %v2916_v60  ;;  %3555 = vrot.lane.b32.xlu1 %v8684_v41, %s7710_s9  ;;  %v9656_v41 = vld [vmem:[#allocation3 + $0x118] sm:$0xff] }
 0x6a8   : > { %11251 = vst [vmem:[#allocation106_spill] sm:$0xff] %v9656_v41 }
 0x6ab   : > { %1707 = vperm.xlu0 %7003, %v9356_v9  }
 0x6ae   : > { %6585 = vmatpush3.bf16.xpose.msra.mxu0 %v2961_v29 }
 0x6b5   : > { %v2371_v63 = vpop.permute.xlu0 %2370  ;;  %v2366_v20 = vpop.permute.xlu1 %2365 }
 0x6b6   : > { %v2420_v53 = vsub.f32 %v9054_v18, %v2371_v63  ;;  %v2419_v23 = vsub.f32 %v9050_v26, %v2366_v20 }
 0x6b8   : > { %v2443_v15 = vmul.f32 1.442695, %v2420_v53  ;;  %v2441_v37 = vmul.f32 1.442695, %v2419_v23 }
 0x6b9   : > { %v2361_v6 = vpop.permute.xlu0 %2360  ;;  %v2356_v55 = vpop.permute.xlu1 %2355 }
 0x6ba   : > { %v2418_v35 = vsub.f32 %v9064_v21, %v2361_v6  ;;  %v2417_v45 = vsub.f32 %v9060_v16, %v2356_v55  ;;  %7095 = vpow2.f32 %v2443_v15 }
 0x6bb   : > { %7097 = vpow2.f32 %v2441_v37 }
 0x6bc   : > { %v2439_v40 = vmul.f32 1.442695, %v2418_v35  ;;  %v2437_v54 = vmul.f32 1.442695, %v2417_v45 }
 0x6bd   : > { %v2386_v24 = vpop.permute.xlu0 %2385  ;;  %v2391_v30 = vpop.permute.xlu1 %2390 }
 0x6be   : > { %7099 = vpow2.f32 %v2439_v40  ;;  %v2423_v57 = vsub.f32 %v9070_v32, %v2386_v24  ;;  %v2424_v18 = vsub.f32 %v9074_v27, %v2391_v30 }
 0x6bf   : > { %7101 = vpow2.f32 %v2437_v54 }
 0x6c0   : > { %v2449_v26 = vmul.f32 1.442695, %v2423_v57  ;;  %v2451_v33 = vmul.f32 1.442695, %v2424_v18 }
 0x6c1   : > { %v2376_v1 = vpop.permute.xlu0 %2375  ;;  %v2381_v22 = vpop.permute.xlu1 %2380 }
 0x6c2   : > { %v2421_v21 = vsub.f32 %v9080_v38, %v2376_v1  ;;  %v2422_v16 = vsub.f32 %v9084_v3, %v2381_v22  ;;  %7103 = vpow2.f32 %v2449_v26 }
 0x6c3   : > { %7105 = vpow2.f32 %v2451_v33 }
 0x6c4   : > { %v2445_v10 = vmul.f32 1.442695, %v2421_v21  ;;  %v2447_v34 = vmul.f32 1.442695, %v2422_v16 }
 0x6c5   : > { %v2914_v7 = vpop.permute.xlu0 %2913  ;;  %v2406_v14 = vpop.permute.xlu1 %2405 }
 0x6c6   : > { %7107 = vpow2.f32 %v2445_v10  ;;  %6823 = vmatprep.subr.msk.bf16.mxu0 %vm1184_vm3, %v2914_v7  ;;  %v2958_v27 = vsel %vm1184_vm3, %v2914_v7, 0  ;;  %v2427_v60 = vsub.f32 %v9090_v8, %v2406_v14 }
 0x6c7   : > { %7109 = vpow2.f32 %v2447_v34  ;;  %6587 = vmatpush3.bf16.xpose.msra.mxu0 %v2958_v27  ;;  %v9370_v32 = vpop.eup %7095  ;;  %v7037_v27 = vld [vmem:[#allocation2 + $0x80] sm:$0xff]  }
 0x6c8   : > { %v9373_v3 = vpop.eup %7097  ;;  %v2457_v6 = vmul.f32 1.442695, %v2427_v60 }
 0x6c9   : > { %v2401_v38 = vpop.permute.xlu0 %2400  ;;  %v2396_v29 = vpop.permute.xlu1 %2395 }
 0x6ca   : > { %v2426_v63 = vsub.f32 %v9104_v4, %v2401_v38  ;;  %v2425_v20 = vsub.f32 %v9100_v25, %v2396_v29  ;;  %v2674_v25 = vpack.c.bf16 %v9370_v32, %v9373_v3  ;;  %v7038_v29 = vld [vmem:[#allocation2 + $0x88] sm:$0xff]  }
 0x6cb   : > { %v9377_v53 = vpop.eup %7099 }
 0x6cc   : > { %v9379_v23 = vpop.eup %7101  ;;  %v2455_v15 = vmul.f32 1.442695, %v2426_v63  ;;  %v2453_v37 = vmul.f32 1.442695, %v2425_v20  ;;  %v7039_v63 = vld [vmem:[#allocation2 + $0x90] sm:$0xff]   ;;  %v11195_v20 = vsub.f32 %v8734_v12, %v8754_v28  ;;  %v11198_v12 = vsub.f32 %v8773_v50, %v8791_v59  ;;  %v7042_v50 = vld [vmem:[#allocation2 + $0xa8] sm:$0xff]  }
 0x6cd   : > { %v2411_v55 = vpop.permute.xlu0 %2410  ;;  %v2912_v35 = vpop.permute.xlu1 %2911  ;;  %v2673_v8 = vpack.c.bf16 %v9377_v53, %v9379_v23  ;;  %v7043_v59 = vld [vmem:[#allocation2 + $0xb0] sm:$0xff]  }
 0x6ce   : > { %7111 = vpow2.f32 %v2455_v15  ;;  %v2428_v45 = vsub.f32 %v9094_v42, %v2411_v55  ;;  %6824 = vmatprep.subr.msk.bf16.mxu0 %vm1184_vm3, %v2912_v35  ;;  %v2955_v4 = vsel %vm1184_vm3, %v2912_v35, 0  ;;  %v1434_v15 = vmul.f32 1.442695, %v11195_v20  ;;  %v11213_v20 = vld [vmem:[#allocation42_spill] sm:$0xff] }
 0x6cf   : > { %7113 = vpow2.f32 %v2453_v37  ;;  %6568 = vmatprep.mubr.bf16.mxu0 %v2673_v8  ;;  %6589 = vmatpush3.bf16.xpose.msra.mxu0 %v2955_v4  ;;  %v9388_v54 = vpop.eup %7103  ;;  %v11196_v37 = vsub.f32 %v8710_v58, %v8717_v61  ;;  %v11197_v55 = vsub.f32 %v8723_v5, %v8742_v17  ;;  %v7040_v8 = vld [vmem:[#allocation2 + $0x98] sm:$0xff]   ;;  %v1440_v28 = vmul.f32 1.442695, %v11198_v12  ;;  %v11201_v5 = vld [vmem:[#allocation37_spill] sm:$0xff] }
 0x6d0   : > { %v2459_v40 = vmul.f32 1.442695, %v2428_v45  ;;  %6569 = vmatmul.mubr.bf16.gmra.mxu0 %v2674_v25  ;;  %7115 = vpow2.f32 %v2457_v6  ;;  %v9390_v30 = vpop.eup %7105  ;;  %v7041_v45 = vld [vmem:[#allocation2 + $0xa0] sm:$0xff]   ;;  %v11199_v25 = vsub.f32 %v8784_v56, %v8801_v11  ;;  %v11200_v58 = vsub.f32 %v8757_v31, %v8770_v44 }
 0x6d1   : > { %v2910_v24 = vpop.permute.xlu0 %2909  ;;  %v2908_v33 = vpop.permute.xlu1 %2907  ;;  %v2676_v1 = vpack.c.bf16 %v9390_v30, %v9388_v54  ;;  %v1436_v6 = vmul.f32 1.442695, %v11196_v37  ;;  %v1438_v35 = vmul.f32 1.442695, %v11197_v55  ;;  %v11202_v17 = vsub.f32 %v8767_v39, %v11201_v5  ;;  %v11204_v56 = vld [vmem:[#allocation44_spill] sm:$0xff] }
 0x6d2   : > { %7117 = vpow2.f32 %v2459_v40  ;;  %6825 = vmatprep.subr.msk.bf16.mxu0 %vm1184_vm3, %v2910_v24  ;;  %v2952_v18 = vsel %vm1184_vm3, %v2910_v24, 0  ;;  %v2949_v16 = vsel %vm1184_vm3, %v2908_v33, 0  ;;  %v1442_v4 = vmul.f32 1.442695, %v11199_v25  ;;  %v11203_v24 = vld [vmem:[#allocation41_spill] sm:$0xff]  ;;  %v1592_v39 = vld [vmem:[#allocation4] sm:$0xff] }
 0x6d3   : > { %v9393_v42 = vpop.eup %7107  ;;  %7119 = vpow2.f32 %v1434_v15  ;;  %v1444_v61 = vmul.f32 1.442695, %v11200_v58  ;;  %v1446_v40 = vmul.f32 1.442695, %v11202_v17  ;;  %v11205_v11 = vsub.f32 %v11203_v24, %v11204_v56  ;;  %v1595_v25 = vld [vmem:[#allocation4 + $0x18] sm:$0xff]  ;;  %v11215_v58 = vld [vmem:[#allocation49_spill] sm:$0xff] }
 0x6d4   : > { %v9395_v57 = vpop.eup %7109  ;;  %7121 = vpow2.f32 %v1436_v6  ;;  %v1608_v55 = vmul.f32 %v9356_v9, %v1592_v39  ;;  %v11218_v9 = vld [vmem:[#allocation51_spill] sm:$0xff] }
 0x6d5   : > { %v2675_v26 = vpack.c.bf16 %v9395_v57, %v9393_v42  ;;  %v2906_v34 = vpop.permute.xlu0 %2905  ;;  %7123 = vpow2.f32 %v1438_v35  ;;  %v1594_v35 = vld [vmem:[#allocation4 + $0x10] sm:$0xff] }
 0x6d6   : > { %v2946_v38 = vsel %vm1184_vm3, %v2906_v34, 0  ;;  %7125 = vpow2.f32 %v1440_v28 }
 0x6d7   : > { %6572 = vmatprep.mubr.bf16.mxu0 %v2675_v26  ;;  %6591 = vmatpush3.bf16.xpose.msra.mxu0 %v2952_v18  ;;  %7127 = vpow2.f32 %v1442_v4  ;;  %v1448_v18 = vmul.f32 1.442695, %v11205_v11 }
 0x6d8   : > { %6573 = vmatmul.mubr.bf16.gmra.mxu0 %v2676_v1  ;;  %6826 = vmatprep.subr.msk.bf16.mxu0 %vm1184_vm3, %v2908_v33  ;;  %7129 = vpow2.f32 %v1444_v61  ;;  %v11206_v33 = vld [vmem:[#allocation43_spill] sm:$0xff]  ;;  %v11207_v1 = vld [vmem:[#allocation46_spill] sm:$0xff]  ;;  %v11216_v61 = vld [vmem:[#allocation52_spill] sm:$0xff] }
 0x6d9   : > { %7131 = vpow2.f32 %v1446_v40  ;;  %v11208_v31 = vsub.f32 %v11206_v33, %v11207_v1  ;;  %v11217_v5 = vsub.f32 %v11215_v58, %v11216_v61  ;;  %v1596_v33 = vld [vmem:[#allocation4 + $0x20] sm:$0xff] }
 0x6da   : > { %7133 = vpow2.f32 %v1448_v18 }
 0x6db   : > { %v9403_v22 = vpop.eup %7111  ;;  %v1450_v44 = vmul.f32 1.442695, %v11208_v31  ;;  %v1456_v17 = vmul.f32 1.442695, %v11217_v5 }
 0x6dc   : > { %v9405_v21 = vpop.eup %7113 }
 0x6dd   : > { %v2677_v10 = vpack.c.bf16 %v9403_v22, %v9405_v21  ;;  %v9410_v7 = vpop.eup %7115  ;;  %7135 = vpow2.f32 %v1450_v44 }
 0x6df   : > { %v9412_v14 = vpop.eup %7117  ;;  %6576 = vmatprep.mubr.bf16.mxu0 %v2677_v10  ;;  %6593 = vmatpush3.bf16.xpose.msra.mxu0 %v2949_v16  ;;  %v1593_v16 = vld [vmem:[#allocation4 + $0x8] sm:$0xff]  ;;  %v11209_v10 = vld [vmem:[#allocation38_spill] sm:$0xff] }
 0x6e0   : > { %v2678_v60 = vpack.c.bf16 %v9412_v14, %v9410_v7  ;;  %6827 = vmatprep.subr.msk.bf16.mxu0 %vm1184_vm3, %v2906_v34  ;;  %v9447_v26 = vpop.eup %7119  ;;  %v11210_v34 = vld [vmem:[#allocation40_spill] sm:$0xff] }
 0x6e2   : > { %6577 = vmatmul.mubr.bf16.gmra.mxu0 %v2678_v60 }
 0x6e3   : > { %6596 = vmatprep.mubr.msk.bf16.mxu0 %vm1184_vm3, %v7037_v27  ;;  %v11211_v27 = vsub.f32 %v11209_v10, %v11210_v34  ;;  %v11221_v10 = vld [vmem:[#allocation45_spill] sm:$0xff]  ;;  %v11222_v34 = vld [vmem:[#allocation48_spill] sm:$0xff] }
 0x6e5   : > { %v1452_v60 = vmul.f32 1.442695, %v11211_v27  ;;  %v11223_v27 = vsub.f32 %v11221_v10, %v11222_v34 }
 0x6e7   : > { %6595 = vmatpush3.bf16.xpose.msra.mxu0 %v2946_v38  ;;  %v1609_v38 = vmul.f32 %v9447_v26, %v1593_v16  ;;  %7137 = vpow2.f32 %v1452_v60  ;;  %v1597_v16 = vld [vmem:[#allocation4 + $0x28] sm:$0xff]  ;;  %v1460_v60 = vmul.f32 1.442695, %v11223_v27 }
 0x6ee   : > { %6597 = vmatmul.mubr.msk.bf16.vlgmr.msra.gmra.mxu0 %vm1184_vm3, %v7038_v29  ;;  %v9458_v29 = vpop.eup %7121 }
 0x6ef   : > { %6600 = vmatprep.mubr.msk.bf16.mxu0 %vm1184_vm3, %v7039_v63  ;;  %v11212_v63 = vld [vmem:[#allocation39_spill] sm:$0xff]  ;;  %v1610_v40 = vmul.f32 %v9458_v29, %v1594_v35 }
 0x6f0   : > { %v11214_v15 = vsub.f32 %v11212_v63, %v11213_v20  ;;  %v11224_v20 = vld [vmem:[#allocation47_spill] sm:$0xff] }
 0x6f2   : > { %v1454_v37 = vmul.f32 1.442695, %v11214_v15  ;;  %v11225_v15 = vld [vmem:[#allocation50_spill] sm:$0xff] }
 0x6f4   : > { %7139 = vpow2.f32 %v1454_v37  ;;  %v11226_v37 = vsub.f32 %v11224_v20, %v11225_v15 }
 0x6f5   : > { %7141 = vpow2.f32 %v1456_v17 }
 0x6f6   : > { %6601 = vmatmul.mubr.msk.bf16.gmra.mxu0 %vm1184_vm3, %v7040_v8  ;;  %v7044_v8 = vld [vmem:[#allocation2 + $0xb8] sm:$0xff]  }
 0x6f7   : > { %6604 = vmatprep.mubr.msk.bf16.mxu0 %vm1184_vm3, %v7041_v45  ;;  %v9464_v45 = vpop.eup %7123 }
 0x6f8   : > { %v1611_v18 = vmul.f32 %v9464_v45, %v1595_v25 }
 0x6fe   : > { %6605 = vmatmul.mubr.msk.bf16.gmra.mxu0 %vm1184_vm3, %v7042_v50  ;;  %v9471_v50 = vpop.eup %7125 }
 0x6ff   : > { %6608 = vmatprep.mubr.msk.bf16.mxu0 %vm1184_vm3, %v7043_v59  ;;  %v11219_v59 = vld [vmem:[#allocation53_spill] sm:$0xff]  ;;  %v9479_v1 = vpop.eup %7127 }
 0x700   : > { %v11220_v24 = vsub.f32 %v11218_v9, %v11219_v59  ;;  %v9486_v63 = vpop.eup %7129  ;;  %v1613_v35 = vmul.f32 %v9479_v1, %v1597_v16  ;;  %v1600_v9 = vld [vmem:[#allocation4 + $0x40] sm:$0xff] }
 0x702   : > { %v1627_v6 = vpop.xlane.xlu0 %1626  ;;  %v1458_v56 = vmul.f32 1.442695, %v11220_v24 }
 0x703   : > { %v1657_v12 = vadd.f32 %v1627_v6, %v1609_v38  ;;  %v1625_v28 = vpop.xlane.xlu1 %1624  ;;  %v1612_v38 = vmul.f32 %v9471_v50, %v1596_v33  ;;  %v1462_v6 = vmul.f32 1.442695, %v11226_v37 }
 0x704   : > { %v1656_v4 = vadd.f32 %v1625_v28, %v1608_v55  ;;  %7143 = vpow2.f32 %v1458_v56 }
 0x705   : > { %1674 = vst.msk [vmem:[#allocation4 + $0x8] sm:$0xff] %vm1672_vm6, %v1657_v12  ;;  %v9493_v12 = vpop.eup %7131  ;;  %7145 = vpow2.f32 %v1460_v60  ;;  %v1603_v60 = vld [vmem:[#allocation4 + $0x58] sm:$0xff] }
 0x706   : > { %1673 = vst.msk [vmem:[#allocation4] sm:$0xff] %vm1672_vm6, %v1656_v4  ;;  %v1629_v11 = vpop.xlane.xlu0 %1628  ;;  %6609 = vmatmul.mubr.msk.bf16.gmra.mxu0 %vm1184_vm3, %v7044_v8  ;;  %v1598_v8 = vld [vmem:[#allocation4 + $0x30] sm:$0xff]  ;;  %v1599_v4 = vld [vmem:[#allocation4 + $0x38] sm:$0xff]  ;;  %v9497_v5 = vpop.eup %7133  ;;  %7147 = vpow2.f32 %v1462_v6 }
 0x707   : > { %v1658_v31 = vadd.f32 %v1629_v11, %v1610_v40  ;;  %v1631_v44 = vpop.xlane.xlu1 %1630  ;;  %v1614_v61 = vmul.f32 %v9486_v63, %v1598_v8  ;;  %v1615_v40 = vmul.f32 %v9493_v12, %v1599_v4  ;;  %v9501_v59 = vpop.eup %7135  ;;  %v1601_v11 = vld [vmem:[#allocation4 + $0x48] sm:$0xff]  ;;  %v1616_v33 = vmul.f32 %v9497_v5, %v1600_v9  ;;  %v1606_v9 = vld [vmem:[#allocation4 + $0x70] sm:$0xff] }
 0x708   : > { %v1659_v39 = vadd.f32 %v1631_v44, %v1611_v18  ;;  %v1617_v16 = vmul.f32 %v9501_v59, %v1601_v11 }
 0x709   : > { %1675 = vst.msk [vmem:[#allocation4 + $0x10] sm:$0xff] %vm1672_vm6, %v1658_v31  ;;  %v9505_v31 = vpop.eup %7137 }
 0x70a   : > { %1676 = vst.msk [vmem:[#allocation4 + $0x18] sm:$0xff] %vm1672_vm6, %v1659_v39  ;;  %v1633_v55 = vpop.xlane.xlu0 %1632  ;;  %v1602_v39 = vld [vmem:[#allocation4 + $0x50] sm:$0xff]  ;;  %v9509_v10 = vpop.eup %7139 }
 0x70b   : > { %v1660_v28 = vadd.f32 %v1633_v55, %v1612_v38  ;;  %v1635_v25 = vpop.xlane.xlu1 %1634  ;;  %v1618_v20 = vmul.f32 %v9505_v31, %v1602_v39  ;;  %v9513_v15 = vpop.eup %7141  ;;  %v1619_v6 = vmul.f32 %v9509_v10, %v1603_v60  ;;  %v1604_v55 = vld [vmem:[#allocation4 + $0x60] sm:$0xff] }
 0x70c   : > { %v1661_v58 = vadd.f32 %v1635_v25, %v1613_v35  ;;  %v1605_v25 = vld [vmem:[#allocation4 + $0x68] sm:$0xff] }
 0x70d   : > { %1677 = vst.msk [vmem:[#allocation4 + $0x20] sm:$0xff] %vm1672_vm6, %v1660_v28 }
 0x70e   : > { %1678 = vst.msk [vmem:[#allocation4 + $0x28] sm:$0xff] %vm1672_vm6, %v1661_v58  ;;  %v1637_v17 = vpop.xlane.xlu0 %1636  ;;  %v1620_v58 = vmul.f32 %v9513_v15, %v1604_v55 }
 0x70f   : > { %v1662_v24 = vadd.f32 %v1637_v17, %v1614_v61  ;;  %v1639_v56 = vpop.xlane.xlu1 %1638 }
 0x710   : > { %v1663_v18 = vadd.f32 %v1639_v56, %v1615_v40 }
 0x711   : > { %1679 = vst.msk [vmem:[#allocation4 + $0x30] sm:$0xff] %vm1672_vm6, %v1662_v24  ;;  %v9517_v35 = vpop.eup %7143 }
 0x712   : > { %1680 = vst.msk [vmem:[#allocation4 + $0x38] sm:$0xff] %vm1672_vm6, %v1663_v18  ;;  %v1641_v44 = vpop.xlane.xlu0 %1640  ;;  %v9521_v61 = vpop.eup %7145  ;;  %v1621_v40 = vmul.f32 %v9517_v35, %v1605_v25  ;;  %v1607_v18 = vld [vmem:[#allocation4 + $0x78] sm:$0xff] }
 0x713   : > { %v1664_v34 = vadd.f32 %v1641_v44, %v1616_v33  ;;  %v1643_v27 = vpop.xlane.xlu1 %1642  ;;  %v9525_v24 = vpop.eup %7147  ;;  %v1622_v44 = vmul.f32 %v9521_v61, %v1606_v9 }
 0x714   : > { %v1665_v38 = vadd.f32 %v1643_v27, %v1617_v16  ;;  %v1623_v39 = vmul.f32 %v9525_v24, %v1607_v18 }
 0x715   : > { %1681 = vst.msk [vmem:[#allocation4 + $0x40] sm:$0xff] %vm1672_vm6, %v1664_v34 }
 0x716   : > { %1682 = vst.msk [vmem:[#allocation4 + $0x48] sm:$0xff] %vm1672_vm6, %v1665_v38  ;;  %v1645_v37 = vpop.xlane.xlu0 %1644  ;;  %v1689_v38 = vld [vmem:[#allocation5] sm:$0xff] }
 0x717   : > { %v1666_v8 = vadd.f32 %v1645_v37, %v1618_v20  ;;  %v1647_v28 = vpop.xlane.xlu1 %1646 }
 0x718   : > { %v1667_v4 = vadd.f32 %v1647_v28, %v1619_v6  ;;  %v11227_v6 = vld [vmem:[#allocation55_spill] sm:$0xff] }
 0x719   : > { %1683 = vst.msk [vmem:[#allocation4 + $0x50] sm:$0xff] %vm1672_vm6, %v1666_v8 }
 0x71a   : > { %1684 = vst.msk [vmem:[#allocation4 + $0x58] sm:$0xff] %vm1672_vm6, %v1667_v4  ;;  %v1649_v17 = vpop.xlane.xlu0 %1648 }
 0x71b   : > { %v1668_v56 = vadd.f32 %v1649_v17, %v1620_v58  ;;  %v1651_v11 = vpop.xlane.xlu1 %1650 }
 0x71c   : > { %v1669_v33 = vadd.f32 %v1651_v11, %v1621_v40 }
 0x71d   : > { %1685 = vst.msk [vmem:[#allocation4 + $0x60] sm:$0xff] %vm1672_vm6, %v1668_v56 }
 0x71e   : > { %1686 = vst.msk [vmem:[#allocation4 + $0x68] sm:$0xff] %vm1672_vm6, %v1669_v33  ;;  %v1653_v16 = vpop.xlane.xlu0 %1652 }
 0x71f   : > { %v1670_v34 = vadd.f32 %v1653_v16, %v1622_v44  ;;  %v1655_v27 = vpop.xlane.xlu1 %1654 }
 0x720   : > { %v1671_v60 = vadd.f32 %v1655_v27, %v1623_v39 }
 0x721   : > { %1687 = vst.msk [vmem:[#allocation4 + $0x70] sm:$0xff] %vm1672_vm6, %v1670_v34 }
 0x722   : > { %1688 = vst.msk [vmem:[#allocation4 + $0x78] sm:$0xff] %vm1672_vm6, %v1671_v60 }
 0x723   : > { %v3556_v8 = vpop.permute.xlu1 %3555 }
 0x724   : > { %6612 = vmatprep.subr.bf16.mxu1 %v3556_v8 }
 0x725   : > { %6613 = vmatpush3.bf16.msra.mxu1 %v3556_v8 }
 0x726   : > { %v1708_v20 = vpop.permute.xlu0 %1707 }
 0x727   : > { %v1785_v37 = vmul.f32 %v1708_v20, %v1689_v38 }
 0x729   : > { %v1938_v55 = vadd.f32 %v11227_v6, %v1785_v37 }
 0x72b   : > { %1954 = vst.msk [vmem:[#allocation5] sm:$0xff] %vm1184_vm3, %v1938_v55 }
 0x75d   : > { %v9535_v28 = vpop.f32.mrf.mxu0 }
 0x75e   : > { %11228 = vst [vmem:[#allocation37_spill] sm:$0xff] %v9535_v28 }
 0x75f   : > { %v9537_v25 = vpop.f32.mrf.mxu0 }
 0x760   : > { %11229 = vst [vmem:[#allocation41_spill] sm:$0xff] %v9537_v25  ;;  %v9649_v25 = vld [vmem:[#allocation3 + $0x110] sm:$0xff] }
 0x761   : > { %v9539_v4 = vpop.f32.mrf.mxu0  ;;  %11249 = vst [vmem:[#allocation104_spill] sm:$0xff] %v9649_v25 }
 0x762   : > { %11230 = vst [vmem:[#allocation44_spill] sm:$0xff] %v9539_v4 }
 0x763   : > { %v9541_v58 = vpop.f32.mrf.mxu0 }
 0x764   : > { %11231 = vst [vmem:[#allocation43_spill] sm:$0xff] %v9541_v58  ;;  %v9654_v58 = vld [vmem:[#allocation3 + $0x100] sm:$0xff] }
 0x790   : > { %v9543_v17 = vpop.f32.mrf.mxu0 }
 0x791   : > { %11232 = vst [vmem:[#allocation46_spill] sm:$0xff] %v9543_v17 }
 0x792   : > { %v9545_v40 = vpop.f32.mrf.mxu0 }
 0x793   : > { %11233 = vst [vmem:[#allocation38_spill] sm:$0xff] %v9545_v40 }
 0x794   : > { %v9547_v9 = vpop.f32.mrf.mxu0 }
 0x795   : > { %11234 = vst [vmem:[#allocation40_spill] sm:$0xff] %v9547_v9 }
 0x796   : > { %v9549_v56 = vpop.f32.mrf.mxu0 }
 0x797   : > { %11235 = vst [vmem:[#allocation39_spill] sm:$0xff] %v9549_v56  ;;  %v11245_v56 = vld [vmem:[#allocation30_spill] sm:$0xff] }
 0x798   : > { %v9551_v11 = vpop.f32.mrf.mxu0 }
 0x799   : > { %11236 = vst [vmem:[#allocation42_spill] sm:$0xff] %v9551_v11 }
 0x79a   : > { %v9553_v18 = vpop.f32.mrf.mxu0 }
 0x79b   : > { %11237 = vst [vmem:[#allocation49_spill] sm:$0xff] %v9553_v18 }
 0x79c   : > { %v9555_v33 = vpop.f32.mrf.mxu0 }
 0x79d   : > { %11238 = vst [vmem:[#allocation52_spill] sm:$0xff] %v9555_v33 }
 0x79e   : > { %v9557_v44 = vpop.f32.mrf.mxu0 }
 0x79f   : > { %11239 = vst [vmem:[#allocation51_spill] sm:$0xff] %v9557_v44 }
 0x7a2   : > { %v9559_v16 = vpop.f32.mrf.mxu0 }
 0x7a3   : > { %11240 = vst [vmem:[#allocation53_spill] sm:$0xff] %v9559_v16 }
 0x7a4   : > { %v9561_v39 = vpop.f32.mrf.mxu0 }
 0x7a5   : > { %11241 = vst [vmem:[#allocation45_spill] sm:$0xff] %v9561_v39 }
 0x7a6   : > { %v9563_v34 = vpop.f32.mrf.mxu0 }
 0x7a7   : > { %11242 = vst [vmem:[#allocation48_spill] sm:$0xff] %v9563_v34 }
 0x7a8   : > { %v9565_v27 = vpop.f32.mrf.mxu0 }
 0x7a9   : > { %11243 = vst [vmem:[#allocation47_spill] sm:$0xff] %v9565_v27 }
 0x7ae   : > { %v6598_v60 = vpop.f32.mrf.mxu0 }
 0x7af   : > { %v9569_v20 = vsel %vm1335_vm5, -2.3819763e+38, %v6598_v60 }
 0x7b0   : > { %3103 = vmax.xlane.f32.xlu0 %v9569_v20  ;;  %v3003_v37 = vpop.f32.mrf.mxu0 }
 0x7b1   : > { %v9574_v55 = vsel %vm1335_vm5, -2.3819763e+38, %v3003_v37 }
 0x7b2   : > { %v6599_v6 = vpop.f32.mrf.mxu0 }
 0x7b3   : > { %v9578_v8 = vsel %vm1335_vm5, -2.3819763e+38, %v6599_v6 }
 0x7b4   : > { %3099 = vmax.xlane.f32.xlu0 %v9574_v55  ;;  %3105 = vmax.xlane.f32.xlu1 %v9578_v8  ;;  %v3006_v34 = vpop.f32.mrf.mxu0 }
 0x7b5   : > { %v9584_v60 = vsel %vm1335_vm5, -2.3819763e+38, %v3006_v34 }
 0x7b6   : > { %v6602_v27 = vpop.f32.mrf.mxu0 }
 0x7b7   : > { %v9589_v37 = vsel %vm1335_vm5, -2.3819763e+38, %v6602_v27 }
 0x7b8   : > { %3101 = vmax.xlane.f32.xlu1 %v9584_v60  ;;  %v3019_v33 = vpop.f32.mrf.mxu0 }
 0x7b9   : > { %v9594_v6 = vsel %vm1335_vm5, -2.3819763e+38, %v3019_v33 }
 0x7ba   : > { %v6603_v44 = vpop.f32.mrf.mxu0 }
 0x7bb   : > { %v9599_v34 = vsel %vm1335_vm5, -2.3819763e+38, %v6603_v44 }
 0x7bc   : > { %3111 = vmax.xlane.f32.xlu1 %v9589_v37  ;;  %v3022_v16 = vpop.f32.mrf.mxu0 }
 0x7bd   : > { %v9604_v27 = vsel %vm1335_vm5, -2.3819763e+38, %v3022_v16 }
 0x7be   : > { %v6606_v9 = vpop.f32.mrf.mxu0 }
 0x7bf   : > { %v9609_v33 = vsel %vm1335_vm5, -2.3819763e+38, %v6606_v9 }
 0x7c0   : > { %3107 = vmax.xlane.f32.xlu1 %v9594_v6  ;;  %v3035_v39 = vpop.f32.mrf.mxu0 }
 0x7c1   : > { %v9616_v11 = vsel %vm1335_vm5, -2.3819763e+38, %v3035_v39 }
 0x7c2   : > { %v6607_v44 = vpop.f32.mrf.mxu0 }
 0x7c3   : > { %v9621_v4 = vsel %vm1335_vm5, -2.3819763e+38, %v6607_v44 }
 0x7c4   : > { %3113 = vmax.xlane.f32.xlu1 %v9599_v34  ;;  %v3038_v16 = vpop.f32.mrf.mxu0 }
 0x7c6   : > { %v6610_v18 = vpop.f32.mrf.mxu0 }
 0x7c7   : > { %v9626_v9 = vsel %vm1335_vm5, -2.3819763e+38, %v6610_v18 }
 0x7c8   : > { %3109 = vmax.xlane.f32.xlu1 %v9604_v27  ;;  %11246 = vst [vmem:[#allocation50_spill] sm:$0xff] %v9626_v9 }
 0x7ca   : > { %3553 = vrot.lane.b32.xlu0 %v11245_v56, %s7710_s9  ;;  %v3051_v56 = vpop.f32.mrf.mxu0 }
 0x7cb   : > { %v9631_v39 = vsel %vm1335_vm5, -2.3819763e+38, %v3051_v56  ;;  %v9646_v56 = vsel %vm1335_vm5, -2.3819763e+38, %v3038_v16 }
 0x7cc   : > { %3119 = vmax.xlane.f32.xlu1 %v9609_v33  ;;  %11247 = vst [vmem:[#allocation55_spill] sm:$0xff] %v9631_v39  ;;  %v6611_v28 = vpop.f32.mrf.mxu0 }
 0x7cd   : > { %v9636_v44 = vsel %vm1335_vm5, -2.3819763e+38, %v6611_v28 }
 0x7ce   : > { %11248 = vst [vmem:[#allocation103_spill] sm:$0xff] %v9636_v44  ;;  %v3054_v17 = vpop.f32.mrf.mxu0 }
 0x7cf   : > { %v9641_v18 = vsel %vm1335_vm5, -2.3819763e+38, %v3054_v17 }
 0x7d0   : > { %3115 = vmax.xlane.f32.xlu1 %v9616_v11 }
 0x7d4   : > { %3121 = vmax.xlane.f32.xlu1 %v9621_v4 }
 0x7d8   : > { %3127 = vmax.xlane.f32.xlu1 %v9626_v9  ;;  %v9684_v9 = vld [vmem:[#allocation3 + $0x130] sm:$0xff] }
 0x7d9   : > { %11254 = vst [vmem:[#allocation109_spill] sm:$0xff] %v9684_v9 }
 0x7dc   : > { %3123 = vmax.xlane.f32.xlu1 %v9631_v39 }
 0x7e0   : > { %3129 = vmax.xlane.f32.xlu1 %v9636_v44  ;;  %v9669_v44 = vld [vmem:[#allocation3 + $0x108] sm:$0xff] }
 0x7e4   : > { %3125 = vmax.xlane.f32.xlu1 %v9641_v18 }
 0x7e9   : > { %3117 = vmax.xlane.f32.xlu0 %v9646_v56 }
 0x839   : > { %v3104_v40 = vpop.xlane.xlu0 %3103 }
 0x83a   : > { %v9652_v28 = vmax.f32 %v9649_v25, %v3104_v40 }
 0x83c   : > { %11250 = vst [vmem:[#allocation105_spill] sm:$0xff] %v9652_v28  ;;  %3696 = vst.msk [vmem:[#allocation3 + $0x110] sm:$0xff] %vm1672_vm6, %v9652_v28  ;;  %3207 = vperm.xlu1 %7004, %v9652_v28  }
 0x83d   : > { %v3100_v16 = vpop.xlane.xlu0 %3099  ;;  %v3106_v38 = vpop.xlane.xlu1 %3105 }
 0x83e   : > { %v9664_v39 = vmax.f32 %v9654_v58, %v3100_v16  ;;  %v9667_v40 = vmax.f32 %v9656_v41, %v3106_v38  ;;  %v11262_v41 = vld [vmem:[#allocation78_spill] sm:$0xff] }
 0x840   : > { %11252 = vst [vmem:[#allocation107_spill] sm:$0xff] %v9664_v39  ;;  %11253 = vst [vmem:[#allocation108_spill] sm:$0xff] %v9667_v40  ;;  %3197 = vperm.xlu1 %7004, %v9664_v39   ;;  %3212 = vperm.xlu0 %7003, %v9667_v40  }
 0x841   : > { %3694 = vst.msk [vmem:[#allocation3 + $0x100] sm:$0xff] %vm1672_vm6, %v9664_v39  ;;  %3697 = vst.msk [vmem:[#allocation3 + $0x118] sm:$0xff] %vm1672_vm6, %v9667_v40  ;;  %v3554_v38 = vpop.permute.xlu0 %3553  ;;  %v3102_v16 = vpop.xlane.xlu1 %3101  ;;  %v9747_v39 = vld [vmem:[#allocation3 + $0x140] sm:$0xff] }
 0x842   : > { %v9682_v28 = vmax.f32 %v9669_v44, %v3102_v16  ;;  %6614 = vmatprep.subr.bf16.mxu1 %v3554_v38  ;;  %v9696_v16 = vld [vmem:[#allocation3 + $0x120] sm:$0xff]  ;;  %11266 = vst [vmem:[#allocation117_spill] sm:$0xff] %v9747_v39 }
 0x843   : > { %6615 = vmatpush3.bf16.msra.mxu1 %v3554_v38  ;;  %11256 = vst [vmem:[#allocation111_spill] sm:$0xff] %v9696_v16  ;;  %v11259_v38 = vld [vmem:[#allocation33_spill] sm:$0xff] }
 0x844   : > { %3695 = vst.msk [vmem:[#allocation3 + $0x108] sm:$0xff] %vm1672_vm6, %v9682_v28  ;;  %3549 = vrot.lane.b32.xlu0 %v8699_v52, %s7710_s9  ;;  %3202 = vperm.xlu1 %7004, %v9682_v28  }
 0x845   : > { %v3112_v17 = vpop.xlane.xlu1 %3111 }
 0x846   : > { %v9694_v40 = vmax.f32 %v9684_v9, %v3112_v17  ;;  %v9709_v17 = vld [vmem:[#allocation3 + $0x138] sm:$0xff] }
 0x847   : > { %11258 = vst [vmem:[#allocation113_spill] sm:$0xff] %v9709_v17  ;;  %v7318_v9 = vld [vmem:[%s7962_s30 + $0x50] ss:$8 sps:$4 sm:$0xff]  }
 0x848   : > { %11255 = vst [vmem:[#allocation110_spill] sm:$0xff] %v9694_v40  ;;  %3700 = vst.msk [vmem:[#allocation3 + $0x130] sm:$0xff] %vm1672_vm6, %v9694_v40  ;;  %3545 = vrot.lane.b32.xlu0 %v8719_v62, %s7710_s9  ;;  %3551 = vrot.lane.b32.xlu1 %v8693_v48, %s7710_s9 }
 0x849   : > { %v3108_v25 = vpop.xlane.xlu1 %3107 }
 0x84a   : > { %v9707_v52 = vmax.f32 %v9696_v16, %v3108_v25  ;;  %v9722_v25 = vld [vmem:[#allocation3 + $0x128] sm:$0xff]  ;;  %v9735_v16 = vld [vmem:[#allocation3 + $0x150] sm:$0xff] }
 0x84b   : > { %11261 = vst [vmem:[#allocation115_spill] sm:$0xff] %v9722_v25  ;;  %11264 = vst [vmem:[#allocation78_spill] sm:$0xff] %v9735_v16 }
 0x84c   : > { %11257 = vst [vmem:[#allocation112_spill] sm:$0xff] %v9707_v52  ;;  %3698 = vst.msk [vmem:[#allocation3 + $0x120] sm:$0xff] %vm1672_vm6, %v9707_v52  ;;  %3541 = vrot.lane.b32.xlu0 %v8765_v36, %s7710_s9  ;;  %3547 = vrot.lane.b32.xlu1 %v11259_v38, %s7710_s9  ;;  %v11263_v36 = vld [vmem:[#allocation35_spill] sm:$0xff] }
 0x84d   : > { %v3114_v62 = vpop.xlane.xlu1 %3113 }
 0x84e   : > { %v9720_v48 = vmax.f32 %v9709_v17, %v3114_v62  ;;  %v7317_v17 = vld [vmem:[%s7962_s30 + $0x70] ss:$8 sps:$4 sm:$0xff]  }
 0x850   : > { %11260 = vst [vmem:[#allocation114_spill] sm:$0xff] %v9720_v48  ;;  %3701 = vst.msk [vmem:[#allocation3 + $0x138] sm:$0xff] %vm1672_vm6, %v9720_v48  ;;  %3779 = vrot.lane.b32.xlu0 %v11262_v41, %s7711_s18  ;;  %3543 = vrot.lane.b32.xlu1 %v11263_v36, %s7710_s9 }
 0x851   : > { %v3110_v38 = vpop.xlane.xlu1 %3109 }
 0x852   : > { %v9733_v62 = vmax.f32 %v9722_v25, %v3110_v38 }
 0x854   : > { %3699 = vst.msk [vmem:[#allocation3 + $0x128] sm:$0xff] %vm1672_vm6, %v9733_v62  ;;  %3781 = vrot.lane.b32.xlu1 %v7317_v17, %s7711_s18  ;;  %3232 = vperm.xlu0 %7003, %v9720_v48   ;;  %v9759_v48 = vld [vmem:[#allocation3 + $0x158] sm:$0xff] }
 0x855   : > { %v3120_v41 = vpop.xlane.xlu1 %3119 }
 0x856   : > { %v9745_v36 = vmax.f32 %v9735_v16, %v3120_v41  ;;  %v9770_v16 = vld [vmem:[#allocation3 + $0x170] sm:$0xff] }
 0x857   : > { %11269 = vst [vmem:[#allocation120_spill] sm:$0xff] %v9770_v16 }
 0x858   : > { %11265 = vst [vmem:[#allocation116_spill] sm:$0xff] %v9745_v36  ;;  %3704 = vst.msk [vmem:[#allocation3 + $0x150] sm:$0xff] %vm1672_vm6, %v9745_v36  ;;  %3777 = vrot.lane.b32.xlu1 %v7318_v9, %s7711_s18  ;;  %3222 = vperm.xlu0 %7003, %v9733_v62  }
 0x859   : > { %v3116_v17 = vpop.xlane.xlu1 %3115 }
 0x85a   : > { %v9757_v25 = vmax.f32 %v9747_v39, %v3116_v17 }
 0x85c   : > { %11267 = vst [vmem:[#allocation118_spill] sm:$0xff] %v9757_v25  ;;  %3702 = vst.msk [vmem:[#allocation3 + $0x140] sm:$0xff] %vm1672_vm6, %v9757_v25  ;;  %3227 = vperm.xlu1 %7004, %v9694_v40   ;;  %3247 = vperm.xlu0 %7003, %v9745_v36   ;;  %v9781_v36 = vld [vmem:[#allocation3 + $0x160] sm:$0xff]  ;;  %v9802_v40 = vld [vmem:[#allocation3 + $0x168] sm:$0xff] }
 0x85d   : > { %v3122_v38 = vpop.xlane.xlu1 %3121  ;;  %11270 = vst [vmem:[#allocation121_spill] sm:$0xff] %v9781_v36 }
 0x85e   : > { %v9768_v9 = vmax.f32 %v9759_v48, %v3122_v38 }
 0x860   : > { %11268 = vst [vmem:[#allocation119_spill] sm:$0xff] %v9768_v9  ;;  %3705 = vst.msk [vmem:[#allocation3 + $0x158] sm:$0xff] %vm1672_vm6, %v9768_v9  ;;  %3217 = vperm.xlu1 %7004, %v9707_v52   ;;  %3237 = vperm.xlu0 %7003, %v9757_v25   ;;  %v9793_v52 = vld [vmem:[#allocation3 + $0x178] sm:$0xff] }
 0x861   : > { %v3128_v41 = vpop.xlane.xlu1 %3127 }
 0x862   : > { %v9779_v39 = vmax.f32 %v9770_v16, %v3128_v41 }
 0x864   : > { %3708 = vst.msk [vmem:[#allocation3 + $0x170] sm:$0xff] %vm1672_vm6, %v9779_v39  ;;  %3252 = vperm.xlu1 %7004, %v9768_v9   ;;  %3775 = vrot.lane.b32.xlu0 %v9272_v0, %s7711_s18 }
 0x865   : > { %v3124_v17 = vpop.xlane.xlu1 %3123 }
 0x866   : > { %v9791_v25 = vmax.f32 %v9781_v36, %v3124_v17 }
 0x868   : > { %3706 = vst.msk [vmem:[#allocation3 + $0x160] sm:$0xff] %vm1672_vm6, %v9791_v25 }
 0x869   : > { %v3130_v38 = vpop.xlane.xlu1 %3129 }
 0x86a   : > { %v9800_v16 = vmax.f32 %v9793_v52, %v3130_v38  ;;  %v9816_v38 = vld [vmem:[#allocation3 + $0x148] sm:$0xff] }
 0x86c   : > { %3709 = vst.msk [vmem:[#allocation3 + $0x178] sm:$0xff] %vm1672_vm6, %v9800_v16 }
 0x86d   : > { %v3126_v17 = vpop.xlane.xlu1 %3125 }
 0x86e   : > { %v9809_v9 = vmax.f32 %v9802_v40, %v3126_v17 }
 0x870   : > { %v3160_v41 = vsub.f32 %v9802_v40, %v9809_v9  ;;  %3707 = vst.msk [vmem:[#allocation3 + $0x168] sm:$0xff] %vm1672_vm6, %v9809_v9  ;;  %3262 = vperm.xlu0 %7003, %v9809_v9  }
 0x872   : > { %v3118_v36 = vpop.xlane.xlu0 %3117 }
 0x873   : > { %v9819_v0 = vmax.f32 %v9816_v38, %v3118_v36 }
 0x874   : > { %3272 = vperm.xlu0 %7003, %v9800_v16  }
 0x875   : > { %v3156_v17 = vsub.f32 %v9816_v38, %v9819_v0  ;;  %3703 = vst.msk [vmem:[#allocation3 + $0x148] sm:$0xff] %vm1672_vm6, %v9819_v0  ;;  %3242 = vperm.xlu1 %7004, %v9819_v0  }
 0x878   : > { %3771 = vrot.lane.b32.xlu0 %v9305_v49, %s7711_s18 }
 0x879   : > { %3267 = vperm.xlu1 %7004, %v9779_v39  }
 0x87c   : > { %3767 = vrot.lane.b32.xlu0 %v9310_v47, %s7711_s18 }
 0x87d   : > { %3257 = vperm.xlu1 %7004, %v9791_v25  }
 0x881   : > { %3773 = vrot.lane.b32.xlu1 %v9294_v46, %s7711_s18 }
 0x885   : > { %3769 = vrot.lane.b32.xlu1 %v9300_v19, %s7711_s18 }
 0x89b   : > { %2494 = vadd.xlane.f32.xlu0 %v9330_v43 }
 0x89f   : > { %2498 = vadd.xlane.f32.xlu0 %v9345_v2 }
 0x8a3   : > { %2500 = vadd.xlane.f32.xlu0 %v9340_v13 }
 0x8a7   : > { %2504 = vadd.xlane.f32.xlu0 %v9377_v53 }
 0x8a9   : > { %2496 = vadd.xlane.f32.xlu1 %v9333_v51 }
 0x8ab   : > { %2508 = vadd.xlane.f32.xlu0 %v9370_v32 }
 0x8ad   : > { %2502 = vadd.xlane.f32.xlu1 %v9379_v23 }
 0x8af   : > { %2512 = vadd.xlane.f32.xlu0 %v9395_v57 }
 0x8b1   : > { %2506 = vadd.xlane.f32.xlu1 %v9373_v3 }
 0x8b3   : > { %2516 = vadd.xlane.f32.xlu0 %v9390_v30 }
 0x8b5   : > { %2510 = vadd.xlane.f32.xlu1 %v9393_v42 }
 0x8b7   : > { %2520 = vadd.xlane.f32.xlu0 %v9403_v22  ;;  %v3208_v36 = vpop.permute.xlu1 %3207 }
 0x8b8   : > { %v3277_v23 = vsub.f32 %v9569_v20, %v3208_v36 }
 0x8b9   : > { %2514 = vadd.xlane.f32.xlu1 %v9388_v54 }
 0x8ba   : > { %v3295_v57 = vmul.f32 1.442695, %v3277_v23  ;;  %v11275_v23 = vld [vmem:[#allocation85_spill] sm:$0xff] }
 0x8bb   : > { %v3213_v49 = vpop.permute.xlu0 %3212  ;;  %2524 = vadd.xlane.f32.xlu0 %v9412_v14  ;;  %v3198_v47 = vpop.permute.xlu1 %3197 }
 0x8bc   : > { %v3275_v46 = vsub.f32 %v9574_v55, %v3198_v47  ;;  %v3278_v2 = vsub.f32 %v9578_v8, %v3213_v49 }
 0x8bd   : > { %2518 = vadd.xlane.f32.xlu1 %v9405_v21 }
 0x8be   : > { %v3291_v19 = vmul.f32 1.442695, %v3275_v46  ;;  %v3297_v54 = vmul.f32 1.442695, %v3278_v2 }
 0x8bf   : > { %v3550_v43 = vpop.permute.xlu0 %3549  ;;  %v3203_v51 = vpop.permute.xlu1 %3202 }
 0x8c0   : > { %v3276_v13 = vsub.f32 %v9584_v60, %v3203_v51  ;;  %7149 = vpow2.f32 %v3291_v19  ;;  %v11271_v19 = vld [vmem:[#allocation75_spill] sm:$0xff] }
 0x8c1   : > { %2522 = vadd.xlane.f32.xlu1 %v9410_v7 }
 0x8c2   : > { %v3293_v32 = vmul.f32 1.442695, %v3276_v13 }
 0x8c3   : > { %v3546_v3 = vpop.permute.xlu0 %3545  ;;  %v3552_v53 = vpop.permute.xlu1 %3551 }
 0x8c4   : > { %7151 = vpow2.f32 %v3293_v32  ;;  %6616 = vmatprep.subr.bf16.mxu1 %v3552_v53 }
 0x8c5   : > { %6617 = vmatpush3.bf16.msra.mxu1 %v3552_v53  ;;  %7153 = vpow2.f32 %v3297_v54  ;;  %v11274_v53 = vld [vmem:[#allocation83_spill] sm:$0xff] }
 0x8c6   : > { %6618 = vmatprep.subr.bf16.mxu1 %v3550_v43  ;;  %7155 = vpow2.f32 %v3295_v57  ;;  %v11276_v54 = vsub.f32 %v11274_v53, %v11275_v23  ;;  %v11295_v53 = vld [vmem:[#allocation84_spill] sm:$0xff]  ;;  %v11296_v23 = vld [vmem:[#allocation86_spill] sm:$0xff] }
 0x8c7   : > { %v3542_v30 = vpop.permute.xlu0 %3541  ;;  %v3548_v42 = vpop.permute.xlu1 %3547 }
 0x8c9   : > { %6619 = vmatpush3.bf16.msra.mxu1 %v3550_v43  ;;  %v11272_v43 = vld [vmem:[#allocation77_spill] sm:$0xff] }
 0x8ca   : > { %6620 = vmatprep.subr.bf16.mxu1 %v3548_v42  ;;  %v11273_v51 = vsub.f32 %v11271_v19, %v11272_v43 }
 0x8cb   : > { %v3780_v22 = vpop.permute.xlu0 %3779  ;;  %v3544_v21 = vpop.permute.xlu1 %3543 }
 0x8cc   : > { %v3826_v19 = vsel %vm1184_vm3, %v3780_v22, 0 }
 0x8cd   : > { %6621 = vmatpush3.bf16.msra.mxu1 %v3548_v42  ;;  %v9857_v55 = vpop.eup %7149  ;;  %v11278_v42 = vld [vmem:[#allocation73_spill] sm:$0xff] }
 0x8ce   : > { %6622 = vmatprep.subr.bf16.mxu1 %v3546_v3 }
 0x8cf   : > { %v3233_v7 = vpop.permute.xlu0 %3232  ;;  %v3782_v14 = vpop.permute.xlu1 %3781 }
 0x8d0   : > { %v3282_v13 = vsub.f32 %v9599_v34, %v3233_v7 }
 0x8d1   : > { %v9859_v20 = vpop.eup %7151  ;;  %1717 = vperm.xlu0 %7003, %v9458_v29   ;;  %6623 = vmatpush3.bf16.msra.mxu1 %v3546_v3 }
 0x8d2   : > { %1712 = vperm.xlu1 %7004, %v9447_v26   ;;  %6624 = vmatprep.subr.bf16.mxu1 %v3544_v21  ;;  %v3533_v8 = vpack.c.bf16 %v9859_v20, %v9857_v55  ;;  %v9869_v49 = vpop.eup %7153 }
 0x8d3   : > { %v9865_v60 = vpop.permute.xlu1 %3777  ;;  %v3223_v36 = vpop.permute.xlu0 %3222 }
 0x8d4   : > { %6628 = vmatprep.mubr.bf16.mxu1 %v3533_v8  ;;  %v3280_v29 = vsub.f32 %v9604_v27, %v3223_v36  ;;  %v9873_v46 = vpop.eup %7155  ;;  %v11283_v36 = vld [vmem:[#allocation70_spill] sm:$0xff] }
 0x8d5   : > { %1727 = vperm.xlu0 %7003, %v9471_v50   ;;  %6625 = vmatpush3.bf16.msra.mxu1 %v3544_v21  ;;  %v2303_v50 = vmul.f32 1.442695, %v11273_v51 }
 0x8d6   : > { %1722 = vperm.xlu1 %7004, %v9464_v45   ;;  %6626 = vmatprep.subr.bf16.mxu1 %v3542_v30  ;;  %v3534_v45 = vpack.c.bf16 %v9869_v49, %v9873_v46  ;;  %v3301_v27 = vmul.f32 1.442695, %v3280_v29  ;;  %v11284_v29 = vld [vmem:[#allocation72_spill] sm:$0xff] }
 0x8d7   : > { %v3228_v47 = vpop.permute.xlu1 %3227  ;;  %v9886_v3 = vpop.permute.xlu0 %3247  ;;  %7157 = vpow2.f32 %v2303_v50 }
 0x8d8   : > { %v3281_v26 = vsub.f32 %v9589_v37, %v3228_v47  ;;  %7159 = vpow2.f32 %v3301_v27  ;;  %v11285_v47 = vsub.f32 %v11283_v36, %v11284_v29 }
 0x8d9   : > { %1737 = vperm.xlu0 %7003, %v9486_v63   ;;  %6627 = vmatpush3.bf16.msra.mxu1 %v3542_v30  ;;  %v3829_v63 = vsel %vm1184_vm3, %v3782_v14, 0  ;;  %v2309_v30 = vmul.f32 1.442695, %v11276_v54  ;;  %v11297_v54 = vsub.f32 %v11295_v53, %v11296_v23 }
 0x8da   : > { %1732 = vperm.xlu1 %7004, %v9479_v1   ;;  %6828 = vmatprep.subr.msk.bf16.mxu1 %vm1184_vm3, %v3782_v14  ;;  %v3303_v2 = vmul.f32 1.442695, %v3281_v26  ;;  %v3305_v1 = vmul.f32 1.442695, %v3282_v13  ;;  %v2305_v26 = vmul.f32 1.442695, %v11285_v47 }
 0x8db   : > { %v3218_v37 = vpop.permute.xlu1 %3217  ;;  %v3238_v8 = vpop.permute.xlu0 %3237  ;;  %v11289_v13 = vld [vmem:[#allocation74_spill] sm:$0xff] }
 0x8dc   : > { %v3279_v32 = vsub.f32 %v9594_v6, %v3218_v37  ;;  %6629 = vmatmul.mubr.bf16.vlgmr.msra.gmra.mxu1 %v3534_v45  ;;  %v11277_v6 = vld [vmem:[#allocation71_spill] sm:$0xff]  ;;  %7161 = vpow2.f32 %v3303_v2  ;;  %v11290_v45 = vld [vmem:[#allocation76_spill] sm:$0xff]  ;;  %v11293_v2 = vld [vmem:[#allocation89_spill] sm:$0xff] }
 0x8dd   : > { %1747 = vperm.xlu0 %7003, %v9497_v5   ;;  %6645 = vmatpush3.bf16.xpose.msra.mxu1 %v3829_v63  ;;  %v11279_v57 = vsub.f32 %v11277_v6, %v11278_v42  ;;  %v11280_v5 = vld [vmem:[#allocation79_spill] sm:$0xff]  ;;  %v11291_v27 = vsub.f32 %v11289_v13, %v11290_v45  ;;  %v11298_v42 = vld [vmem:[#allocation80_spill] sm:$0xff] }
 0x8de   : > { %v3299_v34 = vmul.f32 1.442695, %v3279_v32  ;;  %1742 = vperm.xlu1 %7004, %v9493_v12   ;;  %6829 = vmatprep.subr.msk.bf16.mxu1 %vm1184_vm3, %v3780_v22  ;;  %v11281_v12 = vld [vmem:[#allocation81_spill] sm:$0xff] }
 0x8df   : > { %v2301_v21 = vmul.f32 1.442695, %v11279_v57  ;;  %v11282_v7 = vsub.f32 %v11280_v5, %v11281_v12  ;;  %v3776_v50 = vpop.permute.xlu0 %3775  ;;  %v2307_v37 = vmul.f32 1.442695, %v11291_v27  ;;  %v3253_v22 = vpop.permute.xlu1 %3252  ;;  %v11299_v57 = vld [vmem:[#allocation82_spill] sm:$0xff] }
 0x8e0   : > { %7163 = vpow2.f32 %v3299_v34  ;;  %v3820_v53 = vsel %vm1184_vm3, %v3776_v50, 0 }
 0x8e1   : > { %1757 = vperm.xlu0 %7003, %v9505_v31   ;;  %7165 = vpow2.f32 %v3305_v1  ;;  %v2313_v14 = vmul.f32 1.442695, %v11282_v7  ;;  %v11287_v31 = vld [vmem:[#allocation93_spill] sm:$0xff]  ;;  %v3283_v1 = vsub.f32 %v9616_v11, %v3238_v8  ;;  %v11301_v7 = vld [vmem:[#allocation99_spill] sm:$0xff] }
 0x8e2   : > { %1752 = vperm.xlu1 %7004, %v9501_v59   ;;  %7167 = vpow2.f32 %v2309_v30  ;;  %v11286_v59 = vld [vmem:[#allocation91_spill] sm:$0xff]  ;;  %v2311_v30 = vmul.f32 1.442695, %v11297_v54  ;;  %v11310_v54 = vld [vmem:[#allocation88_spill] sm:$0xff] }
 0x8e3   : > { %7169 = vpow2.f32 %v2301_v21  ;;  %v11288_v43 = vsub.f32 %v11286_v59, %v11287_v31  ;;  %v11300_v21 = vsub.f32 %v11298_v42, %v11299_v57  ;;  %v3307_v29 = vmul.f32 1.442695, %v3283_v1 }
 0x8e4   : > { %7171 = vpow2.f32 %v2313_v14  ;;  %v11302_v14 = vld [vmem:[#allocation101_spill] sm:$0xff]  ;;  %v11314_v57 = vsub.f32 %v9669_v44, %v9682_v28 }
 0x8e5   : > { %1767 = vperm.xlu0 %7003, %v9513_v15   ;;  %6647 = vmatpush3.bf16.xpose.msra.mxu1 %v3826_v19  ;;  %v2317_v51 = vmul.f32 1.442695, %v11288_v43  ;;  %7173 = vpow2.f32 %v2305_v26  ;;  %v11292_v15 = vld [vmem:[#allocation87_spill] sm:$0xff]  ;;  %v2315_v5 = vmul.f32 1.442695, %v11300_v21  ;;  %v11303_v8 = vsub.f32 %v11301_v7, %v11302_v14 }
 0x8e6   : > { %1762 = vperm.xlu1 %7004, %v9509_v10   ;;  %6830 = vmatprep.subr.msk.bf16.mxu1 %vm1184_vm3, %v9865_v60  ;;  %v9918_v10 = vpop.eup %7157  ;;  %v11294_v32 = vsub.f32 %v11292_v15, %v11293_v2  ;;  %v11304_v43 = vld [vmem:[#allocation95_spill] sm:$0xff]  ;;  %v11307_v2 = vld [vmem:[#allocation92_spill] sm:$0xff]  ;;  %v3165_v21 = vmul.f32 1.442695, %v11314_v57 }
 0x8e7   : > { %7175 = vpow2.f32 %v2317_v51  ;;  %v9924_v34 = vpop.eup %7159  ;;  %v2325_v36 = vmul.f32 1.442695, %v11303_v8  ;;  %v11305_v51 = vld [vmem:[#allocation97_spill] sm:$0xff] }
 0x8e8   : > { %v2321_v63 = vmul.f32 1.442695, %v11294_v32  ;;  %7177 = vpow2.f32 %v2307_v37  ;;  %v11306_v13 = vsub.f32 %v11304_v43, %v11305_v51 }
 0x8e9   : > { %1777 = vperm.xlu0 %7003, %v9521_v61   ;;  %v3286_v61 = vsub.f32 %v9621_v4, %v3253_v22  ;;  %v9932_v6 = vpop.eup %7161  ;;  %v3285_v4 = vsub.f32 %v9609_v33, %v9886_v3 }
 0x8ea   : > { %1772 = vperm.xlu1 %7004, %v9517_v35   ;;  %v3823_v35 = vsel %vm1184_vm3, %v9865_v60, 0  ;;  %7179 = vpow2.f32 %v2321_v63  ;;  %v2329_v45 = vmul.f32 1.442695, %v11306_v13 }
 0x8eb   : > { %v3263_v12 = vpop.permute.xlu0 %3262  ;;  %7181 = vpow2.f32 %v2311_v30  ;;  %v3313_v19 = vmul.f32 1.442695, %v3286_v61  ;;  %v3311_v3 = vmul.f32 1.442695, %v3285_v4  ;;  %v11311_v30 = vld [vmem:[#allocation90_spill] sm:$0xff]  ;;  %v11316_v4 = vld [vmem:[#allocation55_spill] sm:$0xff] }
 0x8ec   : > { %7183 = vpow2.f32 %v2315_v5  ;;  %v3288_v27 = vsub.f32 %v9641_v18, %v3263_v12  ;;  %v11312_v61 = vsub.f32 %v11310_v54, %v11311_v30  ;;  %v11313_v18 = vld [vmem:[#allocation50_spill] sm:$0xff]  ;;  %v11315_v5 = vld [vmem:[#allocation103_spill] sm:$0xff] }
 0x8ed   : > { %2582 = vperm.xlu0 %7003, %v9918_v10   ;;  %6649 = vmatpush3.bf16.xpose.msra.mxu1 %v3823_v35  ;;  %v9938_v11 = vpop.eup %7163  ;;  %7185 = vpow2.f32 %v2325_v36 }
 0x8ee   : > { %1782 = vperm.xlu1 %7004, %v9525_v24   ;;  %6831 = vmatprep.subr.msk.bf16.mxu1 %vm1184_vm3, %v3776_v50  ;;  %v9947_v60 = vpop.eup %7165  ;;  %v3535_v47 = vpack.c.bf16 %v9924_v34, %v9938_v11  ;;  %7187 = vpow2.f32 %v3307_v29  ;;  %v2323_v35 = vmul.f32 1.442695, %v11312_v61  ;;  %v3317_v50 = vmul.f32 1.442695, %v3288_v27  ;;  %v11323_v61 = vld [vmem:[#allocation107_spill] sm:$0xff] }
 0x8ef   : > { %v9951_v26 = vpop.eup %7167  ;;  %v3536_v31 = vpack.c.bf16 %v9947_v60, %v9932_v6  ;;  %v3273_v37 = vpop.permute.xlu0 %3272  ;;  %7189 = vpow2.f32 %v3313_v19  ;;  %v11317_v19 = vld [vmem:[#allocation100_spill] sm:$0xff] }
 0x8f0   : > { %v3243_v59 = vpop.permute.xlu1 %3242  ;;  %v9955_v33 = vpop.eup %7169  ;;  %6632 = vmatprep.mubr.bf16.mxu1 %v3535_v47  ;;  %v3290_v12 = vsub.f32 %v11315_v5, %v3273_v37 }
 0x8f1   : > { %v3284_v24 = vsub.f32 %v9646_v56, %v3243_v59  ;;  %2597 = vperm.xlu0 %7003, %v9951_v26   ;;  %6633 = vmatmul.mubr.bf16.gmra.mxu1 %v3536_v31  ;;  %v9964_v15 = vpop.eup %7171  ;;  %v11308_v56 = vld [vmem:[#allocation94_spill] sm:$0xff] }
 0x8f2   : > { %2577 = vperm.xlu1 %7004, %v9955_v33   ;;  %v11309_v32 = vsub.f32 %v11307_v2, %v11308_v56  ;;  %v9970_v23 = vpop.eup %7173  ;;  %v3321_v44 = vmul.f32 1.442695, %v3290_v12  ;;  %v11318_v59 = vld [vmem:[#allocation102_spill] sm:$0xff] }
 0x8f3   : > { %v3309_v22 = vmul.f32 1.442695, %v3284_v24  ;;  %v11319_v31 = vsub.f32 %v11317_v19, %v11318_v59  ;;  %v3772_v43 = vpop.permute.xlu0 %3771  ;;  %v11321_v2 = vld [vmem:[#allocation98_spill] sm:$0xff]  ;;  %v11326_v19 = vld [vmem:[#allocation105_spill] sm:$0xff] }
 0x8f4   : > { %v2319_v63 = vmul.f32 1.442695, %v11309_v32  ;;  %v3268_v1 = vpop.permute.xlu1 %3267  ;;  %v9982_v7 = vpop.eup %7175  ;;  %v3814_v57 = vsel %vm1184_vm3, %v3772_v43, 0 }
 0x8f5   : > { %7191 = vpow2.f32 %v3309_v22  ;;  %v3289_v42 = vsub.f32 %v11313_v18, %v3268_v1  ;;  %2607 = vperm.xlu0 %7003, %v9964_v15   ;;  %6651 = vmatpush3.bf16.xpose.msra.mxu1 %v3820_v53  ;;  %v9984_v36 = vpop.eup %7177  ;;  %v2327_v24 = vmul.f32 1.442695, %v11319_v31  ;;  %v11320_v22 = vld [vmem:[#allocation96_spill] sm:$0xff] }
 0x8f6   : > { %7193 = vpow2.f32 %v3311_v3  ;;  %2587 = vperm.xlu1 %7004, %v9970_v23   ;;  %v11322_v56 = vsub.f32 %v11320_v22, %v11321_v2 }
 0x8f7   : > { %7195 = vpow2.f32 %v2329_v45  ;;  %v3319_v14 = vmul.f32 1.442695, %v3289_v42  ;;  %v9989_v47 = vpop.eup %7179 }
 0x8f8   : > { %7197 = vpow2.f32 %v2319_v63  ;;  %v3258_v8 = vpop.permute.xlu1 %3257  ;;  %v9994_v51 = vpop.eup %7181  ;;  %v2331_v32 = vmul.f32 1.442695, %v11322_v56 }
 0x8f9   : > { %7199 = vpow2.f32 %v2323_v35  ;;  %v3287_v29 = vsub.f32 %v11316_v4, %v3258_v8  ;;  %2617 = vperm.xlu0 %7003, %v9982_v7   ;;  %v9999_v45 = vpop.eup %7183  ;;  %v11324_v35 = vsub.f32 %v9654_v58, %v11323_v61  ;;  %v7047_v61 = vld [vmem:[#allocation2 + $0xd0] sm:$0xff]  }
 0x8fa   : > { %7201 = vpow2.f32 %v3165_v21  ;;  %2592 = vperm.xlu1 %7004, %v9984_v36   ;;  %v10002_v27 = vpop.eup %7185 }
 0x8fb   : > { %7203 = vpow2.f32 %v3317_v50  ;;  %v3315_v28 = vmul.f32 1.442695, %v3287_v29  ;;  %v10005_v37 = vpop.eup %7187  ;;  %v3163_v18 = vmul.f32 1.442695, %v11324_v35 }
 0x8fc   : > { %7205 = vpow2.f32 %v3319_v14  ;;  %v3774_v3 = vpop.permute.xlu1 %3773  ;;  %v10010_v63 = vpop.eup %7189 }
 0x8fd   : > { %7207 = vpow2.f32 %v3315_v28  ;;  %2627 = vperm.xlu0 %7003, %v9989_v47   ;;  %6832 = vmatprep.subr.msk.bf16.mxu1 %vm1184_vm3, %v3774_v3  ;;  %v3817_v13 = vsel %vm1184_vm3, %v3774_v3, 0  ;;  %v11325_v28 = vld [vmem:[#allocation104_spill] sm:$0xff] }
 0x8fe   : > { %7209 = vpow2.f32 %v3321_v44  ;;  %2602 = vperm.xlu1 %7004, %v9994_v51   ;;  %6653 = vmatpush3.bf16.xpose.msra.mxu1 %v3817_v13  ;;  %v7045_v44 = vld [vmem:[#allocation2 + $0xc0] sm:$0xff]   ;;  %v11327_v59 = vsub.f32 %v11325_v28, %v11326_v19  ;;  %v3768_v13 = vpop.permute.xlu0 %3767 }
 0x8ff   : > { %6833 = vmatprep.subr.msk.bf16.mxu1 %vm1184_vm3, %v3772_v43  ;;  %7211 = vpow2.f32 %v2327_v24  ;;  %v3808_v2 = vsel %vm1184_vm3, %v3768_v13, 0 }
 0x900   : > { %7213 = vpow2.f32 %v2331_v32  ;;  %v3770_v5 = vpop.permute.xlu1 %3769  ;;  %v3167_v31 = vmul.f32 1.442695, %v11327_v59  ;;  %v11328_v32 = vld [vmem:[#allocation29_spill] sm:$0xff] }
 0x901   : > { %2637 = vperm.xlu0 %7003, %v10002_v27   ;;  %7215 = vpow2.f32 %v3163_v18  ;;  %v3811_v3 = vsel %vm1184_vm3, %v3770_v5, 0  ;;  %v2462_v18 = vld [vmem:[#allocation4 + $0x80] sm:$0xff] }
 0x902   : > { %v10013_v1 = vpop.eup %7191  ;;  %2612 = vperm.xlu1 %7004, %v9999_v45   ;;  %7217 = vpow2.f32 %v3167_v31  ;;  %v2465_v31 = vld [vmem:[#allocation4 + $0x98] sm:$0xff] }
 0x903   : > { %v10016_v53 = vpop.eup %7193  ;;  %v3537_v54 = vpack.c.bf16 %v10013_v1, %v10005_v37 }
 0x904   : > { %v10020_v30 = vpop.eup %7195  ;;  %v3538_v42 = vpack.c.bf16 %v10010_v63, %v10016_v53 }
 0x905   : > { %v10028_v21 = vpop.eup %7197  ;;  %2647 = vperm.xlu0 %7003, %v10020_v30   ;;  %6636 = vmatprep.mubr.bf16.mxu1 %v3537_v54  ;;  %v7046_v54 = vld [vmem:[#allocation2 + $0xc8] sm:$0xff]  }
 0x906   : > { %v10031_v12 = vpop.eup %7199  ;;  %2622 = vperm.xlu1 %7004, %v10028_v21   ;;  %6637 = vmatmul.mubr.bf16.gmra.mxu1 %v3538_v42  ;;  %v7048_v42 = vld [vmem:[#allocation2 + $0xd8] sm:$0xff]  }
 0x907   : > { %v10034_v50 = vpop.eup %7201  ;;  %6655 = vmatpush3.bf16.xpose.msra.mxu1 %v3814_v57  ;;  %v2478_v57 = vmul.f32 %v9955_v33, %v2462_v18  ;;  %v2481_v33 = vmul.f32 %v9984_v36, %v2465_v31  ;;  %v2469_v18 = vld [vmem:[#allocation4 + $0xb8] sm:$0xff] }
 0x908   : > { %v10036_v58 = vpop.eup %7203  ;;  %6834 = vmatprep.subr.msk.bf16.mxu1 %vm1184_vm3, %v3770_v5  ;;  %v7049_v5 = vld [vmem:[#allocation2 + $0xe0] sm:$0xff]  }
 0x909   : > { %v10039_v14 = vpop.eup %7205  ;;  %3444 = vperm.xlu0 %7003, %v10034_v50  }
 0x90a   : > { %v10042_v8 = vpop.eup %7207  ;;  %2632 = vperm.xlu1 %7004, %v10031_v12  }
 0x90b   : > { %v10045_v4 = vpop.eup %7209  ;;  %v3539_v29 = vpack.c.bf16 %v10036_v58, %v10042_v8 }
 0x90c   : > { %v3540_v24 = vpack.c.bf16 %v10045_v4, %v10039_v14  ;;  %v10055_v43 = vpop.eup %7211 }
 0x90d   : > { %6640 = vmatprep.mubr.bf16.mxu1 %v3539_v29  ;;  %v10060_v22 = vpop.eup %7213 }
 0x90e   : > { %2642 = vperm.xlu1 %7004, %v10055_v43   ;;  %6641 = vmatmul.mubr.bf16.gmra.mxu1 %v3540_v24  ;;  %v10064_v56 = vpop.eup %7215 }
 0x90f   : > { %6657 = vmatpush3.bf16.xpose.msra.mxu1 %v3811_v3  ;;  %6660 = vmatprep.mubr.msk.bf16.mxu1 %vm1184_vm3, %v7045_v44  ;;  %v10069_v35 = vpop.eup %7217  ;;  %v2464_v44 = vld [vmem:[#allocation4 + $0x90] sm:$0xff]  ;;  %v7050_v3 = vld [vmem:[#allocation2 + $0xe8] sm:$0xff]  }
 0x910   : > { %6835 = vmatprep.subr.msk.bf16.mxu1 %vm1184_vm3, %v3768_v13  ;;  %v2480_v19 = vmul.f32 %v9970_v23, %v2464_v44  ;;  %v7051_v13 = vld [vmem:[#allocation2 + $0xf0] sm:$0xff]   ;;  %v2463_v23 = vld [vmem:[#allocation4 + $0x88] sm:$0xff]  ;;  %v2485_v44 = vmul.f32 %v9999_v45, %v2469_v18  ;;  %v2473_v45 = vld [vmem:[#allocation4 + $0xd8] sm:$0xff] }
 0x912   : > { %2652 = vperm.xlu1 %7004, %v10060_v22  }
 0x916   : > { %3439 = vperm.xlu1 %7004, %v10064_v56  }
 0x917   : > { %6659 = vmatpush3.bf16.xpose.msra.mxu1 %v3808_v2 }
 0x91a   : > { %4417 = vrot.lane.b32.xlu1 %v11328_v32, %s7711_s18  ;;  %v2467_v32 = vld [vmem:[#allocation4 + $0xa8] sm:$0xff] }
 0x91e   : > { %6661 = vmatmul.mubr.msk.bf16.vlgmr.msra.gmra.mxu1 %vm1184_vm3, %v7046_v54  ;;  %3449 = vperm.xlu1 %7004, %v10069_v35  }
 0x91f   : > { %6664 = vmatprep.mubr.msk.bf16.mxu1 %vm1184_vm3, %v7047_v61 }
 0x924   : > { %v2495_v29 = vpop.xlane.xlu0 %2494 }
 0x925   : > { %v2526_v28 = vadd.f32 %v2495_v29, %v2478_v57 }
 0x926   : > { %6665 = vmatmul.mubr.msk.bf16.gmra.mxu1 %vm1184_vm3, %v7048_v42  ;;  %v2479_v42 = vmul.f32 %v9918_v10, %v2463_v23 }
 0x927   : > { %2542 = vst.msk [vmem:[#allocation4 + $0x80] sm:$0xff] %vm1672_vm6, %v2526_v28  ;;  %6668 = vmatprep.mubr.msk.bf16.mxu1 %vm1184_vm3, %v7049_v5  ;;  %v2466_v5 = vld [vmem:[#allocation4 + $0xa0] sm:$0xff] }
 0x928   : > { %v2499_v59 = vpop.xlane.xlu0 %2498  ;;  %3360 = vadd.xlane.f32.xlu0 %v9873_v46  ;;  %v2483_v46 = vmul.f32 %v9994_v51, %v2467_v32  ;;  %v2471_v51 = vld [vmem:[#allocation4 + $0xc8] sm:$0xff]  ;;  %v2489_v32 = vmul.f32 %v10031_v12, %v2473_v45  ;;  %v2477_v12 = vld [vmem:[#allocation4 + $0xf8] sm:$0xff] }
 0x929   : > { %v2528_v24 = vadd.f32 %v2499_v59, %v2480_v19  ;;  %v2468_v59 = vld [vmem:[#allocation4 + $0xb0] sm:$0xff] }
 0x92b   : > { %2544 = vst.msk [vmem:[#allocation4 + $0x90] sm:$0xff] %vm1672_vm6, %v2528_v24  ;;  %v2487_v24 = vmul.f32 %v10028_v21, %v2471_v51  ;;  %v2475_v21 = vld [vmem:[#allocation4 + $0xe8] sm:$0xff] }
 0x92c   : > { %v2501_v2 = vpop.xlane.xlu0 %2500  ;;  %3356 = vadd.xlane.f32.xlu0 %v9857_v55  ;;  %v7052_v55 = vld [vmem:[#allocation2 + $0xf8] sm:$0xff]   ;;  %v2491_v18 = vmul.f32 %v10055_v43, %v2475_v21 }
 0x92d   : > { %v2529_v54 = vadd.f32 %v2501_v2, %v2481_v33  ;;  %v2484_v33 = vmul.f32 %v9964_v15, %v2468_v59  ;;  %v11329_v59 = vld [vmem:[#allocation54_spill] sm:$0xff] }
 0x92e   : > { %6669 = vmatmul.mubr.msk.bf16.gmra.mxu1 %vm1184_vm3, %v7050_v3 }
 0x92f   : > { %2545 = vst.msk [vmem:[#allocation4 + $0x98] sm:$0xff] %vm1672_vm6, %v2529_v54  ;;  %6672 = vmatprep.mubr.msk.bf16.mxu1 %vm1184_vm3, %v7051_v13 }
 0x930   : > { %v2505_v61 = vpop.xlane.xlu0 %2504  ;;  %3362 = vadd.xlane.f32.xlu0 %v9869_v49  ;;  %v2482_v49 = vmul.f32 %v9951_v26, %v2466_v5  ;;  %v2470_v26 = vld [vmem:[#allocation4 + $0xc0] sm:$0xff]  ;;  %v2493_v5 = vmul.f32 %v10060_v22, %v2477_v12  ;;  %v11334_v12 = vld [vmem:[#allocation61_spill] sm:$0xff] }
 0x931   : > { %v2531_v36 = vadd.f32 %v2505_v61, %v2483_v46  ;;  %v2486_v23 = vmul.f32 %v9982_v7, %v2470_v26  ;;  %v2472_v61 = vld [vmem:[#allocation4 + $0xd0] sm:$0xff]  ;;  %v2474_v7 = vld [vmem:[#allocation4 + $0xe0] sm:$0xff] }
 0x932   : > { %v2497_v57 = vpop.xlane.xlu1 %2496  ;;  %v2490_v43 = vmul.f32 %v10002_v27, %v2474_v7  ;;  %v1690_v27 = vld [vmem:[#allocation5 + $0x8] sm:$0xff]  ;;  %v1699_v7 = vld [vmem:[#allocation5 + $0x50] sm:$0xff] }
 0x933   : > { %2547 = vst.msk [vmem:[#allocation4 + $0xa8] sm:$0xff] %vm1672_vm6, %v2531_v36  ;;  %v2527_v29 = vadd.f32 %v2497_v57, %v2479_v42  ;;  %v2488_v42 = vmul.f32 %v9989_v47, %v2472_v61 }
 0x934   : > { %v2509_v28 = vpop.xlane.xlu0 %2508  ;;  %3370 = vadd.xlane.f32.xlu0 %v9947_v60 }
 0x935   : > { %2543 = vst.msk [vmem:[#allocation4 + $0x88] sm:$0xff] %vm1672_vm6, %v2527_v29  ;;  %v2533_v19 = vadd.f32 %v2509_v28, %v2485_v44  ;;  %v2476_v44 = vld [vmem:[#allocation4 + $0xf0] sm:$0xff] }
 0x936   : > { %6673 = vmatmul.mubr.msk.bf16.gmra.mxu1 %vm1184_vm3, %v7052_v55  ;;  %v2503_v10 = vpop.xlane.xlu1 %2502  ;;  %v2492_v22 = vmul.f32 %v10020_v30, %v2476_v44  ;;  %v1691_v28 = vld [vmem:[#allocation5 + $0x10] sm:$0xff] }
 0x937   : > { %2549 = vst.msk [vmem:[#allocation4 + $0xb8] sm:$0xff] %vm1672_vm6, %v2533_v19  ;;  %v2530_v31 = vadd.f32 %v2503_v10, %v2482_v49  ;;  %v1693_v10 = vld [vmem:[#allocation5 + $0x20] sm:$0xff] }
 0x938   : > { %v2513_v3 = vpop.xlane.xlu0 %2512  ;;  %3366 = vadd.xlane.f32.xlu0 %v9924_v34 }
 0x939   : > { %2546 = vst.msk [vmem:[#allocation4 + $0xa0] sm:$0xff] %vm1672_vm6, %v2530_v31  ;;  %v2535_v60 = vadd.f32 %v2513_v3, %v2487_v24  ;;  %v1692_v3 = vld [vmem:[#allocation5 + $0x18] sm:$0xff] }
 0x93a   : > { %v2507_v13 = vpop.xlane.xlu1 %2506 }
 0x93b   : > { %2551 = vst.msk [vmem:[#allocation4 + $0xc8] sm:$0xff] %vm1672_vm6, %v2535_v60  ;;  %v2532_v2 = vadd.f32 %v2507_v13, %v2484_v33  ;;  %v1695_v33 = vld [vmem:[#allocation5 + $0x30] sm:$0xff]  ;;  %v11331_v13 = vld [vmem:[#allocation59_spill] sm:$0xff] }
 0x93c   : > { %v2517_v54 = vpop.xlane.xlu0 %2516  ;;  %3378 = vadd.xlane.f32.xlu0 %v10010_v63 }
 0x93d   : > { %2548 = vst.msk [vmem:[#allocation4 + $0xb0] sm:$0xff] %vm1672_vm6, %v2532_v2  ;;  %v2537_v34 = vadd.f32 %v2517_v54, %v2489_v32  ;;  %v1694_v32 = vld [vmem:[#allocation5 + $0x28] sm:$0xff]  ;;  %v11332_v54 = vld [vmem:[#allocation56_spill] sm:$0xff] }
 0x93e   : > { %v2511_v46 = vpop.xlane.xlu1 %2510 }
 0x93f   : > { %2553 = vst.msk [vmem:[#allocation4 + $0xd8] sm:$0xff] %vm1672_vm6, %v2537_v34  ;;  %v2534_v15 = vadd.f32 %v2511_v46, %v2486_v23  ;;  %v1697_v46 = vld [vmem:[#allocation5 + $0x40] sm:$0xff] }
 0x940   : > { %v2521_v36 = vpop.xlane.xlu0 %2520  ;;  %3374 = vadd.xlane.f32.xlu0 %v10013_v1 }
 0x941   : > { %2550 = vst.msk [vmem:[#allocation4 + $0xc0] sm:$0xff] %vm1672_vm6, %v2534_v15  ;;  %v2539_v63 = vadd.f32 %v2521_v36, %v2491_v18  ;;  %v1696_v36 = vld [vmem:[#allocation5 + $0x38] sm:$0xff] }
 0x942   : > { %3358 = vadd.xlane.f32.xlu1 %v9859_v20  ;;  %v2515_v57 = vpop.xlane.xlu1 %2514 }
 0x943   : > { %2555 = vst.msk [vmem:[#allocation4 + $0xe8] sm:$0xff] %vm1672_vm6, %v2539_v63  ;;  %v2536_v55 = vadd.f32 %v2515_v57, %v2488_v42 }
 0x944   : > { %v2525_v29 = vpop.xlane.xlu0 %2524  ;;  %3386 = vadd.xlane.f32.xlu0 %v10045_v4 }
 0x945   : > { %2552 = vst.msk [vmem:[#allocation4 + $0xd0] sm:$0xff] %vm1672_vm6, %v2536_v55  ;;  %v2541_v1 = vadd.f32 %v2525_v29, %v2493_v5 }
 0x946   : > { %3368 = vadd.xlane.f32.xlu1 %v9932_v6  ;;  %v2519_v47 = vpop.xlane.xlu1 %2518 }
 0x947   : > { %2557 = vst.msk [vmem:[#allocation4 + $0xf8] sm:$0xff] %vm1672_vm6, %v2541_v1  ;;  %v2538_v20 = vadd.f32 %v2519_v47, %v2490_v43  ;;  %v1698_v1 = vld [vmem:[#allocation5 + $0x48] sm:$0xff]  ;;  %v11336_v43 = vld [vmem:[#allocation60_spill] sm:$0xff] }
 0x948   : > { %3382 = vadd.xlane.f32.xlu0 %v10036_v58 }
 0x949   : > { %2554 = vst.msk [vmem:[#allocation4 + $0xe0] sm:$0xff] %vm1672_vm6, %v2538_v20 }
 0x94a   : > { %3364 = vadd.xlane.f32.xlu1 %v9938_v11  ;;  %v2523_v4 = vpop.xlane.xlu1 %2522  ;;  %v11330_v11 = vld [vmem:[#allocation57_spill] sm:$0xff] }
 0x94b   : > { %v2540_v51 = vadd.f32 %v2523_v4, %v2492_v22  ;;  %v1701_v22 = vld [vmem:[#allocation5 + $0x60] sm:$0xff]  ;;  %v11337_v4 = vld [vmem:[#allocation62_spill] sm:$0xff] }
 0x94c   : > { %v1718_v19 = vpop.permute.xlu0 %1717 }
 0x94d   : > { %2556 = vst.msk [vmem:[#allocation4 + $0xf0] sm:$0xff] %vm1672_vm6, %v2540_v51  ;;  %v1787_v6 = vmul.f32 %v1718_v19, %v1691_v28  ;;  %v1700_v19 = vld [vmem:[#allocation5 + $0x58] sm:$0xff] }
 0x94e   : > { %3376 = vadd.xlane.f32.xlu1 %v10016_v53  ;;  %v1713_v49 = vpop.permute.xlu1 %1712 }
 0x94f   : > { %v1940_v58 = vadd.f32 %v11329_v59, %v1787_v6  ;;  %v1786_v31 = vmul.f32 %v1713_v49, %v1690_v27  ;;  %v11338_v27 = vld [vmem:[#allocation65_spill] sm:$0xff]  ;;  %v1703_v59 = vld [vmem:[#allocation5 + $0x70] sm:$0xff] }
 0x950   : > { %v1728_v24 = vpop.permute.xlu0 %1727 }
 0x951   : > { %1956 = vst.msk [vmem:[#allocation5 + $0x10] sm:$0xff] %vm1184_vm3, %v1940_v58  ;;  %v1939_v30 = vadd.f32 %v11330_v11, %v1786_v31  ;;  %v1789_v45 = vmul.f32 %v1728_v24, %v1693_v10  ;;  %v11339_v58 = vld [vmem:[#allocation67_spill] sm:$0xff]  ;;  %v1702_v11 = vld [vmem:[#allocation5 + $0x68] sm:$0xff] }
 0x952   : > { %3372 = vadd.xlane.f32.xlu1 %v10005_v37  ;;  %v1723_v60 = vpop.permute.xlu1 %1722  ;;  %v11333_v37 = vld [vmem:[#allocation58_spill] sm:$0xff] }
 0x953   : > { %1955 = vst.msk [vmem:[#allocation5 + $0x8] sm:$0xff] %vm1184_vm3, %v1939_v30  ;;  %v1942_v53 = vadd.f32 %v11331_v13, %v1789_v45  ;;  %v1788_v26 = vmul.f32 %v1723_v60, %v1692_v3  ;;  %v11340_v30 = vld [vmem:[#allocation64_spill] sm:$0xff]  ;;  %v2560_v13 = vld [vmem:[#allocation5 + $0x88] sm:$0xff] }
 0x954   : > { %v1738_v2 = vpop.permute.xlu0 %1737 }
 0x955   : > { %1958 = vst.msk [vmem:[#allocation5 + $0x20] sm:$0xff] %vm1184_vm3, %v1942_v53  ;;  %v1941_v21 = vadd.f32 %v11332_v54, %v1788_v26  ;;  %v1791_v34 = vmul.f32 %v1738_v2, %v1695_v33  ;;  %v11341_v53 = vld [vmem:[#allocation66_spill] sm:$0xff]  ;;  %v1704_v54 = vld [vmem:[#allocation5 + $0x78] sm:$0xff] }
 0x956   : > { %3384 = vadd.xlane.f32.xlu1 %v10039_v14  ;;  %v1733_v23 = vpop.permute.xlu1 %1732  ;;  %v11335_v14 = vld [vmem:[#allocation63_spill] sm:$0xff] }
 0x957   : > { %1957 = vst.msk [vmem:[#allocation5 + $0x18] sm:$0xff] %vm1184_vm3, %v1941_v21  ;;  %v1944_v61 = vadd.f32 %v11333_v37, %v1791_v34  ;;  %v1790_v15 = vmul.f32 %v1733_v23, %v1694_v32  ;;  %v11342_v21 = vld [vmem:[#allocation69_spill] sm:$0xff]  ;;  %v2563_v37 = vld [vmem:[#allocation5 + $0xa0] sm:$0xff] }
 0x958   : > { %v1748_v18 = vpop.permute.xlu0 %1747 }
 0x959   : > { %1960 = vst.msk [vmem:[#allocation5 + $0x30] sm:$0xff] %vm1184_vm3, %v1944_v61  ;;  %v1943_v63 = vadd.f32 %v11334_v12, %v1790_v15  ;;  %v1793_v42 = vmul.f32 %v1748_v18, %v1697_v46  ;;  %v11343_v61 = vld [vmem:[#allocation43_spill] sm:$0xff]  ;;  %v2559_v12 = vld [vmem:[#allocation5 + $0x80] sm:$0xff] }
 0x95a   : > { %3380 = vadd.xlane.f32.xlu1 %v10042_v8  ;;  %v1743_v57 = vpop.permute.xlu1 %1742 }
 0x95b   : > { %1959 = vst.msk [vmem:[#allocation5 + $0x28] sm:$0xff] %vm1184_vm3, %v1943_v63  ;;  %v1946_v55 = vadd.f32 %v11335_v14, %v1793_v42  ;;  %v1792_v5 = vmul.f32 %v1743_v57, %v1696_v36  ;;  %v11344_v63 = vld [vmem:[#allocation68_spill] sm:$0xff]  ;;  %v2565_v14 = vld [vmem:[#allocation5 + $0xb0] sm:$0xff] }
 0x95c   : > { %v1758_v29 = vpop.permute.xlu0 %1757 }
 0x95d   : > { %1962 = vst.msk [vmem:[#allocation5 + $0x40] sm:$0xff] %vm1184_vm3, %v1946_v55  ;;  %v1945_v47 = vadd.f32 %v11336_v43, %v1792_v5  ;;  %v1795_v44 = vmul.f32 %v1758_v29, %v1699_v7  ;;  %v11345_v55 = vld [vmem:[#allocation38_spill] sm:$0xff] }
 0x95e   : > { %v1753_v20 = vpop.permute.xlu1 %1752  ;;  %v2561_v43 = vld [vmem:[#allocation5 + $0x90] sm:$0xff] }
 0x95f   : > { %1961 = vst.msk [vmem:[#allocation5 + $0x38] sm:$0xff] %vm1184_vm3, %v1945_v47  ;;  %v1948_v8 = vadd.f32 %v11337_v4, %v1795_v44  ;;  %v1794_v28 = vmul.f32 %v1753_v20, %v1698_v1  ;;  %v11346_v47 = vld [vmem:[#allocation41_spill] sm:$0xff]  ;;  %v2567_v4 = vld [vmem:[#allocation5 + $0xc0] sm:$0xff] }
 0x960   : > { %v1768_v51 = vpop.permute.xlu0 %1767 }
 0x961   : > { %1964 = vst.msk [vmem:[#allocation5 + $0x50] sm:$0xff] %vm1184_vm3, %v1948_v8  ;;  %v1947_v6 = vadd.f32 %v11338_v27, %v1794_v28  ;;  %v1797_v49 = vmul.f32 %v1768_v51, %v1701_v22  ;;  %v11347_v8 = vld [vmem:[#allocation46_spill] sm:$0xff]  ;;  %v2562_v27 = vld [vmem:[#allocation5 + $0x98] sm:$0xff] }
 0x962   : > { %v1763_v10 = vpop.permute.xlu1 %1762 }
 0x963   : > { %1963 = vst.msk [vmem:[#allocation5 + $0x48] sm:$0xff] %vm1184_vm3, %v1947_v6  ;;  %v1950_v31 = vadd.f32 %v11339_v58, %v1797_v49  ;;  %v1796_v24 = vmul.f32 %v1763_v10, %v1700_v19  ;;  %v11348_v6 = vld [vmem:[#allocation37_spill] sm:$0xff]  ;;  %v2569_v58 = vld [vmem:[#allocation5 + $0xd0] sm:$0xff] }
 0x964   : > { %v1778_v3 = vpop.permute.xlu0 %1777 }
 0x965   : > { %1966 = vst.msk [vmem:[#allocation5 + $0x60] sm:$0xff] %vm1184_vm3, %v1950_v31  ;;  %v1949_v45 = vadd.f32 %v11340_v30, %v1796_v24  ;;  %v1799_v60 = vmul.f32 %v1778_v3, %v1703_v59  ;;  %v11349_v31 = vld [vmem:[#allocation49_spill] sm:$0xff] }
 0x966   : > { %v1773_v33 = vpop.permute.xlu1 %1772  ;;  %v2564_v30 = vld [vmem:[#allocation5 + $0xa8] sm:$0xff] }
 0x967   : > { %1965 = vst.msk [vmem:[#allocation5 + $0x58] sm:$0xff] %vm1184_vm3, %v1949_v45  ;;  %v1952_v26 = vadd.f32 %v11341_v53, %v1799_v60  ;;  %v1798_v2 = vmul.f32 %v1773_v33, %v1702_v11  ;;  %v11350_v45 = vld [vmem:[#allocation44_spill] sm:$0xff] }
 0x968   : > { %v2583_v32 = vpop.permute.xlu0 %2582  ;;  %v2571_v53 = vld [vmem:[#allocation5 + $0xe0] sm:$0xff] }
 0x969   : > { %1968 = vst.msk [vmem:[#allocation5 + $0x70] sm:$0xff] %vm1184_vm3, %v1952_v26  ;;  %v1951_v34 = vadd.f32 %v11342_v21, %v1798_v2  ;;  %v2656_v23 = vmul.f32 %v2583_v32, %v2560_v13  ;;  %v11351_v26 = vld [vmem:[#allocation42_spill] sm:$0xff]  ;;  %v2566_v21 = vld [vmem:[#allocation5 + $0xb8] sm:$0xff] }
 0x96a   : > { %v1783_v46 = vpop.permute.xlu1 %1782 }
 0x96b   : > { %1967 = vst.msk [vmem:[#allocation5 + $0x68] sm:$0xff] %vm1184_vm3, %v1951_v34  ;;  %v2801_v15 = vadd.f32 %v11343_v61, %v2656_v23  ;;  %v1800_v18 = vmul.f32 %v1783_v46, %v1704_v54  ;;  %v11352_v34 = vld [vmem:[#allocation39_spill] sm:$0xff]  ;;  %v2573_v61 = vld [vmem:[#allocation5 + $0xf0] sm:$0xff] }
 0x96c   : > { %v2598_v36 = vpop.permute.xlu0 %2597 }
 0x96d   : > { %2817 = vst.msk [vmem:[#allocation5 + $0x88] sm:$0xff] %vm1184_vm3, %v2801_v15  ;;  %v1953_v42 = vadd.f32 %v11344_v63, %v1800_v18  ;;  %v2659_v57 = vmul.f32 %v2598_v36, %v2563_v37  ;;  %v11353_v15 = vld [vmem:[#allocation45_spill] sm:$0xff] }
 0x96e   : > { %v2578_v7 = vpop.permute.xlu1 %2577  ;;  %v2568_v63 = vld [vmem:[#allocation5 + $0xc8] sm:$0xff] }
 0x96f   : > { %1969 = vst.msk [vmem:[#allocation5 + $0x78] sm:$0xff] %vm1184_vm3, %v1953_v42  ;;  %v2804_v5 = vadd.f32 %v11345_v55, %v2659_v57  ;;  %v2655_v29 = vmul.f32 %v2578_v7, %v2559_v12  ;;  %v11354_v42 = vld [vmem:[#allocation40_spill] sm:$0xff]  ;;  %v11355_v55 = vld [vmem:[#allocation53_spill] sm:$0xff] }
 0x970   : > { %v2608_v1 = vpop.permute.xlu0 %2607 }
 0x971   : > { %2820 = vst.msk [vmem:[#allocation5 + $0xa0] sm:$0xff] %vm1184_vm3, %v2804_v5  ;;  %v2800_v44 = vadd.f32 %v11346_v47, %v2655_v29  ;;  %v2661_v20 = vmul.f32 %v2608_v1, %v2565_v14  ;;  %v2570_v1 = vld [vmem:[#allocation5 + $0xd8] sm:$0xff] }
 0x972   : > { %v2588_v22 = vpop.permute.xlu1 %2587 }
 0x973   : > { %2816 = vst.msk [vmem:[#allocation5 + $0x80] sm:$0xff] %vm1184_vm3, %v2800_v44  ;;  %v2806_v28 = vadd.f32 %v11347_v8, %v2661_v20  ;;  %v2657_v51 = vmul.f32 %v2588_v22, %v2561_v43  ;;  %v11356_v43 = vld [vmem:[#allocation51_spill] sm:$0xff]  ;;  %v2572_v22 = vld [vmem:[#allocation5 + $0xe8] sm:$0xff] }
 0x974   : > { %v2618_v19 = vpop.permute.xlu0 %2617 }
 0x975   : > { %2822 = vst.msk [vmem:[#allocation5 + $0xb0] sm:$0xff] %vm1184_vm3, %v2806_v28  ;;  %v2802_v49 = vadd.f32 %v11348_v6, %v2657_v51  ;;  %v2663_v10 = vmul.f32 %v2618_v19, %v2567_v4  ;;  %v11357_v4 = vld [vmem:[#allocation52_spill] sm:$0xff]  ;;  %v2574_v19 = vld [vmem:[#allocation5 + $0xf8] sm:$0xff] }
 0x976   : > { %v2593_v59 = vpop.permute.xlu1 %2592 }
 0x977   : > { %2818 = vst.msk [vmem:[#allocation5 + $0x90] sm:$0xff] %vm1184_vm3, %v2802_v49  ;;  %v2808_v24 = vadd.f32 %v11349_v31, %v2663_v10  ;;  %v2658_v3 = vmul.f32 %v2593_v59, %v2562_v27  ;;  %v11358_v27 = vld [vmem:[#allocation47_spill] sm:$0xff]  ;;  %v11359_v59 = vld [vmem:[#allocation48_spill] sm:$0xff] }
 0x978   : > { %v2628_v11 = vpop.permute.xlu0 %2627 }
 0x979   : > { %2824 = vst.msk [vmem:[#allocation5 + $0xc0] sm:$0xff] %vm1184_vm3, %v2808_v24  ;;  %v2803_v60 = vadd.f32 %v11350_v45, %v2658_v3  ;;  %v2665_v33 = vmul.f32 %v2628_v11, %v2569_v58  ;;  %v3423_v3 = vld [vmem:[#allocation5 + $0x110] sm:$0xff]  ;;  %v3421_v11 = vld [vmem:[#allocation5 + $0x100] sm:$0xff] }
 0x97a   : > { %v2603_v13 = vpop.permute.xlu1 %2602 }
 0x97b   : > { %2819 = vst.msk [vmem:[#allocation5 + $0x98] sm:$0xff] %vm1184_vm3, %v2803_v60  ;;  %v2810_v2 = vadd.f32 %v11351_v26, %v2665_v33  ;;  %v2660_v32 = vmul.f32 %v2603_v13, %v2564_v30 }
 0x97c   : > { %v2638_v54 = vpop.permute.xlu0 %2637 }
 0x97d   : > { %2826 = vst.msk [vmem:[#allocation5 + $0xd0] sm:$0xff] %vm1184_vm3, %v2810_v2  ;;  %v2805_v23 = vadd.f32 %v11352_v34, %v2660_v32  ;;  %v2667_v46 = vmul.f32 %v2638_v54, %v2571_v53  ;;  %v3422_v53 = vld [vmem:[#allocation5 + $0x108] sm:$0xff] }
 0x97e   : > { %v2613_v37 = vpop.permute.xlu1 %2612 }
 0x97f   : > { %2821 = vst.msk [vmem:[#allocation5 + $0xa8] sm:$0xff] %vm1184_vm3, %v2805_v23  ;;  %v2812_v18 = vadd.f32 %v11353_v15, %v2667_v46  ;;  %v2662_v36 = vmul.f32 %v2613_v37, %v2566_v21  ;;  %v11361_v46 = vld [vmem:[#allocation106_spill] sm:$0xff]  ;;  %v11362_v37 = vld [vmem:[#allocation108_spill] sm:$0xff] }
 0x980   : > { %v2648_v12 = vpop.permute.xlu0 %2647 }
 0x981   : > { %2828 = vst.msk [vmem:[#allocation5 + $0xe0] sm:$0xff] %vm1184_vm3, %v2812_v18  ;;  %v2807_v57 = vadd.f32 %v11354_v42, %v2662_v36  ;;  %v2669_v7 = vmul.f32 %v2648_v12, %v2573_v61  ;;  %v11363_v61 = vsub.f32 %v11361_v46, %v11362_v37  ;;  %v11364_v18 = vld [vmem:[#allocation113_spill] sm:$0xff]  ;;  %v11365_v36 = vld [vmem:[#allocation114_spill] sm:$0xff]  ;;  %v11367_v42 = vld [vmem:[#allocation115_spill] sm:$0xff] }
 0x982   : > { %v2623_v14 = vpop.permute.xlu1 %2622  ;;  %v11366_v12 = vsub.f32 %v11364_v18, %v11365_v36  ;;  %v11386_v18 = vld [vmem:[#allocation118_spill] sm:$0xff] }
 0x983   : > { %2823 = vst.msk [vmem:[#allocation5 + $0xb8] sm:$0xff] %vm1184_vm3, %v2807_v57  ;;  %v2814_v5 = vadd.f32 %v11355_v55, %v2669_v7  ;;  %v2664_v29 = vmul.f32 %v2623_v14, %v2568_v63  ;;  %v3169_v15 = vmul.f32 1.442695, %v11363_v61  ;;  %v11368_v57 = vsub.f32 %v11367_v42, %v9733_v62  ;;  %v3326_v14 = vld [vmem:[#allocation4 + $0x110] sm:$0xff]  ;;  %v11369_v55 = vld [vmem:[#allocation119_spill] sm:$0xff]  ;;  %v3333_v61 = vld [vmem:[#allocation4 + $0x148] sm:$0xff] }
 0x984   : > { %v3445_v26 = vpop.permute.xlu0 %3444  ;;  %v3177_v63 = vmul.f32 1.442695, %v11366_v12 }
 0x985   : > { %2830 = vst.msk [vmem:[#allocation5 + $0xf0] sm:$0xff] %vm1184_vm3, %v2814_v5  ;;  %v2809_v47 = vadd.f32 %v11356_v43, %v2664_v29  ;;  %v3518_v21 = vmul.f32 %v3445_v26, %v3422_v53  ;;  %7219 = vpow2.f32 %v3169_v15  ;;  %v3173_v7 = vmul.f32 1.442695, %v11368_v57  ;;  %v11381_v53 = vld [vmem:[#allocation78_spill] sm:$0xff]  ;;  %v11382_v26 = vld [vmem:[#allocation116_spill] sm:$0xff]  ;;  %v11385_v15 = vld [vmem:[#allocation117_spill] sm:$0xff] }
 0x986   : > { %v2633_v44 = vpop.permute.xlu1 %2632  ;;  %7221 = vpow2.f32 %v3177_v63  ;;  %v11370_v5 = vsub.f32 %v9759_v48, %v11369_v55  ;;  %v11387_v36 = vsub.f32 %v11385_v15, %v11386_v18  ;;  %v3325_v57 = vld [vmem:[#allocation4 + $0x108] sm:$0xff]  ;;  %v3338_v18 = vld [vmem:[#allocation4 + $0x170] sm:$0xff] }
 0x987   : > { %2825 = vst.msk [vmem:[#allocation5 + $0xc8] sm:$0xff] %vm1184_vm3, %v2809_v47  ;;  %v2666_v20 = vmul.f32 %v2633_v44, %v2570_v1  ;;  %7223 = vpow2.f32 %v3173_v7  ;;  %v3342_v1 = vmul.f32 %v10069_v35, %v3326_v14  ;;  %v3324_v47 = vld [vmem:[#allocation4 + $0x100] sm:$0xff]  ;;  %v11371_v35 = vsub.f32 %v9793_v52, %v9800_v16 }
 0x988   : > { %v3185_v29 = vmul.f32 1.442695, %v11370_v5  ;;  %v3340_v62 = vmul.f32 %v10064_v56, %v3324_v47  ;;  %v3331_v56 = vld [vmem:[#allocation4 + $0x138] sm:$0xff]  ;;  %v3189_v52 = vmul.f32 1.442695, %v3160_v41 }
 0x989   : > { %v2811_v8 = vadd.f32 %v11357_v4, %v2666_v20  ;;  %v3181_v20 = vmul.f32 1.442695, %v3156_v17  ;;  %v3179_v12 = vmul.f32 1.442695, %v11387_v36 }
 0x98a   : > { %v2643_v28 = vpop.permute.xlu1 %2642  ;;  %7225 = vpow2.f32 %v3185_v29  ;;  %v3339_v29 = vld [vmem:[#allocation4 + $0x178] sm:$0xff] }
 0x98b   : > { %2827 = vst.msk [vmem:[#allocation5 + $0xd8] sm:$0xff] %vm1184_vm3, %v2811_v8  ;;  %v2668_v51 = vmul.f32 %v2643_v28, %v2572_v22  ;;  %v3327_v8 = vld [vmem:[#allocation4 + $0x118] sm:$0xff]  ;;  %v3193_v28 = vmul.f32 1.442695, %v11371_v35  ;;  %7227 = vpow2.f32 %v3181_v20 }
 0x98d   : > { %v2813_v6 = vadd.f32 %v11358_v27, %v2668_v51  ;;  %v11374_v27 = vld [vmem:[#allocation110_spill] sm:$0xff]  ;;  %7229 = vpow2.f32 %v3193_v28 }
 0x98e   : > { %v2653_v49 = vpop.permute.xlu1 %2652 }
 0x98f   : > { %2829 = vst.msk [vmem:[#allocation5 + $0xe8] sm:$0xff] %vm1184_vm3, %v2813_v6  ;;  %v2670_v10 = vmul.f32 %v2653_v49, %v2574_v19  ;;  %v11373_v19 = vld [vmem:[#allocation109_spill] sm:$0xff] }
 0x990   : > { %v11375_v6 = vsub.f32 %v11373_v19, %v11374_v27  ;;  %v11394_v19 = vld [vmem:[#allocation121_spill] sm:$0xff] }
 0x991   : > { %v2815_v58 = vadd.f32 %v11359_v59, %v2670_v10  ;;  %v11395_v27 = vsub.f32 %v11394_v19, %v9791_v25 }
 0x992   : > { %v3440_v31 = vpop.permute.xlu1 %3439  ;;  %v10212_v22 = vpop.eup %7219  ;;  %v3175_v49 = vmul.f32 1.442695, %v11375_v6 }
 0x993   : > { %2831 = vst.msk [vmem:[#allocation5 + $0xf8] sm:$0xff] %vm1184_vm3, %v2815_v58  ;;  %v3517_v33 = vmul.f32 %v3440_v31, %v3421_v11  ;;  %v3343_v0 = vmul.f32 %v10212_v22, %v3327_v8  ;;  %v10221_v38 = vpop.eup %7221  ;;  %v11378_v11 = vld [vmem:[#allocation112_spill] sm:$0xff] }
 0x994   : > { %v3347_v59 = vmul.f32 %v10221_v38, %v3331_v56  ;;  %v10233_v58 = vpop.eup %7223  ;;  %7231 = vpow2.f32 %v3175_v49  ;;  %v3337_v56 = vld [vmem:[#allocation4 + $0x168] sm:$0xff] }
 0x995   : > { %7233 = vpow2.f32 %v3189_v52 }
 0x996   : > { %v4418_v24 = vpop.permute.xlu1 %4417 }
 0x997   : > { %6676 = vmatprep.subr.bf16.mxu0 %v4418_v24  ;;  %v10242_v9 = vpop.eup %7225 }
 0x998   : > { %6677 = vmatpush3.bf16.msra.mxu0 %v4418_v24  ;;  %v3329_v24 = vld [vmem:[#allocation4 + $0x128] sm:$0xff]  ;;  %v10251_v46 = vpop.eup %7227 }
 0x999   : > { %v3345_v40 = vmul.f32 %v10233_v58, %v3329_v24  ;;  %v3349_v14 = vmul.f32 %v10251_v46, %v3333_v61 }
 0x99a   : > { %v3450_v30 = vpop.permute.xlu1 %3449  ;;  %v10262_v55 = vpop.eup %7229 }
 0x99b   : > { %v3519_v45 = vmul.f32 %v3450_v30, %v3423_v3  ;;  %v11377_v3 = vld [vmem:[#allocation111_spill] sm:$0xff] }
 0x99c   : > { %v6630_v60 = vpop.f32.mrf.mxu1  ;;  %v11379_v30 = vsub.f32 %v11377_v3, %v11378_v11 }
 0x99d   : > { %v3664_v13 = vadd.f32 %v6630_v60, %v3519_v45 }
 0x99e   : > { %v3599_v2 = vpop.f32.mrf.mxu1  ;;  %v3171_v45 = vmul.f32 1.442695, %v11379_v30 }
 0x99f   : > { %3680 = vst.msk [vmem:[#allocation5 + $0x110] sm:$0xff] %vm1184_vm3, %v3664_v13  ;;  %v3662_v32 = vadd.f32 %v3599_v2, %v3517_v33  ;;  %v3335_v13 = vld [vmem:[#allocation4 + $0x158] sm:$0xff]  ;;  %v11383_v2 = vsub.f32 %v11381_v53, %v11382_v26 }
 0x9a0   : > { %v10190_v54 = vpop.f32.mrf.mxu1  ;;  %7235 = vpow2.f32 %v3171_v45 }
 0x9a1   : > { %11360 = vst [vmem:[#allocation75_spill] sm:$0xff] %v10190_v54  ;;  %3678 = vst.msk [vmem:[#allocation5 + $0x100] sm:$0xff] %vm1184_vm3, %v3662_v32  ;;  %v3183_v32 = vmul.f32 1.442695, %v11383_v2  ;;  %v10522_v54 = vld [vmem:[#allocation3 + $0x1e8] sm:$0xff] }
 0x9a2   : > { %v3602_v34 = vpop.f32.mrf.mxu1 }
 0x9a3   : > { %v3663_v23 = vadd.f32 %v3602_v34, %v3518_v21  ;;  %7237 = vpow2.f32 %v3183_v32  ;;  %v3332_v32 = vld [vmem:[#allocation4 + $0x140] sm:$0xff] }
 0x9a4   : > { %7239 = vpow2.f32 %v3179_v12 }
 0x9a5   : > { %3679 = vst.msk [vmem:[#allocation5 + $0x108] sm:$0xff] %vm1184_vm3, %v3663_v23  ;;  %v3351_v23 = vmul.f32 %v10242_v9, %v3335_v13 }
 0x9b1   : > { %v3361_v43 = vpop.xlane.xlu0 %3360  ;;  %v10217_v51 = vpop.f32.mrf.mxu1 }
 0x9b2   : > { %v3390_v44 = vadd.f32 %v3361_v43, %v3342_v1  ;;  %11372 = vst [vmem:[#allocation77_spill] sm:$0xff] %v10217_v51  ;;  %v11390_v1 = vld [vmem:[#allocation120_spill] sm:$0xff] }
 0x9b3   : > { %v10229_v16 = vpop.f32.mrf.mxu1  ;;  %v11391_v43 = vsub.f32 %v11390_v1, %v9779_v39 }
 0x9b4   : > { %3406 = vst.msk [vmem:[#allocation4 + $0x110] sm:$0xff] %vm1672_vm6, %v3390_v44  ;;  %11376 = vst [vmem:[#allocation83_spill] sm:$0xff] %v10229_v16 }
 0x9b5   : > { %v3357_v4 = vpop.xlane.xlu0 %3356  ;;  %v10238_v33 = vpop.f32.mrf.mxu1  ;;  %v3191_v47 = vmul.f32 1.442695, %v11391_v43  ;;  %v3336_v43 = vld [vmem:[#allocation4 + $0x160] sm:$0xff] }
 0x9b6   : > { %v3388_v48 = vadd.f32 %v3357_v4, %v3340_v62  ;;  %11380 = vst [vmem:[#allocation85_spill] sm:$0xff] %v10238_v33  ;;  %v3341_v62 = vmul.f32 %v10034_v50, %v3325_v57  ;;  %v10270_v4 = vpop.eup %7231  ;;  %v3187_v50 = vmul.f32 1.442695, %v11395_v27 }
 0x9b7   : > { %v10247_v34 = vpop.f32.mrf.mxu1  ;;  %7241 = vpow2.f32 %v3191_v47 }
 0x9b8   : > { %3404 = vst.msk [vmem:[#allocation4 + $0x100] sm:$0xff] %vm1672_vm6, %v3388_v48  ;;  %11384 = vst [vmem:[#allocation71_spill] sm:$0xff] %v10247_v34  ;;  %v3330_v48 = vld [vmem:[#allocation4 + $0x130] sm:$0xff]  ;;  %7243 = vpow2.f32 %v3187_v50 }
 0x9b9   : > { %v3363_v17 = vpop.xlane.xlu0 %3362  ;;  %v3346_v49 = vmul.f32 %v10270_v4, %v3330_v48 }
 0x9ba   : > { %v3391_v10 = vadd.f32 %v3363_v17, %v3343_v0  ;;  %v3355_v0 = vmul.f32 %v10262_v55, %v3339_v29  ;;  %v10276_v17 = vpop.eup %7233 }
 0x9bb   : > { %v3353_v3 = vmul.f32 %v10276_v17, %v3337_v56 }
 0x9bc   : > { %3407 = vst.msk [vmem:[#allocation4 + $0x118] sm:$0xff] %vm1672_vm6, %v3391_v10  ;;  %v10283_v10 = vpop.eup %7235 }
 0x9bd   : > { %v3371_v31 = vpop.xlane.xlu0 %3370  ;;  %v10291_v45 = vpop.eup %7237 }
 0x9be   : > { %v3395_v60 = vadd.f32 %v3371_v31, %v3347_v59  ;;  %v3328_v59 = vld [vmem:[#allocation4 + $0x120] sm:$0xff]  ;;  %v10298_v26 = vpop.eup %7239 }
 0x9bf   : > { %v3344_v30 = vmul.f32 %v10283_v10, %v3328_v59 }
 0x9c0   : > { %3411 = vst.msk [vmem:[#allocation4 + $0x138] sm:$0xff] %vm1672_vm6, %v3395_v60 }
 0x9c1   : > { %v3367_v41 = vpop.xlane.xlu0 %3366 }
 0x9c2   : > { %v3393_v21 = vadd.f32 %v3367_v41, %v3345_v40  ;;  %v3334_v40 = vld [vmem:[#allocation4 + $0x150] sm:$0xff] }
 0x9c3   : > { %v3350_v53 = vmul.f32 %v10291_v45, %v3334_v40 }
 0x9c4   : > { %3409 = vst.msk [vmem:[#allocation4 + $0x128] sm:$0xff] %vm1672_vm6, %v3393_v21  ;;  %v10304_v61 = vpop.eup %7241 }
 0x9c5   : > { %v3379_v37 = vpop.xlane.xlu0 %3378  ;;  %v3354_v57 = vmul.f32 %v10304_v61, %v3338_v18 }
 0x9c6   : > { %v3399_v63 = vadd.f32 %v3379_v37, %v3351_v23  ;;  %v10256_v42 = vpop.f32.mrf.mxu1  ;;  %v3348_v37 = vmul.f32 %v10298_v26, %v3332_v32 }
 0x9c7   : > { %11388 = vst [vmem:[#allocation73_spill] sm:$0xff] %v10256_v42 }
 0x9c8   : > { %3415 = vst.msk [vmem:[#allocation4 + $0x158] sm:$0xff] %vm1672_vm6, %v3399_v63  ;;  %v10259_v7 = vpop.f32.mrf.mxu1 }
 0x9c9   : > { %11389 = vst [vmem:[#allocation79_spill] sm:$0xff] %v10259_v7  ;;  %v3375_v5 = vpop.xlane.xlu0 %3374  ;;  %v10505_v7 = vld [vmem:[#allocation3 + $0x1e0] sm:$0xff] }
 0x9ca   : > { %v3397_v44 = vadd.f32 %v3375_v5, %v3349_v14  ;;  %v10267_v20 = vpop.f32.mrf.mxu1  ;;  %v10310_v14 = vpop.eup %7243  ;;  %v10405_v5 = vld [vmem:[#allocation3 + $0x190] sm:$0xff] }
 0x9cb   : > { %11392 = vst [vmem:[#allocation81_spill] sm:$0xff] %v10267_v20  ;;  %v3359_v8 = vpop.xlane.xlu1 %3358 }
 0x9cc   : > { %3413 = vst.msk [vmem:[#allocation4 + $0x148] sm:$0xff] %vm1672_vm6, %v3397_v44  ;;  %v3389_v35 = vadd.f32 %v3359_v8, %v3341_v62  ;;  %v10273_v28 = vpop.f32.mrf.mxu1  ;;  %v3352_v8 = vmul.f32 %v10310_v14, %v3336_v43  ;;  %v11402_v43 = vld [vmem:[#allocation33_spill] sm:$0xff] }
 0x9cd   : > { %11393 = vst [vmem:[#allocation70_spill] sm:$0xff] %v10273_v28  ;;  %v3387_v39 = vpop.xlane.xlu0 %3386  ;;  %v10503_v28 = vld [vmem:[#allocation3 + $0x1f8] sm:$0xff] }
 0x9ce   : > { %3405 = vst.msk [vmem:[#allocation4 + $0x108] sm:$0xff] %vm1672_vm6, %v3389_v35  ;;  %v3403_v6 = vadd.f32 %v3387_v39, %v3355_v0  ;;  %v10286_v31 = vpop.f32.mrf.mxu1  ;;  %11408 = vst [vmem:[#allocation89_spill] sm:$0xff] %v10503_v28 }
 0x9cf   : > { %v3369_v52 = vpop.xlane.xlu1 %3368  ;;  %11396 = vst [vmem:[#allocation72_spill] sm:$0xff] %v10286_v31 }
 0x9d0   : > { %3419 = vst.msk [vmem:[#allocation4 + $0x178] sm:$0xff] %vm1672_vm6, %v3403_v6  ;;  %v3394_v24 = vadd.f32 %v3369_v52, %v3346_v49  ;;  %v10293_v41 = vpop.f32.mrf.mxu1 }
 0x9d1   : > { %v3383_v11 = vpop.xlane.xlu0 %3382  ;;  %11397 = vst [vmem:[#allocation91_spill] sm:$0xff] %v10293_v41  ;;  %v10489_v41 = vld [vmem:[#allocation3 + $0x1f0] sm:$0xff] }
 0x9d2   : > { %3410 = vst.msk [vmem:[#allocation4 + $0x130] sm:$0xff] %vm1672_vm6, %v3394_v24  ;;  %v3401_v25 = vadd.f32 %v3383_v11, %v3353_v3  ;;  %v10300_v21 = vpop.f32.mrf.mxu1  ;;  %11406 = vst [vmem:[#allocation76_spill] sm:$0xff] %v10489_v41 }
 0x9d3   : > { %v3365_v60 = vpop.xlane.xlu1 %3364  ;;  %11398 = vst [vmem:[#allocation93_spill] sm:$0xff] %v10300_v21 }
 0x9d4   : > { %3417 = vst.msk [vmem:[#allocation4 + $0x168] sm:$0xff] %vm1672_vm6, %v3401_v25  ;;  %v3392_v13 = vadd.f32 %v3365_v60, %v3344_v30  ;;  %v10306_v36 = vpop.f32.mrf.mxu1 }
 0x9d5   : > { %11399 = vst [vmem:[#allocation74_spill] sm:$0xff] %v10306_v36  ;;  %v10487_v36 = vld [vmem:[#allocation3 + $0x1c8] sm:$0xff] }
 0x9d6   : > { %3408 = vst.msk [vmem:[#allocation4 + $0x120] sm:$0xff] %vm1672_vm6, %v3392_v13 }
 0x9d7   : > { %v3377_v2 = vpop.xlane.xlu1 %3376 }
 0x9d8   : > { %v3398_v23 = vadd.f32 %v3377_v2, %v3350_v53 }
 0x9da   : > { %3414 = vst.msk [vmem:[#allocation4 + $0x150] sm:$0xff] %vm1672_vm6, %v3398_v23 }
 0x9db   : > { %v3373_v15 = vpop.xlane.xlu1 %3372 }
 0x9dc   : > { %v3396_v12 = vadd.f32 %v3373_v15, %v3348_v37 }
 0x9de   : > { %3412 = vst.msk [vmem:[#allocation4 + $0x140] sm:$0xff] %vm1672_vm6, %v3396_v12  ;;  %v6662_v63 = vpop.f32.mrf.mxu1 }
 0x9df   : > { %v10314_v29 = vsel %vm1335_vm5, -2.3819763e+38, %v6662_v63  ;;  %v3385_v1 = vpop.xlane.xlu1 %3384 }
 0x9e0   : > { %3965 = vmax.xlane.f32.xlu1 %v10314_v29  ;;  %v3865_v47 = vpop.f32.mrf.mxu1  ;;  %v3402_v44 = vadd.f32 %v3385_v1, %v3354_v57  ;;  %v11401_v1 = vld [vmem:[#allocation31_spill] sm:$0xff] }
 0x9e1   : > { %v10321_v48 = vsel %vm1335_vm5, -2.3819763e+38, %v3865_v47  ;;  %v11403_v47 = vld [vmem:[#allocation30_spill] sm:$0xff] }
 0x9e2   : > { %3418 = vst.msk [vmem:[#allocation4 + $0x170] sm:$0xff] %vm1672_vm6, %v3402_v44  ;;  %v6663_v62 = vpop.f32.mrf.mxu1  ;;  %v11404_v44 = vld [vmem:[#allocation32_spill] sm:$0xff] }
 0x9e3   : > { %v10325_v35 = vsel %vm1335_vm5, -2.3819763e+38, %v6663_v62  ;;  %v3381_v0 = vpop.xlane.xlu1 %3380  ;;  %v11405_v62 = vld [vmem:[#allocation34_spill] sm:$0xff] }
 0x9e4   : > { %3961 = vmax.xlane.f32.xlu1 %v10321_v48  ;;  %3967 = vmax.xlane.f32.xlu0 %v10325_v35  ;;  %v3868_v39 = vpop.f32.mrf.mxu1  ;;  %v3400_v56 = vadd.f32 %v3381_v0, %v3352_v8 }
 0x9e5   : > { %v10332_v27 = vsel %vm1335_vm5, -2.3819763e+38, %v3868_v39  ;;  %v10410_v39 = vld [vmem:[#allocation3 + $0x198] sm:$0xff] }
 0x9e6   : > { %3416 = vst.msk [vmem:[#allocation4 + $0x160] sm:$0xff] %vm1672_vm6, %v3400_v56  ;;  %v6666_v19 = vpop.f32.mrf.mxu1  ;;  %v10412_v56 = vld [vmem:[#allocation3 + $0x180] sm:$0xff] }
 0x9e7   : > { %v10336_v50 = vsel %vm1335_vm5, -2.3819763e+38, %v6666_v19 }
 0x9e8   : > { %3963 = vmax.xlane.f32.xlu0 %v10332_v27  ;;  %3973 = vmax.xlane.f32.xlu1 %v10336_v50  ;;  %v3881_v6 = vpop.f32.mrf.mxu1 }
 0x9e9   : > { %v10342_v52 = vsel %vm1335_vm5, -2.3819763e+38, %v3881_v6 }
 0x9ea   : > { %v6667_v49 = vpop.f32.mrf.mxu1 }
 0x9eb   : > { %v10346_v59 = vsel %vm1335_vm5, -2.3819763e+38, %v6667_v49 }
 0x9ec   : > { %3969 = vmax.xlane.f32.xlu1 %v10342_v52  ;;  %3975 = vmax.xlane.f32.xlu0 %v10346_v59  ;;  %v3884_v24 = vpop.f32.mrf.mxu1 }
 0x9ed   : > { %v10352_v11 = vsel %vm1335_vm5, -2.3819763e+38, %v3884_v24 }
 0x9ee   : > { %v6670_v3 = vpop.f32.mrf.mxu1 }
 0x9ef   : > { %v10356_v25 = vsel %vm1335_vm5, -2.3819763e+38, %v6670_v3  ;;  %v10423_v3 = vld [vmem:[#allocation3 + $0x188] sm:$0xff] }
 0x9f0   : > { %3971 = vmax.xlane.f32.xlu0 %v10352_v11  ;;  %3981 = vmax.xlane.f32.xlu1 %v10356_v25  ;;  %v3897_v30 = vpop.f32.mrf.mxu1 }
 0x9f1   : > { %v10362_v40 = vsel %vm1335_vm5, -2.3819763e+38, %v3897_v30  ;;  %v10425_v30 = vld [vmem:[#allocation3 + $0x1b0] sm:$0xff] }
 0x9f2   : > { %v6671_v60 = vpop.f32.mrf.mxu1 }
 0x9f3   : > { %v10366_v13 = vsel %vm1335_vm5, -2.3819763e+38, %v6671_v60 }
 0x9f4   : > { %3977 = vmax.xlane.f32.xlu1 %v10362_v40  ;;  %3983 = vmax.xlane.f32.xlu0 %v10366_v13  ;;  %v3900_v53 = vpop.f32.mrf.mxu1 }
 0x9f5   : > { %v10372_v32 = vsel %vm1335_vm5, -2.3819763e+38, %v3900_v53 }
 0x9f6   : > { %v6674_v2 = vpop.f32.mrf.mxu1 }
 0x9f7   : > { %v10376_v23 = vsel %vm1335_vm5, -2.3819763e+38, %v6674_v2 }
 0x9f8   : > { %3979 = vmax.xlane.f32.xlu0 %v10372_v32  ;;  %3989 = vmax.xlane.f32.xlu1 %v10376_v23  ;;  %v3913_v37 = vpop.f32.mrf.mxu1 }
 0x9f9   : > { %v10382_v18 = vsel %vm1335_vm5, -2.3819763e+38, %v3913_v37 }
 0x9fa   : > { %v6675_v15 = vpop.f32.mrf.mxu1 }
 0x9fb   : > { %v10386_v12 = vsel %vm1335_vm5, -2.3819763e+38, %v6675_v15  ;;  %v10439_v15 = vld [vmem:[#allocation3 + $0x1b8] sm:$0xff] }
 0x9fc   : > { %3985 = vmax.xlane.f32.xlu1 %v10382_v18  ;;  %3991 = vmax.xlane.f32.xlu0 %v10386_v12  ;;  %v3916_v63 = vpop.f32.mrf.mxu1 }
 0x9fd   : > { %v10392_v57 = vsel %vm1335_vm5, -2.3819763e+38, %v3916_v63  ;;  %v10441_v63 = vld [vmem:[#allocation3 + $0x1a0] sm:$0xff] }
 0xa00   : > { %3987 = vmax.xlane.f32.xlu0 %v10392_v57 }
 0xa0d   : > { %4413 = vrot.lane.b32.xlu1 %v11401_v1, %s7711_s18 }
 0xa11   : > { %4409 = vrot.lane.b32.xlu1 %v11402_v43, %s7711_s18 }
 0xa16   : > { %4415 = vrot.lane.b32.xlu0 %v11403_v47, %s7711_s18 }
 0xa1a   : > { %4411 = vrot.lane.b32.xlu0 %v11404_v44, %s7711_s18 }
 0xa1e   : > { %4407 = vrot.lane.b32.xlu0 %v11405_v62, %s7711_s18  ;;  %v10455_v62 = vld [vmem:[#allocation3 + $0x1a8] sm:$0xff] }
 0xa69   : > { %v3966_v8 = vpop.xlane.xlu1 %3965 }
 0xa6a   : > { %v10408_v0 = vmax.f32 %v10405_v5, %v3966_v8  ;;  %v10457_v8 = vld [vmem:[#allocation3 + $0x1d0] sm:$0xff] }
 0xa6c   : > { %4558 = vst.msk [vmem:[#allocation3 + $0x190] sm:$0xff] %vm1672_vm6, %v10408_v0  ;;  %4069 = vperm.xlu1 %7004, %v10408_v0  }
 0xa6d   : > { %v3968_v19 = vpop.xlane.xlu0 %3967  ;;  %v3962_v6 = vpop.xlane.xlu1 %3961 }
 0xa6e   : > { %v10418_v49 = vmax.f32 %v10410_v39, %v3968_v19  ;;  %v10421_v24 = vmax.f32 %v10412_v56, %v3962_v6 }
 0xa70   : > { %4559 = vst.msk [vmem:[#allocation3 + $0x198] sm:$0xff] %vm1672_vm6, %v10418_v49  ;;  %4556 = vst.msk [vmem:[#allocation3 + $0x180] sm:$0xff] %vm1672_vm6, %v10421_v24  ;;  %4074 = vperm.xlu0 %7003, %v10418_v49   ;;  %4059 = vperm.xlu1 %7004, %v10421_v24  }
 0xa71   : > { %v3964_v60 = vpop.xlane.xlu0 %3963  ;;  %v3974_v53 = vpop.xlane.xlu1 %3973 }
 0xa72   : > { %v10434_v2 = vmax.f32 %v10423_v3, %v3964_v60  ;;  %v10437_v37 = vmax.f32 %v10425_v30, %v3974_v53 }
 0xa74   : > { %4557 = vst.msk [vmem:[#allocation3 + $0x188] sm:$0xff] %vm1672_vm6, %v10434_v2  ;;  %4562 = vst.msk [vmem:[#allocation3 + $0x1b0] sm:$0xff] %vm1672_vm6, %v10437_v37  ;;  %4064 = vperm.xlu0 %7003, %v10434_v2   ;;  %4089 = vperm.xlu1 %7004, %v10437_v37  }
 0xa75   : > { %v3976_v1 = vpop.xlane.xlu0 %3975  ;;  %v3970_v43 = vpop.xlane.xlu1 %3969 }
 0xa76   : > { %v10450_v47 = vmax.f32 %v10439_v15, %v3976_v1  ;;  %v10453_v44 = vmax.f32 %v10441_v63, %v3970_v43  ;;  %v10471_v1 = vld [vmem:[#allocation3 + $0x1d8] sm:$0xff]  ;;  %v10473_v43 = vld [vmem:[#allocation3 + $0x1c0] sm:$0xff] }
 0xa78   : > { %4563 = vst.msk [vmem:[#allocation3 + $0x1b8] sm:$0xff] %vm1672_vm6, %v10450_v47  ;;  %4560 = vst.msk [vmem:[#allocation3 + $0x1a0] sm:$0xff] %vm1672_vm6, %v10453_v44  ;;  %4094 = vperm.xlu0 %7003, %v10450_v47   ;;  %4079 = vperm.xlu1 %7004, %v10453_v44  }
 0xa79   : > { %v3972_v19 = vpop.xlane.xlu0 %3971  ;;  %v3982_v6 = vpop.xlane.xlu1 %3981 }
 0xa7a   : > { %v10466_v60 = vmax.f32 %v10455_v62, %v3972_v19  ;;  %v10469_v53 = vmax.f32 %v10457_v8, %v3982_v6 }
 0xa7c   : > { %4561 = vst.msk [vmem:[#allocation3 + $0x1a8] sm:$0xff] %vm1672_vm6, %v10466_v60  ;;  %4566 = vst.msk [vmem:[#allocation3 + $0x1d0] sm:$0xff] %vm1672_vm6, %v10469_v53  ;;  %4084 = vperm.xlu0 %7003, %v10466_v60   ;;  %4109 = vperm.xlu1 %7004, %v10469_v53  }
 0xa7d   : > { %v3984_v21 = vpop.xlane.xlu0 %3983  ;;  %v3978_v19 = vpop.xlane.xlu1 %3977 }
 0xa7e   : > { %v10482_v31 = vmax.f32 %v10471_v1, %v3984_v21  ;;  %v10485_v6 = vmax.f32 %v10473_v43, %v3978_v19 }
 0xa80   : > { %4567 = vst.msk [vmem:[#allocation3 + $0x1d8] sm:$0xff] %vm1672_vm6, %v10482_v31  ;;  %4564 = vst.msk [vmem:[#allocation3 + $0x1c0] sm:$0xff] %vm1672_vm6, %v10485_v6  ;;  %4114 = vperm.xlu0 %7003, %v10482_v31   ;;  %4099 = vperm.xlu1 %7004, %v10485_v6  }
 0xa81   : > { %v3980_v20 = vpop.xlane.xlu0 %3979  ;;  %v3990_v21 = vpop.xlane.xlu1 %3989 }
 0xa82   : > { %v10498_v42 = vmax.f32 %v10487_v36, %v3980_v20  ;;  %v10501_v19 = vmax.f32 %v10489_v41, %v3990_v21  ;;  %v11409_v20 = vld [vmem:[#allocation35_spill] sm:$0xff] }
 0xa84   : > { %11407 = vst [vmem:[#allocation87_spill] sm:$0xff] %v10501_v19  ;;  %4565 = vst.msk [vmem:[#allocation3 + $0x1c8] sm:$0xff] %vm1672_vm6, %v10498_v42  ;;  %4104 = vperm.xlu0 %7003, %v10498_v42   ;;  %4405 = vrot.lane.b32.xlu1 %v11409_v20, %s7711_s18  ;;  %v11410_v20 = vld [vmem:[#allocation36_spill] sm:$0xff] }
 0xa85   : > { %4570 = vst.msk [vmem:[#allocation3 + $0x1f0] sm:$0xff] %vm1672_vm6, %v10501_v19  ;;  %v3992_v21 = vpop.xlane.xlu0 %3991  ;;  %v3986_v51 = vpop.xlane.xlu1 %3985 }
 0xa86   : > { %v10517_v34 = vmax.f32 %v10503_v28, %v3992_v21  ;;  %v10520_v16 = vmax.f32 %v10505_v7, %v3986_v51 }
 0xa88   : > { %4571 = vst.msk [vmem:[#allocation3 + $0x1f8] sm:$0xff] %vm1672_vm6, %v10517_v34  ;;  %4568 = vst.msk [vmem:[#allocation3 + $0x1e0] sm:$0xff] %vm1672_vm6, %v10520_v16  ;;  %4403 = vrot.lane.b32.xlu0 %v11410_v20, %s7711_s18  ;;  %4119 = vperm.xlu1 %7004, %v10520_v16  }
 0xa89   : > { %v3988_v21 = vpop.xlane.xlu0 %3987  ;;  %v4414_v41 = vpop.permute.xlu1 %4413 }
 0xa8a   : > { %v10534_v51 = vmax.f32 %v10522_v54, %v3988_v21  ;;  %v4009_v21 = vsub.f32 %v10412_v56, %v10421_v24 }
 0xa8c   : > { %4569 = vst.msk [vmem:[#allocation3 + $0x1e8] sm:$0xff] %vm1672_vm6, %v10534_v51  ;;  %4124 = vperm.xlu0 %7003, %v10534_v51   ;;  %4129 = vperm.xlu1 %7004, %v10501_v19   ;;  %v4010_v19 = vsub.f32 %v10423_v3, %v10434_v2 }
 0xa8d   : > { %v4416_v33 = vpop.permute.xlu0 %4415  ;;  %v4410_v28 = vpop.permute.xlu1 %4409 }
 0xa8e   : > { %6678 = vmatprep.subr.bf16.mxu0 %v4416_v33 }
 0xa8f   : > { %6679 = vmatpush3.bf16.msra.mxu0 %v4416_v33  ;;  %v4025_v33 = vmul.f32 1.442695, %v4009_v21 }
 0xa90   : > { %4134 = vperm.xlu0 %7003, %v10517_v34   ;;  %3454 = vperm.xlu1 %7004, %v10212_v22   ;;  %v4011_v22 = vsub.f32 %v10405_v5, %v10408_v0  ;;  %v4019_v0 = vsub.f32 %v10457_v8, %v10469_v53 }
 0xa91   : > { %6680 = vmatprep.subr.bf16.mxu0 %v4414_v41  ;;  %v4412_v20 = vpop.permute.xlu0 %4411  ;;  %7245 = vpow2.f32 %v4025_v33 }
 0xa92   : > { %v4029_v56 = vmul.f32 1.442695, %v4011_v22 }
 0xa93   : > { %6681 = vmatpush3.bf16.msra.mxu0 %v4414_v41 }
 0xa94   : > { %3459 = vperm.xlu0 %7003, %v10283_v10   ;;  %3464 = vperm.xlu1 %7004, %v10233_v58   ;;  %v4027_v10 = vmul.f32 1.442695, %v4010_v19  ;;  %v4013_v58 = vsub.f32 %v10441_v63, %v10453_v44  ;;  %v4022_v63 = vsub.f32 %v10522_v54, %v10534_v51 }
 0xa95   : > { %6682 = vmatprep.subr.bf16.mxu0 %v4412_v20  ;;  %v4408_v41 = vpop.permute.xlu0 %4407 }
 0xa96   : > { %7247 = vpow2.f32 %v4027_v10  ;;  %v4033_v5 = vmul.f32 1.442695, %v4013_v58 }
 0xa97   : > { %6683 = vmatpush3.bf16.msra.mxu0 %v4412_v20  ;;  %7249 = vpow2.f32 %v4029_v56 }
 0xa98   : > { %3469 = vperm.xlu0 %7003, %v10270_v4   ;;  %3474 = vperm.xlu1 %7004, %v10221_v38   ;;  %v4012_v4 = vsub.f32 %v10410_v39, %v10418_v49  ;;  %v4015_v38 = vsub.f32 %v10425_v30, %v10437_v37  ;;  %7251 = vpow2.f32 %v4033_v5  ;;  %v4017_v49 = vsub.f32 %v10473_v43, %v10485_v6 }
 0xa99   : > { %6684 = vmatprep.subr.bf16.mxu0 %v4410_v28  ;;  %v4021_v30 = vsub.f32 %v10505_v7, %v10520_v16 }
 0xa9a   : > { %v4041_v3 = vmul.f32 1.442695, %v4017_v49 }
 0xa9b   : > { %6685 = vmatpush3.bf16.msra.mxu0 %v4410_v28  ;;  %v4031_v28 = vmul.f32 1.442695, %v4012_v4  ;;  %v4049_v37 = vmul.f32 1.442695, %v4021_v30 }
 0xa9c   : > { %3479 = vperm.xlu0 %7003, %v10298_v26   ;;  %3484 = vperm.xlu1 %7004, %v10251_v46   ;;  %v4016_v46 = vsub.f32 %v10439_v15, %v10450_v47  ;;  %v4037_v26 = vmul.f32 1.442695, %v4015_v38 }
 0xa9d   : > { %6686 = vmatprep.subr.bf16.mxu0 %v4408_v41  ;;  %7253 = vpow2.f32 %v4031_v28 }
 0xa9e   : > { %v4039_v39 = vmul.f32 1.442695, %v4016_v46  ;;  %7255 = vpow2.f32 %v4037_v26 }
 0xa9f   : > { %6687 = vmatpush3.bf16.msra.mxu0 %v4408_v41 }
 0xaa0   : > { %3489 = vperm.xlu0 %7003, %v10291_v45   ;;  %3494 = vperm.xlu1 %7004, %v10242_v9   ;;  %v4014_v45 = vsub.f32 %v10455_v62, %v10466_v60  ;;  %v4045_v9 = vmul.f32 1.442695, %v4019_v0  ;;  %7257 = vpow2.f32 %v4039_v39 }
 0xaa2   : > { %v4035_v24 = vmul.f32 1.442695, %v4014_v45  ;;  %7259 = vpow2.f32 %v4045_v9 }
 0xaa4   : > { %3499 = vperm.xlu0 %7003, %v10310_v14   ;;  %3504 = vperm.xlu1 %7004, %v10276_v17   ;;  %v4020_v14 = vsub.f32 %v10471_v1, %v10482_v31  ;;  %v10576_v17 = vpop.eup %7245  ;;  %7261 = vpow2.f32 %v4035_v24  ;;  %v4018_v31 = vsub.f32 %v10487_v36, %v10498_v42  ;;  %v4051_v36 = vmul.f32 1.442695, %v4022_v63 }
 0xaa5   : > { %v10580_v2 = vpop.eup %7247  ;;  %7263 = vpow2.f32 %v4041_v3 }
 0xaa6   : > { %v4043_v7 = vmul.f32 1.442695, %v4018_v31 }
 0xaa8   : > { %3509 = vperm.xlu0 %7003, %v10304_v61   ;;  %3514 = vperm.xlu1 %7004, %v10262_v55   ;;  %v4047_v55 = vmul.f32 1.442695, %v4020_v14  ;;  %v10584_v61 = vpop.eup %7249 }
 0xaa9   : > { %v10588_v15 = vpop.eup %7251 }
 0xaaa   : > { %7265 = vpow2.f32 %v4047_v55  ;;  %v10592_v16 = vpop.eup %7253 }
 0xaab   : > { %7267 = vpow2.f32 %v4049_v37  ;;  %v10596_v47 = vpop.eup %7255 }
 0xaac   : > { %4306 = vperm.xlu0 %7003, %v10580_v2   ;;  %4301 = vperm.xlu1 %7004, %v10576_v17   ;;  %7269 = vpow2.f32 %v4043_v7 }
 0xaad   : > { %v10600_v42 = vpop.eup %7257  ;;  %7271 = vpow2.f32 %v4051_v36 }
 0xaaf   : > { %v10602_v44 = vpop.eup %7259 }
 0xab0   : > { %4321 = vperm.xlu0 %7003, %v10588_v15   ;;  %4311 = vperm.xlu1 %7004, %v10584_v61  }
 0xab1   : > { %v10606_v62 = vpop.eup %7261 }
 0xab2   : > { %v10608_v54 = vpop.eup %7263 }
 0xab4   : > { %4331 = vperm.xlu0 %7003, %v10596_v47   ;;  %4316 = vperm.xlu1 %7004, %v10592_v16  }
 0xab7   : > { %v10612_v8 = vpop.eup %7265 }
 0xab8   : > { %4351 = vperm.xlu0 %7003, %v10602_v44   ;;  %4336 = vperm.xlu1 %7004, %v10600_v42   ;;  %v10614_v60 = vpop.eup %7267 }
 0xab9   : > { %v10618_v53 = vpop.eup %7269 }
 0xaba   : > { %v10621_v1 = vpop.eup %7271 }
 0xabc   : > { %4341 = vperm.xlu0 %7003, %v10608_v54   ;;  %4326 = vperm.xlu1 %7004, %v10606_v62  }
 0xac0   : > { %4356 = vperm.xlu1 %7004, %v10612_v8   ;;  %4361 = vperm.xlu0 %7003, %v10614_v60  }
 0xac4   : > { %4346 = vperm.xlu1 %7004, %v10618_v53  }
 0xac8   : > { %4366 = vperm.xlu1 %7004, %v10621_v1  }
 0xae7   : > { %v4070_v43 = vpop.permute.xlu1 %4069 }
 0xae8   : > { %v4139_v6 = vsub.f32 %v10314_v29, %v4070_v43 }
 0xaea   : > { %v4157_v19 = vmul.f32 1.442695, %v4139_v6 }
 0xaeb   : > { %v4075_v51 = vpop.permute.xlu0 %4074  ;;  %v4060_v20 = vpop.permute.xlu1 %4059 }
 0xaec   : > { %7273 = vpow2.f32 %v4157_v19  ;;  %v4137_v21 = vsub.f32 %v10321_v48, %v4060_v20  ;;  %v4140_v22 = vsub.f32 %v10325_v35, %v4075_v51 }
 0xaee   : > { %v4153_v33 = vmul.f32 1.442695, %v4137_v21  ;;  %v4159_v4 = vmul.f32 1.442695, %v4140_v22 }
 0xaef   : > { %v4065_v10 = vpop.permute.xlu0 %4064  ;;  %v4090_v58 = vpop.permute.xlu1 %4089 }
 0xaf0   : > { %v4138_v41 = vsub.f32 %v10332_v27, %v4065_v10  ;;  %v4143_v56 = vsub.f32 %v10336_v50, %v4090_v58  ;;  %7275 = vpow2.f32 %v4153_v33 }
 0xaf2   : > { %v4155_v38 = vmul.f32 1.442695, %v4138_v41  ;;  %v4165_v5 = vmul.f32 1.442695, %v4143_v56  ;;  %v3424_v41 = vld [vmem:[#allocation5 + $0x118] sm:$0xff] }
 0xaf3   : > { %v4095_v29 = vpop.permute.xlu0 %4094  ;;  %v4080_v28 = vpop.permute.xlu1 %4079 }
 0xaf4   : > { %7277 = vpow2.f32 %v4155_v38  ;;  %v4144_v46 = vsub.f32 %v10346_v59, %v4095_v29  ;;  %v4141_v48 = vsub.f32 %v10342_v52, %v4080_v28 }
 0xaf5   : > { %7279 = vpow2.f32 %v4159_v4 }
 0xaf6   : > { %v4167_v35 = vmul.f32 1.442695, %v4144_v46  ;;  %7281 = vpow2.f32 %v4165_v5  ;;  %v4161_v26 = vmul.f32 1.442695, %v4141_v48  ;;  %v3426_v48 = vld [vmem:[#allocation5 + $0x128] sm:$0xff] }
 0xaf7   : > { %v4085_v0 = vpop.permute.xlu0 %4084  ;;  %v4110_v39 = vpop.permute.xlu1 %4109 }
 0xaf8   : > { %7283 = vpow2.f32 %v4167_v35  ;;  %v4142_v27 = vsub.f32 %v10352_v11, %v4085_v0  ;;  %v4147_v50 = vsub.f32 %v10356_v25, %v4110_v39 }
 0xaf9   : > { %v7274_v45 = vpop.eup %7273  ;;  %7285 = vpow2.f32 %v4161_v26  ;;  %v11411_v26 = vld [vmem:[#allocation75_spill] sm:$0xff] }
 0xafa   : > { %v4163_v9 = vmul.f32 1.442695, %v4142_v27  ;;  %4222 = vadd.xlane.f32.xlu0 %v7274_v45  ;;  %v4173_v49 = vmul.f32 1.442695, %v4147_v50 }
 0xafb   : > { %v4115_v24 = vpop.permute.xlu0 %4114  ;;  %v4100_v59 = vpop.permute.xlu1 %4099 }
 0xafc   : > { %7287 = vpow2.f32 %v4163_v9  ;;  %v4148_v52 = vsub.f32 %v10366_v13, %v4115_v24  ;;  %v4145_v14 = vsub.f32 %v10362_v40, %v4100_v59  ;;  %v3427_v24 = vld [vmem:[#allocation5 + $0x130] sm:$0xff]  ;;  %v3428_v59 = vld [vmem:[#allocation5 + $0x138] sm:$0xff] }
 0xafd   : > { %v7276_v3 = vpop.eup %7275  ;;  %7289 = vpow2.f32 %v4173_v49 }
 0xafe   : > { %v4175_v30 = vmul.f32 1.442695, %v4148_v52  ;;  %v4169_v55 = vmul.f32 1.442695, %v4145_v14  ;;  %4218 = vadd.xlane.f32.xlu0 %v7276_v3  ;;  %v11412_v52 = vld [vmem:[#allocation83_spill] sm:$0xff] }
 0xaff   : > { %v4105_v11 = vpop.permute.xlu0 %4104  ;;  %v4406_v31 = vpop.permute.xlu1 %4405 }
 0xb00   : > { %7291 = vpow2.f32 %v4175_v30  ;;  %v4146_v25 = vsub.f32 %v10372_v32, %v4105_v11  ;;  %6688 = vmatprep.subr.bf16.mxu0 %v4406_v31 }
 0xb01   : > { %v7278_v37 = vpop.eup %7277  ;;  %6689 = vmatpush3.bf16.msra.mxu0 %v4406_v31  ;;  %7293 = vpow2.f32 %v4169_v55 }
 0xb02   : > { %v7280_v7 = vpop.eup %7279  ;;  %v4171_v63 = vmul.f32 1.442695, %v4146_v25  ;;  %4220 = vadd.xlane.f32.xlu1 %v7278_v37  ;;  %v4395_v36 = vpack.c.bf16 %v7278_v37, %v7276_v3  ;;  %v11413_v3 = vld [vmem:[#allocation71_spill] sm:$0xff] }
 0xb03   : > { %4224 = vadd.xlane.f32.xlu0 %v7280_v7  ;;  %v4404_v40 = vpop.permute.xlu0 %4403  ;;  %v4120_v13 = vpop.permute.xlu1 %4119  ;;  %v4396_v32 = vpack.c.bf16 %v7280_v7, %v7274_v45  ;;  %v3429_v7 = vld [vmem:[#allocation5 + $0x140] sm:$0xff] }
 0xb04   : > { %v7282_v43 = vpop.eup %7281  ;;  %7295 = vpow2.f32 %v4171_v63  ;;  %v4149_v6 = vsub.f32 %v10382_v18, %v4120_v13  ;;  %6690 = vmatprep.subr.bf16.mxu0 %v4404_v40  ;;  %6692 = vmatprep.mubr.bf16.mxu0 %v4395_v36  ;;  %v3430_v63 = vld [vmem:[#allocation5 + $0x148] sm:$0xff] }
 0xb05   : > { %v7284_v19 = vpop.eup %7283  ;;  %6691 = vmatpush3.bf16.msra.mxu0 %v4404_v40  ;;  %v11414_v36 = vld [vmem:[#allocation77_spill] sm:$0xff] }
 0xb06   : > { %4230 = vadd.xlane.f32.xlu1 %v7282_v43  ;;  %v4177_v51 = vmul.f32 1.442695, %v4149_v6  ;;  %v7286_v22 = vpop.eup %7285  ;;  %v4398_v39 = vpack.c.bf16 %v7284_v19, %v7282_v43  ;;  %v11415_v13 = vld [vmem:[#allocation85_spill] sm:$0xff] }
 0xb07   : > { %4232 = vadd.xlane.f32.xlu0 %v7284_v19  ;;  %v4125_v20 = vpop.permute.xlu0 %4124  ;;  %v4130_v21 = vpop.permute.xlu1 %4129 }
 0xb08   : > { %v4150_v33 = vsub.f32 %v10392_v57, %v4125_v20  ;;  %v4151_v10 = vsub.f32 %v10376_v23, %v4130_v21  ;;  %6693 = vmatmul.mubr.bf16.vlgmr.msra.gmra.mxu0 %v4396_v32  ;;  %7297 = vpow2.f32 %v4177_v51  ;;  %v3425_v23 = vld [vmem:[#allocation5 + $0x120] sm:$0xff] }
 0xb09   : > { %v7288_v58 = vpop.eup %7287 }
 0xb0a   : > { %v4179_v56 = vmul.f32 1.442695, %v4150_v33  ;;  %v4181_v18 = vmul.f32 1.442695, %v4151_v10  ;;  %4226 = vadd.xlane.f32.xlu1 %v7286_v22  ;;  %v4397_v4 = vpack.c.bf16 %v7288_v58, %v7286_v22  ;;  %v7290_v29 = vpop.eup %7289  ;;  %v3431_v33 = vld [vmem:[#allocation5 + $0x150] sm:$0xff]  ;;  %v3432_v10 = vld [vmem:[#allocation5 + $0x158] sm:$0xff] }
 0xb0b   : > { %4228 = vadd.xlane.f32.xlu0 %v7288_v58  ;;  %v4135_v38 = vpop.permute.xlu0 %4134  ;;  %v3455_v5 = vpop.permute.xlu1 %3454 }
 0xb0c   : > { %7299 = vpow2.f32 %v4179_v56  ;;  %v4152_v28 = vsub.f32 %v10386_v12, %v4135_v38  ;;  %v3520_v46 = vmul.f32 %v3455_v5, %v3424_v41  ;;  %6696 = vmatprep.mubr.bf16.mxu0 %v4397_v4  ;;  %v11416_v41 = vld [vmem:[#allocation79_spill] sm:$0xff] }
 0xb0d   : > { %v7292_v57 = vpop.eup %7291  ;;  %7301 = vpow2.f32 %v4181_v18  ;;  %v11417_v18 = vld [vmem:[#allocation70_spill] sm:$0xff] }
 0xb0e   : > { %v4183_v35 = vmul.f32 1.442695, %v4152_v28  ;;  %v3665_v0 = vadd.f32 %v11411_v26, %v3520_v46  ;;  %4238 = vadd.xlane.f32.xlu1 %v7290_v29  ;;  %v7294_v45 = vpop.eup %7293  ;;  %v4400_v6 = vpack.c.bf16 %v7292_v57, %v7290_v29 }
 0xb0f   : > { %4240 = vadd.xlane.f32.xlu0 %v7292_v57  ;;  %v3460_v27 = vpop.permute.xlu0 %3459  ;;  %v3465_v50 = vpop.permute.xlu1 %3464 }
 0xb10   : > { %7303 = vpow2.f32 %v4183_v35  ;;  %3681 = vst.msk [vmem:[#allocation5 + $0x118] sm:$0xff] %vm1184_vm3, %v3665_v0  ;;  %v3521_v9 = vmul.f32 %v3460_v27, %v3425_v23  ;;  %v3522_v12 = vmul.f32 %v3465_v50, %v3426_v48  ;;  %6697 = vmatmul.mubr.bf16.gmra.mxu0 %v4398_v39  ;;  %v3433_v23 = vld [vmem:[#allocation5 + $0x160] sm:$0xff]  ;;  %v3434_v48 = vld [vmem:[#allocation5 + $0x168] sm:$0xff] }
 0xb11   : > { %v7296_v49 = vpop.eup %7295  ;;  %v11418_v35 = vld [vmem:[#allocation89_spill] sm:$0xff] }
 0xb12   : > { %v3666_v14 = vadd.f32 %v11412_v52, %v3521_v9  ;;  %v3667_v30 = vadd.f32 %v11413_v3, %v3522_v12  ;;  %4234 = vadd.xlane.f32.xlu1 %v7294_v45  ;;  %v4399_v55 = vpack.c.bf16 %v7296_v49, %v7294_v45  ;;  %v11419_v26 = vsub.f32 %v11418_v35, %v10517_v34  ;;  %v11420_v39 = vld [vmem:[#allocation73_spill] sm:$0xff]  ;;  %v3435_v52 = vld [vmem:[#allocation5 + $0x170] sm:$0xff]  ;;  %v11422_v34 = vld [vmem:[#allocation91_spill] sm:$0xff] }
 0xb13   : > { %4236 = vadd.xlane.f32.xlu0 %v7296_v49  ;;  %v3470_v11 = vpop.permute.xlu0 %3469  ;;  %v3475_v31 = vpop.permute.xlu1 %3474  ;;  %v11421_v50 = vld [vmem:[#allocation81_spill] sm:$0xff] }
 0xb14   : > { %3682 = vst.msk [vmem:[#allocation5 + $0x120] sm:$0xff] %vm1184_vm3, %v3666_v14  ;;  %3683 = vst.msk [vmem:[#allocation5 + $0x128] sm:$0xff] %vm1184_vm3, %v3667_v30  ;;  %v3523_v25 = vmul.f32 %v3470_v11, %v3427_v24  ;;  %v3524_v37 = vmul.f32 %v3475_v31, %v3428_v59  ;;  %6700 = vmatprep.mubr.bf16.mxu0 %v4399_v55  ;;  %v4055_v0 = vmul.f32 1.442695, %v11419_v26  ;;  %v3436_v14 = vld [vmem:[#allocation5 + $0x178] sm:$0xff]  ;;  %v11423_v30 = vld [vmem:[#allocation74_spill] sm:$0xff] }
 0xb15   : > { %v7298_v51 = vpop.eup %7297 }
 0xb16   : > { %v3668_v40 = vadd.f32 %v11414_v36, %v3523_v25  ;;  %v3669_v43 = vadd.f32 %v11415_v13, %v3524_v37  ;;  %7305 = vpow2.f32 %v4055_v0  ;;  %v11427_v13 = vld [vmem:[#allocation72_spill] sm:$0xff]  ;;  %v4187_v0 = vld [vmem:[#allocation4 + $0x188] sm:$0xff] }
 0xb17   : > { %v3480_v19 = vpop.permute.xlu0 %3479  ;;  %v3485_v32 = vpop.permute.xlu1 %3484 }
 0xb18   : > { %3684 = vst.msk [vmem:[#allocation5 + $0x130] sm:$0xff] %vm1184_vm3, %v3668_v40  ;;  %3685 = vst.msk [vmem:[#allocation5 + $0x138] sm:$0xff] %vm1184_vm3, %v3669_v43  ;;  %v3525_v20 = vmul.f32 %v3480_v19, %v3429_v7  ;;  %v3526_v21 = vmul.f32 %v3485_v32, %v3430_v63  ;;  %6701 = vmatmul.mubr.bf16.gmra.mxu0 %v4400_v6  ;;  %v11424_v7 = vld [vmem:[#allocation76_spill] sm:$0xff]  ;;  %v11425_v63 = vld [vmem:[#allocation87_spill] sm:$0xff] }
 0xb19   : > { %v7300_v22 = vpop.eup %7299  ;;  %v11426_v36 = vsub.f32 %v11424_v7, %v11425_v63  ;;  %v11428_v6 = vld [vmem:[#allocation93_spill] sm:$0xff]  ;;  %v4197_v63 = vld [vmem:[#allocation4 + $0x1d8] sm:$0xff] }
 0xb1a   : > { %v7302_v58 = vpop.eup %7301  ;;  %v3670_v56 = vadd.f32 %v11416_v41, %v3525_v20  ;;  %v3671_v4 = vadd.f32 %v11417_v18, %v3526_v21  ;;  %v4401_v38 = vpack.c.bf16 %v7300_v22, %v7298_v51 }
 0xb1b   : > { %4246 = vadd.xlane.f32.xlu1 %v7302_v58  ;;  %v3490_v5 = vpop.permute.xlu0 %3489  ;;  %v3495_v29 = vpop.permute.xlu1 %3494  ;;  %v4053_v40 = vmul.f32 1.442695, %v11426_v36 }
 0xb1c   : > { %3686 = vst.msk [vmem:[#allocation5 + $0x140] sm:$0xff] %vm1184_vm3, %v3670_v56  ;;  %3687 = vst.msk [vmem:[#allocation5 + $0x148] sm:$0xff] %vm1184_vm3, %v3671_v4  ;;  %v3527_v28 = vmul.f32 %v3490_v5, %v3431_v33  ;;  %v3528_v46 = vmul.f32 %v3495_v29, %v3432_v10  ;;  %6704 = vmatprep.mubr.bf16.mxu0 %v4401_v38  ;;  %v4188_v29 = vld [vmem:[#allocation4 + $0x190] sm:$0xff] }
 0xb1d   : > { %v7304_v57 = vpop.eup %7303  ;;  %7307 = vpow2.f32 %v4053_v40  ;;  %v4213_v40 = vmul.f32 %v10612_v8, %v4197_v63  ;;  %v4200_v8 = vld [vmem:[#allocation4 + $0x1f0] sm:$0xff] }
 0xb1e   : > { %v3672_v27 = vadd.f32 %v11420_v39, %v3527_v28  ;;  %v3673_v45 = vadd.f32 %v11421_v50, %v3528_v46  ;;  %4248 = vadd.xlane.f32.xlu0 %v7304_v57  ;;  %v4402_v9 = vpack.c.bf16 %v7304_v57, %v7302_v58  ;;  %v4204_v46 = vmul.f32 %v10584_v61, %v4188_v29 }
 0xb1f   : > { %4242 = vadd.xlane.f32.xlu1 %v7298_v51  ;;  %v3500_v12 = vpop.permute.xlu0 %3499  ;;  %v3505_v49 = vpop.permute.xlu1 %3504 }
 0xb20   : > { %3688 = vst.msk [vmem:[#allocation5 + $0x150] sm:$0xff] %vm1184_vm3, %v3672_v27  ;;  %3689 = vst.msk [vmem:[#allocation5 + $0x158] sm:$0xff] %vm1184_vm3, %v3673_v45  ;;  %v3529_v24 = vmul.f32 %v3500_v12, %v3433_v23  ;;  %v3530_v59 = vmul.f32 %v3505_v49, %v3434_v48  ;;  %6705 = vmatmul.mubr.bf16.gmra.mxu0 %v4402_v9  ;;  %v4186_v48 = vld [vmem:[#allocation4 + $0x180] sm:$0xff]  ;;  %v4189_v27 = vld [vmem:[#allocation4 + $0x198] sm:$0xff]  ;;  %v4203_v45 = vmul.f32 %v10580_v2, %v4187_v0 }
 0xb21   : > { %v4202_v26 = vmul.f32 %v10576_v17, %v4186_v48  ;;  %v4205_v9 = vmul.f32 %v10592_v16, %v4189_v27  ;;  %v4192_v12 = vld [vmem:[#allocation4 + $0x1b0] sm:$0xff]  ;;  %v4190_v2 = vld [vmem:[#allocation4 + $0x1a0] sm:$0xff]  ;;  %v4201_v0 = vld [vmem:[#allocation4 + $0x1f8] sm:$0xff] }
 0xb22   : > { %v3674_v3 = vadd.f32 %v11422_v34, %v3529_v24  ;;  %v3675_v55 = vadd.f32 %v11423_v30, %v3530_v59  ;;  %4244 = vadd.xlane.f32.xlu0 %v7300_v22  ;;  %v4193_v59 = vld [vmem:[#allocation4 + $0x1b8] sm:$0xff]  ;;  %v4208_v17 = vmul.f32 %v10596_v47, %v4192_v12  ;;  %v4196_v47 = vld [vmem:[#allocation4 + $0x1d0] sm:$0xff]  ;;  %v4198_v27 = vld [vmem:[#allocation4 + $0x1e0] sm:$0xff] }
 0xb23   : > { %v3510_v11 = vpop.permute.xlu0 %3509  ;;  %v3515_v31 = vpop.permute.xlu1 %3514  ;;  %v4212_v36 = vmul.f32 %v10602_v44, %v4196_v47 }
 0xb24   : > { %3690 = vst.msk [vmem:[#allocation5 + $0x160] sm:$0xff] %vm1184_vm3, %v3674_v3  ;;  %3691 = vst.msk [vmem:[#allocation5 + $0x168] sm:$0xff] %vm1184_vm3, %v3675_v55  ;;  %v3531_v25 = vmul.f32 %v3510_v11, %v3435_v52  ;;  %v3532_v37 = vmul.f32 %v3515_v31, %v3436_v14  ;;  %v10672_v32 = vpop.eup %7305  ;;  %v4209_v14 = vmul.f32 %v10600_v42, %v4193_v59  ;;  %v4191_v55 = vld [vmem:[#allocation4 + $0x1a8] sm:$0xff] }
 0xb25   : > { %v4206_v11 = vmul.f32 %v10588_v15, %v4190_v2  ;;  %v4207_v31 = vmul.f32 %v10606_v62, %v4191_v55  ;;  %v4194_v15 = vld [vmem:[#allocation4 + $0x1c0] sm:$0xff] }
 0xb26   : > { %v3676_v43 = vadd.f32 %v11427_v13, %v3531_v25  ;;  %v3677_v19 = vadd.f32 %v11428_v6, %v3532_v37  ;;  %v4210_v29 = vmul.f32 %v10608_v54, %v4194_v15  ;;  %v4217_v54 = vmul.f32 %v10672_v32, %v4201_v0  ;;  %v4293_v15 = vld [vmem:[#allocation5 + $0x1d0] sm:$0xff] }
 0xb27   : > { %v10678_v20 = vpop.permute.xlu1 %4301  ;;  %v10680_v21 = vpop.permute.xlu0 %4306 }
 0xb28   : > { %3692 = vst.msk [vmem:[#allocation5 + $0x170] sm:$0xff] %vm1184_vm3, %v3676_v43  ;;  %3693 = vst.msk [vmem:[#allocation5 + $0x178] sm:$0xff] %vm1184_vm3, %v3677_v19  ;;  %v4195_v19 = vld [vmem:[#allocation4 + $0x1c8] sm:$0xff] }
 0xb2a   : > { %v10675_v51 = vpop.eup %7307 }
 0xb2b   : > { %v10682_v22 = vpop.permute.xlu1 %4311  ;;  %v10684_v33 = vpop.permute.xlu0 %4321 }
 0xb2f   : > { %v10686_v10 = vpop.permute.xlu1 %4316  ;;  %v10688_v58 = vpop.permute.xlu0 %4331 }
 0xb30   : > { %4376 = vperm.xlu1 %7004, %v10672_v32   ;;  %v4285_v32 = vld [vmem:[#allocation5 + $0x190] sm:$0xff] }
 0xb33   : > { %v10690_v41 = vpop.permute.xlu1 %4336  ;;  %v10692_v56 = vpop.permute.xlu0 %4351 }
 0xb37   : > { %v10694_v18 = vpop.permute.xlu1 %4326  ;;  %v10696_v4 = vpop.permute.xlu0 %4341 }
 0xb38   : > { %4371 = vperm.xlu0 %7003, %v10675_v51  }
 0xb3b   : > { %v10698_v38 = vpop.permute.xlu1 %4356  ;;  %v10700_v5 = vpop.permute.xlu0 %4361 }
 0xb3f   : > { %v10702_v28 = vpop.permute.xlu1 %4346 }
 0xb43   : > { %v10706_v35 = vpop.permute.xlu1 %4366 }
 0xb83   : > { %v4223_v57 = vpop.xlane.xlu0 %4222 }
 0xb84   : > { %v4252_v23 = vadd.f32 %v4223_v57, %v4204_v46  ;;  %v4211_v46 = vmul.f32 %v10618_v53, %v4195_v19  ;;  %v4291_v19 = vld [vmem:[#allocation5 + $0x1c0] sm:$0xff] }
 0xb86   : > { %4268 = vst.msk [vmem:[#allocation4 + $0x190] sm:$0xff] %vm1672_vm6, %v4252_v23 }
 0xb87   : > { %v4219_v39 = vpop.xlane.xlu0 %4218 }
 0xb88   : > { %v4250_v50 = vadd.f32 %v4219_v39, %v4202_v26  ;;  %v4216_v26 = vmul.f32 %v10675_v51, %v4200_v8 }
 0xb8a   : > { %4266 = vst.msk [vmem:[#allocation4 + $0x180] sm:$0xff] %vm1672_vm6, %v4250_v50 }
 0xb8b   : > { %v4221_v61 = vpop.xlane.xlu1 %4220 }
 0xb8c   : > { %v4225_v49 = vpop.xlane.xlu0 %4224  ;;  %v4251_v24 = vadd.f32 %v4221_v61, %v4203_v45  ;;  %v4214_v45 = vmul.f32 %v10614_v60, %v4198_v27 }
 0xb8d   : > { %v4253_v52 = vadd.f32 %v4225_v49, %v4205_v9  ;;  %v4199_v9 = vld [vmem:[#allocation4 + $0x1e8] sm:$0xff] }
 0xb8e   : > { %4267 = vst.msk [vmem:[#allocation4 + $0x188] sm:$0xff] %vm1672_vm6, %v4251_v24  ;;  %v4215_v24 = vmul.f32 %v10621_v1, %v4199_v9 }
 0xb8f   : > { %4269 = vst.msk [vmem:[#allocation4 + $0x198] sm:$0xff] %vm1672_vm6, %v4253_v52  ;;  %v4231_v34 = vpop.xlane.xlu1 %4230  ;;  %v4283_v52 = vld [vmem:[#allocation5 + $0x180] sm:$0xff] }
 0xb90   : > { %v4233_v3 = vpop.xlane.xlu0 %4232  ;;  %v4256_v30 = vadd.f32 %v4231_v34, %v4208_v17  ;;  %v4381_v17 = vmul.f32 %v10682_v22, %v4285_v32  ;;  %v4379_v34 = vmul.f32 %v10678_v20, %v4283_v52  ;;  %v4287_v22 = vld [vmem:[#allocation5 + $0x1a0] sm:$0xff] }
 0xb91   : > { %v4257_v16 = vadd.f32 %v4233_v3, %v4209_v14  ;;  %v4286_v14 = vld [vmem:[#allocation5 + $0x198] sm:$0xff]  ;;  %v4284_v3 = vld [vmem:[#allocation5 + $0x188] sm:$0xff] }
 0xb92   : > { %4272 = vst.msk [vmem:[#allocation4 + $0x1b0] sm:$0xff] %vm1672_vm6, %v4256_v30  ;;  %v4382_v55 = vmul.f32 %v10686_v10, %v4286_v14  ;;  %v4383_v10 = vmul.f32 %v10684_v33, %v4287_v22  ;;  %v4389_v33 = vmul.f32 %v10692_v56, %v4293_v15 }
 0xb93   : > { %4273 = vst.msk [vmem:[#allocation4 + $0x1b8] sm:$0xff] %vm1672_vm6, %v4257_v16  ;;  %v4227_v25 = vpop.xlane.xlu1 %4226  ;;  %v4289_v16 = vld [vmem:[#allocation5 + $0x1b0] sm:$0xff] }
 0xb94   : > { %v4229_v37 = vpop.xlane.xlu0 %4228  ;;  %v4254_v7 = vadd.f32 %v4227_v25, %v4206_v11 }
 0xb95   : > { %v4255_v42 = vadd.f32 %v4229_v37, %v4207_v31  ;;  %v4380_v31 = vmul.f32 %v10680_v21, %v4284_v3  ;;  %v4385_v37 = vmul.f32 %v10688_v58, %v4289_v16 }
 0xb96   : > { %4270 = vst.msk [vmem:[#allocation4 + $0x1a0] sm:$0xff] %vm1672_vm6, %v4254_v7  ;;  %v4290_v7 = vld [vmem:[#allocation5 + $0x1b8] sm:$0xff] }
 0xb97   : > { %4271 = vst.msk [vmem:[#allocation4 + $0x1a8] sm:$0xff] %vm1672_vm6, %v4255_v42  ;;  %v4239_v13 = vpop.xlane.xlu1 %4238  ;;  %v4386_v21 = vmul.f32 %v10690_v41, %v4290_v7  ;;  %v4387_v41 = vmul.f32 %v10696_v4, %v4291_v19 }
 0xb98   : > { %v4241_v43 = vpop.xlane.xlu0 %4240  ;;  %v4260_v6 = vadd.f32 %v4239_v13, %v4212_v36  ;;  %v4288_v36 = vld [vmem:[#allocation5 + $0x1a8] sm:$0xff] }
 0xb99   : > { %v4261_v62 = vadd.f32 %v4241_v43, %v4213_v40  ;;  %v4384_v58 = vmul.f32 %v10694_v18, %v4288_v36 }
 0xb9a   : > { %4276 = vst.msk [vmem:[#allocation4 + $0x1d0] sm:$0xff] %vm1672_vm6, %v4260_v6 }
 0xb9b   : > { %4277 = vst.msk [vmem:[#allocation4 + $0x1d8] sm:$0xff] %vm1672_vm6, %v4261_v62  ;;  %v4235_v57 = vpop.xlane.xlu1 %4234 }
 0xb9c   : > { %v4237_v44 = vpop.xlane.xlu0 %4236  ;;  %v4258_v23 = vadd.f32 %v4235_v57, %v4210_v29 }
 0xb9d   : > { %v4259_v48 = vadd.f32 %v4237_v44, %v4211_v46  ;;  %v4294_v46 = vld [vmem:[#allocation5 + $0x1d8] sm:$0xff] }
 0xb9e   : > { %4274 = vst.msk [vmem:[#allocation4 + $0x1c0] sm:$0xff] %vm1672_vm6, %v4258_v23  ;;  %v4292_v23 = vld [vmem:[#allocation5 + $0x1c8] sm:$0xff]  ;;  %v4390_v18 = vmul.f32 %v10698_v38, %v4294_v46 }
 0xb9f   : > { %4275 = vst.msk [vmem:[#allocation4 + $0x1c8] sm:$0xff] %vm1672_vm6, %v4259_v48 }
 0xba4   : > { %v4247_v39 = vpop.xlane.xlu1 %4246 }
 0xba5   : > { %v4264_v50 = vadd.f32 %v4247_v39, %v4216_v26  ;;  %v4297_v26 = vld [vmem:[#allocation5 + $0x1f0] sm:$0xff]  ;;  %v4388_v39 = vmul.f32 %v10702_v28, %v4292_v23 }
 0xba7   : > { %4280 = vst.msk [vmem:[#allocation4 + $0x1f0] sm:$0xff] %vm1672_vm6, %v4264_v50  ;;  %v4249_v53 = vpop.xlane.xlu0 %4248  ;;  %v4295_v50 = vld [vmem:[#allocation5 + $0x1e0] sm:$0xff] }
 0xba8   : > { %v4265_v61 = vadd.f32 %v4249_v53, %v4217_v54  ;;  %v4243_v12 = vpop.xlane.xlu1 %4242 }
 0xba9   : > { %v4262_v49 = vadd.f32 %v4243_v12, %v4214_v45  ;;  %v4298_v45 = vld [vmem:[#allocation5 + $0x1f8] sm:$0xff] }
 0xbaa   : > { %4281 = vst.msk [vmem:[#allocation4 + $0x1f8] sm:$0xff] %vm1672_vm6, %v4265_v61  ;;  %v4391_v61 = vmul.f32 %v10700_v5, %v4295_v50 }
 0xbab   : > { %4278 = vst.msk [vmem:[#allocation4 + $0x1e0] sm:$0xff] %vm1672_vm6, %v4262_v49  ;;  %v4245_v51 = vpop.xlane.xlu0 %4244  ;;  %v4296_v49 = vld [vmem:[#allocation5 + $0x1e8] sm:$0xff] }
 0xbac   : > { %v4263_v59 = vadd.f32 %v4245_v51, %v4215_v24  ;;  %v4377_v9 = vpop.permute.xlu1 %4376  ;;  %v4392_v32 = vmul.f32 %v10706_v35, %v4296_v49 }
 0xbad   : > { %v4394_v28 = vmul.f32 %v4377_v9, %v4298_v45 }
 0xbae   : > { %4279 = vst.msk [vmem:[#allocation4 + $0x1e8] sm:$0xff] %vm1672_vm6, %v4263_v59 }
 0xbb3   : > { %v4372_v0 = vpop.permute.xlu0 %4371 }
 0xbb4   : > { %v4393_v54 = vmul.f32 %v4372_v0, %v4297_v26 }
 0xbc8   : > { %v6694_v60 = vpop.f32.mrf.mxu0 }
 0xbc9   : > { %v4526_v2 = vadd.f32 %v6694_v60, %v4381_v17 }
 0xbca   : > { %v4461_v30 = vpop.f32.mrf.mxu0 }
 0xbcb   : > { %4542 = vst.msk [vmem:[#allocation5 + $0x190] sm:$0xff] %vm1184_vm3, %v4526_v2  ;;  %v4524_v1 = vadd.f32 %v4461_v30, %v4379_v34 }
 0xbcc   : > { %v6695_v11 = vpop.f32.mrf.mxu0 }
 0xbcd   : > { %4540 = vst.msk [vmem:[#allocation5 + $0x180] sm:$0xff] %vm1184_vm3, %v4524_v1  ;;  %v4527_v25 = vadd.f32 %v6695_v11, %v4382_v55 }
 0xbce   : > { %v4464_v47 = vpop.f32.mrf.mxu0 }
 0xbcf   : > { %4543 = vst.msk [vmem:[#allocation5 + $0x198] sm:$0xff] %vm1184_vm3, %v4527_v25  ;;  %v4525_v20 = vadd.f32 %v4464_v47, %v4380_v31 }
 0xbd0   : > { %v6698_v63 = vpop.f32.mrf.mxu0 }
 0xbd1   : > { %4541 = vst.msk [vmem:[#allocation5 + $0x188] sm:$0xff] %vm1184_vm3, %v4525_v20  ;;  %v4530_v42 = vadd.f32 %v6698_v63, %v4385_v37 }
 0xbd2   : > { %v4477_v40 = vpop.f32.mrf.mxu0 }
 0xbd3   : > { %4546 = vst.msk [vmem:[#allocation5 + $0x1b0] sm:$0xff] %vm1184_vm3, %v4530_v42  ;;  %v4528_v13 = vadd.f32 %v4477_v40, %v4383_v10 }
 0xbd4   : > { %v6699_v43 = vpop.f32.mrf.mxu0 }
 0xbd5   : > { %4544 = vst.msk [vmem:[#allocation5 + $0x1a0] sm:$0xff] %vm1184_vm3, %v4528_v13  ;;  %v4531_v6 = vadd.f32 %v6699_v43, %v4386_v21 }
 0xbd6   : > { %v4480_v62 = vpop.f32.mrf.mxu0 }
 0xbd7   : > { %4547 = vst.msk [vmem:[#allocation5 + $0x1b8] sm:$0xff] %vm1184_vm3, %v4531_v6  ;;  %v4529_v29 = vadd.f32 %v4480_v62, %v4384_v58 }
 0xbd8   : > { %v6702_v57 = vpop.f32.mrf.mxu0 }
 0xbd9   : > { %4545 = vst.msk [vmem:[#allocation5 + $0x1a8] sm:$0xff] %vm1184_vm3, %v4529_v29  ;;  %v4534_v44 = vadd.f32 %v6702_v57, %v4389_v33 }
 0xbda   : > { %v4493_v48 = vpop.f32.mrf.mxu0 }
 0xbdb   : > { %4550 = vst.msk [vmem:[#allocation5 + $0x1d0] sm:$0xff] %vm1184_vm3, %v4534_v44  ;;  %v4532_v8 = vadd.f32 %v4493_v48, %v4387_v41 }
 0xbdc   : > { %v6703_v56 = vpop.f32.mrf.mxu0 }
 0xbdd   : > { %4548 = vst.msk [vmem:[#allocation5 + $0x1c0] sm:$0xff] %vm1184_vm3, %v4532_v8  ;;  %v4535_v27 = vadd.f32 %v6703_v56, %v4390_v18 }
 0xbde   : > { %v4496_v4 = vpop.f32.mrf.mxu0 }
 0xbdf   : > { %4551 = vst.msk [vmem:[#allocation5 + $0x1d8] sm:$0xff] %vm1184_vm3, %v4535_v27  ;;  %v4533_v53 = vadd.f32 %v4496_v4, %v4388_v39 }
 0xbe0   : > { %v6706_v38 = vpop.f32.mrf.mxu0 }
 0xbe1   : > { %4549 = vst.msk [vmem:[#allocation5 + $0x1c8] sm:$0xff] %vm1184_vm3, %v4533_v53  ;;  %v4538_v12 = vadd.f32 %v6706_v38, %v4393_v54 }
 0xbe2   : > { %v4509_v24 = vpop.f32.mrf.mxu0 }
 0xbe3   : > { %4554 = vst.msk [vmem:[#allocation5 + $0x1f0] sm:$0xff] %vm1184_vm3, %v4538_v12  ;;  %v4536_v51 = vadd.f32 %v4509_v24, %v4391_v61 }
 0xbe4   : > { %v6707_v59 = vpop.f32.mrf.mxu0 }
 0xbe5   : > { %4552 = vst.msk [vmem:[#allocation5 + $0x1e0] sm:$0xff] %vm1184_vm3, %v4536_v51  ;;  %v4539_v52 = vadd.f32 %v6707_v59, %v4394_v28 }
 0xbe6   : > { %v4512_v17 = vpop.f32.mrf.mxu0 }
 0xbe7   : > { %4555 = vst.msk [vmem:[#allocation5 + $0x1f8] sm:$0xff] %vm1184_vm3, %v4539_v52  ;;  %v4537_v14 = vadd.f32 %v4512_v17, %v4392_v32 }
 0xbe9   : > { %4553 = vst.msk [vmem:[#allocation5 + $0x1e8] sm:$0xff] %vm1184_vm3, %v4537_v14 }
 0xbea PF: > { %p6171_p1 = scmp.ne.s32.totalorder %s7669_s29, 1 }
 0xbeb   : > { %s11429_s15 = sld [smem:[#allocation125_spill]] (!%p6171_p1) }
 0xbec   : > { %4575 = sbr.rel (%p6171_p1) target bundleno = 3531 (0xdcb), region = 64 }
 0xbf1   : > { %v4751_v5 = vld [vmem:[#allocation4 + $0x90] sm:$0xff]  ;;  %v4749_v60 = vld [vmem:[#allocation4 + $0x80] sm:$0xff]  ;;  %v4752_v34 = vld [vmem:[#allocation4 + $0x98] sm:$0xff]  ;;  %v7712_v2 = vmov 0   ;;  %vm4934_vm7 = vcmask 261120  }
 0xbf2   : > { %7320 = vset.pattern.permute.xlu1 %v7712_v2  ;;  %7319 = vset.pattern.permute.xlu0 %v7712_v2  ;;  %v4767_v35 = vmax.f32 %v4751_v5, 1e-30  ;;  %v4765_v3 = vmax.f32 %v4749_v60, 1e-30  ;;  %v4768_v30 = vmax.f32 %v4752_v34, 1e-30 }
 0xbf3   : > { %v4750_v55 = vld [vmem:[#allocation4 + $0x88] sm:$0xff]  ;;  %v4576_v11 = vld [vmem:[#allocation4] sm:$0xff]  ;;  %v4579_v22 = vld [vmem:[#allocation4 + $0x18] sm:$0xff] }
 0xbf4   : > { %v4577_v1 = vld [vmem:[#allocation4 + $0x8] sm:$0xff]  ;;  %7329 = vrcp.f32 %v4767_v35  ;;  %v4766_v16 = vmax.f32 %v4750_v55, 1e-30  ;;  %v4592_v25 = vmax.f32 %v4576_v11, 1e-30  ;;  %v4578_v47 = vld [vmem:[#allocation4 + $0x10] sm:$0xff] }
 0xbf5   : > { %7331 = vrcp.f32 %v4765_v3  ;;  %v4593_v31 = vmax.f32 %v4577_v1, 1e-30  ;;  %v4595_v37 = vmax.f32 %v4579_v22, 1e-30  ;;  %v4594_v20 = vmax.f32 %v4578_v47, 1e-30 }
 0xbf6   : > { %7333 = vrcp.f32 %v4768_v30  ;;  %v4754_v7 = vld [vmem:[#allocation4 + $0xa8] sm:$0xff]  ;;  %v4753_v63 = vld [vmem:[#allocation4 + $0xa0] sm:$0xff]  ;;  %v4756_v36 = vld [vmem:[#allocation4 + $0xb8] sm:$0xff] }
 0xbf7   : > { %7335 = vrcp.f32 %v4766_v16  ;;  %v4770_v10 = vmax.f32 %v4754_v7, 1e-30  ;;  %v4769_v42 = vmax.f32 %v4753_v63, 1e-30  ;;  %v4755_v40 = vld [vmem:[#allocation4 + $0xb0] sm:$0xff]  ;;  %v4581_v6 = vld [vmem:[#allocation4 + $0x28] sm:$0xff] }
 0xbf8   : > { %7337 = vrcp.f32 %v4593_v31  ;;  %v4772_v15 = vmax.f32 %v4756_v36, 1e-30  ;;  %v4771_v58 = vmax.f32 %v4755_v40, 1e-30  ;;  %v4580_v62 = vld [vmem:[#allocation4 + $0x20] sm:$0xff]  ;;  %v4583_v57 = vld [vmem:[#allocation4 + $0x38] sm:$0xff] }
 0xbf9   : > { %7339 = vrcp.f32 %v4592_v25  ;;  %v4597_v33 = vmax.f32 %v4581_v6, 1e-30  ;;  %v4596_v46 = vmax.f32 %v4580_v62, 1e-30  ;;  %v4582_v44 = vld [vmem:[#allocation4 + $0x30] sm:$0xff]  ;;  %v4758_v8 = vld [vmem:[#allocation4 + $0xc8] sm:$0xff] }
 0xbfa   : > { %7341 = vrcp.f32 %v4595_v37  ;;  %v4599_v23 = vmax.f32 %v4583_v57, 1e-30  ;;  %v4598_v18 = vmax.f32 %v4582_v44, 1e-30  ;;  %v4757_v0 = vld [vmem:[#allocation4 + $0xc0] sm:$0xff]  ;;  %v4760_v50 = vld [vmem:[#allocation4 + $0xd8] sm:$0xff] }
 0xbfb   : > { %7343 = vrcp.f32 %v4594_v20  ;;  %v4774_v56 = vmax.f32 %v4758_v8, 1e-30  ;;  %v4773_v27 = vmax.f32 %v4757_v0, 1e-30  ;;  %v4759_v54 = vld [vmem:[#allocation4 + $0xd0] sm:$0xff]  ;;  %v4585_v38 = vld [vmem:[#allocation4 + $0x48] sm:$0xff] }
 0xbfc   : > { %7345 = vrcp.f32 %v4770_v10  ;;  %v4776_v53 = vmax.f32 %v4760_v50, 1e-30  ;;  %v4775_v9 = vmax.f32 %v4759_v54, 1e-30  ;;  %v4584_v12 = vld [vmem:[#allocation4 + $0x40] sm:$0xff]  ;;  %v4587_v51 = vld [vmem:[#allocation4 + $0x58] sm:$0xff] }
 0xbfd   : > { %7347 = vrcp.f32 %v4769_v42  ;;  %v4601_v49 = vmax.f32 %v4585_v38, 1e-30  ;;  %v4600_v28 = vmax.f32 %v4584_v12, 1e-30  ;;  %v4586_v32 = vld [vmem:[#allocation4 + $0x50] sm:$0xff]  ;;  %v4762_v5 = vld [vmem:[#allocation4 + $0xe8] sm:$0xff] }
 0xbfe   : > { %7349 = vrcp.f32 %v4772_v15  ;;  %v4603_v52 = vmax.f32 %v4587_v51, 1e-30  ;;  %v4602_v14 = vmax.f32 %v4586_v32, 1e-30  ;;  %v4761_v60 = vld [vmem:[#allocation4 + $0xe0] sm:$0xff]  ;;  %v4764_v35 = vld [vmem:[#allocation4 + $0xf8] sm:$0xff] }
 0xbff   : > { %7351 = vrcp.f32 %v4771_v58  ;;  %v7321_v2 = vld [vmem:[#allocation13 + $0x34] ss:$8 sps:$4 sm:$0xff]   ;;  %v4778_v3 = vmax.f32 %v4762_v5, 1e-30  ;;  %v4777_v30 = vmax.f32 %v4761_v60, 1e-30 }
 0xc00   : > { %7353 = vrcp.f32 %v4597_v33  ;;  %6708 = vmatprep.subr.bf16.mxu0 %v7321_v2  ;;  %v7322_v55 = vld [vmem:[#allocation13 + $0x24] ss:$8 sps:$4 sm:$0xff]   ;;  %v7323_v16 = vld [vmem:[#allocation13 + $0x14] ss:$8 sps:$4 sm:$0xff]   ;;  %v4780_v22 = vmax.f32 %v4764_v35, 1e-30 }
 0xc01   : > { %v7330_v21 = vpop.eup %7329  ;;  %7355 = vrcp.f32 %v4596_v46  ;;  %6709 = vmatpush3.bf16.msra.mxu0 %v7321_v2  ;;  %v4763_v31 = vld [vmem:[#allocation4 + $0xf0] sm:$0xff]  ;;  %6728 = vmatprep.subr.bf16.mxu1 %v7323_v16  ;;  %v7324_v25 = vld [vmem:[#allocation13 + $0x4] ss:$8 sps:$4 sm:$0xff]   ;;  %v4591_v36 = vld [vmem:[#allocation4 + $0x78] sm:$0xff] }
 0xc02   : > { %v7332_v13 = vpop.eup %7331  ;;  %4826 = vperm.xlu1 %7320, %v7330_v21   ;;  %7357 = vrcp.f32 %v4599_v23  ;;  %6710 = vmatprep.subr.bf16.mxu0 %v7322_v55  ;;  %v4589_v47 = vld [vmem:[#allocation4 + $0x68] sm:$0xff]  ;;  %v4588_v37 = vld [vmem:[#allocation4 + $0x60] sm:$0xff]  ;;  %v4779_v7 = vmax.f32 %v4763_v31, 1e-30  ;;  %v4590_v40 = vld [vmem:[#allocation4 + $0x70] sm:$0xff] }
 0xc03   : > { %v7334_v43 = vpop.eup %7333  ;;  %4816 = vperm.xlu0 %7319, %v7332_v13   ;;  %7359 = vrcp.f32 %v4598_v18  ;;  %6729 = vmatpush3.bf16.msra.mxu1 %v7323_v16  ;;  %v4605_v10 = vmax.f32 %v4589_v47, 1e-30  ;;  %v4604_v42 = vmax.f32 %v4588_v37, 1e-30  ;;  %v4607_v15 = vmax.f32 %v4591_v36, 1e-30 }
 0xc04   : > { %v7336_v19 = vpop.eup %7335  ;;  %7361 = vrcp.f32 %v4774_v56  ;;  %6730 = vmatprep.subr.bf16.mxu1 %v7324_v25  ;;  %v4606_v58 = vmax.f32 %v4590_v40, 1e-30  ;;  %v5191_v6 = vld [vmem:[#allocation4 + $0x108] sm:$0xff]  ;;  %v5190_v62 = vld [vmem:[#allocation4 + $0x100] sm:$0xff]  ;;  %v5193_v57 = vld [vmem:[#allocation4 + $0x118] sm:$0xff] }
 0xc05   : > { %v7338_v29 = vpop.eup %7337  ;;  %7363 = vrcp.f32 %v4773_v27  ;;  %6711 = vmatpush3.bf16.msra.mxu0 %v7322_v55  ;;  %v5207_v33 = vmax.f32 %v5191_v6, 1e-30  ;;  %v5206_v46 = vmax.f32 %v5190_v62, 1e-30  ;;  %v5192_v44 = vld [vmem:[#allocation4 + $0x110] sm:$0xff]  ;;  %v5514_v8 = vld [vmem:[#allocation4 + $0x188] sm:$0xff] }
 0xc06   : > { %4831 = vperm.xlu1 %7320, %v7334_v43   ;;  %v7340_v41 = vpop.eup %7339  ;;  %7365 = vrcp.f32 %v4776_v53  ;;  %v5209_v23 = vmax.f32 %v5193_v57, 1e-30  ;;  %v5208_v18 = vmax.f32 %v5192_v44, 1e-30  ;;  %v5513_v0 = vld [vmem:[#allocation4 + $0x180] sm:$0xff]  ;;  %v5516_v50 = vld [vmem:[#allocation4 + $0x198] sm:$0xff] }
 0xc07   : > { %4821 = vperm.xlu0 %7319, %v7336_v19   ;;  %v7342_v48 = vpop.eup %7341  ;;  %7367 = vrcp.f32 %v4775_v9  ;;  %6731 = vmatpush3.bf16.msra.mxu1 %v7324_v25  ;;  %v5530_v56 = vmax.f32 %v5514_v8, 1e-30  ;;  %v5529_v27 = vmax.f32 %v5513_v0, 1e-30  ;;  %v5515_v54 = vld [vmem:[#allocation4 + $0x190] sm:$0xff]  ;;  %v5195_v38 = vld [vmem:[#allocation4 + $0x128] sm:$0xff] }
 0xc08   : > { %v7344_v26 = vpop.eup %7343  ;;  %7369 = vrcp.f32 %v4601_v49  ;;  %v5532_v53 = vmax.f32 %v5516_v50, 1e-30  ;;  %v5531_v9 = vmax.f32 %v5515_v54, 1e-30  ;;  %v5194_v12 = vld [vmem:[#allocation4 + $0x120] sm:$0xff]  ;;  %v5518_v60 = vld [vmem:[#allocation4 + $0x1a8] sm:$0xff] }
 0xc09   : > { %v7346_v39 = vpop.eup %7345  ;;  %7371 = vrcp.f32 %v4600_v28  ;;  %v10769_v49 = vld [vmem:[#allocation13 + $0x54] ss:$8 sps:$4 sm:$0xff]   ;;  %v5210_v51 = vmax.f32 %v5194_v12, 1e-30  ;;  %v5517_v2 = vld [vmem:[#allocation4 + $0x1a0] sm:$0xff]  ;;  %v5199_v47 = vld [vmem:[#allocation4 + $0x148] sm:$0xff] }
 0xc0a   : > { %4647 = vperm.xlu1 %7320, %v7338_v29   ;;  %v7348_v4 = vpop.eup %7347  ;;  %7373 = vrcp.f32 %v4603_v52  ;;  %6748 = vmatprep.subr.bf16.mxu0 %v10769_v49  ;;  %v5196_v52 = vld [vmem:[#allocation4 + $0x130] sm:$0xff]  ;;  %v5533_v55 = vmax.f32 %v5517_v2, 1e-30  ;;  %v5521_v6 = vld [vmem:[#allocation4 + $0x1c0] sm:$0xff] }
 0xc0b   : > { %4642 = vperm.xlu0 %7319, %v7340_v41   ;;  %v7350_v45 = vpop.eup %7349  ;;  %7375 = vrcp.f32 %v4602_v14  ;;  %v5212_v5 = vmax.f32 %v5196_v52, 1e-30  ;;  %v10772_v35 = vld [vmem:[#allocation13 + $0x74] ss:$8 sps:$4 sm:$0xff]   ;;  %v5202_v8 = vld [vmem:[#allocation4 + $0x160] sm:$0xff] }
 0xc0c   : > { %v7352_v61 = vpop.eup %7351  ;;  %7377 = vrcp.f32 %v4778_v3  ;;  %v5534_v3 = vmax.f32 %v5518_v60, 1e-30  ;;  %6768 = vmatprep.subr.bf16.mxu1 %v10772_v35  ;;  %v5200_v40 = vld [vmem:[#allocation4 + $0x150] sm:$0xff] }
 0xc0d   : > { %v7354_v24 = vpop.eup %7353  ;;  %7379 = vrcp.f32 %v4777_v30  ;;  %v5523_v57 = vld [vmem:[#allocation4 + $0x1d0] sm:$0xff] }
 0xc0e   : > { %4657 = vperm.xlu1 %7320, %v7342_v48   ;;  %v7356_v59 = vpop.eup %7355  ;;  %7381 = vrcp.f32 %v4780_v22  ;;  %v5204_v50 = vld [vmem:[#allocation4 + $0x170] sm:$0xff] }
 0xc0f   : > { %4652 = vperm.xlu0 %7319, %v7344_v26   ;;  %v7358_v17 = vpop.eup %7357  ;;  %7383 = vrcp.f32 %v4779_v7  ;;  %v5215_v7 = vmax.f32 %v5199_v47, 1e-30  ;;  %v4799_v47 = vld [vmem:[#allocation5 + $0x88] sm:$0xff] }
 0xc10   : > { %v7360_v34 = vpop.eup %7359  ;;  %7385 = vrcp.f32 %v4605_v10 }
 0xc11   : > { %v7362_v1 = vpop.eup %7361  ;;  %7387 = vrcp.f32 %v4604_v42  ;;  %v5201_v42 = vld [vmem:[#allocation4 + $0x158] sm:$0xff] }
 0xc12   : > { %4841 = vperm.xlu1 %7320, %v7346_v39   ;;  %v7364_v11 = vpop.eup %7363  ;;  %7389 = vrcp.f32 %v4607_v15  ;;  %v5216_v15 = vmax.f32 %v5200_v40, 1e-30 }
 0xc13   : > { %4836 = vperm.xlu0 %7319, %v7348_v4   ;;  %v7366_v20 = vpop.eup %7365  ;;  %7391 = vrcp.f32 %v4606_v58 }
 0xc14   : > { %v7368_v63 = vpop.eup %7367  ;;  %7393 = vrcp.f32 %v5207_v33  ;;  %v5537_v33 = vmax.f32 %v5521_v6, 1e-30  ;;  %v7326_v6 = vld [vmem:[#allocation13 + $0x44] ss:$8 sps:$4 sm:$0xff]  }
 0xc15   : > { %v7370_v21 = vpop.eup %7369  ;;  %7395 = vrcp.f32 %v5206_v46 }
 0xc16   : > { %4851 = vperm.xlu1 %7320, %v7350_v45   ;;  %v7372_v13 = vpop.eup %7371  ;;  %7397 = vrcp.f32 %v5209_v23  ;;  %v5539_v23 = vmax.f32 %v5523_v57, 1e-30 }
 0xc17   : > { %4846 = vperm.xlu0 %7319, %v7352_v61   ;;  %v7374_v43 = vpop.eup %7373  ;;  %7399 = vrcp.f32 %v5208_v18 }
 0xc18   : > { %v7376_v19 = vpop.eup %7375  ;;  %7401 = vrcp.f32 %v5530_v56  ;;  %v5218_v56 = vmax.f32 %v5202_v8, 1e-30 }
 0xc19   : > { %v7378_v29 = vpop.eup %7377  ;;  %7403 = vrcp.f32 %v5529_v27 }
 0xc1a   : > { %4667 = vperm.xlu1 %7320, %v7354_v24   ;;  %v7380_v41 = vpop.eup %7379  ;;  %7405 = vrcp.f32 %v5532_v53  ;;  %v5211_v24 = vmax.f32 %v5195_v38, 1e-30  ;;  %v5220_v53 = vmax.f32 %v5204_v50, 1e-30  ;;  %v5525_v38 = vld [vmem:[#allocation4 + $0x1e0] sm:$0xff]  ;;  %v4804_v50 = vld [vmem:[#allocation5 + $0xb0] sm:$0xff] }
 0xc1b   : > { %4662 = vperm.xlu0 %7319, %v7356_v59   ;;  %v7382_v48 = vpop.eup %7381  ;;  %7407 = vrcp.f32 %v5531_v9  ;;  %v5197_v59 = vld [vmem:[#allocation4 + $0x138] sm:$0xff] }
 0xc1c   : > { %v7384_v26 = vpop.eup %7383  ;;  %7409 = vrcp.f32 %v5211_v24  ;;  %v5541_v24 = vmax.f32 %v5525_v38, 1e-30  ;;  %v4628_v38 = vld [vmem:[#allocation5 + $0x20] sm:$0xff] }
 0xc1d   : > { %v7386_v39 = vpop.eup %7385  ;;  %7411 = vrcp.f32 %v5210_v51 }
 0xc1e   : > { %4677 = vperm.xlu1 %7320, %v7358_v17   ;;  %v7388_v4 = vpop.eup %7387  ;;  %v5213_v17 = vmax.f32 %v5197_v59, 1e-30  ;;  %v5527_v59 = vld [vmem:[#allocation4 + $0x1f0] sm:$0xff] }
 0xc1f   : > { %4672 = vperm.xlu0 %7319, %v7360_v34   ;;  %v7390_v45 = vpop.eup %7389 }
 0xc20   : > { %v7392_v61 = vpop.eup %7391  ;;  %7413 = vrcp.f32 %v5213_v17  ;;  %v5543_v17 = vmax.f32 %v5527_v59, 1e-30  ;;  %v4631_v59 = vld [vmem:[#allocation5 + $0x38] sm:$0xff] }
 0xc21   : > { %v7394_v28 = vpop.eup %7393  ;;  %7415 = vrcp.f32 %v5212_v5 }
 0xc22   : > { %4861 = vperm.xlu1 %7320, %v7362_v1   ;;  %v7396_v32 = vpop.eup %7395  ;;  %v5520_v1 = vld [vmem:[#allocation4 + $0x1b8] sm:$0xff]  ;;  %7417 = vrcp.f32 %v5534_v3 }
 0xc23   : > { %4856 = vperm.xlu0 %7319, %v7364_v11   ;;  %v7398_v14 = vpop.eup %7397  ;;  %v5519_v11 = vld [vmem:[#allocation4 + $0x1b0] sm:$0xff]  ;;  %v5536_v31 = vmax.f32 %v5520_v1, 1e-30  ;;  %7419 = vrcp.f32 %v5533_v55 }
 0xc24   : > { %v7400_v34 = vpop.eup %7399  ;;  %v5535_v22 = vmax.f32 %v5519_v11, 1e-30 }
 0xc25   : > { %v7402_v30 = vpop.eup %7401  ;;  %7421 = vrcp.f32 %v5536_v31  ;;  %v4800_v31 = vld [vmem:[#allocation5 + $0x90] sm:$0xff] }
 0xc26   : > { %4871 = vperm.xlu1 %7320, %v7366_v20   ;;  %v7404_v16 = vpop.eup %7403  ;;  %v5198_v20 = vld [vmem:[#allocation4 + $0x140] sm:$0xff]  ;;  %7423 = vrcp.f32 %v5535_v22 }
 0xc27   : > { %4866 = vperm.xlu0 %7319, %v7368_v63   ;;  %v7406_v25 = vpop.eup %7405  ;;  %v5214_v10 = vmax.f32 %v5198_v20, 1e-30  ;;  %7425 = vrcp.f32 %v5215_v7  ;;  %v4798_v22 = vld [vmem:[#allocation5 + $0x80] sm:$0xff] }
 0xc28   : > { %v7408_v37 = vpop.eup %7407 }
 0xc29   : > { %v7410_v63 = vpop.eup %7409  ;;  %7427 = vrcp.f32 %v5214_v10 }
 0xc2a   : > { %4687 = vperm.xlu1 %7320, %v7370_v21   ;;  %v7412_v36 = vpop.eup %7411  ;;  %v5217_v21 = vmax.f32 %v5201_v42, 1e-30 }
 0xc2b   : > { %4682 = vperm.xlu0 %7319, %v7372_v13  }
 0xc2c   : > { %7429 = vrcp.f32 %v5217_v21  ;;  %v4624_v21 = vld [vmem:[#allocation5] sm:$0xff] }
 0xc2d   : > { %v7414_v13 = vpop.eup %7413  ;;  %7431 = vrcp.f32 %v5216_v15 }
 0xc2e   : > { %4697 = vperm.xlu1 %7320, %v7374_v43   ;;  %v5522_v43 = vld [vmem:[#allocation4 + $0x1c8] sm:$0xff]  ;;  %v7416_v58 = vpop.eup %7415 }
 0xc2f   : > { %4692 = vperm.xlu0 %7319, %v7376_v19   ;;  %v5538_v19 = vmax.f32 %v5522_v43, 1e-30  ;;  %v7418_v62 = vpop.eup %7417 }
 0xc30   : > { %v7420_v46 = vpop.eup %7419 }
 0xc31   : > { %7433 = vrcp.f32 %v5538_v19 }
 0xc32   : > { %4881 = vperm.xlu1 %7320, %v7378_v29   ;;  %v5524_v29 = vld [vmem:[#allocation4 + $0x1d8] sm:$0xff]  ;;  %v7422_v44 = vpop.eup %7421  ;;  %7435 = vrcp.f32 %v5537_v33  ;;  %v4626_v33 = vld [vmem:[#allocation5 + $0x10] sm:$0xff] }
 0xc33   : > { %4876 = vperm.xlu0 %7319, %v7380_v41   ;;  %v5540_v41 = vmax.f32 %v5524_v29, 1e-30  ;;  %v7424_v18 = vpop.eup %7423 }
 0xc34   : > { %v7426_v0 = vpop.eup %7425 }
 0xc35   : > { %7437 = vrcp.f32 %v5540_v41 }
 0xc36   : > { %4891 = vperm.xlu1 %7320, %v7382_v48   ;;  %v5203_v48 = vld [vmem:[#allocation4 + $0x168] sm:$0xff]  ;;  %7439 = vrcp.f32 %v5539_v23  ;;  %v7428_v27 = vpop.eup %7427 }
 0xc37   : > { %4886 = vperm.xlu0 %7319, %v7384_v26   ;;  %v5219_v26 = vmax.f32 %v5203_v48, 1e-30  ;;  %v4803_v23 = vld [vmem:[#allocation5 + $0xa8] sm:$0xff]  ;;  %v4802_v48 = vld [vmem:[#allocation5 + $0xa0] sm:$0xff] }
 0xc39   : > { %7441 = vrcp.f32 %v5219_v26  ;;  %v7430_v54 = vpop.eup %7429  ;;  %v7328_v26 = vld [vmem:[#allocation13 + $0x64] ss:$8 sps:$4 sm:$0xff]  }
 0xc3a   : > { %4707 = vperm.xlu1 %7320, %v7386_v39   ;;  %v5205_v39 = vld [vmem:[#allocation4 + $0x178] sm:$0xff]  ;;  %7443 = vrcp.f32 %v5218_v56  ;;  %v7432_v9 = vpop.eup %7431 }
 0xc3b   : > { %4702 = vperm.xlu0 %7319, %v7388_v4   ;;  %v5221_v4 = vmax.f32 %v5205_v39, 1e-30 }
 0xc3d   : > { %7445 = vrcp.f32 %v5221_v4 }
 0xc3e   : > { %4717 = vperm.xlu1 %7320, %v7390_v45   ;;  %v5526_v45 = vld [vmem:[#allocation4 + $0x1e8] sm:$0xff]  ;;  %v7434_v12 = vpop.eup %7433  ;;  %7447 = vrcp.f32 %v5220_v53 }
 0xc3f   : > { %4712 = vperm.xlu0 %7319, %v7392_v61   ;;  %v5542_v61 = vmax.f32 %v5526_v45, 1e-30  ;;  %v7436_v51 = vpop.eup %7435 }
 0xc41   : > { %7449 = vrcp.f32 %v5542_v61 }
 0xc42   : > { %5262 = vperm.xlu1 %7320, %v7394_v28   ;;  %v5528_v28 = vld [vmem:[#allocation4 + $0x1f8] sm:$0xff]  ;;  %v7438_v52 = vpop.eup %7437  ;;  %7451 = vrcp.f32 %v5541_v24 }
 0xc43   : > { %5257 = vperm.xlu0 %7319, %v7396_v32   ;;  %v5544_v32 = vmax.f32 %v5528_v28, 1e-30 }
 0xc45   : > { %7453 = vrcp.f32 %v5544_v32 }
 0xc46   : > { %5272 = vperm.xlu1 %7320, %v7398_v14   ;;  %v7440_v14 = vpop.eup %7439  ;;  %7455 = vrcp.f32 %v5543_v17 }
 0xc47   : > { %5267 = vperm.xlu0 %7319, %v7400_v34   ;;  %v7442_v5 = vpop.eup %7441 }
 0xc48   : > { %v7444_v60 = vpop.eup %7443 }
 0xc4a   : > { %5585 = vperm.xlu1 %7320, %v7402_v30   ;;  %v7446_v34 = vpop.eup %7445 }
 0xc4b   : > { %5580 = vperm.xlu0 %7319, %v7404_v16   ;;  %v7448_v2 = vpop.eup %7447 }
 0xc4e   : > { %5595 = vperm.xlu1 %7320, %v7406_v25   ;;  %v7450_v3 = vpop.eup %7449  ;;  %v4801_v25 = vld [vmem:[#allocation5 + $0x98] sm:$0xff] }
 0xc4f   : > { %5590 = vperm.xlu0 %7319, %v7408_v37   ;;  %v7452_v30 = vpop.eup %7451 }
 0xc52   : > { %5282 = vperm.xlu1 %7320, %v7410_v63   ;;  %v7454_v55 = vpop.eup %7453 }
 0xc53   : > { %5277 = vperm.xlu0 %7319, %v7412_v36   ;;  %v7456_v1 = vpop.eup %7455  ;;  %v4625_v36 = vld [vmem:[#allocation5 + $0x8] sm:$0xff] }
 0xc56   : > { %5292 = vperm.xlu1 %7320, %v7414_v13  }
 0xc57   : > { %5287 = vperm.xlu0 %7319, %v7416_v58  }
 0xc5a   : > { %5605 = vperm.xlu1 %7320, %v7418_v62   ;;  %v4627_v62 = vld [vmem:[#allocation5 + $0x18] sm:$0xff] }
 0xc5b   : > { %5600 = vperm.xlu0 %7319, %v7420_v46  }
 0xc5e   : > { %5615 = vperm.xlu1 %7320, %v7422_v44  }
 0xc5f   : > { %5610 = vperm.xlu0 %7319, %v7424_v18  }
 0xc62   : > { %5302 = vperm.xlu1 %7320, %v7426_v0  }
 0xc63   : > { %5297 = vperm.xlu0 %7319, %v7428_v27   ;;  %v4805_v27 = vld [vmem:[#allocation5 + $0xb8] sm:$0xff] }
 0xc66   : > { %5312 = vperm.xlu1 %7320, %v7430_v54  }
 0xc67   : > { %5307 = vperm.xlu0 %7319, %v7432_v9   ;;  %v4629_v9 = vld [vmem:[#allocation5 + $0x28] sm:$0xff] }
 0xc6a   : > { %5625 = vperm.xlu1 %7320, %v7434_v12  }
 0xc6b   : > { %5620 = vperm.xlu0 %7319, %v7436_v51  }
 0xc6e   : > { %5635 = vperm.xlu1 %7320, %v7438_v52  }
 0xc6f   : > { %5630 = vperm.xlu0 %7319, %v7440_v14  }
 0xc72   : > { %5322 = vperm.xlu1 %7320, %v7442_v5  }
 0xc73   : > { %5317 = vperm.xlu0 %7319, %v7444_v60   ;;  %v4807_v60 = vld [vmem:[#allocation5 + $0xc8] sm:$0xff] }
 0xc76   : > { %5332 = vperm.xlu1 %7320, %v7446_v34   ;;  %v4806_v34 = vld [vmem:[#allocation5 + $0xc0] sm:$0xff] }
 0xc77   : > { %5327 = vperm.xlu0 %7319, %v7448_v2  }
 0xc7a   : > { %5645 = vperm.xlu1 %7320, %v7450_v3  }
 0xc7b   : > { %5640 = vperm.xlu0 %7319, %v7452_v30  }
 0xc7d   : > { %v4827_v16 = vpop.permute.xlu1 %4826 }
 0xc7e   : > { %v4817_v11 = vpop.permute.xlu0 %4816  ;;  %5655 = vperm.xlu1 %7320, %v7454_v55   ;;  %v4896_v20 = vmul.f32 %v4827_v16, %v4800_v31  ;;  %v4809_v16 = vld [vmem:[#allocation5 + $0xd8] sm:$0xff] }
 0xc7f   : > { %5650 = vperm.xlu0 %7319, %v7456_v1   ;;  %v4894_v10 = vmul.f32 %v4817_v11, %v4798_v22  ;;  %v4808_v11 = vld [vmem:[#allocation5 + $0xd0] sm:$0xff] }
 0xc81   : > { %v4832_v37 = vpop.permute.xlu1 %4831 }
 0xc82   : > { %v4897_v7 = vmul.f32 %v4832_v37, %v4801_v25  ;;  %v4822_v63 = vpop.permute.xlu0 %4821 }
 0xc83   : > { %v4895_v42 = vmul.f32 %v4822_v63, %v4799_v47 }
 0xc84   : > { %v4911_v40 = vpack.c.bf16 %v4897_v7, %v4896_v20  ;;  %v4633_v20 = vld [vmem:[#allocation5 + $0x48] sm:$0xff]  ;;  %v4632_v7 = vld [vmem:[#allocation5 + $0x40] sm:$0xff] }
 0xc85   : > { %v4648_v13 = vpop.permute.xlu1 %4647  ;;  %v4910_v15 = vpack.c.bf16 %v4895_v42, %v4894_v10 }
 0xc86   : > { %v4721_v43 = vmul.f32 %v4648_v13, %v4625_v36  ;;  %v4643_v58 = vpop.permute.xlu0 %4642  ;;  %v4634_v13 = vld [vmem:[#allocation5 + $0x50] sm:$0xff] }
 0xc87   : > { %v4720_v19 = vmul.f32 %v4643_v58, %v4624_v21  ;;  %6712 = vmatprep.mubr.msk.bf16.mxu0 %vm4934_vm7, %v4910_v15  ;;  %v4635_v21 = vld [vmem:[#allocation5 + $0x58] sm:$0xff] }
 0xc88   : > { %6713 = vmatmul.mubr.msk.bf16.vlgmr.msra.gmra.mxu0 %vm4934_vm7, %v4911_v40 }
 0xc89   : > { %v4658_v29 = vpop.permute.xlu1 %4657  ;;  %v4736_v46 = vpack.c.bf16 %v4721_v43, %v4720_v19  ;;  %6749 = vmatpush3.bf16.msra.mxu0 %v10769_v49 }
 0xc8a   : > { %v4723_v57 = vmul.f32 %v4658_v29, %v4627_v62  ;;  %v4653_v41 = vpop.permute.xlu0 %4652  ;;  %6750 = vmatprep.subr.bf16.mxu0 %v7326_v6  ;;  %v4811_v62 = vld [vmem:[#allocation5 + $0xe8] sm:$0xff] }
 0xc8b   : > { %v4722_v44 = vmul.f32 %v4653_v41, %v4626_v33  ;;  %6732 = vmatprep.mubr.msk.bf16.mxu1 %vm4934_vm7, %v4736_v46  ;;  %v4810_v33 = vld [vmem:[#allocation5 + $0xe0] sm:$0xff] }
 0xc8d   : > { %v4737_v18 = vpack.c.bf16 %v4723_v57, %v4722_v44  ;;  %v4842_v8 = vpop.permute.xlu1 %4841  ;;  %6751 = vmatpush3.bf16.msra.mxu0 %v7326_v6 }
 0xc8e   : > { %v4899_v0 = vmul.f32 %v4842_v8, %v4803_v23  ;;  %v4837_v56 = vpop.permute.xlu0 %4836  ;;  %v4813_v23 = vld [vmem:[#allocation5 + $0xf8] sm:$0xff] }
 0xc8f   : > { %v4898_v39 = vmul.f32 %v4837_v56, %v4802_v48  ;;  %6733 = vmatmul.mubr.msk.bf16.vlgmr.msra.gmra.mxu1 %vm4934_vm7, %v4737_v18  ;;  %v4812_v48 = vld [vmem:[#allocation5 + $0xf0] sm:$0xff] }
 0xc90   : > { %6769 = vmatpush3.bf16.msra.mxu1 %v10772_v35  ;;  %v4630_v35 = vld [vmem:[#allocation5 + $0x30] sm:$0xff] }
 0xc91   : > { %v4912_v49 = vpack.c.bf16 %v4899_v0, %v4898_v39  ;;  %v4852_v4 = vpop.permute.xlu1 %4851  ;;  %6770 = vmatprep.subr.bf16.mxu1 %v7328_v26  ;;  %v4637_v39 = vld [vmem:[#allocation5 + $0x68] sm:$0xff] }
 0xc92   : > { %v4901_v54 = vmul.f32 %v4852_v4, %v4805_v27  ;;  %v4847_v53 = vpop.permute.xlu0 %4846  ;;  %v4636_v27 = vld [vmem:[#allocation5 + $0x60] sm:$0xff] }
 0xc93   : > { %v4900_v45 = vmul.f32 %v4847_v53, %v4804_v50  ;;  %6716 = vmatprep.mubr.msk.bf16.mxu0 %vm4934_vm7, %v4912_v49 }
 0xc94   : > { %6771 = vmatpush3.bf16.msra.mxu1 %v7328_v26 }
 0xc95   : > { %v4913_v61 = vpack.c.bf16 %v4901_v54, %v4900_v45  ;;  %v4668_v12 = vpop.permute.xlu1 %4667  ;;  %v4639_v45 = vld [vmem:[#allocation5 + $0x78] sm:$0xff] }
 0xc96   : > { %v4725_v24 = vmul.f32 %v4668_v12, %v4629_v9  ;;  %v4663_v28 = vpop.permute.xlu0 %4662  ;;  %v4638_v9 = vld [vmem:[#allocation5 + $0x70] sm:$0xff] }
 0xc97   : > { %v4724_v51 = vmul.f32 %v4663_v28, %v4628_v38  ;;  %6717 = vmatmul.mubr.msk.bf16.gmra.mxu0 %vm4934_vm7, %v4913_v61 }
 0xc99   : > { %v4738_v32 = vpack.c.bf16 %v4725_v24, %v4724_v51  ;;  %v4678_v52 = vpop.permute.xlu1 %4677  ;;  %v5240_v51 = vld [vmem:[#allocation5 + $0x108] sm:$0xff] }
 0xc9a   : > { %v4727_v17 = vmul.f32 %v4678_v52, %v4631_v59  ;;  %v4673_v14 = vpop.permute.xlu0 %4672  ;;  %v5239_v59 = vld [vmem:[#allocation5 + $0x100] sm:$0xff] }
 0xc9b   : > { %v4726_v5 = vmul.f32 %v4673_v14, %v4630_v35  ;;  %6736 = vmatprep.mubr.msk.bf16.mxu1 %vm4934_vm7, %v4738_v32 }
 0xc9d   : > { %v4739_v2 = vpack.c.bf16 %v4727_v17, %v4726_v5  ;;  %v4862_v3 = vpop.permute.xlu1 %4861  ;;  %v5242_v5 = vld [vmem:[#allocation5 + $0x118] sm:$0xff] }
 0xc9e   : > { %v4903_v30 = vmul.f32 %v4862_v3, %v4807_v60  ;;  %v4857_v55 = vpop.permute.xlu0 %4856  ;;  %v5241_v60 = vld [vmem:[#allocation5 + $0x110] sm:$0xff] }
 0xc9f   : > { %v4902_v1 = vmul.f32 %v4857_v55, %v4806_v34  ;;  %6737 = vmatmul.mubr.msk.bf16.gmra.mxu1 %vm4934_vm7, %v4739_v2 }
 0xca1   : > { %v4914_v31 = vpack.c.bf16 %v4903_v30, %v4902_v1  ;;  %v4872_v25 = vpop.permute.xlu1 %4871  ;;  %v5563_v1 = vld [vmem:[#allocation5 + $0x188] sm:$0xff] }
 0xca2   : > { %v4905_v22 = vmul.f32 %v4872_v25, %v4809_v16  ;;  %v4867_v47 = vpop.permute.xlu0 %4866  ;;  %v5562_v16 = vld [vmem:[#allocation5 + $0x180] sm:$0xff] }
 0xca3   : > { %v4904_v37 = vmul.f32 %v4867_v47, %v4808_v11  ;;  %6720 = vmatprep.mubr.msk.bf16.mxu0 %vm4934_vm7, %v4914_v31 }
 0xca5   : > { %v4915_v63 = vpack.c.bf16 %v4905_v22, %v4904_v37  ;;  %v4688_v10 = vpop.permute.xlu1 %4687  ;;  %v5565_v37 = vld [vmem:[#allocation5 + $0x198] sm:$0xff] }
 0xca6   : > { %v4729_v42 = vmul.f32 %v4688_v10, %v4633_v20  ;;  %v4683_v36 = vpop.permute.xlu0 %4682  ;;  %v5564_v20 = vld [vmem:[#allocation5 + $0x190] sm:$0xff] }
 0xca7   : > { %v4728_v40 = vmul.f32 %v4683_v36, %v4632_v7  ;;  %6721 = vmatmul.mubr.msk.bf16.gmra.mxu0 %vm4934_vm7, %v4915_v63 }
 0xca9   : > { %v4740_v15 = vpack.c.bf16 %v4729_v42, %v4728_v40  ;;  %v4698_v43 = vpop.permute.xlu1 %4697  ;;  %v5244_v40 = vld [vmem:[#allocation5 + $0x128] sm:$0xff] }
 0xcaa   : > { %v4731_v58 = vmul.f32 %v4698_v43, %v4635_v21  ;;  %v4693_v6 = vpop.permute.xlu0 %4692  ;;  %v5243_v21 = vld [vmem:[#allocation5 + $0x120] sm:$0xff] }
 0xcab   : > { %v4730_v19 = vmul.f32 %v4693_v6, %v4634_v13  ;;  %6740 = vmatprep.mubr.msk.bf16.mxu1 %vm4934_vm7, %v4740_v15 }
 0xcad   : > { %v4741_v29 = vpack.c.bf16 %v4731_v58, %v4730_v19  ;;  %v4882_v46 = vpop.permute.xlu1 %4881  ;;  %v5246_v19 = vld [vmem:[#allocation5 + $0x138] sm:$0xff] }
 0xcae   : > { %v4907_v57 = vmul.f32 %v4882_v46, %v4811_v62  ;;  %v4877_v41 = vpop.permute.xlu0 %4876  ;;  %v5245_v62 = vld [vmem:[#allocation5 + $0x130] sm:$0xff] }
 0xcaf   : > { %v4906_v44 = vmul.f32 %v4877_v41, %v4810_v33  ;;  %6741 = vmatmul.mubr.msk.bf16.gmra.mxu1 %vm4934_vm7, %v4741_v29 }
 0xcb1   : > { %v4916_v18 = vpack.c.bf16 %v4907_v57, %v4906_v44  ;;  %v4892_v8 = vpop.permute.xlu1 %4891  ;;  %v5567_v44 = vld [vmem:[#allocation5 + $0x1a8] sm:$0xff] }
 0xcb2   : > { %v4909_v26 = vmul.f32 %v4892_v8, %v4813_v23  ;;  %v4887_v0 = vpop.permute.xlu0 %4886  ;;  %v5566_v23 = vld [vmem:[#allocation5 + $0x1a0] sm:$0xff] }
 0xcb3   : > { %v4908_v56 = vmul.f32 %v4887_v0, %v4812_v48  ;;  %6724 = vmatprep.mubr.msk.bf16.mxu0 %vm4934_vm7, %v4916_v18 }
 0xcb5   : > { %v4917_v50 = vpack.c.bf16 %v4909_v26, %v4908_v56  ;;  %v4708_v49 = vpop.permute.xlu1 %4707  ;;  %v5569_v56 = vld [vmem:[#allocation5 + $0x1b8] sm:$0xff] }
 0xcb6   : > { %v4733_v4 = vmul.f32 %v4708_v49, %v4637_v39  ;;  %v4703_v54 = vpop.permute.xlu0 %4702  ;;  %v5568_v39 = vld [vmem:[#allocation5 + $0x1b0] sm:$0xff] }
 0xcb7   : > { %v4732_v53 = vmul.f32 %v4703_v54, %v4636_v27  ;;  %6725 = vmatmul.mubr.msk.bf16.gmra.mxu0 %vm4934_vm7, %v4917_v50 }
 0xcb9   : > { %v4742_v38 = vpack.c.bf16 %v4733_v4, %v4732_v53  ;;  %v4718_v61 = vpop.permute.xlu1 %4717  ;;  %v5248_v53 = vld [vmem:[#allocation5 + $0x148] sm:$0xff] }
 0xcba   : > { %v4735_v12 = vmul.f32 %v4718_v61, %v4639_v45  ;;  %v4713_v24 = vpop.permute.xlu0 %4712  ;;  %v5247_v45 = vld [vmem:[#allocation5 + $0x140] sm:$0xff] }
 0xcbb   : > { %v4734_v28 = vmul.f32 %v4713_v24, %v4638_v9  ;;  %6744 = vmatprep.mubr.msk.bf16.mxu1 %vm4934_vm7, %v4742_v38 }
 0xcbd   : > { %v4743_v35 = vpack.c.bf16 %v4735_v12, %v4734_v28  ;;  %v5263_v32 = vpop.permute.xlu1 %5262  ;;  %v5250_v28 = vld [vmem:[#allocation5 + $0x158] sm:$0xff] }
 0xcbe   : > { %v5336_v52 = vmul.f32 %v5263_v32, %v5240_v51  ;;  %v5258_v17 = vpop.permute.xlu0 %5257  ;;  %v5249_v51 = vld [vmem:[#allocation5 + $0x150] sm:$0xff] }
 0xcbf   : > { %v5335_v14 = vmul.f32 %v5258_v17, %v5239_v59  ;;  %6745 = vmatmul.mubr.msk.bf16.gmra.mxu1 %vm4934_vm7, %v4743_v35 }
 0xcc1   : > { %v5351_v34 = vpack.c.bf16 %v5336_v52, %v5335_v14  ;;  %v5273_v2 = vpop.permute.xlu1 %5272  ;;  %v5571_v14 = vld [vmem:[#allocation5 + $0x1c8] sm:$0xff] }
 0xcc2   : > { %v5338_v3 = vmul.f32 %v5273_v2, %v5242_v5  ;;  %v5268_v30 = vpop.permute.xlu0 %5267  ;;  %v5570_v5 = vld [vmem:[#allocation5 + $0x1c0] sm:$0xff] }
 0xcc3   : > { %v5337_v55 = vmul.f32 %v5268_v30, %v5241_v60  ;;  %6752 = vmatprep.mubr.msk.bf16.mxu0 %vm4934_vm7, %v5351_v34 }
 0xcc5   : > { %v5352_v11 = vpack.c.bf16 %v5338_v3, %v5337_v55  ;;  %v5586_v31 = vpop.permute.xlu1 %5585  ;;  %v5573_v55 = vld [vmem:[#allocation5 + $0x1d8] sm:$0xff] }
 0xcc6   : > { %v5659_v25 = vmul.f32 %v5586_v31, %v5563_v1  ;;  %v5581_v22 = vpop.permute.xlu0 %5580  ;;  %v5572_v1 = vld [vmem:[#allocation5 + $0x1d0] sm:$0xff] }
 0xcc7   : > { %v5658_v47 = vmul.f32 %v5581_v22, %v5562_v16  ;;  %6753 = vmatmul.mubr.msk.bf16.vlgmr.msra.gmra.mxu0 %vm4934_vm7, %v5352_v11 }
 0xcc9   : > { %v5674_v7 = vpack.c.bf16 %v5659_v25, %v5658_v47  ;;  %v5596_v63 = vpop.permute.xlu1 %5595  ;;  %v5252_v47 = vld [vmem:[#allocation5 + $0x168] sm:$0xff] }
 0xcca   : > { %v5661_v10 = vmul.f32 %v5596_v63, %v5565_v37  ;;  %v5591_v42 = vpop.permute.xlu0 %5590  ;;  %v5251_v37 = vld [vmem:[#allocation5 + $0x160] sm:$0xff] }
 0xccb   : > { %v5660_v36 = vmul.f32 %v5591_v42, %v5564_v20  ;;  %6772 = vmatprep.mubr.msk.bf16.mxu1 %vm4934_vm7, %v5674_v7 }
 0xccd   : > { %v5675_v13 = vpack.c.bf16 %v5661_v10, %v5660_v36  ;;  %v5283_v15 = vpop.permute.xlu1 %5282  ;;  %v5254_v36 = vld [vmem:[#allocation5 + $0x178] sm:$0xff] }
 0xcce   : > { %v5340_v43 = vmul.f32 %v5283_v15, %v5244_v40  ;;  %v5278_v58 = vpop.permute.xlu0 %5277  ;;  %v5253_v40 = vld [vmem:[#allocation5 + $0x170] sm:$0xff] }
 0xccf   : > { %v5339_v6 = vmul.f32 %v5278_v58, %v5243_v21  ;;  %6773 = vmatmul.mubr.msk.bf16.vlgmr.msra.gmra.mxu1 %vm4934_vm7, %v5675_v13 }
 0xcd1   : > { %v5353_v33 = vpack.c.bf16 %v5340_v43, %v5339_v6  ;;  %v5293_v29 = vpop.permute.xlu1 %5292  ;;  %v5575_v6 = vld [vmem:[#allocation5 + $0x1e8] sm:$0xff] }
 0xcd2   : > { %v5342_v46 = vmul.f32 %v5293_v29, %v5246_v19  ;;  %v5288_v57 = vpop.permute.xlu0 %5287  ;;  %v5574_v19 = vld [vmem:[#allocation5 + $0x1e0] sm:$0xff] }
 0xcd3   : > { %v5341_v41 = vmul.f32 %v5288_v57, %v5245_v62  ;;  %6756 = vmatprep.mubr.msk.bf16.mxu0 %vm4934_vm7, %v5353_v33 }
 0xcd5   : > { %v5354_v48 = vpack.c.bf16 %v5342_v46, %v5341_v41  ;;  %v5606_v18 = vpop.permute.xlu1 %5605  ;;  %v5577_v41 = vld [vmem:[#allocation5 + $0x1f8] sm:$0xff] }
 0xcd6   : > { %v5663_v8 = vmul.f32 %v5606_v18, %v5567_v44  ;;  %v5601_v26 = vpop.permute.xlu0 %5600  ;;  %v5576_v44 = vld [vmem:[#allocation5 + $0x1f0] sm:$0xff] }
 0xcd7   : > { %v5662_v0 = vmul.f32 %v5601_v26, %v5566_v23  ;;  %6757 = vmatmul.mubr.msk.bf16.gmra.mxu0 %vm4934_vm7, %v5354_v48 }
 0xcd9   : > { %v5676_v27 = vpack.c.bf16 %v5663_v8, %v5662_v0  ;;  %v5616_v50 = vpop.permute.xlu1 %5615 }
 0xcda   : > { %v5665_v49 = vmul.f32 %v5616_v50, %v5569_v56  ;;  %v5611_v4 = vpop.permute.xlu0 %5610 }
 0xcdb   : > { %v5664_v54 = vmul.f32 %v5611_v4, %v5568_v39  ;;  %6776 = vmatprep.mubr.msk.bf16.mxu1 %vm4934_vm7, %v5676_v27 }
 0xcdd   : > { %v5677_v9 = vpack.c.bf16 %v5665_v49, %v5664_v54  ;;  %v5303_v38 = vpop.permute.xlu1 %5302 }
 0xcde   : > { %v5344_v61 = vmul.f32 %v5303_v38, %v5248_v53  ;;  %v5298_v12 = vpop.permute.xlu0 %5297 }
 0xcdf   : > { %v5343_v24 = vmul.f32 %v5298_v12, %v5247_v45  ;;  %6777 = vmatmul.mubr.msk.bf16.gmra.mxu1 %vm4934_vm7, %v5677_v9 }
 0xce1   : > { %v5355_v59 = vpack.c.bf16 %v5344_v61, %v5343_v24  ;;  %v5313_v35 = vpop.permute.xlu1 %5312 }
 0xce2   : > { %v5346_v32 = vmul.f32 %v5313_v35, %v5250_v28  ;;  %v5308_v52 = vpop.permute.xlu0 %5307 }
 0xce3   : > { %v5345_v17 = vmul.f32 %v5308_v52, %v5249_v51  ;;  %6760 = vmatprep.mubr.msk.bf16.mxu0 %vm4934_vm7, %v5355_v59 }
 0xce5   : > { %v5356_v60 = vpack.c.bf16 %v5346_v32, %v5345_v17  ;;  %v5626_v34 = vpop.permute.xlu1 %5625 }
 0xce6   : > { %v5667_v2 = vmul.f32 %v5626_v34, %v5571_v14  ;;  %v5621_v3 = vpop.permute.xlu0 %5620 }
 0xce7   : > { %v5666_v30 = vmul.f32 %v5621_v3, %v5570_v5  ;;  %6761 = vmatmul.mubr.msk.bf16.gmra.mxu0 %vm4934_vm7, %v5356_v60 }
 0xce9   : > { %v5678_v16 = vpack.c.bf16 %v5667_v2, %v5666_v30  ;;  %v5636_v11 = vpop.permute.xlu1 %5635 }
 0xcea   : > { %v5669_v31 = vmul.f32 %v5636_v11, %v5573_v55  ;;  %v5631_v25 = vpop.permute.xlu0 %5630 }
 0xceb   : > { %v5668_v22 = vmul.f32 %v5631_v25, %v5572_v1  ;;  %6780 = vmatprep.mubr.msk.bf16.mxu1 %vm4934_vm7, %v5678_v16 }
 0xced   : > { %v5679_v20 = vpack.c.bf16 %v5669_v31, %v5668_v22  ;;  %v5323_v7 = vpop.permute.xlu1 %5322 }
 0xcee   : > { %v5348_v63 = vmul.f32 %v5323_v7, %v5252_v47  ;;  %v5318_v10 = vpop.permute.xlu0 %5317 }
 0xcef   : > { %v5347_v42 = vmul.f32 %v5318_v10, %v5251_v37  ;;  %6781 = vmatmul.mubr.msk.bf16.gmra.mxu1 %vm4934_vm7, %v5679_v20 }
 0xcf1   : > { %v5357_v21 = vpack.c.bf16 %v5348_v63, %v5347_v42  ;;  %v5333_v13 = vpop.permute.xlu1 %5332  ;;  %v10844_v63 = vld [vmem:[%s11429_s15] ss:$0 sm:$0xff] }
 0xcf2   : > { %v5350_v15 = vmul.f32 %v5333_v13, %v5254_v36  ;;  %v5328_v43 = vpop.permute.xlu0 %5327 }
 0xcf3   : > { %v5349_v58 = vmul.f32 %v5328_v43, %v5253_v40  ;;  %6764 = vmatprep.mubr.msk.bf16.mxu0 %vm4934_vm7, %v5357_v21 }
 0xcf5   : > { %v5358_v62 = vpack.c.bf16 %v5350_v15, %v5349_v58  ;;  %v5646_v33 = vpop.permute.xlu1 %5645 }
 0xcf6   : > { %v5671_v29 = vmul.f32 %v5646_v33, %v5575_v6  ;;  %v5641_v46 = vpop.permute.xlu0 %5640 }
 0xcf7   : > { %v5670_v57 = vmul.f32 %v5641_v46, %v5574_v19  ;;  %6765 = vmatmul.mubr.msk.bf16.gmra.mxu0 %vm4934_vm7, %v5358_v62 }
 0xcf9   : > { %v5680_v23 = vpack.c.bf16 %v5671_v29, %v5670_v57  ;;  %v5656_v48 = vpop.permute.xlu1 %5655 }
 0xcfa   : > { %v5673_v18 = vmul.f32 %v5656_v48, %v5577_v41  ;;  %v5651_v8 = vpop.permute.xlu0 %5650 }
 0xcfb   : > { %v5672_v26 = vmul.f32 %v5651_v8, %v5576_v44  ;;  %6784 = vmatprep.mubr.msk.bf16.mxu1 %vm4934_vm7, %v5680_v23 }
 0xcfd   : > { %v5681_v0 = vpack.c.bf16 %v5673_v18, %v5672_v26 }
 0xcff   : > { %6785 = vmatmul.mubr.msk.bf16.gmra.mxu1 %vm4934_vm7, %v5681_v0 }
 0xd48   : > { %v6714_v56 = vpop.f32.mrf.mxu0 }
 0xd4a   : > { %v4993_v39 = vpop.f32.mrf.mxu0 }
 0xd4c   : > { %v6715_v27 = vpop.f32.mrf.mxu0 }
 0xd4e   : > { %v4996_v49 = vpop.f32.mrf.mxu0 }
 0xd4f   : > { %v6734_v50 = vpop.f32.mrf.mxu1 }
 0xd50   : > { %v5135_v25 = vadd.f32 %v6734_v50, %v6714_v56 }
 0xd51   : > { %v5126_v4 = vpop.f32.mrf.mxu1 }
 0xd52   : > { %v5127_v37 = vadd.f32 %v5126_v4, %v4993_v39 }
 0xd53   : > { %v6735_v53 = vpop.f32.mrf.mxu1 }
 0xd54   : > { %v5138_v10 = vadd.f32 %v6735_v53, %v6715_v27 }
 0xd55   : > { %v5129_v9 = vpop.f32.mrf.mxu1 }
 0xd56   : > { %v5130_v13 = vadd.f32 %v5129_v9, %v4996_v49 }
 0xd57   : > { %v6718_v54 = vpop.f32.mrf.mxu0 }
 0xd59   : > { %v5009_v45 = vpop.f32.mrf.mxu0 }
 0xd5b   : > { %v6719_v38 = vpop.f32.mrf.mxu0 }
 0xd5d   : > { %v5012_v12 = vpop.f32.mrf.mxu0 }
 0xd5f   : > { %v6738_v61 = vpop.f32.mrf.mxu1 }
 0xd60   : > { %v5151_v48 = vadd.f32 %v6738_v61, %v6718_v54 }
 0xd61   : > { %v5142_v24 = vpop.f32.mrf.mxu1 }
 0xd62   : > { %v5143_v8 = vadd.f32 %v5142_v24, %v5009_v45 }
 0xd63   : > { %v6739_v51 = vpop.f32.mrf.mxu1 }
 0xd64   : > { %v5154_v56 = vadd.f32 %v6739_v51, %v6719_v38 }
 0xd65   : > { %v5145_v35 = vpop.f32.mrf.mxu1 }
 0xd66   : > { %v5146_v4 = vadd.f32 %v5145_v35, %v5012_v12 }
 0xd67   : > { %v10809_v28 = vpop.f32.mrf.mxu0 }
 0xd69   : > { %v10811_v59 = vpop.f32.mrf.mxu0 }
 0xd6b   : > { %v10813_v32 = vpop.f32.mrf.mxu0 }
 0xd6d   : > { %v10817_v17 = vpop.f32.mrf.mxu0 }
 0xd6f   : > { %v10815_v52 = vpop.f32.mrf.mxu1 }
 0xd71   : > { %v10819_v14 = vpop.f32.mrf.mxu1 }
 0xd73   : > { %v10823_v60 = vpop.f32.mrf.mxu1 }
 0xd75   : > { %v10827_v2 = vpop.f32.mrf.mxu1 }
 0xd77   : > { %v10821_v5 = vpop.f32.mrf.mxu0 }
 0xd79   : > { %v10825_v34 = vpop.f32.mrf.mxu0 }
 0xd7b   : > { %v10829_v3 = vpop.f32.mrf.mxu0 }
 0xd7d   : > { %v10833_v55 = vpop.f32.mrf.mxu0 }
 0xd7f   : > { %v10831_v30 = vpop.f32.mrf.mxu1 }
 0xd81   : > { %v10835_v1 = vpop.f32.mrf.mxu1 }
 0xd83   : > { %v10837_v11 = vpop.f32.mrf.mxu1 }
 0xd85   : > { %v10839_v22 = vpop.f32.mrf.mxu1 }
 0xd87   : > { %v6754_v16 = vpop.f32.mrf.mxu0 }
 0xd88   : > { %v5498_v20 = vadd.f32 %v6754_v16, %v5135_v25 }
 0xd89   : > { %v5433_v31 = vpop.f32.mrf.mxu0 }
 0xd8a   : > { %v5496_v42 = vadd.f32 %v5433_v31, %v5127_v37 }
 0xd8b   : > { %v6755_v47 = vpop.f32.mrf.mxu0 }
 0xd8c   : > { %v5499_v15 = vadd.f32 %v6755_v47, %v5138_v10  ;;  %v5167_v47 = vadd.f32 %v10815_v52, %v10809_v28 }
 0xd8d   : > { %v5436_v40 = vpop.f32.mrf.mxu0 }
 0xd8e   : > { %v5497_v19 = vadd.f32 %v5436_v40, %v5130_v13 }
 0xd8f   : > { %v6774_v7 = vpop.f32.mrf.mxu1 }
 0xd90   : > { %v5821_v36 = vadd.f32 %v6774_v7, %v5498_v20  ;;  %v5159_v20 = vadd.f32 %v10819_v14, %v10811_v59 }
 0xd91   : > { %v5756_v21 = vpop.f32.mrf.mxu1 }
 0xd92   : > { %v5844_v43 = vadd.f32 %v10844_v63, %v5821_v36  ;;  %v5819_v58 = vadd.f32 %v5756_v21, %v5496_v42  ;;  %v5170_v42 = vadd.f32 %v10823_v60, %v10813_v32 }
 0xd93   : > { %v6775_v6 = vpop.f32.mrf.mxu1 }
 0xd94   : > { %5860 = vst [vmem:[%s7983_s12 + $0x10] sm:$0xff] %v5844_v43  ;;  %v5842_v62 = vadd.f32 %v10844_v63, %v5819_v58  ;;  %v5822_v33 = vadd.f32 %v6775_v6, %v5499_v15  ;;  %v5162_v15 = vadd.f32 %v10827_v2, %v10817_v17 }
 0xd95   : > { %v5759_v29 = vpop.f32.mrf.mxu1 }
 0xd96   : > { %5858 = vst [vmem:[%s7983_s12] sm:$0xff] %v5842_v62  ;;  %v5845_v46 = vadd.f32 %v10844_v63, %v5822_v33  ;;  %v5820_v57 = vadd.f32 %v5759_v29, %v5497_v19  ;;  %v5183_v33 = vadd.f32 %v10831_v30, %v10821_v5  ;;  %v5178_v5 = vadd.f32 %v10839_v22, %v10833_v55 }
 0xd97   : > { %v6758_v41 = vpop.f32.mrf.mxu0 }
 0xd98   : > { %5861 = vst [vmem:[%s7983_s12 + $0x18] sm:$0xff] %v5845_v46  ;;  %v5843_v44 = vadd.f32 %v10844_v63, %v5820_v57  ;;  %v5502_v26 = vadd.f32 %v6758_v41, %v5151_v48  ;;  %v5175_v46 = vadd.f32 %v10835_v1, %v10825_v34 }
 0xd99   : > { %v5449_v23 = vpop.f32.mrf.mxu0 }
 0xd9a   : > { %5859 = vst [vmem:[%s7983_s12 + $0x8] sm:$0xff] %v5843_v44  ;;  %v5500_v39 = vadd.f32 %v5449_v23, %v5143_v8  ;;  %v5186_v44 = vadd.f32 %v10837_v11, %v10829_v3 }
 0xd9b   : > { %v6759_v18 = vpop.f32.mrf.mxu0 }
 0xd9c   : > { %v5503_v53 = vadd.f32 %v6759_v18, %v5154_v56 }
 0xd9d   : > { %v5452_v50 = vpop.f32.mrf.mxu0 }
 0xd9e   : > { %v5501_v54 = vadd.f32 %v5452_v50, %v5146_v4 }
 0xd9f   : > { %v6778_v0 = vpop.f32.mrf.mxu1 }
 0xda0   : > { %v5825_v27 = vadd.f32 %v6778_v0, %v5502_v26 }
 0xda1   : > { %v5772_v49 = vpop.f32.mrf.mxu1 }
 0xda2   : > { %v5848_v9 = vadd.f32 %v10844_v63, %v5825_v27  ;;  %v5823_v16 = vadd.f32 %v5772_v49, %v5500_v39 }
 0xda3   : > { %v6779_v31 = vpop.f32.mrf.mxu1 }
 0xda4   : > { %5864 = vst [vmem:[%s7983_s12 + $0x30] sm:$0xff] %v5848_v9  ;;  %v5846_v45 = vadd.f32 %v10844_v63, %v5823_v16  ;;  %v5826_v61 = vadd.f32 %v6779_v31, %v5503_v53 }
 0xda5   : > { %v5775_v24 = vpop.f32.mrf.mxu1 }
 0xda6   : > { %5862 = vst [vmem:[%s7983_s12 + $0x20] sm:$0xff] %v5846_v45  ;;  %v5849_v38 = vadd.f32 %v10844_v63, %v5826_v61  ;;  %v5824_v51 = vadd.f32 %v5775_v24, %v5501_v54 }
 0xda7   : > { %v6762_v25 = vpop.f32.mrf.mxu0 }
 0xda8   : > { %5865 = vst [vmem:[%s7983_s12 + $0x38] sm:$0xff] %v5849_v38  ;;  %v5847_v12 = vadd.f32 %v10844_v63, %v5824_v51  ;;  %v5506_v7 = vadd.f32 %v6762_v25, %v5167_v47 }
 0xda9   : > { %v5465_v35 = vpop.f32.mrf.mxu0 }
 0xdaa   : > { %5863 = vst [vmem:[%s7983_s12 + $0x28] sm:$0xff] %v5847_v12  ;;  %v5504_v36 = vadd.f32 %v5465_v35, %v5159_v20 }
 0xdab   : > { %v6763_v37 = vpop.f32.mrf.mxu0 }
 0xdac   : > { %v5507_v28 = vadd.f32 %v6763_v37, %v5170_v42 }
 0xdad   : > { %v5468_v21 = vpop.f32.mrf.mxu0 }
 0xdae   : > { %v5505_v14 = vadd.f32 %v5468_v21, %v5162_v15 }
 0xdaf   : > { %v6782_v10 = vpop.f32.mrf.mxu1 }
 0xdb0   : > { %v5829_v40 = vadd.f32 %v6782_v10, %v5506_v7 }
 0xdb1   : > { %v5788_v13 = vpop.f32.mrf.mxu1 }
 0xdb2   : > { %v5852_v52 = vadd.f32 %v10844_v63, %v5829_v40  ;;  %v5827_v43 = vadd.f32 %v5788_v13, %v5504_v36 }
 0xdb3   : > { %v6783_v59 = vpop.f32.mrf.mxu1 }
 0xdb4   : > { %5868 = vst [vmem:[%s7983_s12 + $0x50] sm:$0xff] %v5852_v52  ;;  %v5850_v58 = vadd.f32 %v10844_v63, %v5827_v43  ;;  %v5830_v6 = vadd.f32 %v6783_v59, %v5507_v28 }
 0xdb5   : > { %v5791_v32 = vpop.f32.mrf.mxu1 }
 0xdb6   : > { %5866 = vst [vmem:[%s7983_s12 + $0x40] sm:$0xff] %v5850_v58  ;;  %v5853_v60 = vadd.f32 %v10844_v63, %v5830_v6  ;;  %v5828_v19 = vadd.f32 %v5791_v32, %v5505_v14 }
 0xdb7   : > { %v6766_v62 = vpop.f32.mrf.mxu0 }
 0xdb8   : > { %5869 = vst [vmem:[%s7983_s12 + $0x58] sm:$0xff] %v5853_v60  ;;  %v5851_v17 = vadd.f32 %v10844_v63, %v5828_v19  ;;  %v5510_v57 = vadd.f32 %v6766_v62, %v5183_v33 }
 0xdb9   : > { %v5481_v2 = vpop.f32.mrf.mxu0 }
 0xdba   : > { %5867 = vst [vmem:[%s7983_s12 + $0x48] sm:$0xff] %v5851_v17  ;;  %v5508_v23 = vadd.f32 %v5481_v2, %v5175_v46 }
 0xdbb   : > { %v6767_v29 = vpop.f32.mrf.mxu0 }
 0xdbc   : > { %v5511_v30 = vadd.f32 %v6767_v29, %v5186_v44 }
 0xdbd   : > { %v5484_v18 = vpop.f32.mrf.mxu0 }
 0xdbe   : > { %v5509_v1 = vadd.f32 %v5484_v18, %v5178_v5 }
 0xdbf   : > { %v6786_v41 = vpop.f32.mrf.mxu1 }
 0xdc0   : > { %v5833_v48 = vadd.f32 %v6786_v41, %v5510_v57 }
 0xdc1   : > { %v5804_v8 = vpop.f32.mrf.mxu1 }
 0xdc2   : > { %v5856_v26 = vadd.f32 %v10844_v63, %v5833_v48  ;;  %v5831_v0 = vadd.f32 %v5804_v8, %v5508_v23 }
 0xdc3   : > { %v6787_v34 = vpop.f32.mrf.mxu1 }
 0xdc4   : > { %5872 = vst [vmem:[%s7983_s12 + $0x70] sm:$0xff] %v5856_v26  ;;  %v5854_v56 = vadd.f32 %v10844_v63, %v5831_v0  ;;  %v5834_v39 = vadd.f32 %v6787_v34, %v5511_v30 }
 0xdc5   : > { %v5807_v3 = vpop.f32.mrf.mxu1 }
 0xdc6   : > { %5870 = vst [vmem:[%s7983_s12 + $0x60] sm:$0xff] %v5854_v56  ;;  %v5857_v11 = vadd.f32 %v10844_v63, %v5834_v39  ;;  %v5832_v27 = vadd.f32 %v5807_v3, %v5509_v1 }
 0xdc8   : > { %5873 = vst [vmem:[%s7983_s12 + $0x78] sm:$0xff] %v5857_v11  ;;  %v5855_v50 = vadd.f32 %v10844_v63, %v5832_v27 }
 0xdca   : > { %5871 = vst [vmem:[%s7983_s12 + $0x68] sm:$0xff] %v5855_v50 }
 0xdcb PF: > { %s11430_s24 = sld [smem:[#allocation21_spill]]  ;;  %s6215_s27 = sshll.u32 %s7677_s7, 5 }
 0xdcc   : > { %s5890_s19 = sshll.u32 %s7983_s12, 4  ;;  %s11432_s13 = sld [smem:[#allocation126_spill]]  ;;  %s10897_s19 = int_to_ptr.vmem [resolvable:$true] %s5890_s19 }
 0xdcd   : > { %s5875_s1 = scalar_lea.sflag [#allocation10], %s7950_s6  ;;  %s7547_s8 = scalar_lea.vmem %s10897_s19, 2048 }
 0xdce   : > { %p7548_p0 = scmp.ne.s32.totalorder %s10897_s19, %s7547_s8  ;;  %s7713_s7 = smov [#allocation14]  }
 0xdcf   : > { %s7551_s12 = sshll.u32 %s7713_s7, 4  ;;  %s7552_s12 = int_to_ptr.vmem [resolvable:$false] %s7551_s12 }
 0xdd0   : > { %p7549_p10 = pnand %p7548_p0, %p7867_p13  ;;  %s7553_s9 = scalar_lea.vmem %s7552_s12, 4096 }
 0xdd1   : > { %s6214_s4 = sshll.u32 %s11430_s24, 4  ;;  %p7554_p11 = scmp.lt.s32.totalorder %s10897_s19, %s7552_s12 }
 0xdd2   : > { %s5887_s20 = sadd.s32 %s6215_s27, %s6214_s4  ;;  %p7550_p2 = pneg %p7549_p10 }
 0xdd3   : > { %s6216_s3 = sshll.u32 %s5887_s20, 7  ;;  %p7555_p4 = scmp.lt.s32.totalorder %s7553_s9, %s7547_s8 }
 0xdd4   : > { %s10902_s14 = scalar_lea.hbm %s11432_s13, %s6216_s3 }
 0xdd5   : > { %p7556_p9 = por %p7555_p4, %p7554_p11 }
 0xdd7   : > { %p7557_p8 = pnand %p7556_p9, %p7550_p2 }
 0xdd9   : > { %7560 = shalt.err (!%p7557_p8)
}
 0xdda   : > { %s7561_s18 = scalar_lea.hbm %s10902_s14, 2048  ;;  %s7565_s15 = scalar_lea.hbm %s11432_s13, 8192 }
 0xddb   : > { %p7562_p6 = scmp.ne.s32.totalorder %s10902_s14, %s7561_s18  ;;  %p7566_p7 = scmp.lt.s32.totalorder %s10902_s14, %s11432_s13 }
 0xddc   : > { %p7567_p12 = scmp.lt.s32.totalorder %s7565_s15, %s7561_s18 }
 0xddd   : > { %p7563_p3 = pnand %p7562_p6, %p7867_p13 }
 0xdde   : > { %p7568_p1 = por %p7567_p12, %p7566_p7 }
 0xddf   : > { %p7564_p5 = pneg %p7563_p3 }
 0xde1   : > { %p7569_p0 = pnand %p7568_p1, %p7564_p5 }
 0xde3   : > { %7572 = shalt.err (!%p7569_p0)
}
 0xde4   : > { %s7714_s27 = smov 128   ;;  %s7715_s20 = smov 8  }
 0xde5   : > { %6844 = dma.vmem_to_hbm [thread:$0]  (%p7867_p13), %s10897_s19, 2048, %s10902_s14, %s5875_s1, %s7714_s27, %s7714_s27, %s7715_s20  }
 0xde6 PF: > { %s11433_s3 = sld [smem:[#allocation20_spill]]  ;;  %p6864_p10 = scmp.ge.s32.totalorder %s7693_s11, 2 }
 0xde7   : > { %s11434_s17 = sld [smem:[#allocation24_spill]] }
 0xdec   : > { %s5905_s16 = sand.u32 1, %s11433_s3  }
 0xded   : > { %p11435_p2 = scmp.ne.s32.totalorder %s11434_s17, 0  ;;  %s5906_s8 = scalar_lea.sflag [#allocation10], %s5905_s16 }
 0xdef   : > { %p6858_p11 = pnand %p6864_p10, %p11435_p2 }
 0xdf1   : > { %p6859_p4 = pneg %p6858_p11 }
 0xdf3   : > { %7640 = dma.done.wait (%p6859_p4), %s5906_s8, 2048  }
 0xdf4   : > { %7642 = vsyncadd (%p6859_p4), %s5906_s8, 4294965248  ;;  %s29_s11 = sadd.s32 1, %s7693_s11   ;;  %s11437_s29 = sld [smem:[#allocation22_spill]] }
 0xdf5   : > { %p10932_p9 = scmp.ge.s32.totalorder %s29_s11, 10   ;;  %s11438_s30 = sld [smem:[#allocation23_spill]] }
 0xdf6   : > { %s11439_s8 = sld [smem:[#allocation26_spill]]  ;;  %s11442_s24 = smov %s7649_s25 }
 0xdf7   : > { %s11440_s9 = sld [smem:[#allocation27_spill]]  ;;  %s11443_s25 = smov %s7653_s26 }
 0xdf8   : > { %s11444_s26 = smov %s7938_s22  ;;  %s11445_s27 = smov %s7661_s28 }
 0xdf9   : > { %s11446_s28 = smov %s7665_s0  ;;  %s11447_s0 = smov %s7933_s21 }
 0xdfa   : > { %s11448_s7 = smov %s7689_s10  ;;  %s11449_s10 = smov %s11459_s23 }
 0xdfb   :  { %28 = sbr.rel (!%p10932_p9) target bundleno = 22 (0x16), region = 138 }
 0xe00   :  { %5911 = vsyncpa [#allocation9], 1 }
 0xe01   :  { %5913 = vsyncpa [#allocation9 + $0x1], 1 }
 0xe02   :  { %5914 = vsyncpa [#allocation12], 1 }
 0xe03   :  { %5916 = vsyncpa [#allocation12 + $0x1], 1 }
 0xe04   :  { %5917 = vsyncpa [#allocation10], 1 }
 0xe05   :  { %5919 = vsyncpa [#allocation10 + $0x1], 1 }

</bundles_post_ra>
